<compile_context>
chip_gen: v6e
topology: v6e:2x2x1
jax: 0.10.0
libtpu: 0.0.40
codegen_flags: <defaults>
</compile_context>

<pallas_src>
import functools

import jax
import jax.numpy as jnp
import numpy as np
from jax.experimental import pallas as pl
from jax.experimental.pallas import tpu as pltpu

EPS = 1e-5
NUM_GROUPS = 32


# ----------------------------- kernel helpers -----------------------------

def _bf16_dot(a_f32, w_bf16):
    """MXU matmul: bf16 operands, f32 accumulation."""
    return jnp.dot(a_f32.astype(jnp.bfloat16), w_bf16,
                   preferred_element_type=jnp.float32)


def _layernorm(x, gamma, beta):
    mu = jnp.mean(x, axis=-1, keepdims=True)
    var = jnp.mean((x - mu) ** 2, axis=-1, keepdims=True)
    return (x - mu) * jax.lax.rsqrt(var + EPS) * gamma + beta


def _mha_batched(q, k, v, mask, wo, bo, *, Bblk, Sq, Sk, num_heads, C):
    """Head-batched multi-head attention (all heads in two wide MXU matmuls).

    Per batch element:
      khat      = tile(k,(H,1)) * mask                  (H*Sk, C)   bf16
      vhat|mask = [tile(v,(H,1)) * mask , mask]         (H*Sk, 2C)  bf16
      s         = q @ khat^T                            (Sq, H*Sk)  one NT dot
      p         = exp(s - rowmax)                        f32 -> bf16
      [pv|den]  = p @ [vhat|mask]                       (Sq, 2C)    one dot
      out head h channels = pv / den  (den = that head's softmax sum)
    The score scale is already folded into the Q projection host-side.
    """
    outs = []
    for b in range(Bblk):
        qb = q[b * Sq:(b + 1) * Sq, :].astype(jnp.bfloat16)          # (Sq, C)
        kb = k[b * Sk:(b + 1) * Sk, :].astype(jnp.bfloat16)          # (Sk, C)
        vb = v[b * Sk:(b + 1) * Sk, :].astype(jnp.bfloat16)          # (Sk, C)
        khat = jnp.tile(kb, (num_heads, 1)) * mask                   # (H*Sk, C)
        vhat = jnp.concatenate([jnp.tile(vb, (num_heads, 1)) * mask, mask],
                               axis=1)                               # (H*Sk, 2C)
        s = jax.lax.dot_general(qb, khat, (((1,), (1,)), ((), ())),
                                preferred_element_type=jnp.float32)  # (Sq, H*Sk)
        # Single per-row max across all heads: mathematically exact softmax;
        # only an underflow risk if per-head score ranges differ by >~80.
        p = jnp.exp(s - jnp.max(s, axis=-1, keepdims=True)).astype(jnp.bfloat16)
        pvd = jnp.dot(p, vhat, preferred_element_type=jnp.float32)   # (Sq, 2C)
        outs.append(pvd[:, :C] * pl.reciprocal(pvd[:, C:], approx=True))
    o_all = jnp.concatenate(outs, axis=0) if Bblk > 1 else outs[0]
    return _bf16_dot(o_all, wo) + bo


# ------------------------------ fused kernel --------------------------------

def mini_transformer_kernel(
        x_ref, e_ref, mask_self_ref, mask_cross_ref, p_ref,
        gn_g_ref, gn_b_ref, w_in_ref, b_in_ref,
        ln1g_ref, ln1b_ref, wqkv1_ref, bqkv1_ref, wo1_ref, bo1_ref,
        ln2g_ref, ln2b_ref, wq2_ref, bq2_ref, wkv2_ref, bkv2_ref,
        wo2_ref, bo2_ref,
        ln3g_ref, ln3b_ref, wf1_ref, bf1_ref, wf2_ref, bf2_ref,
        w_out_ref, b_out_ref,
        o_ref, *, num_layers, num_heads, Bblk, S, Lk, C):
    x_in = x_ref[...]                          # (Bblk*S, C) tokens (final residual)
    e_b = e_ref[...].astype(jnp.bfloat16)      # (Bblk*Lk, E) context
    mask_s = mask_self_ref[...]                # (H*S, C)  bf16, hoisted out of loops
    mask_x = mask_cross_ref[...]               # (H*Lk, C) bf16
    P = p_ref[...]                             # (C, C) group-averaging matrix, f32

    # ---- GroupNorm (two-pass, per batch element) + proj_in (1x1 conv)
    xn_parts = []
    for b in range(Bblk):
        xb = x_in[b * S:(b + 1) * S, :]
        s1 = jnp.sum(xb, axis=0, keepdims=True)                             # (1, C)
        mean_c = jnp.dot(s1, P, preferred_element_type=jnp.float32)         # (1, C)
        d = xb - mean_c
        s2 = jnp.sum(d * d, axis=0, keepdims=True)                          # (1, C)
        var_c = jnp.dot(s2, P, preferred_element_type=jnp.float32)          # (1, C)
        xn_parts.append(d * jax.lax.rsqrt(var_c + EPS))
    xn = jnp.concatenate(xn_parts, axis=0) if Bblk > 1 else xn_parts[0]
    xn = xn * gn_g_ref[...] + gn_b_ref[...]
    x = _bf16_dot(xn, w_in_ref[...]) + b_in_ref[...]                        # (Bblk*S, C)

    # ---- transformer blocks (statically unrolled; weights resident in VMEM)
    for l in range(num_layers):
        # self-attention: fused QKV projection (M = Bblk*S rows), scale folded in
        h1 = _layernorm(x, ln1g_ref[l], ln1b_ref[l])
        qkv = _bf16_dot(h1, wqkv1_ref[l]) + bqkv1_ref[l]                    # (Bblk*S, 3C)
        q, k, v = qkv[:, :C], qkv[:, C:2 * C], qkv[:, 2 * C:]
        x = x + _mha_batched(q, k, v, mask_s, wo1_ref[l], bo1_ref[l],
                             Bblk=Bblk, Sq=S, Sk=S, num_heads=num_heads, C=C)

        # cross-attention on embeds: fused KV projection (all batches at once)
        h2 = _layernorm(x, ln2g_ref[l], ln2b_ref[l])
        q2 = _bf16_dot(h2, wq2_ref[l]) + bq2_ref[l]                         # (Bblk*S, C)
        kv = jnp.dot(e_b, wkv2_ref[l],
                     preferred_element_type=jnp.float32) + bkv2_ref[l]      # (Bblk*Lk, 2C)
        k2, v2 = kv[:, :C], kv[:, C:]
        x = x + _mha_batched(q2, k2, v2, mask_x, wo2_ref[l], bo2_ref[l],
                             Bblk=Bblk, Sq=S, Sk=Lk, num_heads=num_heads, C=C)

        # feed-forward
        h3 = _layernorm(x, ln3g_ref[l], ln3b_ref[l])
        f = jnp.maximum(_bf16_dot(h3, wf1_ref[l]) + bf1_ref[l], 0.0)
        x = x + _bf16_dot(f, wf2_ref[l]) + bf2_ref[l]

    # ---- proj_out + residual with the original input
    o_ref[...] = _bf16_dot(x, w_out_ref[...]) + b_out_ref[...] + x_in


# ------------------------------ wrapper --------------------------------------

def _default_batch_block(B):
    # v7x: 2 TensorCores/chip -> one batch element per grid step ("parallel").
    # Single-TC v5e/v6e: fold the whole batch into one block (M = B*S matmuls,
    # no serial grid steps).
    try:
        if "v7" in jax.devices()[0].device_kind.lower():
            return 1
    except Exception:
        pass
    return B


def mini_transformer(x_nchw, embeds, params, num_heads, batch_block=None):
    B, C, Himg, Wimg = x_nchw.shape
    S = Himg * Wimg
    head_dim = C // num_heads
    G = NUM_GROUPS
    cg = C // G
    layers = params["layers"]
    L = len(layers)
    _, Lk, E = embeds.shape
    sq = float(head_dim) ** 0.5          # reference does q/scale == q*sqrt(head_dim)
    bf = jnp.bfloat16

    Bblk = batch_block if batch_block is not None else _default_batch_block(B)
    assert B % Bblk == 0
    nblk = B // Bblk

    # GroupNorm group-averaging matrix: P[c,c'] = 1/(S*cg) if same group else 0.
    grp = np.arange(C) // cg
    P = jnp.asarray((grp[:, None] == grp[None, :]).astype(np.float32) / float(S * cg))

    # Stacked per-head channel-block masks (bf16) for head-batched attention.
    def head_mask(rows):
        m = np.zeros((num_heads * rows, C), np.float32)
        for h in range(num_heads):
            m[h * rows:(h + 1) * rows, h * head_dim:(h + 1) * head_dim] = 1.0
        return jnp.asarray(m, bf)

    mask_self = head_mask(S)     # (H*S, C)
    mask_cross = head_mask(Lk)   # (H*Lk, C)

    def stack(fn, dtype=None):
        a = jnp.stack([fn(lp) for lp in layers])
        return a.astype(dtype) if dtype is not None else a

    ln1g = stack(lambda p: p["ln1_g"]); ln1b = stack(lambda p: p["ln1_b"])
    ln2g = stack(lambda p: p["ln2_g"]); ln2b = stack(lambda p: p["ln2_b"])
    ln3g = stack(lambda p: p["ln3_g"]); ln3b = stack(lambda p: p["ln3_b"])
    wqkv1 = stack(lambda p: jnp.concatenate([p["wq1"] * sq, p["wk1"], p["wv1"]], 1), bf)
    bqkv1 = stack(lambda p: jnp.concatenate([p["bq1"] * sq, p["bk1"], p["bv1"]], 1))
    wo1 = stack(lambda p: p["wo1"], bf); bo1 = stack(lambda p: p["bo1"])
    wq2 = stack(lambda p: p["wq2"] * sq, bf); bq2 = stack(lambda p: p["bq2"] * sq)
    wkv2 = stack(lambda p: jnp.concatenate([p["wk2"], p["wv2"]], 1), bf)
    bkv2 = stack(lambda p: jnp.concatenate([p["bk2"], p["bv2"]], 1))
    wo2 = stack(lambda p: p["wo2"], bf); bo2 = stack(lambda p: p["bo2"])
    wf1 = stack(lambda p: p["wf1"], bf); bf1 = stack(lambda p: p["bf1"])
    wf2 = stack(lambda p: p["wf2"], bf); bf2 = stack(lambda p: p["bf2"])

    x_flat = jnp.transpose(x_nchw, (0, 2, 3, 1)).reshape(B * S, C)
    e_flat = embeds.reshape(B * Lk, E)

    operands = [
        x_flat, e_flat, mask_self, mask_cross, P,
        params["gn_g"], params["gn_b"], params["w_in"].astype(bf), params["b_in"],
        ln1g, ln1b, wqkv1, bqkv1, wo1, bo1,
        ln2g, ln2b, wq2, bq2, wkv2, bkv2, wo2, bo2,
        ln3g, ln3b, wf1, bf1, wf2, bf2,
        params["w_out"].astype(bf), params["b_out"],
    ]

    def const_spec(a):
        return pl.BlockSpec(a.shape, lambda i, _n=a.ndim: (0,) * _n)

    in_specs = ([pl.BlockSpec((Bblk * S, C), lambda i: (i, 0)),
                 pl.BlockSpec((Bblk * Lk, E), lambda i: (i, 0))]
                + [const_spec(a) for a in operands[2:]])

    kernel = functools.partial(
        mini_transformer_kernel, num_layers=L, num_heads=num_heads,
        Bblk=Bblk, S=S, Lk=Lk, C=C)

    # Total VMEM footprint (<2 MiB) is far below every chip's limit, so no
    # vmem_limit_bytes override is needed; per-step DMA is already hidden.
    out = pl.pallas_call(
        kernel,
        out_shape=jax.ShapeDtypeStruct((B * S, C), jnp.float32),
        grid=(nblk,),
        in_specs=in_specs,
        out_specs=pl.BlockSpec((Bblk * S, C), lambda i: (i, 0)),
        compiler_params=pltpu.CompilerParams(
            dimension_semantics=("parallel",)),
    )(*operands)
    return jnp.transpose(out.reshape(B, Himg, Wimg, C), (0, 3, 1, 2))


# ------------------------------ params & reference ---------------------------

def init_params(key, C, num_heads, num_layers, E):
    def dense(k, din, dout):
        k1, k2 = jax.random.split(k)
        w = jax.random.normal(k1, (din, dout), jnp.float32) * 0.02
        b = jax.random.normal(k2, (1, dout), jnp.float32) * 0.02
        return w, b

    keys = jax.random.split(key, 3 + num_layers)
    params = {
        "gn_g": jnp.ones((1, C), jnp.float32),
        "gn_b": jnp.zeros((1, C), jnp.float32),
    }
    params["w_in"], params["b_in"] = dense(keys[0], C, C)
    params["w_out"], params["b_out"] = dense(keys[1], C, C)
    layers = []
    for l in range(num_layers):
        lk = jax.random.split(keys[3 + l], 10)
        lp = {"ln1_g": jnp.ones((1, C), jnp.float32), "ln1_b": jnp.zeros((1, C), jnp.float32),
              "ln2_g": jnp.ones((1, C), jnp.float32), "ln2_b": jnp.zeros((1, C), jnp.float32),
              "ln3_g": jnp.ones((1, C), jnp.float32), "ln3_b": jnp.zeros((1, C), jnp.float32)}
        lp["wq1"], lp["bq1"] = dense(lk[0], C, C)
        lp["wk1"], lp["bk1"] = dense(lk[1], C, C)
        lp["wv1"], lp["bv1"] = dense(lk[2], C, C)
        lp["wo1"], lp["bo1"] = dense(lk[3], C, C)
        lp["wq2"], lp["bq2"] = dense(lk[4], C, C)
        lp["wk2"], lp["bk2"] = dense(lk[5], E, C)
        lp["wv2"], lp["bv2"] = dense(lk[6], E, C)
        lp["wo2"], lp["bo2"] = dense(lk[7], C, C)
        lp["wf1"], lp["bf1"] = dense(lk[8], C, 4 * C)
        lp["wf2"], lp["bf2"] = dense(lk[9], 4 * C, C)
        layers.append(lp)
    params["layers"] = layers
    return params


def reference(x_nchw, embeds, params, num_heads):
    """Pure-JAX f32 reference of the same (intended) forward semantics."""
    B, C, H, W = x_nchw.shape
    G = NUM_GROUPS
    cg = C // G
    head_dim = C // num_heads
    x = jnp.transpose(x_nchw, (0, 2, 3, 1)).reshape(B, H * W, C)
    res = x
    xg = x.reshape(B, H * W, G, cg)
    mu = jnp.mean(xg, axis=(1, 3), keepdims=True)
    var = jnp.mean((xg - mu) ** 2, axis=(1, 3), keepdims=True)
    xn = ((xg - mu) / jnp.sqrt(var + EPS)).reshape(B, H * W, C)
    xn = xn * params["gn_g"] + params["gn_b"]
    x = xn @ params["w_in"] + params["b_in"]

    def ln(z, g, b):
        m = jnp.mean(z, -1, keepdims=True)
        v = jnp.mean((z - m) ** 2, -1, keepdims=True)
        return (z - m) / jnp.sqrt(v + EPS) * g + b

    def attn(xq, ctx, wq, bq, wk, bk, wv, bv, wo, bo):
        scale = head_dim ** (-0.5)
        q = xq @ wq + bq
        k = ctx @ wk + bk
        v = ctx @ wv + bv
        Bq, Sq, _ = q.shape
        Lk = k.shape[1]
        qh = q.reshape(Bq, Sq, num_heads, head_dim).transpose(0, 2, 1, 3)
        kh = k.reshape(Bq, Lk, num_heads, head_dim).transpose(0, 2, 1, 3)
        vh = v.reshape(Bq, Lk, num_heads, head_dim).transpose(0, 2, 1, 3)
        s = jnp.einsum("bhqd,bhkd->bhqk", qh / scale, kh)
        p = jax.nn.softmax(s, axis=-1)
        o = jnp.einsum("bhqk,bhkd->bhqd", p, vh)
        o = o.transpose(0, 2, 1, 3).reshape(Bq, Sq, num_heads * head_dim)
        return o @ wo + bo

    for lp in params["layers"]:
        h1 = ln(x, lp["ln1_g"], lp["ln1_b"])
        x = attn(h1, h1, lp["wq1"], lp["bq1"], lp["wk1"], lp["bk1"],
                 lp["wv1"], lp["bv1"], lp["wo1"], lp["bo1"]) + x
        h2 = ln(x, lp["ln2_g"], lp["ln2_b"])
        x = attn(h2, embeds, lp["wq2"], lp["bq2"], lp["wk2"], lp["bk2"],
                 lp["wv2"], lp["bv2"], lp["wo2"], lp["bo2"]) + x
        h3 = ln(x, lp["ln3_g"], lp["ln3_b"])
        f = jnp.maximum(h3 @ lp["wf1"] + lp["bf1"], 0.0)
        x = f @ lp["wf2"] + lp["bf2"] + x

    x = x @ params["w_out"] + params["b_out"] + res
    return jnp.transpose(x.reshape(B, H, W, C), (0, 3, 1, 2))


# ------------------------------ main ------------------------------------------

if __name__ == "__main__":
    B, C, H, W = 2, 64, 8, 8          # intermediate_dim=64 (divisible by 32 groups)
    num_heads, num_layers = 4, 2
    embed_dim, ctx_len = 32, 8

    key = jax.random.PRNGKey(0)
    kx, ke, kp = jax.random.split(key, 3)
    x = jax.random.normal(kx, (B, C, H, W), jnp.float32)
    embeds = jax.random.normal(ke, (B, ctx_len, embed_dim), jnp.float32)
    params = init_params(kp, C, num_heads, num_layers, embed_dim)

    out = mini_transformer(x, embeds, params, num_heads)
    out = jax.block_until_ready(out)

    ref = reference(x, embeds, params, num_heads)
    # Kernel uses bf16 MXU operands (f32 accumulation) + approx reciprocal in the
    # softmax, so compare against the f32 reference at bf16-appropriate tolerance.
    np.testing.assert_allclose(np.asarray(out), np.asarray(ref), rtol=2e-2, atol=2e-2)
    print("KERNEL_OK")
</pallas_src>

<mosaic_0001>
module attributes {stable_mosaic.version = 11 : i64} {
  func.func @mini_transformer_kernel(%arg0: i32, %arg1: memref<128x64xf32, #tpu.memory_space<vmem>>, %arg2: memref<16x32xf32, #tpu.memory_space<vmem>>, %arg3: memref<256x64xbf16, #tpu.memory_space<vmem>>, %arg4: memref<32x64xbf16, #tpu.memory_space<vmem>>, %arg5: memref<64x64xf32, #tpu.memory_space<vmem>>, %arg6: memref<1x64xf32, #tpu.memory_space<vmem>>, %arg7: memref<1x64xf32, #tpu.memory_space<vmem>>, %arg8: memref<64x64xbf16, #tpu.memory_space<vmem>>, %arg9: memref<1x64xf32, #tpu.memory_space<vmem>>, %arg10: memref<2x1x64xf32, #tpu.memory_space<vmem>>, %arg11: memref<2x1x64xf32, #tpu.memory_space<vmem>>, %arg12: memref<2x64x192xbf16, #tpu.memory_space<vmem>>, %arg13: memref<2x1x192xf32, #tpu.memory_space<vmem>>, %arg14: memref<2x64x64xbf16, #tpu.memory_space<vmem>>, %arg15: memref<2x1x64xf32, #tpu.memory_space<vmem>>, %arg16: memref<2x1x64xf32, #tpu.memory_space<vmem>>, %arg17: memref<2x1x64xf32, #tpu.memory_space<vmem>>, %arg18: memref<2x64x64xbf16, #tpu.memory_space<vmem>>, %arg19: memref<2x1x64xf32, #tpu.memory_space<vmem>>, %arg20: memref<2x32x128xbf16, #tpu.memory_space<vmem>>, %arg21: memref<2x1x128xf32, #tpu.memory_space<vmem>>, %arg22: memref<2x64x64xbf16, #tpu.memory_space<vmem>>, %arg23: memref<2x1x64xf32, #tpu.memory_space<vmem>>, %arg24: memref<2x1x64xf32, #tpu.memory_space<vmem>>, %arg25: memref<2x1x64xf32, #tpu.memory_space<vmem>>, %arg26: memref<2x64x256xbf16, #tpu.memory_space<vmem>>, %arg27: memref<2x1x256xf32, #tpu.memory_space<vmem>>, %arg28: memref<2x256x64xbf16, #tpu.memory_space<vmem>>, %arg29: memref<2x1x64xf32, #tpu.memory_space<vmem>>, %arg30: memref<64x64xbf16, #tpu.memory_space<vmem>>, %arg31: memref<1x64xf32, #tpu.memory_space<vmem>>, %arg32: memref<128x64xf32, #tpu.memory_space<vmem>>) attributes {dimension_semantics = [#tpu.dimension_semantics<parallel>], iteration_bounds = array<i64: 1>, scalar_prefetch = 0 : i64, scratch_operands = 0 : i64, tpu.core_type = #tpu.core_type<tc>, window_params = [{transform_indices = @transform_0, window_bounds = array<i64: 128, 64>}, {transform_indices = @transform_1, window_bounds = array<i64: 16, 32>}, {pipeline_mode = #tpu.pipeline_mode<synchronous>, transform_indices = @transform_2, window_bounds = array<i64: 256, 64>}, {pipeline_mode = #tpu.pipeline_mode<synchronous>, transform_indices = @transform_3, window_bounds = array<i64: 32, 64>}, {pipeline_mode = #tpu.pipeline_mode<synchronous>, transform_indices = @transform_4, window_bounds = array<i64: 64, 64>}, {pipeline_mode = #tpu.pipeline_mode<synchronous>, transform_indices = @transform_5, window_bounds = array<i64: 1, 64>}, {pipeline_mode = #tpu.pipeline_mode<synchronous>, transform_indices = @transform_6, window_bounds = array<i64: 1, 64>}, {pipeline_mode = #tpu.pipeline_mode<synchronous>, transform_indices = @transform_7, window_bounds = array<i64: 64, 64>}, {pipeline_mode = #tpu.pipeline_mode<synchronous>, transform_indices = @transform_8, window_bounds = array<i64: 1, 64>}, {pipeline_mode = #tpu.pipeline_mode<synchronous>, transform_indices = @transform_9, window_bounds = array<i64: 2, 1, 64>}, {pipeline_mode = #tpu.pipeline_mode<synchronous>, transform_indices = @transform_10, window_bounds = array<i64: 2, 1, 64>}, {pipeline_mode = #tpu.pipeline_mode<synchronous>, transform_indices = @transform_11, window_bounds = array<i64: 2, 64, 192>}, {pipeline_mode = #tpu.pipeline_mode<synchronous>, transform_indices = @transform_12, window_bounds = array<i64: 2, 1, 192>}, {pipeline_mode = #tpu.pipeline_mode<synchronous>, transform_indices = @transform_13, window_bounds = array<i64: 2, 64, 64>}, {pipeline_mode = #tpu.pipeline_mode<synchronous>, transform_indices = @transform_14, window_bounds = array<i64: 2, 1, 64>}, {pipeline_mode = #tpu.pipeline_mode<synchronous>, transform_indices = @transform_15, window_bounds = array<i64: 2, 1, 64>}, {pipeline_mode = #tpu.pipeline_mode<synchronous>, transform_indices = @transform_16, window_bounds = array<i64: 2, 1, 64>}, {pipeline_mode = #tpu.pipeline_mode<synchronous>, transform_indices = @transform_17, window_bounds = array<i64: 2, 64, 64>}, {pipeline_mode = #tpu.pipeline_mode<synchronous>, transform_indices = @transform_18, window_bounds = array<i64: 2, 1, 64>}, {pipeline_mode = #tpu.pipeline_mode<synchronous>, transform_indices = @transform_19, window_bounds = array<i64: 2, 32, 128>}, {pipeline_mode = #tpu.pipeline_mode<synchronous>, transform_indices = @transform_20, window_bounds = array<i64: 2, 1, 128>}, {pipeline_mode = #tpu.pipeline_mode<synchronous>, transform_indices = @transform_21, window_bounds = array<i64: 2, 64, 64>}, {pipeline_mode = #tpu.pipeline_mode<synchronous>, transform_indices = @transform_22, window_bounds = array<i64: 2, 1, 64>}, {pipeline_mode = #tpu.pipeline_mode<synchronous>, transform_indices = @transform_23, window_bounds = array<i64: 2, 1, 64>}, {pipeline_mode = #tpu.pipeline_mode<synchronous>, transform_indices = @transform_24, window_bounds = array<i64: 2, 1, 64>}, {pipeline_mode = #tpu.pipeline_mode<synchronous>, transform_indices = @transform_25, window_bounds = array<i64: 2, 64, 256>}, {pipeline_mode = #tpu.pipeline_mode<synchronous>, transform_indices = @transform_26, window_bounds = array<i64: 2, 1, 256>}, {pipeline_mode = #tpu.pipeline_mode<synchronous>, transform_indices = @transform_27, window_bounds = array<i64: 2, 256, 64>}, {pipeline_mode = #tpu.pipeline_mode<synchronous>, transform_indices = @transform_28, window_bounds = array<i64: 2, 1, 64>}, {pipeline_mode = #tpu.pipeline_mode<synchronous>, transform_indices = @transform_29, window_bounds = array<i64: 64, 64>}, {pipeline_mode = #tpu.pipeline_mode<synchronous>, transform_indices = @transform_30, window_bounds = array<i64: 1, 64>}, {transform_indices = @transform_31, window_bounds = array<i64: 128, 64>}]} {
    %c0 = arith.constant 0 : index
    %c0_0 = arith.constant 0 : index
    %0 = vector.load %arg1[%c0, %c0_0] : memref<128x64xf32, #tpu.memory_space<vmem>>, vector<128x64xf32>
    %c0_1 = arith.constant 0 : index
    %c0_2 = arith.constant 0 : index
    %1 = vector.load %arg2[%c0_1, %c0_2] : memref<16x32xf32, #tpu.memory_space<vmem>>, vector<16x32xf32>
    %2 = arith.truncf %1 : vector<16x32xf32> to vector<16x32xbf16>
    %c0_3 = arith.constant 0 : index
    %c0_4 = arith.constant 0 : index
    %3 = vector.load %arg3[%c0_3, %c0_4] : memref<256x64xbf16, #tpu.memory_space<vmem>>, vector<256x64xbf16>
    %c0_5 = arith.constant 0 : index
    %c0_6 = arith.constant 0 : index
    %4 = vector.load %arg4[%c0_5, %c0_6] : memref<32x64xbf16, #tpu.memory_space<vmem>>, vector<32x64xbf16>
    %c0_7 = arith.constant 0 : index
    %c0_8 = arith.constant 0 : index
    %5 = vector.load %arg5[%c0_7, %c0_8] : memref<64x64xf32, #tpu.memory_space<vmem>>, vector<64x64xf32>
    %6 = vector.extract_strided_slice %0 {offsets = [0, 0], sizes = [64, 64], strides = [1, 1]} : vector<128x64xf32> to vector<64x64xf32>
    %cst = arith.constant dense<0.000000e+00> : vector<64xf32>
    %7 = vector.multi_reduction <add>, %6, %cst [0] : vector<64x64xf32> to vector<64xf32>
    %8 = vector.shape_cast %7 : vector<64xf32> to vector<1x64xf32>
    %cst_9 = arith.constant dense<0.000000e+00> : vector<1x64xf32>
    %9 = tpu.matmul %8, %5, %cst_9 {dimension_numbers = #tpu.dot_dimension_numbers<[1], [0], [0], [1], [0, 0, 1, 1], [], []>} : vector<1x64xf32>, vector<64x64xf32>, vector<1x64xf32> -> vector<1x64xf32>
    %10 = vector.broadcast %9 : vector<1x64xf32> to vector<64x64xf32>
    %11 = arith.subf %6, %10 : vector<64x64xf32>
    %12 = arith.mulf %11, %11 : vector<64x64xf32>
    %cst_10 = arith.constant dense<0.000000e+00> : vector<64xf32>
    %13 = vector.multi_reduction <add>, %12, %cst_10 [0] : vector<64x64xf32> to vector<64xf32>
    %14 = vector.shape_cast %13 : vector<64xf32> to vector<1x64xf32>
    %cst_11 = arith.constant dense<0.000000e+00> : vector<1x64xf32>
    %15 = tpu.matmul %14, %5, %cst_11 {dimension_numbers = #tpu.dot_dimension_numbers<[1], [0], [0], [1], [0, 0, 1, 1], [], []>} : vector<1x64xf32>, vector<64x64xf32>, vector<1x64xf32> -> vector<1x64xf32>
    %cst_12 = arith.constant 9.99999974E-6 : f32
    %16 = vector.broadcast %cst_12 : f32 to vector<1x64xf32>
    %17 = arith.addf %15, %16 : vector<1x64xf32>
    %18 = math.rsqrt %17 : vector<1x64xf32>
    %19 = vector.broadcast %18 : vector<1x64xf32> to vector<64x64xf32>
    %20 = arith.mulf %11, %19 : vector<64x64xf32>
    %21 = vector.extract_strided_slice %0 {offsets = [64, 0], sizes = [64, 64], strides = [1, 1]} : vector<128x64xf32> to vector<64x64xf32>
    %cst_13 = arith.constant dense<0.000000e+00> : vector<64xf32>
    %22 = vector.multi_reduction <add>, %21, %cst_13 [0] : vector<64x64xf32> to vector<64xf32>
    %23 = vector.shape_cast %22 : vector<64xf32> to vector<1x64xf32>
    %cst_14 = arith.constant dense<0.000000e+00> : vector<1x64xf32>
    %24 = tpu.matmul %23, %5, %cst_14 {dimension_numbers = #tpu.dot_dimension_numbers<[1], [0], [0], [1], [0, 0, 1, 1], [], []>} : vector<1x64xf32>, vector<64x64xf32>, vector<1x64xf32> -> vector<1x64xf32>
    %25 = vector.broadcast %24 : vector<1x64xf32> to vector<64x64xf32>
    %26 = arith.subf %21, %25 : vector<64x64xf32>
    %27 = arith.mulf %26, %26 : vector<64x64xf32>
    %cst_15 = arith.constant dense<0.000000e+00> : vector<64xf32>
    %28 = vector.multi_reduction <add>, %27, %cst_15 [0] : vector<64x64xf32> to vector<64xf32>
    %29 = vector.shape_cast %28 : vector<64xf32> to vector<1x64xf32>
    %cst_16 = arith.constant dense<0.000000e+00> : vector<1x64xf32>
    %30 = tpu.matmul %29, %5, %cst_16 {dimension_numbers = #tpu.dot_dimension_numbers<[1], [0], [0], [1], [0, 0, 1, 1], [], []>} : vector<1x64xf32>, vector<64x64xf32>, vector<1x64xf32> -> vector<1x64xf32>
    %cst_17 = arith.constant 9.99999974E-6 : f32
    %31 = vector.broadcast %cst_17 : f32 to vector<1x64xf32>
    %32 = arith.addf %30, %31 : vector<1x64xf32>
    %33 = math.rsqrt %32 : vector<1x64xf32>
    %34 = vector.broadcast %33 : vector<1x64xf32> to vector<64x64xf32>
    %35 = arith.mulf %26, %34 : vector<64x64xf32>
    %36 = tpu.concatenate %20, %35 in 0 : vector<64x64xf32>, vector<64x64xf32> -> vector<128x64xf32>
    %c0_18 = arith.constant 0 : index
    %c0_19 = arith.constant 0 : index
    %37 = vector.load %arg6[%c0_18, %c0_19] : memref<1x64xf32, #tpu.memory_space<vmem>>, vector<1x64xf32>
    %38 = vector.broadcast %37 : vector<1x64xf32> to vector<128x64xf32>
    %39 = arith.mulf %36, %38 : vector<128x64xf32>
    %c0_20 = arith.constant 0 : index
    %c0_21 = arith.constant 0 : index
    %40 = vector.load %arg7[%c0_20, %c0_21] : memref<1x64xf32, #tpu.memory_space<vmem>>, vector<1x64xf32>
    %41 = vector.broadcast %40 : vector<1x64xf32> to vector<128x64xf32>
    %42 = arith.addf %39, %41 : vector<128x64xf32>
    %c0_22 = arith.constant 0 : index
    %c0_23 = arith.constant 0 : index
    %43 = vector.load %arg8[%c0_22, %c0_23] : memref<64x64xbf16, #tpu.memory_space<vmem>>, vector<64x64xbf16>
    %44 = arith.truncf %42 : vector<128x64xf32> to vector<128x64xbf16>
    %cst_24 = arith.constant dense<0.000000e+00> : vector<128x64xf32>
    %45 = tpu.matmul %44, %43, %cst_24 {dimension_numbers = #tpu.dot_dimension_numbers<[1], [0], [0], [1], [0, 0, 1, 1], [], []>} : vector<128x64xbf16>, vector<64x64xbf16>, vector<128x64xf32> -> vector<128x64xf32>
    %c0_25 = arith.constant 0 : index
    %c0_26 = arith.constant 0 : index
    %46 = vector.load %arg9[%c0_25, %c0_26] : memref<1x64xf32, #tpu.memory_space<vmem>>, vector<1x64xf32>
    %47 = vector.broadcast %46 : vector<1x64xf32> to vector<128x64xf32>
    %48 = arith.addf %45, %47 : vector<128x64xf32>
    %c0_27 = arith.constant 0 : index
    %c0_28 = arith.constant 0 : index
    %c0_29 = arith.constant 0 : index
    %49 = vector.load %arg10[%c0_27, %c0_28, %c0_29] : memref<2x1x64xf32, #tpu.memory_space<vmem>>, vector<1x1x64xf32>
    %50 = vector.shape_cast %49 : vector<1x1x64xf32> to vector<1x64xf32>
    %c0_30 = arith.constant 0 : index
    %c0_31 = arith.constant 0 : index
    %c0_32 = arith.constant 0 : index
    %51 = vector.load %arg11[%c0_30, %c0_31, %c0_32] : memref<2x1x64xf32, #tpu.memory_space<vmem>>, vector<1x1x64xf32>
    %52 = vector.shape_cast %51 : vector<1x1x64xf32> to vector<1x64xf32>
    %cst_33 = arith.constant dense<0.000000e+00> : vector<128xf32>
    %53 = vector.multi_reduction <add>, %48, %cst_33 [1] : vector<128x64xf32> to vector<128xf32>
    %54 = vector.shape_cast %53 : vector<128xf32> to vector<128x1xf32>
    %cst_34 = arith.constant 6.400000e+01 : f32
    %55 = vector.broadcast %cst_34 : f32 to vector<128x1xf32>
    %56 = arith.divf %54, %55 : vector<128x1xf32>
    %57 = vector.broadcast %56 : vector<128x1xf32> to vector<128x64xf32>
    %58 = arith.subf %48, %57 : vector<128x64xf32>
    %59 = arith.mulf %58, %58 : vector<128x64xf32>
    %cst_35 = arith.constant dense<0.000000e+00> : vector<128xf32>
    %60 = vector.multi_reduction <add>, %59, %cst_35 [1] : vector<128x64xf32> to vector<128xf32>
    %61 = vector.shape_cast %60 : vector<128xf32> to vector<128x1xf32>
    %cst_36 = arith.constant 6.400000e+01 : f32
    %62 = vector.broadcast %cst_36 : f32 to vector<128x1xf32>
    %63 = arith.divf %61, %62 : vector<128x1xf32>
    %64 = vector.broadcast %56 : vector<128x1xf32> to vector<128x64xf32>
    %65 = arith.subf %48, %64 : vector<128x64xf32>
    %cst_37 = arith.constant 9.99999974E-6 : f32
    %66 = vector.broadcast %cst_37 : f32 to vector<128x1xf32>
    %67 = arith.addf %63, %66 : vector<128x1xf32>
    %68 = math.rsqrt %67 : vector<128x1xf32>
    %69 = vector.broadcast %68 : vector<128x1xf32> to vector<128x64xf32>
    %70 = arith.mulf %65, %69 : vector<128x64xf32>
    %71 = vector.broadcast %50 : vector<1x64xf32> to vector<128x64xf32>
    %72 = arith.mulf %70, %71 : vector<128x64xf32>
    %73 = vector.broadcast %52 : vector<1x64xf32> to vector<128x64xf32>
    %74 = arith.addf %72, %73 : vector<128x64xf32>
    %c0_38 = arith.constant 0 : index
    %c0_39 = arith.constant 0 : index
    %c0_40 = arith.constant 0 : index
    %75 = vector.load %arg12[%c0_38, %c0_39, %c0_40] : memref<2x64x192xbf16, #tpu.memory_space<vmem>>, vector<1x64x192xbf16>
    %76 = vector.shape_cast %75 : vector<1x64x192xbf16> to vector<64x192xbf16>
    %77 = arith.truncf %74 : vector<128x64xf32> to vector<128x64xbf16>
    %cst_41 = arith.constant dense<0.000000e+00> : vector<128x192xf32>
    %78 = tpu.matmul %77, %76, %cst_41 {dimension_numbers = #tpu.dot_dimension_numbers<[1], [0], [0], [1], [0, 0, 1, 1], [], []>} : vector<128x64xbf16>, vector<64x192xbf16>, vector<128x192xf32> -> vector<128x192xf32>
    %c0_42 = arith.constant 0 : index
    %c0_43 = arith.constant 0 : index
    %c0_44 = arith.constant 0 : index
    %79 = vector.load %arg13[%c0_42, %c0_43, %c0_44] : memref<2x1x192xf32, #tpu.memory_space<vmem>>, vector<1x1x192xf32>
    %80 = vector.shape_cast %79 : vector<1x1x192xf32> to vector<1x192xf32>
    %81 = vector.broadcast %80 : vector<1x192xf32> to vector<128x192xf32>
    %82 = arith.addf %78, %81 : vector<128x192xf32>
    %83 = vector.extract_strided_slice %82 {offsets = [0, 0], sizes = [128, 64], strides = [1, 1]} : vector<128x192xf32> to vector<128x64xf32>
    %84 = vector.extract_strided_slice %82 {offsets = [0, 64], sizes = [128, 64], strides = [1, 1]} : vector<128x192xf32> to vector<128x64xf32>
    %85 = vector.extract_strided_slice %82 {offsets = [0, 128], sizes = [128, 64], strides = [1, 1]} : vector<128x192xf32> to vector<128x64xf32>
    %c0_45 = arith.constant 0 : index
    %c0_46 = arith.constant 0 : index
    %c0_47 = arith.constant 0 : index
    %86 = vector.load %arg14[%c0_45, %c0_46, %c0_47] : memref<2x64x64xbf16, #tpu.memory_space<vmem>>, vector<1x64x64xbf16>
    %87 = vector.shape_cast %86 : vector<1x64x64xbf16> to vector<64x64xbf16>
    %c0_48 = arith.constant 0 : index
    %c0_49 = arith.constant 0 : index
    %c0_50 = arith.constant 0 : index
    %88 = vector.load %arg15[%c0_48, %c0_49, %c0_50] : memref<2x1x64xf32, #tpu.memory_space<vmem>>, vector<1x1x64xf32>
    %89 = vector.shape_cast %88 : vector<1x1x64xf32> to vector<1x64xf32>
    %90 = vector.extract_strided_slice %83 {offsets = [0, 0], sizes = [64, 64], strides = [1, 1]} : vector<128x64xf32> to vector<64x64xf32>
    %91 = arith.truncf %90 : vector<64x64xf32> to vector<64x64xbf16>
    %92 = vector.extract_strided_slice %84 {offsets = [0, 0], sizes = [64, 64], strides = [1, 1]} : vector<128x64xf32> to vector<64x64xf32>
    %93 = arith.truncf %92 : vector<64x64xf32> to vector<64x64xbf16>
    %94 = vector.extract_strided_slice %85 {offsets = [0, 0], sizes = [64, 64], strides = [1, 1]} : vector<128x64xf32> to vector<64x64xf32>
    %95 = arith.truncf %94 : vector<64x64xf32> to vector<64x64xbf16>
    %96 = tpu.concatenate %93, %93, %93, %93 in 0 : vector<64x64xbf16>, vector<64x64xbf16>, vector<64x64xbf16>, vector<64x64xbf16> -> vector<256x64xbf16>
    %97 = arith.mulf %96, %3 : vector<256x64xbf16>
    %98 = tpu.concatenate %95, %95, %95, %95 in 0 : vector<64x64xbf16>, vector<64x64xbf16>, vector<64x64xbf16>, vector<64x64xbf16> -> vector<256x64xbf16>
    %99 = arith.mulf %98, %3 : vector<256x64xbf16>
    %100 = tpu.concatenate %99, %3 in 1 : vector<256x64xbf16>, vector<256x64xbf16> -> vector<256x128xbf16>
    %cst_51 = arith.constant dense<0.000000e+00> : vector<64x256xf32>
    %101 = tpu.matmul %91, %97, %cst_51 {dimension_numbers = #tpu.dot_dimension_numbers<[1], [1], [0], [0], [0, 0, 1, 0], [], []>} : vector<64x64xbf16>, vector<256x64xbf16>, vector<64x256xf32> -> vector<64x256xf32>
    %cst_52 = arith.constant dense<0xFF800000> : vector<64xf32>
    %102 = vector.multi_reduction <maximumf>, %101, %cst_52 [1] : vector<64x256xf32> to vector<64xf32>
    %103 = vector.shape_cast %102 : vector<64xf32> to vector<64x1xf32>
    %104 = vector.broadcast %103 : vector<64x1xf32> to vector<64x256xf32>
    %105 = arith.subf %101, %104 : vector<64x256xf32>
    %106 = math.exp %105 : vector<64x256xf32>
    %107 = arith.truncf %106 : vector<64x256xf32> to vector<64x256xbf16>
    %cst_53 = arith.constant dense<0.000000e+00> : vector<64x128xf32>
    %108 = tpu.matmul %107, %100, %cst_53 {dimension_numbers = #tpu.dot_dimension_numbers<[1], [0], [0], [1], [0, 0, 1, 1], [], []>} : vector<64x256xbf16>, vector<256x128xbf16>, vector<64x128xf32> -> vector<64x128xf32>
    %109 = vector.extract_strided_slice %108 {offsets = [0, 0], sizes = [64, 64], strides = [1, 1]} : vector<64x128xf32> to vector<64x64xf32>
    %110 = vector.extract_strided_slice %108 {offsets = [0, 64], sizes = [64, 64], strides = [1, 1]} : vector<64x128xf32> to vector<64x64xf32>
    %111 = tpu.reciprocal %110 {approx = true} : vector<64x64xf32> -> vector<64x64xf32>
    %112 = arith.mulf %109, %111 : vector<64x64xf32>
    %113 = vector.extract_strided_slice %83 {offsets = [64, 0], sizes = [64, 64], strides = [1, 1]} : vector<128x64xf32> to vector<64x64xf32>
    %114 = arith.truncf %113 : vector<64x64xf32> to vector<64x64xbf16>
    %115 = vector.extract_strided_slice %84 {offsets = [64, 0], sizes = [64, 64], strides = [1, 1]} : vector<128x64xf32> to vector<64x64xf32>
    %116 = arith.truncf %115 : vector<64x64xf32> to vector<64x64xbf16>
    %117 = vector.extract_strided_slice %85 {offsets = [64, 0], sizes = [64, 64], strides = [1, 1]} : vector<128x64xf32> to vector<64x64xf32>
    %118 = arith.truncf %117 : vector<64x64xf32> to vector<64x64xbf16>
    %119 = tpu.concatenate %116, %116, %116, %116 in 0 : vector<64x64xbf16>, vector<64x64xbf16>, vector<64x64xbf16>, vector<64x64xbf16> -> vector<256x64xbf16>
    %120 = arith.mulf %119, %3 : vector<256x64xbf16>
    %121 = tpu.concatenate %118, %118, %118, %118 in 0 : vector<64x64xbf16>, vector<64x64xbf16>, vector<64x64xbf16>, vector<64x64xbf16> -> vector<256x64xbf16>
    %122 = arith.mulf %121, %3 : vector<256x64xbf16>
    %123 = tpu.concatenate %122, %3 in 1 : vector<256x64xbf16>, vector<256x64xbf16> -> vector<256x128xbf16>
    %cst_54 = arith.constant dense<0.000000e+00> : vector<64x256xf32>
    %124 = tpu.matmul %114, %120, %cst_54 {dimension_numbers = #tpu.dot_dimension_numbers<[1], [1], [0], [0], [0, 0, 1, 0], [], []>} : vector<64x64xbf16>, vector<256x64xbf16>, vector<64x256xf32> -> vector<64x256xf32>
    %cst_55 = arith.constant dense<0xFF800000> : vector<64xf32>
    %125 = vector.multi_reduction <maximumf>, %124, %cst_55 [1] : vector<64x256xf32> to vector<64xf32>
    %126 = vector.shape_cast %125 : vector<64xf32> to vector<64x1xf32>
    %127 = vector.broadcast %126 : vector<64x1xf32> to vector<64x256xf32>
    %128 = arith.subf %124, %127 : vector<64x256xf32>
    %129 = math.exp %128 : vector<64x256xf32>
    %130 = arith.truncf %129 : vector<64x256xf32> to vector<64x256xbf16>
    %cst_56 = arith.constant dense<0.000000e+00> : vector<64x128xf32>
    %131 = tpu.matmul %130, %123, %cst_56 {dimension_numbers = #tpu.dot_dimension_numbers<[1], [0], [0], [1], [0, 0, 1, 1], [], []>} : vector<64x256xbf16>, vector<256x128xbf16>, vector<64x128xf32> -> vector<64x128xf32>
    %132 = vector.extract_strided_slice %131 {offsets = [0, 0], sizes = [64, 64], strides = [1, 1]} : vector<64x128xf32> to vector<64x64xf32>
    %133 = vector.extract_strided_slice %131 {offsets = [0, 64], sizes = [64, 64], strides = [1, 1]} : vector<64x128xf32> to vector<64x64xf32>
    %134 = tpu.reciprocal %133 {approx = true} : vector<64x64xf32> -> vector<64x64xf32>
    %135 = arith.mulf %132, %134 : vector<64x64xf32>
    %136 = tpu.concatenate %112, %135 in 0 : vector<64x64xf32>, vector<64x64xf32> -> vector<128x64xf32>
    %137 = arith.truncf %136 : vector<128x64xf32> to vector<128x64xbf16>
    %cst_57 = arith.constant dense<0.000000e+00> : vector<128x64xf32>
    %138 = tpu.matmul %137, %87, %cst_57 {dimension_numbers = #tpu.dot_dimension_numbers<[1], [0], [0], [1], [0, 0, 1, 1], [], []>} : vector<128x64xbf16>, vector<64x64xbf16>, vector<128x64xf32> -> vector<128x64xf32>
    %139 = vector.broadcast %89 : vector<1x64xf32> to vector<128x64xf32>
    %140 = arith.addf %138, %139 : vector<128x64xf32>
    %141 = arith.addf %48, %140 : vector<128x64xf32>
    %c0_58 = arith.constant 0 : index
    %c0_59 = arith.constant 0 : index
    %c0_60 = arith.constant 0 : index
    %142 = vector.load %arg16[%c0_58, %c0_59, %c0_60] : memref<2x1x64xf32, #tpu.memory_space<vmem>>, vector<1x1x64xf32>
    %143 = vector.shape_cast %142 : vector<1x1x64xf32> to vector<1x64xf32>
    %c0_61 = arith.constant 0 : index
    %c0_62 = arith.constant 0 : index
    %c0_63 = arith.constant 0 : index
    %144 = vector.load %arg17[%c0_61, %c0_62, %c0_63] : memref<2x1x64xf32, #tpu.memory_space<vmem>>, vector<1x1x64xf32>
    %145 = vector.shape_cast %144 : vector<1x1x64xf32> to vector<1x64xf32>
    %cst_64 = arith.constant dense<0.000000e+00> : vector<128xf32>
    %146 = vector.multi_reduction <add>, %141, %cst_64 [1] : vector<128x64xf32> to vector<128xf32>
    %147 = vector.shape_cast %146 : vector<128xf32> to vector<128x1xf32>
    %cst_65 = arith.constant 6.400000e+01 : f32
    %148 = vector.broadcast %cst_65 : f32 to vector<128x1xf32>
    %149 = arith.divf %147, %148 : vector<128x1xf32>
    %150 = vector.broadcast %149 : vector<128x1xf32> to vector<128x64xf32>
    %151 = arith.subf %141, %150 : vector<128x64xf32>
    %152 = arith.mulf %151, %151 : vector<128x64xf32>
    %cst_66 = arith.constant dense<0.000000e+00> : vector<128xf32>
    %153 = vector.multi_reduction <add>, %152, %cst_66 [1] : vector<128x64xf32> to vector<128xf32>
    %154 = vector.shape_cast %153 : vector<128xf32> to vector<128x1xf32>
    %cst_67 = arith.constant 6.400000e+01 : f32
    %155 = vector.broadcast %cst_67 : f32 to vector<128x1xf32>
    %156 = arith.divf %154, %155 : vector<128x1xf32>
    %157 = vector.broadcast %149 : vector<128x1xf32> to vector<128x64xf32>
    %158 = arith.subf %141, %157 : vector<128x64xf32>
    %cst_68 = arith.constant 9.99999974E-6 : f32
    %159 = vector.broadcast %cst_68 : f32 to vector<128x1xf32>
    %160 = arith.addf %156, %159 : vector<128x1xf32>
    %161 = math.rsqrt %160 : vector<128x1xf32>
    %162 = vector.broadcast %161 : vector<128x1xf32> to vector<128x64xf32>
    %163 = arith.mulf %158, %162 : vector<128x64xf32>
    %164 = vector.broadcast %143 : vector<1x64xf32> to vector<128x64xf32>
    %165 = arith.mulf %163, %164 : vector<128x64xf32>
    %166 = vector.broadcast %145 : vector<1x64xf32> to vector<128x64xf32>
    %167 = arith.addf %165, %166 : vector<128x64xf32>
    %c0_69 = arith.constant 0 : index
    %c0_70 = arith.constant 0 : index
    %c0_71 = arith.constant 0 : index
    %168 = vector.load %arg18[%c0_69, %c0_70, %c0_71] : memref<2x64x64xbf16, #tpu.memory_space<vmem>>, vector<1x64x64xbf16>
    %169 = vector.shape_cast %168 : vector<1x64x64xbf16> to vector<64x64xbf16>
    %170 = arith.truncf %167 : vector<128x64xf32> to vector<128x64xbf16>
    %cst_72 = arith.constant dense<0.000000e+00> : vector<128x64xf32>
    %171 = tpu.matmul %170, %169, %cst_72 {dimension_numbers = #tpu.dot_dimension_numbers<[1], [0], [0], [1], [0, 0, 1, 1], [], []>} : vector<128x64xbf16>, vector<64x64xbf16>, vector<128x64xf32> -> vector<128x64xf32>
    %c0_73 = arith.constant 0 : index
    %c0_74 = arith.constant 0 : index
    %c0_75 = arith.constant 0 : index
    %172 = vector.load %arg19[%c0_73, %c0_74, %c0_75] : memref<2x1x64xf32, #tpu.memory_space<vmem>>, vector<1x1x64xf32>
    %173 = vector.shape_cast %172 : vector<1x1x64xf32> to vector<1x64xf32>
    %174 = vector.broadcast %173 : vector<1x64xf32> to vector<128x64xf32>
    %175 = arith.addf %171, %174 : vector<128x64xf32>
    %c0_76 = arith.constant 0 : index
    %c0_77 = arith.constant 0 : index
    %c0_78 = arith.constant 0 : index
    %176 = vector.load %arg20[%c0_76, %c0_77, %c0_78] : memref<2x32x128xbf16, #tpu.memory_space<vmem>>, vector<1x32x128xbf16>
    %177 = vector.shape_cast %176 : vector<1x32x128xbf16> to vector<32x128xbf16>
    %cst_79 = arith.constant dense<0.000000e+00> : vector<16x128xf32>
    %178 = tpu.matmul %2, %177, %cst_79 {dimension_numbers = #tpu.dot_dimension_numbers<[1], [0], [0], [1], [0, 0, 1, 1], [], []>} : vector<16x32xbf16>, vector<32x128xbf16>, vector<16x128xf32> -> vector<16x128xf32>
    %c0_80 = arith.constant 0 : index
    %c0_81 = arith.constant 0 : index
    %c0_82 = arith.constant 0 : index
    %179 = vector.load %arg21[%c0_80, %c0_81, %c0_82] : memref<2x1x128xf32, #tpu.memory_space<vmem>>, vector<1x1x128xf32>
    %180 = vector.shape_cast %179 : vector<1x1x128xf32> to vector<1x128xf32>
    %181 = vector.broadcast %180 : vector<1x128xf32> to vector<16x128xf32>
    %182 = arith.addf %178, %181 : vector<16x128xf32>
    %183 = vector.extract_strided_slice %182 {offsets = [0, 0], sizes = [16, 64], strides = [1, 1]} : vector<16x128xf32> to vector<16x64xf32>
    %184 = vector.extract_strided_slice %182 {offsets = [0, 64], sizes = [16, 64], strides = [1, 1]} : vector<16x128xf32> to vector<16x64xf32>
    %c0_83 = arith.constant 0 : index
    %c0_84 = arith.constant 0 : index
    %c0_85 = arith.constant 0 : index
    %185 = vector.load %arg22[%c0_83, %c0_84, %c0_85] : memref<2x64x64xbf16, #tpu.memory_space<vmem>>, vector<1x64x64xbf16>
    %186 = vector.shape_cast %185 : vector<1x64x64xbf16> to vector<64x64xbf16>
    %c0_86 = arith.constant 0 : index
    %c0_87 = arith.constant 0 : index
    %c0_88 = arith.constant 0 : index
    %187 = vector.load %arg23[%c0_86, %c0_87, %c0_88] : memref<2x1x64xf32, #tpu.memory_space<vmem>>, vector<1x1x64xf32>
    %188 = vector.shape_cast %187 : vector<1x1x64xf32> to vector<1x64xf32>
    %189 = vector.extract_strided_slice %175 {offsets = [0, 0], sizes = [64, 64], strides = [1, 1]} : vector<128x64xf32> to vector<64x64xf32>
    %190 = arith.truncf %189 : vector<64x64xf32> to vector<64x64xbf16>
    %191 = vector.extract_strided_slice %183 {offsets = [0, 0], sizes = [8, 64], strides = [1, 1]} : vector<16x64xf32> to vector<8x64xf32>
    %192 = arith.truncf %191 : vector<8x64xf32> to vector<8x64xbf16>
    %193 = vector.extract_strided_slice %184 {offsets = [0, 0], sizes = [8, 64], strides = [1, 1]} : vector<16x64xf32> to vector<8x64xf32>
    %194 = arith.truncf %193 : vector<8x64xf32> to vector<8x64xbf16>
    %195 = tpu.concatenate %192, %192, %192, %192 in 0 : vector<8x64xbf16>, vector<8x64xbf16>, vector<8x64xbf16>, vector<8x64xbf16> -> vector<32x64xbf16>
    %196 = arith.mulf %195, %4 : vector<32x64xbf16>
    %197 = tpu.concatenate %194, %194, %194, %194 in 0 : vector<8x64xbf16>, vector<8x64xbf16>, vector<8x64xbf16>, vector<8x64xbf16> -> vector<32x64xbf16>
    %198 = arith.mulf %197, %4 : vector<32x64xbf16>
    %199 = tpu.concatenate %198, %4 in 1 : vector<32x64xbf16>, vector<32x64xbf16> -> vector<32x128xbf16>
    %cst_89 = arith.constant dense<0.000000e+00> : vector<64x32xf32>
    %200 = tpu.matmul %190, %196, %cst_89 {dimension_numbers = #tpu.dot_dimension_numbers<[1], [1], [0], [0], [0, 0, 1, 0], [], []>} : vector<64x64xbf16>, vector<32x64xbf16>, vector<64x32xf32> -> vector<64x32xf32>
    %cst_90 = arith.constant dense<0xFF800000> : vector<64xf32>
    %201 = vector.multi_reduction <maximumf>, %200, %cst_90 [1] : vector<64x32xf32> to vector<64xf32>
    %202 = vector.shape_cast %201 : vector<64xf32> to vector<64x1xf32>
    %203 = vector.broadcast %202 : vector<64x1xf32> to vector<64x32xf32>
    %204 = arith.subf %200, %203 : vector<64x32xf32>
    %205 = math.exp %204 : vector<64x32xf32>
    %206 = arith.truncf %205 : vector<64x32xf32> to vector<64x32xbf16>
    %cst_91 = arith.constant dense<0.000000e+00> : vector<64x128xf32>
    %207 = tpu.matmul %206, %199, %cst_91 {dimension_numbers = #tpu.dot_dimension_numbers<[1], [0], [0], [1], [0, 0, 1, 1], [], []>} : vector<64x32xbf16>, vector<32x128xbf16>, vector<64x128xf32> -> vector<64x128xf32>
    %208 = vector.extract_strided_slice %207 {offsets = [0, 0], sizes = [64, 64], strides = [1, 1]} : vector<64x128xf32> to vector<64x64xf32>
    %209 = vector.extract_strided_slice %207 {offsets = [0, 64], sizes = [64, 64], strides = [1, 1]} : vector<64x128xf32> to vector<64x64xf32>
    %210 = tpu.reciprocal %209 {approx = true} : vector<64x64xf32> -> vector<64x64xf32>
    %211 = arith.mulf %208, %210 : vector<64x64xf32>
    %212 = vector.extract_strided_slice %175 {offsets = [64, 0], sizes = [64, 64], strides = [1, 1]} : vector<128x64xf32> to vector<64x64xf32>
    %213 = arith.truncf %212 : vector<64x64xf32> to vector<64x64xbf16>
    %214 = vector.extract_strided_slice %183 {offsets = [8, 0], sizes = [8, 64], strides = [1, 1]} : vector<16x64xf32> to vector<8x64xf32>
    %215 = arith.truncf %214 : vector<8x64xf32> to vector<8x64xbf16>
    %216 = vector.extract_strided_slice %184 {offsets = [8, 0], sizes = [8, 64], strides = [1, 1]} : vector<16x64xf32> to vector<8x64xf32>
    %217 = arith.truncf %216 : vector<8x64xf32> to vector<8x64xbf16>
    %218 = tpu.concatenate %215, %215, %215, %215 in 0 : vector<8x64xbf16>, vector<8x64xbf16>, vector<8x64xbf16>, vector<8x64xbf16> -> vector<32x64xbf16>
    %219 = arith.mulf %218, %4 : vector<32x64xbf16>
    %220 = tpu.concatenate %217, %217, %217, %217 in 0 : vector<8x64xbf16>, vector<8x64xbf16>, vector<8x64xbf16>, vector<8x64xbf16> -> vector<32x64xbf16>
    %221 = arith.mulf %220, %4 : vector<32x64xbf16>
    %222 = tpu.concatenate %221, %4 in 1 : vector<32x64xbf16>, vector<32x64xbf16> -> vector<32x128xbf16>
    %cst_92 = arith.constant dense<0.000000e+00> : vector<64x32xf32>
    %223 = tpu.matmul %213, %219, %cst_92 {dimension_numbers = #tpu.dot_dimension_numbers<[1], [1], [0], [0], [0, 0, 1, 0], [], []>} : vector<64x64xbf16>, vector<32x64xbf16>, vector<64x32xf32> -> vector<64x32xf32>
    %cst_93 = arith.constant dense<0xFF800000> : vector<64xf32>
    %224 = vector.multi_reduction <maximumf>, %223, %cst_93 [1] : vector<64x32xf32> to vector<64xf32>
    %225 = vector.shape_cast %224 : vector<64xf32> to vector<64x1xf32>
    %226 = vector.broadcast %225 : vector<64x1xf32> to vector<64x32xf32>
    %227 = arith.subf %223, %226 : vector<64x32xf32>
    %228 = math.exp %227 : vector<64x32xf32>
    %229 = arith.truncf %228 : vector<64x32xf32> to vector<64x32xbf16>
    %cst_94 = arith.constant dense<0.000000e+00> : vector<64x128xf32>
    %230 = tpu.matmul %229, %222, %cst_94 {dimension_numbers = #tpu.dot_dimension_numbers<[1], [0], [0], [1], [0, 0, 1, 1], [], []>} : vector<64x32xbf16>, vector<32x128xbf16>, vector<64x128xf32> -> vector<64x128xf32>
    %231 = vector.extract_strided_slice %230 {offsets = [0, 0], sizes = [64, 64], strides = [1, 1]} : vector<64x128xf32> to vector<64x64xf32>
    %232 = vector.extract_strided_slice %230 {offsets = [0, 64], sizes = [64, 64], strides = [1, 1]} : vector<64x128xf32> to vector<64x64xf32>
    %233 = tpu.reciprocal %232 {approx = true} : vector<64x64xf32> -> vector<64x64xf32>
    %234 = arith.mulf %231, %233 : vector<64x64xf32>
    %235 = tpu.concatenate %211, %234 in 0 : vector<64x64xf32>, vector<64x64xf32> -> vector<128x64xf32>
    %236 = arith.truncf %235 : vector<128x64xf32> to vector<128x64xbf16>
    %cst_95 = arith.constant dense<0.000000e+00> : vector<128x64xf32>
    %237 = tpu.matmul %236, %186, %cst_95 {dimension_numbers = #tpu.dot_dimension_numbers<[1], [0], [0], [1], [0, 0, 1, 1], [], []>} : vector<128x64xbf16>, vector<64x64xbf16>, vector<128x64xf32> -> vector<128x64xf32>
    %238 = vector.broadcast %188 : vector<1x64xf32> to vector<128x64xf32>
    %239 = arith.addf %237, %238 : vector<128x64xf32>
    %240 = arith.addf %141, %239 : vector<128x64xf32>
    %c0_96 = arith.constant 0 : index
    %c0_97 = arith.constant 0 : index
    %c0_98 = arith.constant 0 : index
    %241 = vector.load %arg24[%c0_96, %c0_97, %c0_98] : memref<2x1x64xf32, #tpu.memory_space<vmem>>, vector<1x1x64xf32>
    %242 = vector.shape_cast %241 : vector<1x1x64xf32> to vector<1x64xf32>
    %c0_99 = arith.constant 0 : index
    %c0_100 = arith.constant 0 : index
    %c0_101 = arith.constant 0 : index
    %243 = vector.load %arg25[%c0_99, %c0_100, %c0_101] : memref<2x1x64xf32, #tpu.memory_space<vmem>>, vector<1x1x64xf32>
    %244 = vector.shape_cast %243 : vector<1x1x64xf32> to vector<1x64xf32>
    %cst_102 = arith.constant dense<0.000000e+00> : vector<128xf32>
    %245 = vector.multi_reduction <add>, %240, %cst_102 [1] : vector<128x64xf32> to vector<128xf32>
    %246 = vector.shape_cast %245 : vector<128xf32> to vector<128x1xf32>
    %cst_103 = arith.constant 6.400000e+01 : f32
    %247 = vector.broadcast %cst_103 : f32 to vector<128x1xf32>
    %248 = arith.divf %246, %247 : vector<128x1xf32>
    %249 = vector.broadcast %248 : vector<128x1xf32> to vector<128x64xf32>
    %250 = arith.subf %240, %249 : vector<128x64xf32>
    %251 = arith.mulf %250, %250 : vector<128x64xf32>
    %cst_104 = arith.constant dense<0.000000e+00> : vector<128xf32>
    %252 = vector.multi_reduction <add>, %251, %cst_104 [1] : vector<128x64xf32> to vector<128xf32>
    %253 = vector.shape_cast %252 : vector<128xf32> to vector<128x1xf32>
    %cst_105 = arith.constant 6.400000e+01 : f32
    %254 = vector.broadcast %cst_105 : f32 to vector<128x1xf32>
    %255 = arith.divf %253, %254 : vector<128x1xf32>
    %256 = vector.broadcast %248 : vector<128x1xf32> to vector<128x64xf32>
    %257 = arith.subf %240, %256 : vector<128x64xf32>
    %cst_106 = arith.constant 9.99999974E-6 : f32
    %258 = vector.broadcast %cst_106 : f32 to vector<128x1xf32>
    %259 = arith.addf %255, %258 : vector<128x1xf32>
    %260 = math.rsqrt %259 : vector<128x1xf32>
    %261 = vector.broadcast %260 : vector<128x1xf32> to vector<128x64xf32>
    %262 = arith.mulf %257, %261 : vector<128x64xf32>
    %263 = vector.broadcast %242 : vector<1x64xf32> to vector<128x64xf32>
    %264 = arith.mulf %262, %263 : vector<128x64xf32>
    %265 = vector.broadcast %244 : vector<1x64xf32> to vector<128x64xf32>
    %266 = arith.addf %264, %265 : vector<128x64xf32>
    %c0_107 = arith.constant 0 : index
    %c0_108 = arith.constant 0 : index
    %c0_109 = arith.constant 0 : index
    %267 = vector.load %arg26[%c0_107, %c0_108, %c0_109] : memref<2x64x256xbf16, #tpu.memory_space<vmem>>, vector<1x64x256xbf16>
    %268 = vector.shape_cast %267 : vector<1x64x256xbf16> to vector<64x256xbf16>
    %269 = arith.truncf %266 : vector<128x64xf32> to vector<128x64xbf16>
    %cst_110 = arith.constant dense<0.000000e+00> : vector<128x256xf32>
    %270 = tpu.matmul %269, %268, %cst_110 {dimension_numbers = #tpu.dot_dimension_numbers<[1], [0], [0], [1], [0, 0, 1, 1], [], []>} : vector<128x64xbf16>, vector<64x256xbf16>, vector<128x256xf32> -> vector<128x256xf32>
    %c0_111 = arith.constant 0 : index
    %c0_112 = arith.constant 0 : index
    %c0_113 = arith.constant 0 : index
    %271 = vector.load %arg27[%c0_111, %c0_112, %c0_113] : memref<2x1x256xf32, #tpu.memory_space<vmem>>, vector<1x1x256xf32>
    %272 = vector.shape_cast %271 : vector<1x1x256xf32> to vector<1x256xf32>
    %273 = vector.broadcast %272 : vector<1x256xf32> to vector<128x256xf32>
    %274 = arith.addf %270, %273 : vector<128x256xf32>
    %cst_114 = arith.constant 0.000000e+00 : f32
    %275 = vector.broadcast %cst_114 : f32 to vector<128x256xf32>
    %276 = arith.maximumf %274, %275 : vector<128x256xf32>
    %c0_115 = arith.constant 0 : index
    %c0_116 = arith.constant 0 : index
    %c0_117 = arith.constant 0 : index
    %277 = vector.load %arg28[%c0_115, %c0_116, %c0_117] : memref<2x256x64xbf16, #tpu.memory_space<vmem>>, vector<1x256x64xbf16>
    %278 = vector.shape_cast %277 : vector<1x256x64xbf16> to vector<256x64xbf16>
    %279 = arith.truncf %276 : vector<128x256xf32> to vector<128x256xbf16>
    %cst_118 = arith.constant dense<0.000000e+00> : vector<128x64xf32>
    %280 = tpu.matmul %279, %278, %cst_118 {dimension_numbers = #tpu.dot_dimension_numbers<[1], [0], [0], [1], [0, 0, 1, 1], [], []>} : vector<128x256xbf16>, vector<256x64xbf16>, vector<128x64xf32> -> vector<128x64xf32>
    %281 = arith.addf %240, %280 : vector<128x64xf32>
    %c0_119 = arith.constant 0 : index
    %c0_120 = arith.constant 0 : index
    %c0_121 = arith.constant 0 : index
    %282 = vector.load %arg29[%c0_119, %c0_120, %c0_121] : memref<2x1x64xf32, #tpu.memory_space<vmem>>, vector<1x1x64xf32>
    %283 = vector.shape_cast %282 : vector<1x1x64xf32> to vector<1x64xf32>
    %284 = vector.broadcast %283 : vector<1x64xf32> to vector<128x64xf32>
    %285 = arith.addf %281, %284 : vector<128x64xf32>
    %c1 = arith.constant 1 : index
    %c0_122 = arith.constant 0 : index
    %c0_123 = arith.constant 0 : index
    %286 = vector.load %arg10[%c1, %c0_122, %c0_123] : memref<2x1x64xf32, #tpu.memory_space<vmem>>, vector<1x1x64xf32>
    %287 = vector.shape_cast %286 : vector<1x1x64xf32> to vector<1x64xf32>
    %c1_124 = arith.constant 1 : index
    %c0_125 = arith.constant 0 : index
    %c0_126 = arith.constant 0 : index
    %288 = vector.load %arg11[%c1_124, %c0_125, %c0_126] : memref<2x1x64xf32, #tpu.memory_space<vmem>>, vector<1x1x64xf32>
    %289 = vector.shape_cast %288 : vector<1x1x64xf32> to vector<1x64xf32>
    %cst_127 = arith.constant dense<0.000000e+00> : vector<128xf32>
    %290 = vector.multi_reduction <add>, %285, %cst_127 [1] : vector<128x64xf32> to vector<128xf32>
    %291 = vector.shape_cast %290 : vector<128xf32> to vector<128x1xf32>
    %cst_128 = arith.constant 6.400000e+01 : f32
    %292 = vector.broadcast %cst_128 : f32 to vector<128x1xf32>
    %293 = arith.divf %291, %292 : vector<128x1xf32>
    %294 = vector.broadcast %293 : vector<128x1xf32> to vector<128x64xf32>
    %295 = arith.subf %285, %294 : vector<128x64xf32>
    %296 = arith.mulf %295, %295 : vector<128x64xf32>
    %cst_129 = arith.constant dense<0.000000e+00> : vector<128xf32>
    %297 = vector.multi_reduction <add>, %296, %cst_129 [1] : vector<128x64xf32> to vector<128xf32>
    %298 = vector.shape_cast %297 : vector<128xf32> to vector<128x1xf32>
    %cst_130 = arith.constant 6.400000e+01 : f32
    %299 = vector.broadcast %cst_130 : f32 to vector<128x1xf32>
    %300 = arith.divf %298, %299 : vector<128x1xf32>
    %301 = vector.broadcast %293 : vector<128x1xf32> to vector<128x64xf32>
    %302 = arith.subf %285, %301 : vector<128x64xf32>
    %cst_131 = arith.constant 9.99999974E-6 : f32
    %303 = vector.broadcast %cst_131 : f32 to vector<128x1xf32>
    %304 = arith.addf %300, %303 : vector<128x1xf32>
    %305 = math.rsqrt %304 : vector<128x1xf32>
    %306 = vector.broadcast %305 : vector<128x1xf32> to vector<128x64xf32>
    %307 = arith.mulf %302, %306 : vector<128x64xf32>
    %308 = vector.broadcast %287 : vector<1x64xf32> to vector<128x64xf32>
    %309 = arith.mulf %307, %308 : vector<128x64xf32>
    %310 = vector.broadcast %289 : vector<1x64xf32> to vector<128x64xf32>
    %311 = arith.addf %309, %310 : vector<128x64xf32>
    %c1_132 = arith.constant 1 : index
    %c0_133 = arith.constant 0 : index
    %c0_134 = arith.constant 0 : index
    %312 = vector.load %arg12[%c1_132, %c0_133, %c0_134] : memref<2x64x192xbf16, #tpu.memory_space<vmem>>, vector<1x64x192xbf16>
    %313 = vector.shape_cast %312 : vector<1x64x192xbf16> to vector<64x192xbf16>
    %314 = arith.truncf %311 : vector<128x64xf32> to vector<128x64xbf16>
    %cst_135 = arith.constant dense<0.000000e+00> : vector<128x192xf32>
    %315 = tpu.matmul %314, %313, %cst_135 {dimension_numbers = #tpu.dot_dimension_numbers<[1], [0], [0], [1], [0, 0, 1, 1], [], []>} : vector<128x64xbf16>, vector<64x192xbf16>, vector<128x192xf32> -> vector<128x192xf32>
    %c1_136 = arith.constant 1 : index
    %c0_137 = arith.constant 0 : index
    %c0_138 = arith.constant 0 : index
    %316 = vector.load %arg13[%c1_136, %c0_137, %c0_138] : memref<2x1x192xf32, #tpu.memory_space<vmem>>, vector<1x1x192xf32>
    %317 = vector.shape_cast %316 : vector<1x1x192xf32> to vector<1x192xf32>
    %318 = vector.broadcast %317 : vector<1x192xf32> to vector<128x192xf32>
    %319 = arith.addf %315, %318 : vector<128x192xf32>
    %320 = vector.extract_strided_slice %319 {offsets = [0, 0], sizes = [128, 64], strides = [1, 1]} : vector<128x192xf32> to vector<128x64xf32>
    %321 = vector.extract_strided_slice %319 {offsets = [0, 64], sizes = [128, 64], strides = [1, 1]} : vector<128x192xf32> to vector<128x64xf32>
    %322 = vector.extract_strided_slice %319 {offsets = [0, 128], sizes = [128, 64], strides = [1, 1]} : vector<128x192xf32> to vector<128x64xf32>
    %c1_139 = arith.constant 1 : index
    %c0_140 = arith.constant 0 : index
    %c0_141 = arith.constant 0 : index
    %323 = vector.load %arg14[%c1_139, %c0_140, %c0_141] : memref<2x64x64xbf16, #tpu.memory_space<vmem>>, vector<1x64x64xbf16>
    %324 = vector.shape_cast %323 : vector<1x64x64xbf16> to vector<64x64xbf16>
    %c1_142 = arith.constant 1 : index
    %c0_143 = arith.constant 0 : index
    %c0_144 = arith.constant 0 : index
    %325 = vector.load %arg15[%c1_142, %c0_143, %c0_144] : memref<2x1x64xf32, #tpu.memory_space<vmem>>, vector<1x1x64xf32>
    %326 = vector.shape_cast %325 : vector<1x1x64xf32> to vector<1x64xf32>
    %327 = vector.extract_strided_slice %320 {offsets = [0, 0], sizes = [64, 64], strides = [1, 1]} : vector<128x64xf32> to vector<64x64xf32>
    %328 = arith.truncf %327 : vector<64x64xf32> to vector<64x64xbf16>
    %329 = vector.extract_strided_slice %321 {offsets = [0, 0], sizes = [64, 64], strides = [1, 1]} : vector<128x64xf32> to vector<64x64xf32>
    %330 = arith.truncf %329 : vector<64x64xf32> to vector<64x64xbf16>
    %331 = vector.extract_strided_slice %322 {offsets = [0, 0], sizes = [64, 64], strides = [1, 1]} : vector<128x64xf32> to vector<64x64xf32>
    %332 = arith.truncf %331 : vector<64x64xf32> to vector<64x64xbf16>
    %333 = tpu.concatenate %330, %330, %330, %330 in 0 : vector<64x64xbf16>, vector<64x64xbf16>, vector<64x64xbf16>, vector<64x64xbf16> -> vector<256x64xbf16>
    %334 = arith.mulf %333, %3 : vector<256x64xbf16>
    %335 = tpu.concatenate %332, %332, %332, %332 in 0 : vector<64x64xbf16>, vector<64x64xbf16>, vector<64x64xbf16>, vector<64x64xbf16> -> vector<256x64xbf16>
    %336 = arith.mulf %335, %3 : vector<256x64xbf16>
    %337 = tpu.concatenate %336, %3 in 1 : vector<256x64xbf16>, vector<256x64xbf16> -> vector<256x128xbf16>
    %cst_145 = arith.constant dense<0.000000e+00> : vector<64x256xf32>
    %338 = tpu.matmul %328, %334, %cst_145 {dimension_numbers = #tpu.dot_dimension_numbers<[1], [1], [0], [0], [0, 0, 1, 0], [], []>} : vector<64x64xbf16>, vector<256x64xbf16>, vector<64x256xf32> -> vector<64x256xf32>
    %cst_146 = arith.constant dense<0xFF800000> : vector<64xf32>
    %339 = vector.multi_reduction <maximumf>, %338, %cst_146 [1] : vector<64x256xf32> to vector<64xf32>
    %340 = vector.shape_cast %339 : vector<64xf32> to vector<64x1xf32>
    %341 = vector.broadcast %340 : vector<64x1xf32> to vector<64x256xf32>
    %342 = arith.subf %338, %341 : vector<64x256xf32>
    %343 = math.exp %342 : vector<64x256xf32>
    %344 = arith.truncf %343 : vector<64x256xf32> to vector<64x256xbf16>
    %cst_147 = arith.constant dense<0.000000e+00> : vector<64x128xf32>
    %345 = tpu.matmul %344, %337, %cst_147 {dimension_numbers = #tpu.dot_dimension_numbers<[1], [0], [0], [1], [0, 0, 1, 1], [], []>} : vector<64x256xbf16>, vector<256x128xbf16>, vector<64x128xf32> -> vector<64x128xf32>
    %346 = vector.extract_strided_slice %345 {offsets = [0, 0], sizes = [64, 64], strides = [1, 1]} : vector<64x128xf32> to vector<64x64xf32>
    %347 = vector.extract_strided_slice %345 {offsets = [0, 64], sizes = [64, 64], strides = [1, 1]} : vector<64x128xf32> to vector<64x64xf32>
    %348 = tpu.reciprocal %347 {approx = true} : vector<64x64xf32> -> vector<64x64xf32>
    %349 = arith.mulf %346, %348 : vector<64x64xf32>
    %350 = vector.extract_strided_slice %320 {offsets = [64, 0], sizes = [64, 64], strides = [1, 1]} : vector<128x64xf32> to vector<64x64xf32>
    %351 = arith.truncf %350 : vector<64x64xf32> to vector<64x64xbf16>
    %352 = vector.extract_strided_slice %321 {offsets = [64, 0], sizes = [64, 64], strides = [1, 1]} : vector<128x64xf32> to vector<64x64xf32>
    %353 = arith.truncf %352 : vector<64x64xf32> to vector<64x64xbf16>
    %354 = vector.extract_strided_slice %322 {offsets = [64, 0], sizes = [64, 64], strides = [1, 1]} : vector<128x64xf32> to vector<64x64xf32>
    %355 = arith.truncf %354 : vector<64x64xf32> to vector<64x64xbf16>
    %356 = tpu.concatenate %353, %353, %353, %353 in 0 : vector<64x64xbf16>, vector<64x64xbf16>, vector<64x64xbf16>, vector<64x64xbf16> -> vector<256x64xbf16>
    %357 = arith.mulf %356, %3 : vector<256x64xbf16>
    %358 = tpu.concatenate %355, %355, %355, %355 in 0 : vector<64x64xbf16>, vector<64x64xbf16>, vector<64x64xbf16>, vector<64x64xbf16> -> vector<256x64xbf16>
    %359 = arith.mulf %358, %3 : vector<256x64xbf16>
    %360 = tpu.concatenate %359, %3 in 1 : vector<256x64xbf16>, vector<256x64xbf16> -> vector<256x128xbf16>
    %cst_148 = arith.constant dense<0.000000e+00> : vector<64x256xf32>
    %361 = tpu.matmul %351, %357, %cst_148 {dimension_numbers = #tpu.dot_dimension_numbers<[1], [1], [0], [0], [0, 0, 1, 0], [], []>} : vector<64x64xbf16>, vector<256x64xbf16>, vector<64x256xf32> -> vector<64x256xf32>
    %cst_149 = arith.constant dense<0xFF800000> : vector<64xf32>
    %362 = vector.multi_reduction <maximumf>, %361, %cst_149 [1] : vector<64x256xf32> to vector<64xf32>
    %363 = vector.shape_cast %362 : vector<64xf32> to vector<64x1xf32>
    %364 = vector.broadcast %363 : vector<64x1xf32> to vector<64x256xf32>
    %365 = arith.subf %361, %364 : vector<64x256xf32>
    %366 = math.exp %365 : vector<64x256xf32>
    %367 = arith.truncf %366 : vector<64x256xf32> to vector<64x256xbf16>
    %cst_150 = arith.constant dense<0.000000e+00> : vector<64x128xf32>
    %368 = tpu.matmul %367, %360, %cst_150 {dimension_numbers = #tpu.dot_dimension_numbers<[1], [0], [0], [1], [0, 0, 1, 1], [], []>} : vector<64x256xbf16>, vector<256x128xbf16>, vector<64x128xf32> -> vector<64x128xf32>
    %369 = vector.extract_strided_slice %368 {offsets = [0, 0], sizes = [64, 64], strides = [1, 1]} : vector<64x128xf32> to vector<64x64xf32>
    %370 = vector.extract_strided_slice %368 {offsets = [0, 64], sizes = [64, 64], strides = [1, 1]} : vector<64x128xf32> to vector<64x64xf32>
    %371 = tpu.reciprocal %370 {approx = true} : vector<64x64xf32> -> vector<64x64xf32>
    %372 = arith.mulf %369, %371 : vector<64x64xf32>
    %373 = tpu.concatenate %349, %372 in 0 : vector<64x64xf32>, vector<64x64xf32> -> vector<128x64xf32>
    %374 = arith.truncf %373 : vector<128x64xf32> to vector<128x64xbf16>
    %cst_151 = arith.constant dense<0.000000e+00> : vector<128x64xf32>
    %375 = tpu.matmul %374, %324, %cst_151 {dimension_numbers = #tpu.dot_dimension_numbers<[1], [0], [0], [1], [0, 0, 1, 1], [], []>} : vector<128x64xbf16>, vector<64x64xbf16>, vector<128x64xf32> -> vector<128x64xf32>
    %376 = vector.broadcast %326 : vector<1x64xf32> to vector<128x64xf32>
    %377 = arith.addf %375, %376 : vector<128x64xf32>
    %378 = arith.addf %285, %377 : vector<128x64xf32>
    %c1_152 = arith.constant 1 : index
    %c0_153 = arith.constant 0 : index
    %c0_154 = arith.constant 0 : index
    %379 = vector.load %arg16[%c1_152, %c0_153, %c0_154] : memref<2x1x64xf32, #tpu.memory_space<vmem>>, vector<1x1x64xf32>
    %380 = vector.shape_cast %379 : vector<1x1x64xf32> to vector<1x64xf32>
    %c1_155 = arith.constant 1 : index
    %c0_156 = arith.constant 0 : index
    %c0_157 = arith.constant 0 : index
    %381 = vector.load %arg17[%c1_155, %c0_156, %c0_157] : memref<2x1x64xf32, #tpu.memory_space<vmem>>, vector<1x1x64xf32>
    %382 = vector.shape_cast %381 : vector<1x1x64xf32> to vector<1x64xf32>
    %cst_158 = arith.constant dense<0.000000e+00> : vector<128xf32>
    %383 = vector.multi_reduction <add>, %378, %cst_158 [1] : vector<128x64xf32> to vector<128xf32>
    %384 = vector.shape_cast %383 : vector<128xf32> to vector<128x1xf32>
    %cst_159 = arith.constant 6.400000e+01 : f32
    %385 = vector.broadcast %cst_159 : f32 to vector<128x1xf32>
    %386 = arith.divf %384, %385 : vector<128x1xf32>
    %387 = vector.broadcast %386 : vector<128x1xf32> to vector<128x64xf32>
    %388 = arith.subf %378, %387 : vector<128x64xf32>
    %389 = arith.mulf %388, %388 : vector<128x64xf32>
    %cst_160 = arith.constant dense<0.000000e+00> : vector<128xf32>
    %390 = vector.multi_reduction <add>, %389, %cst_160 [1] : vector<128x64xf32> to vector<128xf32>
    %391 = vector.shape_cast %390 : vector<128xf32> to vector<128x1xf32>
    %cst_161 = arith.constant 6.400000e+01 : f32
    %392 = vector.broadcast %cst_161 : f32 to vector<128x1xf32>
    %393 = arith.divf %391, %392 : vector<128x1xf32>
    %394 = vector.broadcast %386 : vector<128x1xf32> to vector<128x64xf32>
    %395 = arith.subf %378, %394 : vector<128x64xf32>
    %cst_162 = arith.constant 9.99999974E-6 : f32
    %396 = vector.broadcast %cst_162 : f32 to vector<128x1xf32>
    %397 = arith.addf %393, %396 : vector<128x1xf32>
    %398 = math.rsqrt %397 : vector<128x1xf32>
    %399 = vector.broadcast %398 : vector<128x1xf32> to vector<128x64xf32>
    %400 = arith.mulf %395, %399 : vector<128x64xf32>
    %401 = vector.broadcast %380 : vector<1x64xf32> to vector<128x64xf32>
    %402 = arith.mulf %400, %401 : vector<128x64xf32>
    %403 = vector.broadcast %382 : vector<1x64xf32> to vector<128x64xf32>
    %404 = arith.addf %402, %403 : vector<128x64xf32>
    %c1_163 = arith.constant 1 : index
    %c0_164 = arith.constant 0 : index
    %c0_165 = arith.constant 0 : index
    %405 = vector.load %arg18[%c1_163, %c0_164, %c0_165] : memref<2x64x64xbf16, #tpu.memory_space<vmem>>, vector<1x64x64xbf16>
    %406 = vector.shape_cast %405 : vector<1x64x64xbf16> to vector<64x64xbf16>
    %407 = arith.truncf %404 : vector<128x64xf32> to vector<128x64xbf16>
    %cst_166 = arith.constant dense<0.000000e+00> : vector<128x64xf32>
    %408 = tpu.matmul %407, %406, %cst_166 {dimension_numbers = #tpu.dot_dimension_numbers<[1], [0], [0], [1], [0, 0, 1, 1], [], []>} : vector<128x64xbf16>, vector<64x64xbf16>, vector<128x64xf32> -> vector<128x64xf32>
    %c1_167 = arith.constant 1 : index
    %c0_168 = arith.constant 0 : index
    %c0_169 = arith.constant 0 : index
    %409 = vector.load %arg19[%c1_167, %c0_168, %c0_169] : memref<2x1x64xf32, #tpu.memory_space<vmem>>, vector<1x1x64xf32>
    %410 = vector.shape_cast %409 : vector<1x1x64xf32> to vector<1x64xf32>
    %411 = vector.broadcast %410 : vector<1x64xf32> to vector<128x64xf32>
    %412 = arith.addf %408, %411 : vector<128x64xf32>
    %c1_170 = arith.constant 1 : index
    %c0_171 = arith.constant 0 : index
    %c0_172 = arith.constant 0 : index
    %413 = vector.load %arg20[%c1_170, %c0_171, %c0_172] : memref<2x32x128xbf16, #tpu.memory_space<vmem>>, vector<1x32x128xbf16>
    %414 = vector.shape_cast %413 : vector<1x32x128xbf16> to vector<32x128xbf16>
    %cst_173 = arith.constant dense<0.000000e+00> : vector<16x128xf32>
    %415 = tpu.matmul %2, %414, %cst_173 {dimension_numbers = #tpu.dot_dimension_numbers<[1], [0], [0], [1], [0, 0, 1, 1], [], []>} : vector<16x32xbf16>, vector<32x128xbf16>, vector<16x128xf32> -> vector<16x128xf32>
    %c1_174 = arith.constant 1 : index
    %c0_175 = arith.constant 0 : index
    %c0_176 = arith.constant 0 : index
    %416 = vector.load %arg21[%c1_174, %c0_175, %c0_176] : memref<2x1x128xf32, #tpu.memory_space<vmem>>, vector<1x1x128xf32>
    %417 = vector.shape_cast %416 : vector<1x1x128xf32> to vector<1x128xf32>
    %418 = vector.broadcast %417 : vector<1x128xf32> to vector<16x128xf32>
    %419 = arith.addf %415, %418 : vector<16x128xf32>
    %420 = vector.extract_strided_slice %419 {offsets = [0, 0], sizes = [16, 64], strides = [1, 1]} : vector<16x128xf32> to vector<16x64xf32>
    %421 = vector.extract_strided_slice %419 {offsets = [0, 64], sizes = [16, 64], strides = [1, 1]} : vector<16x128xf32> to vector<16x64xf32>
    %c1_177 = arith.constant 1 : index
    %c0_178 = arith.constant 0 : index
    %c0_179 = arith.constant 0 : index
    %422 = vector.load %arg22[%c1_177, %c0_178, %c0_179] : memref<2x64x64xbf16, #tpu.memory_space<vmem>>, vector<1x64x64xbf16>
    %423 = vector.shape_cast %422 : vector<1x64x64xbf16> to vector<64x64xbf16>
    %c1_180 = arith.constant 1 : index
    %c0_181 = arith.constant 0 : index
    %c0_182 = arith.constant 0 : index
    %424 = vector.load %arg23[%c1_180, %c0_181, %c0_182] : memref<2x1x64xf32, #tpu.memory_space<vmem>>, vector<1x1x64xf32>
    %425 = vector.shape_cast %424 : vector<1x1x64xf32> to vector<1x64xf32>
    %426 = vector.extract_strided_slice %412 {offsets = [0, 0], sizes = [64, 64], strides = [1, 1]} : vector<128x64xf32> to vector<64x64xf32>
    %427 = arith.truncf %426 : vector<64x64xf32> to vector<64x64xbf16>
    %428 = vector.extract_strided_slice %420 {offsets = [0, 0], sizes = [8, 64], strides = [1, 1]} : vector<16x64xf32> to vector<8x64xf32>
    %429 = arith.truncf %428 : vector<8x64xf32> to vector<8x64xbf16>
    %430 = vector.extract_strided_slice %421 {offsets = [0, 0], sizes = [8, 64], strides = [1, 1]} : vector<16x64xf32> to vector<8x64xf32>
    %431 = arith.truncf %430 : vector<8x64xf32> to vector<8x64xbf16>
    %432 = tpu.concatenate %429, %429, %429, %429 in 0 : vector<8x64xbf16>, vector<8x64xbf16>, vector<8x64xbf16>, vector<8x64xbf16> -> vector<32x64xbf16>
    %433 = arith.mulf %432, %4 : vector<32x64xbf16>
    %434 = tpu.concatenate %431, %431, %431, %431 in 0 : vector<8x64xbf16>, vector<8x64xbf16>, vector<8x64xbf16>, vector<8x64xbf16> -> vector<32x64xbf16>
    %435 = arith.mulf %434, %4 : vector<32x64xbf16>
    %436 = tpu.concatenate %435, %4 in 1 : vector<32x64xbf16>, vector<32x64xbf16> -> vector<32x128xbf16>
    %cst_183 = arith.constant dense<0.000000e+00> : vector<64x32xf32>
    %437 = tpu.matmul %427, %433, %cst_183 {dimension_numbers = #tpu.dot_dimension_numbers<[1], [1], [0], [0], [0, 0, 1, 0], [], []>} : vector<64x64xbf16>, vector<32x64xbf16>, vector<64x32xf32> -> vector<64x32xf32>
    %cst_184 = arith.constant dense<0xFF800000> : vector<64xf32>
    %438 = vector.multi_reduction <maximumf>, %437, %cst_184 [1] : vector<64x32xf32> to vector<64xf32>
    %439 = vector.shape_cast %438 : vector<64xf32> to vector<64x1xf32>
    %440 = vector.broadcast %439 : vector<64x1xf32> to vector<64x32xf32>
    %441 = arith.subf %437, %440 : vector<64x32xf32>
    %442 = math.exp %441 : vector<64x32xf32>
    %443 = arith.truncf %442 : vector<64x32xf32> to vector<64x32xbf16>
    %cst_185 = arith.constant dense<0.000000e+00> : vector<64x128xf32>
    %444 = tpu.matmul %443, %436, %cst_185 {dimension_numbers = #tpu.dot_dimension_numbers<[1], [0], [0], [1], [0, 0, 1, 1], [], []>} : vector<64x32xbf16>, vector<32x128xbf16>, vector<64x128xf32> -> vector<64x128xf32>
    %445 = vector.extract_strided_slice %444 {offsets = [0, 0], sizes = [64, 64], strides = [1, 1]} : vector<64x128xf32> to vector<64x64xf32>
    %446 = vector.extract_strided_slice %444 {offsets = [0, 64], sizes = [64, 64], strides = [1, 1]} : vector<64x128xf32> to vector<64x64xf32>
    %447 = tpu.reciprocal %446 {approx = true} : vector<64x64xf32> -> vector<64x64xf32>
    %448 = arith.mulf %445, %447 : vector<64x64xf32>
    %449 = vector.extract_strided_slice %412 {offsets = [64, 0], sizes = [64, 64], strides = [1, 1]} : vector<128x64xf32> to vector<64x64xf32>
    %450 = arith.truncf %449 : vector<64x64xf32> to vector<64x64xbf16>
    %451 = vector.extract_strided_slice %420 {offsets = [8, 0], sizes = [8, 64], strides = [1, 1]} : vector<16x64xf32> to vector<8x64xf32>
    %452 = arith.truncf %451 : vector<8x64xf32> to vector<8x64xbf16>
    %453 = vector.extract_strided_slice %421 {offsets = [8, 0], sizes = [8, 64], strides = [1, 1]} : vector<16x64xf32> to vector<8x64xf32>
    %454 = arith.truncf %453 : vector<8x64xf32> to vector<8x64xbf16>
    %455 = tpu.concatenate %452, %452, %452, %452 in 0 : vector<8x64xbf16>, vector<8x64xbf16>, vector<8x64xbf16>, vector<8x64xbf16> -> vector<32x64xbf16>
    %456 = arith.mulf %455, %4 : vector<32x64xbf16>
    %457 = tpu.concatenate %454, %454, %454, %454 in 0 : vector<8x64xbf16>, vector<8x64xbf16>, vector<8x64xbf16>, vector<8x64xbf16> -> vector<32x64xbf16>
    %458 = arith.mulf %457, %4 : vector<32x64xbf16>
    %459 = tpu.concatenate %458, %4 in 1 : vector<32x64xbf16>, vector<32x64xbf16> -> vector<32x128xbf16>
    %cst_186 = arith.constant dense<0.000000e+00> : vector<64x32xf32>
    %460 = tpu.matmul %450, %456, %cst_186 {dimension_numbers = #tpu.dot_dimension_numbers<[1], [1], [0], [0], [0, 0, 1, 0], [], []>} : vector<64x64xbf16>, vector<32x64xbf16>, vector<64x32xf32> -> vector<64x32xf32>
    %cst_187 = arith.constant dense<0xFF800000> : vector<64xf32>
    %461 = vector.multi_reduction <maximumf>, %460, %cst_187 [1] : vector<64x32xf32> to vector<64xf32>
    %462 = vector.shape_cast %461 : vector<64xf32> to vector<64x1xf32>
    %463 = vector.broadcast %462 : vector<64x1xf32> to vector<64x32xf32>
    %464 = arith.subf %460, %463 : vector<64x32xf32>
    %465 = math.exp %464 : vector<64x32xf32>
    %466 = arith.truncf %465 : vector<64x32xf32> to vector<64x32xbf16>
    %cst_188 = arith.constant dense<0.000000e+00> : vector<64x128xf32>
    %467 = tpu.matmul %466, %459, %cst_188 {dimension_numbers = #tpu.dot_dimension_numbers<[1], [0], [0], [1], [0, 0, 1, 1], [], []>} : vector<64x32xbf16>, vector<32x128xbf16>, vector<64x128xf32> -> vector<64x128xf32>
    %468 = vector.extract_strided_slice %467 {offsets = [0, 0], sizes = [64, 64], strides = [1, 1]} : vector<64x128xf32> to vector<64x64xf32>
    %469 = vector.extract_strided_slice %467 {offsets = [0, 64], sizes = [64, 64], strides = [1, 1]} : vector<64x128xf32> to vector<64x64xf32>
    %470 = tpu.reciprocal %469 {approx = true} : vector<64x64xf32> -> vector<64x64xf32>
    %471 = arith.mulf %468, %470 : vector<64x64xf32>
    %472 = tpu.concatenate %448, %471 in 0 : vector<64x64xf32>, vector<64x64xf32> -> vector<128x64xf32>
    %473 = arith.truncf %472 : vector<128x64xf32> to vector<128x64xbf16>
    %cst_189 = arith.constant dense<0.000000e+00> : vector<128x64xf32>
    %474 = tpu.matmul %473, %423, %cst_189 {dimension_numbers = #tpu.dot_dimension_numbers<[1], [0], [0], [1], [0, 0, 1, 1], [], []>} : vector<128x64xbf16>, vector<64x64xbf16>, vector<128x64xf32> -> vector<128x64xf32>
    %475 = vector.broadcast %425 : vector<1x64xf32> to vector<128x64xf32>
    %476 = arith.addf %474, %475 : vector<128x64xf32>
    %477 = arith.addf %378, %476 : vector<128x64xf32>
    %c1_190 = arith.constant 1 : index
    %c0_191 = arith.constant 0 : index
    %c0_192 = arith.constant 0 : index
    %478 = vector.load %arg24[%c1_190, %c0_191, %c0_192] : memref<2x1x64xf32, #tpu.memory_space<vmem>>, vector<1x1x64xf32>
    %479 = vector.shape_cast %478 : vector<1x1x64xf32> to vector<1x64xf32>
    %c1_193 = arith.constant 1 : index
    %c0_194 = arith.constant 0 : index
    %c0_195 = arith.constant 0 : index
    %480 = vector.load %arg25[%c1_193, %c0_194, %c0_195] : memref<2x1x64xf32, #tpu.memory_space<vmem>>, vector<1x1x64xf32>
    %481 = vector.shape_cast %480 : vector<1x1x64xf32> to vector<1x64xf32>
    %cst_196 = arith.constant dense<0.000000e+00> : vector<128xf32>
    %482 = vector.multi_reduction <add>, %477, %cst_196 [1] : vector<128x64xf32> to vector<128xf32>
    %483 = vector.shape_cast %482 : vector<128xf32> to vector<128x1xf32>
    %cst_197 = arith.constant 6.400000e+01 : f32
    %484 = vector.broadcast %cst_197 : f32 to vector<128x1xf32>
    %485 = arith.divf %483, %484 : vector<128x1xf32>
    %486 = vector.broadcast %485 : vector<128x1xf32> to vector<128x64xf32>
    %487 = arith.subf %477, %486 : vector<128x64xf32>
    %488 = arith.mulf %487, %487 : vector<128x64xf32>
    %cst_198 = arith.constant dense<0.000000e+00> : vector<128xf32>
    %489 = vector.multi_reduction <add>, %488, %cst_198 [1] : vector<128x64xf32> to vector<128xf32>
    %490 = vector.shape_cast %489 : vector<128xf32> to vector<128x1xf32>
    %cst_199 = arith.constant 6.400000e+01 : f32
    %491 = vector.broadcast %cst_199 : f32 to vector<128x1xf32>
    %492 = arith.divf %490, %491 : vector<128x1xf32>
    %493 = vector.broadcast %485 : vector<128x1xf32> to vector<128x64xf32>
    %494 = arith.subf %477, %493 : vector<128x64xf32>
    %cst_200 = arith.constant 9.99999974E-6 : f32
    %495 = vector.broadcast %cst_200 : f32 to vector<128x1xf32>
    %496 = arith.addf %492, %495 : vector<128x1xf32>
    %497 = math.rsqrt %496 : vector<128x1xf32>
    %498 = vector.broadcast %497 : vector<128x1xf32> to vector<128x64xf32>
    %499 = arith.mulf %494, %498 : vector<128x64xf32>
    %500 = vector.broadcast %479 : vector<1x64xf32> to vector<128x64xf32>
    %501 = arith.mulf %499, %500 : vector<128x64xf32>
    %502 = vector.broadcast %481 : vector<1x64xf32> to vector<128x64xf32>
    %503 = arith.addf %501, %502 : vector<128x64xf32>
    %c1_201 = arith.constant 1 : index
    %c0_202 = arith.constant 0 : index
    %c0_203 = arith.constant 0 : index
    %504 = vector.load %arg26[%c1_201, %c0_202, %c0_203] : memref<2x64x256xbf16, #tpu.memory_space<vmem>>, vector<1x64x256xbf16>
    %505 = vector.shape_cast %504 : vector<1x64x256xbf16> to vector<64x256xbf16>
    %506 = arith.truncf %503 : vector<128x64xf32> to vector<128x64xbf16>
    %cst_204 = arith.constant dense<0.000000e+00> : vector<128x256xf32>
    %507 = tpu.matmul %506, %505, %cst_204 {dimension_numbers = #tpu.dot_dimension_numbers<[1], [0], [0], [1], [0, 0, 1, 1], [], []>} : vector<128x64xbf16>, vector<64x256xbf16>, vector<128x256xf32> -> vector<128x256xf32>
    %c1_205 = arith.constant 1 : index
    %c0_206 = arith.constant 0 : index
    %c0_207 = arith.constant 0 : index
    %508 = vector.load %arg27[%c1_205, %c0_206, %c0_207] : memref<2x1x256xf32, #tpu.memory_space<vmem>>, vector<1x1x256xf32>
    %509 = vector.shape_cast %508 : vector<1x1x256xf32> to vector<1x256xf32>
    %510 = vector.broadcast %509 : vector<1x256xf32> to vector<128x256xf32>
    %511 = arith.addf %507, %510 : vector<128x256xf32>
    %cst_208 = arith.constant 0.000000e+00 : f32
    %512 = vector.broadcast %cst_208 : f32 to vector<128x256xf32>
    %513 = arith.maximumf %511, %512 : vector<128x256xf32>
    %c1_209 = arith.constant 1 : index
    %c0_210 = arith.constant 0 : index
    %c0_211 = arith.constant 0 : index
    %514 = vector.load %arg28[%c1_209, %c0_210, %c0_211] : memref<2x256x64xbf16, #tpu.memory_space<vmem>>, vector<1x256x64xbf16>
    %515 = vector.shape_cast %514 : vector<1x256x64xbf16> to vector<256x64xbf16>
    %516 = arith.truncf %513 : vector<128x256xf32> to vector<128x256xbf16>
    %cst_212 = arith.constant dense<0.000000e+00> : vector<128x64xf32>
    %517 = tpu.matmul %516, %515, %cst_212 {dimension_numbers = #tpu.dot_dimension_numbers<[1], [0], [0], [1], [0, 0, 1, 1], [], []>} : vector<128x256xbf16>, vector<256x64xbf16>, vector<128x64xf32> -> vector<128x64xf32>
    %518 = arith.addf %477, %517 : vector<128x64xf32>
    %c1_213 = arith.constant 1 : index
    %c0_214 = arith.constant 0 : index
    %c0_215 = arith.constant 0 : index
    %519 = vector.load %arg29[%c1_213, %c0_214, %c0_215] : memref<2x1x64xf32, #tpu.memory_space<vmem>>, vector<1x1x64xf32>
    %520 = vector.shape_cast %519 : vector<1x1x64xf32> to vector<1x64xf32>
    %521 = vector.broadcast %520 : vector<1x64xf32> to vector<128x64xf32>
    %522 = arith.addf %518, %521 : vector<128x64xf32>
    %c0_216 = arith.constant 0 : index
    %c0_217 = arith.constant 0 : index
    %523 = vector.load %arg30[%c0_216, %c0_217] : memref<64x64xbf16, #tpu.memory_space<vmem>>, vector<64x64xbf16>
    %524 = arith.truncf %522 : vector<128x64xf32> to vector<128x64xbf16>
    %cst_218 = arith.constant dense<0.000000e+00> : vector<128x64xf32>
    %525 = tpu.matmul %524, %523, %cst_218 {dimension_numbers = #tpu.dot_dimension_numbers<[1], [0], [0], [1], [0, 0, 1, 1], [], []>} : vector<128x64xbf16>, vector<64x64xbf16>, vector<128x64xf32> -> vector<128x64xf32>
    %c0_219 = arith.constant 0 : index
    %c0_220 = arith.constant 0 : index
    %526 = vector.load %arg31[%c0_219, %c0_220] : memref<1x64xf32, #tpu.memory_space<vmem>>, vector<1x64xf32>
    %527 = vector.broadcast %526 : vector<1x64xf32> to vector<128x64xf32>
    %528 = arith.addf %525, %527 : vector<128x64xf32>
    %529 = arith.addf %528, %0 : vector<128x64xf32>
    %c0_221 = arith.constant 0 : index
    %c0_222 = arith.constant 0 : index
    %530 = vector.load %arg32[%c0_221, %c0_222] : memref<128x64xf32, #tpu.memory_space<vmem>>, vector<128x64xf32>
    tpu.vector_store %arg32[%c0_221, %c0_222], %529 {strides = array<i32>} : memref<128x64xf32, #tpu.memory_space<vmem>>, vector<128x64xf32>,
    return
  }
  func.func @transform_0(%arg0: i32) -> (i32, i32) {
    %c0_i32 = arith.constant 0 : i32
    %c0_i32_0 = arith.constant 0 : i32
    return %arg0, %c0_i32 : i32, i32
  }
  func.func @transform_1(%arg0: i32) -> (i32, i32) {
    %c0_i32 = arith.constant 0 : i32
    %c0_i32_0 = arith.constant 0 : i32
    return %arg0, %c0_i32 : i32, i32
  }
  func.func @transform_2(%arg0: i32) -> (i32, i32) {
    %c0_i32 = arith.constant 0 : i32
    %c0_i32_0 = arith.constant 0 : i32
    %c0_i32_1 = arith.constant 0 : i32
    return %c0_i32, %c0_i32_0 : i32, i32
  }
  func.func @transform_3(%arg0: i32) -> (i32, i32) {
    %c0_i32 = arith.constant 0 : i32
    %c0_i32_0 = arith.constant 0 : i32
    %c0_i32_1 = arith.constant 0 : i32
    return %c0_i32, %c0_i32_0 : i32, i32
  }
  func.func @transform_4(%arg0: i32) -> (i32, i32) {
    %c0_i32 = arith.constant 0 : i32
    %c0_i32_0 = arith.constant 0 : i32
    %c0_i32_1 = arith.constant 0 : i32
    return %c0_i32, %c0_i32_0 : i32, i32
  }
  func.func @transform_5(%arg0: i32) -> (i32, i32) {
    %c0_i32 = arith.constant 0 : i32
    %c0_i32_0 = arith.constant 0 : i32
    %c0_i32_1 = arith.constant 0 : i32
    return %c0_i32, %c0_i32_0 : i32, i32
  }
  func.func @transform_6(%arg0: i32) -> (i32, i32) {
    %c0_i32 = arith.constant 0 : i32
    %c0_i32_0 = arith.constant 0 : i32
    %c0_i32_1 = arith.constant 0 : i32
    return %c0_i32, %c0_i32_0 : i32, i32
  }
  func.func @transform_7(%arg0: i32) -> (i32, i32) {
    %c0_i32 = arith.constant 0 : i32
    %c0_i32_0 = arith.constant 0 : i32
    %c0_i32_1 = arith.constant 0 : i32
    return %c0_i32, %c0_i32_0 : i32, i32
  }
  func.func @transform_8(%arg0: i32) -> (i32, i32) {
    %c0_i32 = arith.constant 0 : i32
    %c0_i32_0 = arith.constant 0 : i32
    %c0_i32_1 = arith.constant 0 : i32
    return %c0_i32, %c0_i32_0 : i32, i32
  }
  func.func @transform_9(%arg0: i32) -> (i32, i32, i32) {
    %c0_i32 = arith.constant 0 : i32
    %c0_i32_0 = arith.constant 0 : i32
    %c0_i32_1 = arith.constant 0 : i32
    %c0_i32_2 = arith.constant 0 : i32
    return %c0_i32, %c0_i32_0, %c0_i32_1 : i32, i32, i32
  }
  func.func @transform_10(%arg0: i32) -> (i32, i32, i32) {
    %c0_i32 = arith.constant 0 : i32
    %c0_i32_0 = arith.constant 0 : i32
    %c0_i32_1 = arith.constant 0 : i32
    %c0_i32_2 = arith.constant 0 : i32
    return %c0_i32, %c0_i32_0, %c0_i32_1 : i32, i32, i32
  }
  func.func @transform_11(%arg0: i32) -> (i32, i32, i32) {
    %c0_i32 = arith.constant 0 : i32
    %c0_i32_0 = arith.constant 0 : i32
    %c0_i32_1 = arith.constant 0 : i32
    %c0_i32_2 = arith.constant 0 : i32
    return %c0_i32, %c0_i32_0, %c0_i32_1 : i32, i32, i32
  }
  func.func @transform_12(%arg0: i32) -> (i32, i32, i32) {
    %c0_i32 = arith.constant 0 : i32
    %c0_i32_0 = arith.constant 0 : i32
    %c0_i32_1 = arith.constant 0 : i32
    %c0_i32_2 = arith.constant 0 : i32
    return %c0_i32, %c0_i32_0, %c0_i32_1 : i32, i32, i32
  }
  func.func @transform_13(%arg0: i32) -> (i32, i32, i32) {
    %c0_i32 = arith.constant 0 : i32
    %c0_i32_0 = arith.constant 0 : i32
    %c0_i32_1 = arith.constant 0 : i32
    %c0_i32_2 = arith.constant 0 : i32
    return %c0_i32, %c0_i32_0, %c0_i32_1 : i32, i32, i32
  }
  func.func @transform_14(%arg0: i32) -> (i32, i32, i32) {
    %c0_i32 = arith.constant 0 : i32
    %c0_i32_0 = arith.constant 0 : i32
    %c0_i32_1 = arith.constant 0 : i32
    %c0_i32_2 = arith.constant 0 : i32
    return %c0_i32, %c0_i32_0, %c0_i32_1 : i32, i32, i32
  }
  func.func @transform_15(%arg0: i32) -> (i32, i32, i32) {
    %c0_i32 = arith.constant 0 : i32
    %c0_i32_0 = arith.constant 0 : i32
    %c0_i32_1 = arith.constant 0 : i32
    %c0_i32_2 = arith.constant 0 : i32
    return %c0_i32, %c0_i32_0, %c0_i32_1 : i32, i32, i32
  }
  func.func @transform_16(%arg0: i32) -> (i32, i32, i32) {
    %c0_i32 = arith.constant 0 : i32
    %c0_i32_0 = arith.constant 0 : i32
    %c0_i32_1 = arith.constant 0 : i32
    %c0_i32_2 = arith.constant 0 : i32
    return %c0_i32, %c0_i32_0, %c0_i32_1 : i32, i32, i32
  }
  func.func @transform_17(%arg0: i32) -> (i32, i32, i32) {
    %c0_i32 = arith.constant 0 : i32
    %c0_i32_0 = arith.constant 0 : i32
    %c0_i32_1 = arith.constant 0 : i32
    %c0_i32_2 = arith.constant 0 : i32
    return %c0_i32, %c0_i32_0, %c0_i32_1 : i32, i32, i32
  }
  func.func @transform_18(%arg0: i32) -> (i32, i32, i32) {
    %c0_i32 = arith.constant 0 : i32
    %c0_i32_0 = arith.constant 0 : i32
    %c0_i32_1 = arith.constant 0 : i32
    %c0_i32_2 = arith.constant 0 : i32
    return %c0_i32, %c0_i32_0, %c0_i32_1 : i32, i32, i32
  }
  func.func @transform_19(%arg0: i32) -> (i32, i32, i32) {
    %c0_i32 = arith.constant 0 : i32
    %c0_i32_0 = arith.constant 0 : i32
    %c0_i32_1 = arith.constant 0 : i32
    %c0_i32_2 = arith.constant 0 : i32
    return %c0_i32, %c0_i32_0, %c0_i32_1 : i32, i32, i32
  }
  func.func @transform_20(%arg0: i32) -> (i32, i32, i32) {
    %c0_i32 = arith.constant 0 : i32
    %c0_i32_0 = arith.constant 0 : i32
    %c0_i32_1 = arith.constant 0 : i32
    %c0_i32_2 = arith.constant 0 : i32
    return %c0_i32, %c0_i32_0, %c0_i32_1 : i32, i32, i32
  }
  func.func @transform_21(%arg0: i32) -> (i32, i32, i32) {
    %c0_i32 = arith.constant 0 : i32
    %c0_i32_0 = arith.constant 0 : i32
    %c0_i32_1 = arith.constant 0 : i32
    %c0_i32_2 = arith.constant 0 : i32
    return %c0_i32, %c0_i32_0, %c0_i32_1 : i32, i32, i32
  }
  func.func @transform_22(%arg0: i32) -> (i32, i32, i32) {
    %c0_i32 = arith.constant 0 : i32
    %c0_i32_0 = arith.constant 0 : i32
    %c0_i32_1 = arith.constant 0 : i32
    %c0_i32_2 = arith.constant 0 : i32
    return %c0_i32, %c0_i32_0, %c0_i32_1 : i32, i32, i32
  }
  func.func @transform_23(%arg0: i32) -> (i32, i32, i32) {
    %c0_i32 = arith.constant 0 : i32
    %c0_i32_0 = arith.constant 0 : i32
    %c0_i32_1 = arith.constant 0 : i32
    %c0_i32_2 = arith.constant 0 : i32
    return %c0_i32, %c0_i32_0, %c0_i32_1 : i32, i32, i32
  }
  func.func @transform_24(%arg0: i32) -> (i32, i32, i32) {
    %c0_i32 = arith.constant 0 : i32
    %c0_i32_0 = arith.constant 0 : i32
    %c0_i32_1 = arith.constant 0 : i32
    %c0_i32_2 = arith.constant 0 : i32
    return %c0_i32, %c0_i32_0, %c0_i32_1 : i32, i32, i32
  }
  func.func @transform_25(%arg0: i32) -> (i32, i32, i32) {
    %c0_i32 = arith.constant 0 : i32
    %c0_i32_0 = arith.constant 0 : i32
    %c0_i32_1 = arith.constant 0 : i32
    %c0_i32_2 = arith.constant 0 : i32
    return %c0_i32, %c0_i32_0, %c0_i32_1 : i32, i32, i32
  }
  func.func @transform_26(%arg0: i32) -> (i32, i32, i32) {
    %c0_i32 = arith.constant 0 : i32
    %c0_i32_0 = arith.constant 0 : i32
    %c0_i32_1 = arith.constant 0 : i32
    %c0_i32_2 = arith.constant 0 : i32
    return %c0_i32, %c0_i32_0, %c0_i32_1 : i32, i32, i32
  }
  func.func @transform_27(%arg0: i32) -> (i32, i32, i32) {
    %c0_i32 = arith.constant 0 : i32
    %c0_i32_0 = arith.constant 0 : i32
    %c0_i32_1 = arith.constant 0 : i32
    %c0_i32_2 = arith.constant 0 : i32
    return %c0_i32, %c0_i32_0, %c0_i32_1 : i32, i32, i32
  }
  func.func @transform_28(%arg0: i32) -> (i32, i32, i32) {
    %c0_i32 = arith.constant 0 : i32
    %c0_i32_0 = arith.constant 0 : i32
    %c0_i32_1 = arith.constant 0 : i32
    %c0_i32_2 = arith.constant 0 : i32
    return %c0_i32, %c0_i32_0, %c0_i32_1 : i32, i32, i32
  }
  func.func @transform_29(%arg0: i32) -> (i32, i32) {
    %c0_i32 = arith.constant 0 : i32
    %c0_i32_0 = arith.constant 0 : i32
    %c0_i32_1 = arith.constant 0 : i32
    return %c0_i32, %c0_i32_0 : i32, i32
  }
  func.func @transform_30(%arg0: i32) -> (i32, i32) {
    %c0_i32 = arith.constant 0 : i32
    %c0_i32_0 = arith.constant 0 : i32
    %c0_i32_1 = arith.constant 0 : i32
    return %c0_i32, %c0_i32_0 : i32, i32
  }
  func.func @transform_31(%arg0: i32) -> (i32, i32) {
    %c0_i32 = arith.constant 0 : i32
    %c0_i32_0 = arith.constant 0 : i32
    return %arg0, %c0_i32 : i32, i32
  }
}

</mosaic_0001>

<bundles_post_ra>
// kernel: tpu_custom_call.1
= control target key start
LH: loop header
LB: loop body
LE: loop exit
PB: predicated region body
PF: predicated region fallthrough
CT: control target
= control target key end

     0   :  { %s11095_s6 = smov 1   ;;  %s11096_s10 = smov 2   ;;  %s15198_s0 = inlined_call_operand.smem [shape: u32[32], index: -1, kind: input, shape index: {}] }
   0x1   :  { %s11158_s5 = sld [smem:[%s15198_s0]]   ;;  %s11097_s14 = smov 3  }
   0x2   :  { %s11163_s9 = sld [smem:[%s15198_s0 + %s11095_s6]]   ;;  %s11098_s18 = smov 4  }
   0x3   :  { %s11168_s13 = sld [smem:[%s15198_s0 + %s11096_s10]]   ;;  %s11099_s22 = smov 5  }
   0x4   :  { %s11173_s17 = sld [smem:[%s15198_s0 + %s11097_s14]]   ;;  %s11100_s26 = smov 6  }
   0x5   :  { %s11178_s21 = sld [smem:[%s15198_s0 + %s11098_s18]]   ;;  %s11101_s30 = smov 7  }
   0x6   :  { %s11183_s25 = sld [smem:[%s15198_s0 + %s11099_s22]]   ;;  %s11102_s4 = smov 8  }
   0x7   :  { %15280 = sst [smem:[#allocation33_spill]] %s11158_s5  ;;  %s11103_s10 = smov 9  }
   0x8   :  { %s11188_s29 = sld [smem:[%s15198_s0 + %s11100_s26]]   ;;  %s11104_s15 = smov 10  }
   0x9   :  { %15281 = sst [smem:[#allocation34_spill]] %s11168_s13  ;;  %s11105_s20 = smov 11  }
   0xa   :  { %s11193_s3 = sld [smem:[%s15198_s0 + %s11101_s30]]   ;;  %s11106_s26 = smov 12  }
   0xb   :  { %15282 = sst [smem:[#allocation35_spill]] %s11178_s21  ;;  %s11107_s1 = smov 13  }
   0xc   :  { %s11198_s8 = sld [smem:[%s15198_s0 + %s11102_s4]]   ;;  %s11108_s7 = smov 14  }
   0xd   :  { %s11203_s14 = sld [smem:[%s15198_s0 + %s11103_s10]]   ;;  %s11110_s22 = smov 16  }
   0xe   :  { %s11208_s19 = sld [smem:[%s15198_s0 + %s11104_s15]]   ;;  %s11109_s15 = smov 15  }
   0xf   :  { %s11213_s24 = sld [smem:[%s15198_s0 + %s11105_s20]]   ;;  %s11111_s28 = smov 17  }
  0x10   :  { %15283 = sst [smem:[#allocation36_spill]] %s11193_s3 }
  0x11   :  { %s11218_s30 = sld [smem:[%s15198_s0 + %s11106_s26]]  }
  0x12   :  { %s11223_s6 = sld [smem:[%s15198_s0 + %s11107_s1]]  }
  0x13   :  { %s11228_s12 = sld [smem:[%s15198_s0 + %s11108_s7]]   ;;  %s11112_s7 = smov 18  }
  0x14   :  { %s11233_s20 = sld [smem:[%s15198_s0 + %s11109_s15]]   ;;  %s11113_s15 = smov 19  }
  0x15   :  { %15284 = sst [smem:[#allocation37_spill]] %s11213_s24 }
  0x16   :  { %s11238_s27 = sld [smem:[%s15198_s0 + %s11110_s22]]   ;;  %s11114_s22 = smov 20  }
  0x17   :  { %15285 = sst [smem:[#allocation38_spill]] %s11218_s30 }
  0x18   :  { %15286 = sst [smem:[#allocation39_spill]] %s11223_s6 }
  0x19   :  { %s11243_s4 = sld [smem:[%s15198_s0 + %s11111_s28]]   ;;  %s11115_s28 = smov 21  }
  0x1a   :  { %s11248_s6 = sld [smem:[%s15198_s0 + %s11112_s7]]   ;;  %s11116_s7 = smov 22  }
  0x1b   :  { %s11253_s13 = sld [smem:[%s15198_s0 + %s11113_s15]]   ;;  %s11117_s15 = smov 23  }
  0x1c   :  { %s11258_s24 = sld [smem:[%s15198_s0 + %s11114_s22]]   ;;  %s11118_s22 = smov 24  }
  0x1d   :  { %s11268_s3 = sld [smem:[%s15198_s0 + %s11116_s7]]   ;;  %s11120_s7 = smov 26  }
  0x1e   :  { %s11278_s30 = sld [smem:[%s15198_s0 + %s11118_s22]]   ;;  %s11122_s22 = smov 28  }
  0x1f   :  { %15287 = sst [smem:[#allocation40_spill]] %s11243_s4 }
  0x20   :  { %s11263_s4 = sld [smem:[%s15198_s0 + %s11115_s28]]   ;;  %s11119_s28 = smov 25  }
  0x21   :  { %15288 = sst [smem:[#allocation41_spill]] %s11253_s13 }
  0x22   :  { %s11273_s13 = sld [smem:[%s15198_s0 + %s11117_s15]]   ;;  %s11121_s15 = smov 27  }
  0x23   :  { %s11288_s5 = sld [smem:[%s15198_s0 + %s11120_s7]]   ;;  %s11124_s7 = smov 30  }
  0x24   :  { %15290 = sst [smem:[#allocation43_spill]] %s11278_s30 }
  0x25   :  { %s11293_s21 = sld [smem:[%s15198_s0 + %s11121_s15]]   ;;  %s11125_s15 = smov 31  }
  0x26   :  { %15289 = sst [smem:[#allocation42_spill]] %s11263_s4 }
  0x27   :  { %s11283_s4 = sld [smem:[%s15198_s0 + %s11119_s28]]   ;;  %s11123_s28 = smov 29  }
  0x28   :  { %s11298_s30 = sld [smem:[%s15198_s0 + %s11122_s22]]  }
  0x29   :  { %15292 = sst [smem:[#allocation45_spill]] %s11288_s5 }
  0x2a   :  { %s11308_s5 = sld [smem:[%s15198_s0 + %s11124_s7]]  }
  0x2b   :  { %15293 = sst [smem:[#allocation46_spill]] %s11293_s21 }
  0x2c   :  { %s11313_s21 = sld [smem:[%s15198_s0 + %s11125_s15]]  }
  0x2d   :  { %15291 = sst [smem:[#allocation44_spill]] %s11283_s4 }
  0x2e   :  { %s11303_s4 = sld [smem:[%s15198_s0 + %s11123_s28]]  }
  0x2f   :  { %68 = vsyncpa [#allocation3], 0 }
  0x30   :  { %69 = vsyncpa [#allocation5], 0 }
  0x31   :  { %70 = vsyncpa [#allocation8], 0 }
  0x32   :  { %71 = vsyncpa [#allocation11], 0 }
  0x33   :  { %72 = vsyncpa [#allocation14], 0 }
  0x34   :  { %73 = vsyncpa [#allocation17], 0 }
  0x35   :  { %74 = vsyncpa [#allocation20], 0 }
  0x36   :  { %75 = vsyncpa [#allocation23], 0  ;;  %s11126_s22 = smov [#allocation4]  }
  0x37   :  { %s97_s23 = sshll.u32 %s11126_s22, 4  ;;  %s98_s23 = int_to_ptr.vmem [resolvable:$true] %s97_s23 }
  0x38   :  { %s10787_s26 = scalar_lea.vmem %s98_s23, 256  ;;  %p10792_p1 = scmp.lt.s32.totalorder %s98_s23, %s98_s23 }
  0x39   :  { %p10788_p0 = scmp.ne.s32.totalorder %s98_s23, %s10787_s26  ;;  %p10793_p2 = scmp.lt.s32.totalorder %s10787_s26, %s10787_s26 }
  0x3b   :  { %p10794_p3 = por %p10793_p2, %p10792_p1 }
  0x3d   :  { %p10795_p4 = pnand %p10794_p3, %p10788_p0 }
  0x3f   :  { %10798 = shalt.err (!%p10795_p4)
}
  0x40   :  { %s11127_s0 = smov 64   ;;  %s11128_s28 = smov 4  }
  0x41   :  { %103 = dma.hbm_to_vmem [thread:$0]  %s11173_s17, 256, %s98_s23, [#allocation5], %s11127_s0, %s11127_s0, %s11128_s28  }
  0x42   :  { %s11129_s1 = smov [#allocation7]   ;;  %s11130_s7 = smov [#allocation10]  }
  0x43   :  { %s122_s2 = sshll.u32 %s11129_s1, 4  ;;  %s143_s10 = sshll.u32 %s11130_s7, 4  ;;  %s123_s2 = int_to_ptr.vmem [resolvable:$true] %s122_s2  ;;  %s144_s10 = int_to_ptr.vmem [resolvable:$true] %s143_s10 }
  0x44   :  { %s10807_s11 = scalar_lea.vmem %s123_s2, 16  ;;  %s10811_s15 = scalar_lea.vmem %s123_s2, 32 }
  0x45   :  { %p10808_p5 = scmp.ne.s32.totalorder %s123_s2, %s10807_s11  ;;  %p10812_p6 = scmp.lt.s32.totalorder %s123_s2, %s123_s2 }
  0x46   :  { %p10813_p7 = scmp.lt.s32.totalorder %s10811_s15, %s10807_s11 }
  0x48   :  { %p10814_p8 = por %p10813_p7, %p10812_p6 }
  0x4a   :  { %p10815_p9 = pnand %p10814_p8, %p10808_p5 }
  0x4c   :  { %10818 = shalt.err (!%p10815_p9)
}
  0x4d   :  { %125 = dma.hbm_to_vmem [thread:$0]  %s11188_s29, 16, %s123_s2, [#allocation8]  }
  0x4e   :  { %s10827_s16 = scalar_lea.vmem %s144_s10, 32  ;;  %p10832_p11 = scmp.lt.s32.totalorder %s144_s10, %s144_s10 }
  0x4f   :  { %p10828_p10 = scmp.ne.s32.totalorder %s144_s10, %s10827_s16  ;;  %p10833_p12 = scmp.lt.s32.totalorder %s10827_s16, %s10827_s16 }
  0x51   :  { %p10834_p13 = por %p10833_p12, %p10832_p11 }
  0x53   :  { %p10835_p0 = pnand %p10834_p13, %p10828_p10 }
  0x55   :  { %10838 = shalt.err (!%p10835_p0)
}
  0x56   :  { %s11131_s17 = smov 16   ;;  %s11132_s18 = smov 1  }
  0x57   :  { %149 = dma.hbm_to_vmem [thread:$0]  %s11203_s14, 32, %s144_s10, [#allocation11], %s11131_s17, %s11131_s17, %s11132_s18  }
  0x58   :  { %s11133_s22 = smov [#allocation13]   ;;  %s11134_s26 = smov [#allocation16]  }
  0x59   :  { %s173_s23 = sshll.u32 %s11133_s22, 4  ;;  %s197_s29 = sshll.u32 %s11134_s26, 4  ;;  %s174_s23 = int_to_ptr.vmem [resolvable:$true] %s173_s23  ;;  %s198_s29 = int_to_ptr.vmem [resolvable:$true] %s197_s29 }
  0x5a   :  { %s10847_s28 = scalar_lea.vmem %s174_s23, 32  ;;  %p10852_p2 = scmp.lt.s32.totalorder %s174_s23, %s174_s23 }
  0x5b   :  { %p10848_p1 = scmp.ne.s32.totalorder %s174_s23, %s10847_s28  ;;  %p10853_p3 = scmp.lt.s32.totalorder %s10847_s28, %s10847_s28 }
  0x5d   :  { %p10854_p4 = por %p10853_p3, %p10852_p2 }
  0x5f   :  { %p10855_p5 = pnand %p10854_p4, %p10848_p1 }
  0x61   :  { %10858 = shalt.err (!%p10855_p5)
}
  0x62   :  { %179 = dma.hbm_to_vmem [thread:$0]  %s11228_s12, 32, %s174_s23, [#allocation14], %s11131_s17, %s11131_s17, %s11132_s18  }
  0x63   :  { %s10867_s1 = scalar_lea.vmem %s198_s29, 32  ;;  %p10872_p7 = scmp.lt.s32.totalorder %s198_s29, %s198_s29 }
  0x64   :  { %p10868_p6 = scmp.ne.s32.totalorder %s198_s29, %s10867_s1  ;;  %p10873_p8 = scmp.lt.s32.totalorder %s10867_s1, %s10867_s1 }
  0x66   :  { %p10874_p9 = por %p10873_p8, %p10872_p7 }
  0x68   :  { %p10875_p10 = pnand %p10874_p9, %p10868_p6 }
  0x6a   :  { %10878 = shalt.err (!%p10875_p10)
}
  0x6b   :  { %203 = dma.hbm_to_vmem [thread:$0]  %s11238_s27, 32, %s198_s29, [#allocation17], %s11131_s17, %s11131_s17, %s11132_s18  }
  0x6c   :  { %s11135_s14 = smov [#allocation19]   ;;  %s11136_s7 = smov [#allocation22]  }
  0x6d   :  { %s225_s2 = sshll.u32 %s11135_s14, 4  ;;  %s251_s10 = sshll.u32 %s11136_s7, 4  ;;  %s226_s2 = int_to_ptr.vmem [resolvable:$true] %s225_s2  ;;  %s252_s10 = int_to_ptr.vmem [resolvable:$true] %s251_s10 }
  0x6e   :  { %s10887_s11 = scalar_lea.vmem %s226_s2, 32  ;;  %p10892_p12 = scmp.lt.s32.totalorder %s226_s2, %s226_s2 }
  0x6f   :  { %p10888_p11 = scmp.ne.s32.totalorder %s226_s2, %s10887_s11  ;;  %p10893_p13 = scmp.lt.s32.totalorder %s10887_s11, %s10887_s11 }
  0x71   :  { %p10894_p0 = por %p10893_p13, %p10892_p12 }
  0x73   :  { %p10895_p1 = pnand %p10894_p0, %p10888_p11 }
  0x75   :  { %10898 = shalt.err (!%p10895_p1)
}
  0x76   :  { %231 = dma.hbm_to_vmem [thread:$0]  %s11258_s24, 32, %s226_s2, [#allocation20], %s11131_s17, %s11131_s17, %s11132_s18  }
  0x77   :  { %s10907_s12 = scalar_lea.vmem %s252_s10, 32  ;;  %p10912_p3 = scmp.lt.s32.totalorder %s252_s10, %s252_s10 }
  0x78   :  { %p10908_p2 = scmp.ne.s32.totalorder %s252_s10, %s10907_s12  ;;  %p10913_p4 = scmp.lt.s32.totalorder %s10907_s12, %s10907_s12 }
  0x7a   :  { %p10914_p5 = por %p10913_p4, %p10912_p3 }
  0x7c   :  { %p10915_p6 = pnand %p10914_p5, %p10908_p2 }
  0x7e   :  { %10918 = shalt.err (!%p10915_p6)
}
  0x7f   :  { %257 = dma.hbm_to_vmem [thread:$0]  %s11273_s13, 32, %s252_s10, [#allocation23], %s11131_s17, %s11131_s17, %s11132_s18  }
  0x80   :  { %s11137_s27 = smov [#allocation2]  }
  0x81   :  { %s83_s15 = sshll.u32 %s11137_s27, 4  ;;  %s84_s15 = int_to_ptr.vmem [resolvable:$true] %s83_s15 }
  0x82   :  { %s10927_s16 = scalar_lea.vmem %s84_s15, 256  ;;  %p10932_p8 = scmp.lt.s32.totalorder %s84_s15, %s84_s15 }
  0x83   :  { %p10928_p7 = scmp.ne.s32.totalorder %s84_s15, %s10927_s16  ;;  %p10933_p9 = scmp.lt.s32.totalorder %s10927_s16, %s10927_s16 }
  0x85   :  { %p10934_p10 = por %p10933_p9, %p10932_p8 }
  0x87   :  { %p10935_p11 = pnand %p10934_p10, %p10928_p7 }
  0x89   :  { %10938 = shalt.err (!%p10935_p11)
}
  0x8a   :  { %s11138_s24 = smov 128   ;;  %s11139_s22 = smov 8  }
  0x8b   :  { %89 = dma.hbm_to_vmem [thread:$0]  %s11163_s9, 256, %s84_s15, [#allocation3], %s11138_s24, %s11138_s24, %s11139_s22  }
  0x8c   :  { %s11140_s23 = smov [#allocation6]   ;;  %s11141_s29 = smov [#allocation9]  }
  0x8d   :  { %s112_s26 = sshll.u32 %s11140_s23, 4  ;;  %s134_s28 = sshll.u32 %s11141_s29, 4  ;;  %s113_s26 = int_to_ptr.vmem [resolvable:$true] %s112_s26  ;;  %s135_s28 = int_to_ptr.vmem [resolvable:$true] %s134_s28 }
  0x8e   :  { %s10947_s13 = scalar_lea.vmem %s113_s26, 16  ;;  %s10951_s1 = scalar_lea.vmem %s113_s26, 32 }
  0x8f   :  { %p10948_p12 = scmp.ne.s32.totalorder %s113_s26, %s10947_s13  ;;  %p10952_p13 = scmp.lt.s32.totalorder %s113_s26, %s113_s26 }
  0x90   :  { %p10953_p0 = scmp.lt.s32.totalorder %s10951_s1, %s10947_s13 }
  0x92   :  { %p10954_p1 = por %p10953_p0, %p10952_p13 }
  0x94   :  { %p10955_p2 = pnand %p10954_p1, %p10948_p12 }
  0x96   :  { %10958 = shalt.err (!%p10955_p2)
}
  0x97   :  { %115 = dma.hbm_to_vmem [thread:$0]  %s11183_s25, 16, %s113_s26, [#allocation5]  }
  0x98   :  { %s10967_s14 = scalar_lea.vmem %s135_s28, 16  ;;  %s10971_s2 = scalar_lea.vmem %s135_s28, 32 }
  0x99   :  { %p10968_p3 = scmp.ne.s32.totalorder %s135_s28, %s10967_s14  ;;  %p10972_p4 = scmp.lt.s32.totalorder %s135_s28, %s135_s28 }
  0x9a   :  { %p10973_p5 = scmp.lt.s32.totalorder %s10971_s2, %s10967_s14 }
  0x9c   :  { %p10974_p6 = por %p10973_p5, %p10972_p4 }
  0x9e   :  { %p10975_p7 = pnand %p10974_p6, %p10968_p3 }
  0xa0   :  { %10978 = shalt.err (!%p10975_p7)
}
  0xa1   :  { %137 = dma.hbm_to_vmem [thread:$0]  %s11198_s8, 16, %s135_s28, [#allocation8]  }
  0xa2   :  { %s11142_s9 = smov [#allocation12]   ;;  %s11143_s10 = smov [#allocation15]  }
  0xa3   :  { %s155_s7 = sshll.u32 %s11142_s9, 4  ;;  %s185_s11 = sshll.u32 %s11143_s10, 4  ;;  %s156_s7 = int_to_ptr.vmem [resolvable:$true] %s155_s7  ;;  %s186_s11 = int_to_ptr.vmem [resolvable:$true] %s185_s11 }
  0xa4   :  { %s10987_s12 = scalar_lea.vmem %s156_s7, 32  ;;  %p10992_p9 = scmp.lt.s32.totalorder %s156_s7, %s156_s7 }
  0xa5   :  { %p10988_p8 = scmp.ne.s32.totalorder %s156_s7, %s10987_s12  ;;  %p10993_p10 = scmp.lt.s32.totalorder %s10987_s12, %s10987_s12 }
  0xa7   :  { %p10994_p11 = por %p10993_p10, %p10992_p9 }
  0xa9   :  { %p10995_p12 = pnand %p10994_p11, %p10988_p8 }
  0xab   :  { %10998 = shalt.err (!%p10995_p12)
}
  0xac   :  { %161 = dma.hbm_to_vmem [thread:$0]  %s11208_s19, 32, %s156_s7, [#allocation11], %s11131_s17, %s11131_s17, %s11132_s18  }
  0xad   :  { %s11007_s25 = scalar_lea.vmem %s186_s11, 32  ;;  %p11012_p0 = scmp.lt.s32.totalorder %s186_s11, %s186_s11 }
  0xae   :  { %p11008_p13 = scmp.ne.s32.totalorder %s186_s11, %s11007_s25  ;;  %p11013_p1 = scmp.lt.s32.totalorder %s11007_s25, %s11007_s25 }
  0xb0   :  { %p11014_p2 = por %p11013_p1, %p11012_p0 }
  0xb2   :  { %p11015_p3 = pnand %p11014_p2, %p11008_p13 }
  0xb4   :  { %11018 = shalt.err (!%p11015_p3)
}
  0xb5   :  { %191 = dma.hbm_to_vmem [thread:$0]  %s11233_s20, 32, %s186_s11, [#allocation14], %s11131_s17, %s11131_s17, %s11132_s18  }
  0xb6   :  { %s11144_s8 = smov [#allocation18]   ;;  %s11145_s15 = smov [#allocation21]  }
  0xb7   :  { %s211_s27 = sshll.u32 %s11144_s8, 4  ;;  %s239_s16 = sshll.u32 %s11145_s15, 4  ;;  %s212_s27 = int_to_ptr.vmem [resolvable:$true] %s211_s27  ;;  %s240_s16 = int_to_ptr.vmem [resolvable:$true] %s239_s16 }
  0xb8   :  { %s11027_s24 = scalar_lea.vmem %s212_s27, 32  ;;  %p11032_p5 = scmp.lt.s32.totalorder %s212_s27, %s212_s27 }
  0xb9   :  { %p11028_p4 = scmp.ne.s32.totalorder %s212_s27, %s11027_s24  ;;  %p11033_p6 = scmp.lt.s32.totalorder %s11027_s24, %s11027_s24 }
  0xbb   :  { %p11034_p7 = por %p11033_p6, %p11032_p5 }
  0xbd   :  { %p11035_p8 = pnand %p11034_p7, %p11028_p4 }
  0xbf   :  { %11038 = shalt.err (!%p11035_p8)
}
  0xc0   :  { %217 = dma.hbm_to_vmem [thread:$0]  %s11248_s6, 32, %s212_s27, [#allocation17], %s11131_s17, %s11131_s17, %s11132_s18  }
  0xc1   :  { %s11047_s19 = scalar_lea.vmem %s240_s16, 32  ;;  %p11052_p10 = scmp.lt.s32.totalorder %s240_s16, %s240_s16 }
  0xc2   :  { %p11048_p9 = scmp.ne.s32.totalorder %s240_s16, %s11047_s19  ;;  %p11053_p11 = scmp.lt.s32.totalorder %s11047_s19, %s11047_s19 }
  0xc4   :  { %p11054_p12 = por %p11053_p11, %p11052_p10 }
  0xc6   :  { %p11055_p13 = pnand %p11054_p12, %p11048_p9 }
  0xc8   :  { %11058 = shalt.err (!%p11055_p13)
}
  0xc9   :  { %245 = dma.hbm_to_vmem [thread:$0]  %s11268_s3, 32, %s240_s16, [#allocation20], %s11131_s17, %s11131_s17, %s11132_s18  }
  0xca   :  { %s11146_s20 = smov [#allocation24]  }
  0xcb   :  { %s263_s22 = sshll.u32 %s11146_s20, 4  ;;  %s264_s22 = int_to_ptr.vmem [resolvable:$true] %s263_s22 }
  0xcc   :  { %s11067_s23 = scalar_lea.vmem %s264_s22, 32  ;;  %p11072_p1 = scmp.lt.s32.totalorder %s264_s22, %s264_s22 }
  0xcd   :  { %p11068_p0 = scmp.ne.s32.totalorder %s264_s22, %s11067_s23  ;;  %p11073_p2 = scmp.lt.s32.totalorder %s11067_s23, %s11067_s23 }
  0xcf   :  { %p11074_p3 = por %p11073_p2, %p11072_p1 }
  0xd1   :  { %p11075_p4 = pnand %p11074_p3, %p11068_p0 }
  0xd3   :  { %11078 = shalt.err (!%p11075_p4)
}
  0xd4   :  { %s15294_s6 = sld [smem:[#allocation43_spill]] }
  0xda   :  { %269 = dma.hbm_to_vmem [thread:$0]  %s15294_s6, 32, %s264_s22, [#allocation23], %s11131_s17, %s11131_s17, %s11132_s18  }
  0xdb   :  { %11079 = dma.done.wait [#allocation3], 256  }
  0xdc   :  { %11080 = vsyncadd [#allocation3], 4294967040 }
  0xdd   :  { %11081 = dma.done.wait [#allocation5], 272  }
  0xde   :  { %11082 = vsyncadd [#allocation5], 4294967024 }
  0xdf   :  { %11083 = dma.done.wait [#allocation8], 32  }
  0xe0   :  { %11084 = vsyncadd [#allocation8], 4294967264 }
  0xe1   :  { %11085 = dma.done.wait [#allocation11], 64  }
  0xe2   :  { %11086 = vsyncadd [#allocation11], 4294967232 }
  0xe3   :  { %11087 = dma.done.wait [#allocation14], 64  }
  0xe4   :  { %11088 = vsyncadd [#allocation14], 4294967232 }
  0xe5   :  { %11089 = dma.done.wait [#allocation17], 64  }
  0xe6   :  { %11090 = vsyncadd [#allocation17], 4294967232 }
  0xe7   :  { %11091 = dma.done.wait [#allocation20], 64  }
  0xe8   :  { %11092 = vsyncadd [#allocation20], 4294967232 }
  0xe9   :  { %11093 = dma.done.wait [#allocation23], 64  }
  0xea   :  { %11094 = vsyncadd [#allocation23], 4294967232  ;;  %s15295_s3 = sld [smem:[#allocation35_spill]]  ;;  %v15214_v0 = vmov 0.0   ;;  %vm11148_vm0 = vmmov 0   ;;  %vm391_vm1 = vcmask 523264  }
  0xeb   :  { %s15296_s17 = sld [smem:[#allocation33_spill]]  ;;  %9604 = vmatprep.subr.mxu0 %v15214_v0  ;;  %9620 = vmatprep.mubr.msk.f32.mxu0 %vm11148_vm0, %v15214_v0  ;;  %vm3221_vm2 = vcmask 261120   ;;  %vm3282_vm3 = vcmask 1043456  }
  0xec   :  { %9623 = vmatprep.subr.mxu1 %v15214_v0  ;;  %9639 = vmatprep.mubr.msk.f32.mxu1 %vm11148_vm0, %v15214_v0  ;;  %s15297_s18 = sld [smem:[#allocation38_spill]] }
  0xed   :  { %s15301_s26 = sld [smem:[#allocation36_spill]] }
  0xee   :  { %s15316_s29 = sld [smem:[#allocation37_spill]] }
  0xef   :  { %s15317_s28 = sld [smem:[#allocation34_spill]] }
  0xf0   :  { %v11369_v1 = vld [vmem:[%s15295_s3 + $0x38] sm:$0xff]  ;;  %v11372_v2 = vld [vmem:[%s15295_s3 + $0x30] sm:$0xff]  ;;  %v11378_v3 = vld [vmem:[%s15295_s3 + $0x28] sm:$0xff]  ;;  %s15324_s13 = sld [smem:[#allocation39_spill]] }
  0xf1   :  { %9605 = vmatpush3.msra.mxu0 %v11369_v1  ;;  %9624 = vmatpush3.msra.mxu1 %v11369_v1  ;;  %v11381_v4 = vld [vmem:[%s15296_s17] sm:$0xff]  ;;  %v11386_v5 = vld [vmem:[%s15296_s17 + $0x8] sm:$0xff]  ;;  %v11389_v6 = vld [vmem:[%s15296_s17 + $0x10] sm:$0xff]  ;;  %s15340_s1 = sld [smem:[#allocation41_spill]] }
  0xf2   :  { %9606 = vmatprep.subr.mxu0 %v15214_v0  ;;  %9625 = vmatprep.subr.mxu1 %v15214_v0  ;;  %v11392_v7 = vld [vmem:[%s15296_s17 + $0x18] sm:$0xff]  ;;  %v392_v8 = vsel %vm391_vm1, %v11381_v4, 0.0  ;;  %v11399_v9 = vld [vmem:[%s15295_s3 + $0x20] sm:$0xff]  ;;  %v11405_v11 = vld [vmem:[%s15296_s17 + $0x28] sm:$0xff]  ;;  %v393_v12 = vsel %vm391_vm1, %v11386_v5, 0.0  ;;  %v395_v13 = vsel %vm391_vm1, %v11389_v6, 0.0 }
  0xf3   :  { %9607 = vmatpush3.msra.mxu0 %v11372_v2  ;;  %9626 = vmatpush3.msra.mxu1 %v11372_v2  ;;  %v11402_v10 = vld [vmem:[%s15296_s17 + $0x20] sm:$0xff]  ;;  %v11414_v14 = vld [vmem:[%s15295_s3 + $0x18] sm:$0xff]  ;;  %v394_v15 = vadd.f32 %v393_v12, %v392_v8  ;;  %v397_v16 = vsel %vm391_vm1, %v11392_v7, 0.0  ;;  %v11422_v18 = vld [vmem:[%s15296_s17 + $0x48] sm:$0xff]  ;;  %v401_v29 = vsel %vm391_vm1, %v11405_v11, 0.0  ;;  %s15341_s14 = sld [smem:[#allocation40_spill]] }
  0xf4   :  { %9608 = vmatprep.subr.mxu0 %v15214_v0  ;;  %9627 = vmatprep.subr.mxu1 %v15214_v0  ;;  %v11419_v17 = vld [vmem:[%s15296_s17 + $0x40] sm:$0xff]  ;;  %v11427_v19 = vld [vmem:[%s15295_s3 + $0x10] sm:$0xff]  ;;  %v399_v20 = vsel %vm391_vm1, %v11402_v10, 0.0  ;;  %v11435_v22 = vld [vmem:[%s15296_s17 + $0x58] sm:$0xff]  ;;  %v614_v25 = vsel %vm391_vm1, %v11422_v18, 0.0  ;;  %s15345_s2 = sld [smem:[#allocation42_spill]] }
  0xf5   :  { %9609 = vmatpush3.msra.mxu0 %v11378_v3  ;;  %9628 = vmatpush3.msra.mxu1 %v11378_v3  ;;  %v11432_v21 = vld [vmem:[%s15296_s17 + $0x50] sm:$0xff]  ;;  %v11438_v23 = vld [vmem:[%s15296_s17 + $0x60] sm:$0xff]  ;;  %v613_v24 = vsel %vm391_vm1, %v11419_v17, 0.0  ;;  %v11450_v27 = vld [vmem:[%s15296_s17 + $0x38] sm:$0xff]  ;;  %v396_v28 = vadd.f32 %v395_v13, %v394_v15  ;;  %v618_v36 = vsel %vm391_vm1, %v11435_v22, 0.0  ;;  %v486_v15 = vlaneseq  ;;  %s15347_s9 = sld [smem:[#allocation44_spill]] }
  0xf6   :  { %9610 = vmatprep.subr.mxu0 %v15214_v0  ;;  %9629 = vmatprep.subr.mxu1 %v15214_v0  ;;  %v11447_v26 = vld [vmem:[%s15296_s17 + $0x30] sm:$0xff]  ;;  %v11455_v30 = vld [vmem:[%s15296_s17 + $0x68] sm:$0xff]  ;;  %v615_v31 = vadd.f32 %v614_v25, %v613_v24  ;;  %v616_v32 = vsel %vm391_vm1, %v11432_v21, 0.0  ;;  %v11468_v35 = vld [vmem:[%s15296_s17 + $0x78] sm:$0xff]  ;;  %v620_v37 = vsel %vm391_vm1, %v11438_v23, 0.0  ;;  %v405_v44 = vsel %vm391_vm1, %v11450_v27, 0.0 }
  0xf7   :  { %9611 = vmatpush3.msra.mxu0 %v11399_v9  ;;  %9630 = vmatpush3.msra.mxu1 %v11399_v9  ;;  %v11462_v33 = vld [vmem:[%s15295_s3 + $0x8] sm:$0xff]  ;;  %v11465_v34 = vld [vmem:[%s15296_s17 + $0x70] sm:$0xff]  ;;  %v398_v38 = vadd.f32 %v397_v16, %v396_v28  ;;  %v11479_v40 = vld [vmem:[%s15295_s3] sm:$0xff]  ;;  %v403_v43 = vsel %vm391_vm1, %v11447_v26, 0.0  ;;  %v622_v45 = vsel %vm391_vm1, %v11455_v30, 0.0  ;;  %v626_v49 = vsel %vm391_vm1, %v11468_v35, 0.0 }
  0xf8   :  { %9612 = vmatprep.subr.mxu0 %v15214_v0  ;;  %9631 = vmatprep.subr.mxu1 %v15214_v0  ;;  %v617_v39 = vadd.f32 %v616_v32, %v615_v31  ;;  %v624_v48 = vsel %vm391_vm1, %v11465_v34, 0.0  ;;  %v487_v16 = vshrl.u32 %v486_v15, 7  ;;  %v8830_v24 = vld [vmem:[%s15297_s18 + $0x2] sm:$0x3]  ;;  %s15348_s7 = sld [smem:[#allocation46_spill]] }
  0xf9   :  { %9613 = vmatpush3.msra.mxu0 %v11414_v14  ;;  %9632 = vmatpush3.msra.mxu1 %v11414_v14  ;;  %v400_v41 = vadd.f32 %v399_v20, %v398_v38  ;;  %s15349_s10 = sld [smem:[#allocation45_spill]] }
  0xfa   :  { %9614 = vmatprep.subr.mxu0 %v15214_v0  ;;  %9633 = vmatprep.subr.mxu1 %v15214_v0  ;;  %v619_v42 = vadd.f32 %v618_v36, %v617_v39  ;;  %v11523_v20 = vsub.s32 1, %v487_v16  ;;  %v11529_v28 = vsub.s32 0, %v487_v16 }
  0xfb   :  { %9615 = vmatpush3.msra.mxu0 %v11427_v19  ;;  %9634 = vmatpush3.msra.mxu1 %v11427_v19  ;;  %v402_v46 = vadd.f32 %v401_v29, %v400_v41 }
  0xfc   :  { %9616 = vmatprep.subr.mxu0 %v15214_v0  ;;  %9635 = vmatprep.subr.mxu1 %v15214_v0  ;;  %v621_v47 = vadd.f32 %v620_v37, %v619_v42  ;;  %15298 = vst [vmem:[#allocation47_spill] sm:$0xff] %v11523_v20  ;;  %v11527_v25 = vrot.slane %v8830_v24, %v11523_v20  ;;  %15300 = vst [vmem:[#allocation49_spill] sm:$0xff] %v11529_v28 }
  0xfd   :  { %9617 = vmatpush3.msra.mxu0 %v11462_v33  ;;  %9636 = vmatpush3.msra.mxu1 %v11462_v33  ;;  %v404_v50 = vadd.f32 %v403_v43, %v402_v46 }
  0xfe   :  { %9618 = vmatprep.subr.mxu0 %v15214_v0  ;;  %9637 = vmatprep.subr.mxu1 %v15214_v0  ;;  %v623_v51 = vadd.f32 %v622_v45, %v621_v47  ;;  %15299 = vst [vmem:[#allocation48_spill] sm:$0xff] %v11527_v25 }
  0xff   :  { %9619 = vmatpush3.msra.mxu0 %v11479_v40  ;;  %9638 = vmatpush3.msra.mxu1 %v11479_v40  ;;  %v406_v52 = vadd.f32 %v405_v44, %v404_v50 }
 0x100   :  { %9642 = vmatprep.subr.mxu0 %v15214_v0  ;;  %9661 = vmatprep.subr.mxu1 %v15214_v0  ;;  %v625_v53 = vadd.f32 %v624_v48, %v623_v51 }
 0x101   :  { %v407_v54 = vrot.slane %v406_v52, 4 }
 0x102   :  { %v627_v55 = vadd.f32 %v626_v49, %v625_v53 }
 0x103   :  { %v408_v56 = vadd.f32 %v407_v54, %v406_v52 }
 0x104   :  { %v628_v57 = vrot.slane %v627_v55, 4 }
 0x105   :  { %v409_v58 = vrot.slane %v408_v56, 2 }
 0x106   :  { %v629_v60 = vadd.f32 %v628_v57, %v627_v55 }
 0x107   :  { %v410_v59 = vadd.f32 %v409_v58, %v408_v56 }
 0x108   :  { %v630_v63 = vrot.slane %v629_v60, 2 }
 0x109   :  { %v411_v61 = vrot.slane %v410_v59, 1 }
 0x10a   :  { %v631_v8 = vadd.f32 %v630_v63, %v629_v60 }
 0x10b   :  { %v412_v62 = vadd.f32 %v411_v61, %v410_v59 }
 0x10c   :  { %v632_v12 = vrot.slane %v631_v8, 1 }
 0x10d   :  { %9621 = vmatmul.mubr.msk.f32.vlgmr.msra.gmra.mxu0 %vm391_vm1, %v412_v62 }
 0x10e   :  { %9643 = vmatpush3.msra.mxu0 %v11369_v1  ;;  %9658 = vmatprep.mubr.msk.f32.mxu0 %vm11148_vm0, %v15214_v0  ;;  %v633_v13 = vadd.f32 %v632_v12, %v631_v8 }
 0x10f   :  { %9644 = vmatprep.subr.mxu0 %v15214_v0 }
 0x110   :  { %9645 = vmatpush3.msra.mxu0 %v11372_v2 }
 0x111   :  { %9646 = vmatprep.subr.mxu0 %v15214_v0 }
 0x112   :  { %9647 = vmatpush3.msra.mxu0 %v11378_v3 }
 0x113   :  { %9648 = vmatprep.subr.mxu0 %v15214_v0 }
 0x114   :  { %9649 = vmatpush3.msra.mxu0 %v11399_v9 }
 0x115   :  { %9650 = vmatprep.subr.mxu0 %v15214_v0 }
 0x116   :  { %9651 = vmatpush3.msra.mxu0 %v11414_v14 }
 0x117   :  { %9652 = vmatprep.subr.mxu0 %v15214_v0 }
 0x118   :  { %9653 = vmatpush3.msra.mxu0 %v11427_v19 }
 0x119   :  { %9654 = vmatprep.subr.mxu0 %v15214_v0 }
 0x11a   :  { %9655 = vmatpush3.msra.mxu0 %v11462_v33 }
 0x11b   :  { %9656 = vmatprep.subr.mxu0 %v15214_v0 }
 0x11c   :  { %9657 = vmatpush3.msra.mxu0 %v11479_v40 }
 0x11d   :  { %9659 = vmatmul.mubr.msk.f32.vlgmr.msra.gmra.mxu0 %vm391_vm1, %v633_v13 }
 0x1cd   :  { %v482_v29 = vpop.f32.mrf.mxu0 }
 0x1ce   :  { %v489_v31 = vrot.slane %v482_v29, %v11529_v28 }
 0x1cf   :  { %v9622_v32 = vpop.f32.mrf.mxu0 }
 0x1d0   :  { %v11533_v36 = vsub.f32 %v11381_v4, %v489_v31  ;;  %v11536_v37 = vsub.f32 %v11386_v5, %v489_v31  ;;  %v11539_v38 = vsub.f32 %v11389_v6, %v489_v31  ;;  %v11542_v39 = vsub.f32 %v11392_v7, %v489_v31 }
 0x1d1   :  { %v11545_v41 = vsub.f32 %v11402_v10, %v489_v31  ;;  %v11554_v5 = vsub.f32 %v11405_v11, %v489_v31  ;;  %v11561_v45 = vsub.f32 %v11447_v26, %v489_v31  ;;  %v11567_v48 = vsub.f32 %v11450_v27, %v489_v31 }
 0x1d2   :  { %v498_v42 = vmul.f32 %v11533_v36, %v11533_v36  ;;  %v499_v43 = vmul.f32 %v11536_v37, %v11536_v37  ;;  %v500_v4 = vmul.f32 %v11539_v38, %v11539_v38  ;;  %v501_v6 = vmul.f32 %v11542_v39, %v11542_v39 }
 0x1d3   :  { %v502_v46 = vmul.f32 %v11545_v41, %v11545_v41  ;;  %v503_v49 = vmul.f32 %v11554_v5, %v11554_v5  ;;  %v504_v52 = vmul.f32 %v11561_v45, %v11561_v45  ;;  %v505_v53 = vmul.f32 %v11567_v48, %v11567_v48 }
 0x1d4   :  { %v506_v7 = vsel %vm391_vm1, %v498_v42, 0.0  ;;  %v507_v10 = vsel %vm391_vm1, %v499_v43, 0.0  ;;  %v509_v47 = vsel %vm391_vm1, %v500_v4, 0.0  ;;  %v511_v50 = vsel %vm391_vm1, %v501_v6, 0.0 }
 0x1d5   :  { %v508_v44 = vadd.f32 %v507_v10, %v506_v7  ;;  %v513_v26 = vsel %vm391_vm1, %v502_v46, 0.0  ;;  %v515_v55 = vsel %vm391_vm1, %v503_v49, 0.0  ;;  %v517_v58 = vsel %vm391_vm1, %v504_v52, 0.0 }
 0x1d6   :  { %v519_v60 = vsel %vm391_vm1, %v505_v53, 0.0 }
 0x1d7   :  { %v510_v11 = vadd.f32 %v509_v47, %v508_v44 }
 0x1d9   :  { %v512_v51 = vadd.f32 %v511_v50, %v510_v11 }
 0x1db   :  { %v514_v54 = vadd.f32 %v513_v26, %v512_v51 }
 0x1dd   :  { %v703_v27 = vpop.f32.mrf.mxu0  ;;  %v516_v56 = vadd.f32 %v515_v55, %v514_v54 }
 0x1de   :  { %v710_v57 = vrot.slane %v703_v27, %v11529_v28 }
 0x1df   :  { %v518_v59 = vadd.f32 %v517_v58, %v516_v56  ;;  %v9660_v61 = vpop.f32.mrf.mxu0  ;;  %v10080_v58 = vld [vmem:[%s15301_s26 + $0x10] sm:$0xff]  }
 0x1e0   :  { %v11582_v62 = vsub.f32 %v11419_v17, %v710_v57  ;;  %v11585_v63 = vsub.f32 %v11422_v18, %v710_v57  ;;  %v11588_v8 = vsub.f32 %v11432_v21, %v710_v57  ;;  %v11591_v12 = vsub.f32 %v11435_v22, %v710_v57 }
 0x1e1   :  { %v520_v13 = vadd.f32 %v519_v60, %v518_v59  ;;  %v11594_v15 = vsub.f32 %v11438_v23, %v710_v57  ;;  %v11597_v16 = vsub.f32 %v11455_v30, %v710_v57  ;;  %v11608_v29 = vsub.f32 %v11465_v34, %v710_v57  ;;  %v10082_v59 = vld [vmem:[%s15301_s26] sm:$0xff]  }
 0x1e2   :  { %v719_v17 = vmul.f32 %v11582_v62, %v11582_v62  ;;  %v720_v18 = vmul.f32 %v11585_v63, %v11585_v63  ;;  %v721_v21 = vmul.f32 %v11588_v8, %v11588_v8  ;;  %v722_v22 = vmul.f32 %v11591_v12, %v11591_v12 }
 0x1e3   :  { %v521_v24 = vrot.slane %v520_v13, 4  ;;  %v723_v23 = vmul.f32 %v11594_v15, %v11594_v15  ;;  %v11616_v4 = vsub.f32 %v11468_v35, %v710_v57  ;;  %v724_v6 = vmul.f32 %v11597_v16, %v11597_v16 }
 0x1e4   :  { %v727_v30 = vsel %vm391_vm1, %v719_v17, 0.0  ;;  %v728_v31 = vsel %vm391_vm1, %v720_v18, 0.0  ;;  %v730_v43 = vsel %vm391_vm1, %v721_v21, 0.0  ;;  %v732_v34 = vsel %vm391_vm1, %v722_v22, 0.0  ;;  %v8665_v21 = vld [vmem:[#allocation6] ss:$0 sm:$0xff] }
 0x1e5   :  { %v522_v32 = vadd.f32 %v521_v24, %v520_v13  ;;  %v729_v42 = vadd.f32 %v728_v31, %v727_v30  ;;  %v725_v44 = vmul.f32 %v11608_v29, %v11608_v29  ;;  %v734_v46 = vsel %vm391_vm1, %v723_v23, 0.0  ;;  %v8666_v31 = vld [vmem:[#allocation7] ss:$0 sm:$0xff] }
 0x1e6   :  { %v726_v49 = vmul.f32 %v11616_v4, %v11616_v4  ;;  %v736_v35 = vsel %vm391_vm1, %v724_v6, 0.0 }
 0x1e7   :  { %v523_v7 = vrot.slane %v522_v32, 2  ;;  %v731_v10 = vadd.f32 %v730_v43, %v729_v42  ;;  %v738_v52 = vsel %vm391_vm1, %v725_v44, 0.0 }
 0x1e8   :  { %v740_v54 = vsel %vm391_vm1, %v726_v49, 0.0 }
 0x1e9   :  { %v524_v47 = vadd.f32 %v523_v7, %v522_v32  ;;  %v733_v11 = vadd.f32 %v732_v34, %v731_v10 }
 0x1eb   :  { %v525_v50 = vrot.slane %v524_v47, 1  ;;  %v735_v51 = vadd.f32 %v734_v46, %v733_v11 }
 0x1ed   :  { %v526_v26 = vadd.f32 %v525_v50, %v524_v47  ;;  %v737_v53 = vadd.f32 %v736_v35, %v735_v51 }
 0x1ef   :  { %9640 = vmatmul.mubr.msk.f32.vlgmr.msra.gmra.mxu1 %vm391_vm1, %v526_v26  ;;  %v739_v55 = vadd.f32 %v738_v52, %v737_v53 }
 0x1f0   :  { %9662 = vmatpush3.msra.mxu1 %v11369_v1  ;;  %9677 = vmatprep.mubr.msk.f32.mxu1 %vm11148_vm0, %v15214_v0 }
 0x1f1   :  { %9663 = vmatprep.subr.mxu1 %v15214_v0  ;;  %v741_v27 = vadd.f32 %v740_v54, %v739_v55 }
 0x1f2   :  { %9664 = vmatpush3.msra.mxu1 %v11372_v2 }
 0x1f3   :  { %9665 = vmatprep.subr.mxu1 %v15214_v0  ;;  %v742_v56 = vrot.slane %v741_v27, 4 }
 0x1f4   :  { %9666 = vmatpush3.msra.mxu1 %v11378_v3 }
 0x1f5   :  { %9667 = vmatprep.subr.mxu1 %v15214_v0  ;;  %v743_v57 = vadd.f32 %v742_v56, %v741_v27 }
 0x1f6   :  { %9668 = vmatpush3.msra.mxu1 %v11399_v9 }
 0x1f7   :  { %9669 = vmatprep.subr.mxu1 %v15214_v0  ;;  %v744_v1 = vrot.slane %v743_v57, 2 }
 0x1f8   :  { %9670 = vmatpush3.msra.mxu1 %v11414_v14  ;;  %v10079_v14 = vld [vmem:[%s15301_s26 + $0x18] sm:$0xff]  }
 0x1f9   :  { %9671 = vmatprep.subr.mxu1 %v15214_v0  ;;  %v745_v2 = vadd.f32 %v744_v1, %v743_v57  ;;  %9680 = vmatprep.subr.bf16.mxu0 %v10079_v14 }
 0x1fa   :  { %9672 = vmatpush3.msra.mxu1 %v11427_v19  ;;  %9681 = vmatpush3.bf16.msra.mxu0 %v10079_v14  ;;  %v10081_v19 = vld [vmem:[%s15301_s26 + $0x8] sm:$0xff]  }
 0x1fb   :  { %9673 = vmatprep.subr.mxu1 %v15214_v0  ;;  %v746_v3 = vrot.slane %v745_v2, 1  ;;  %9682 = vmatprep.subr.bf16.mxu0 %v10080_v58 }
 0x1fc   :  { %9674 = vmatpush3.msra.mxu1 %v11462_v33 }
 0x1fd   :  { %9675 = vmatprep.subr.mxu1 %v15214_v0  ;;  %v747_v9 = vadd.f32 %v746_v3, %v745_v2 }
 0x1fe   :  { %9676 = vmatpush3.msra.mxu1 %v11479_v40  ;;  %9683 = vmatpush3.bf16.msra.mxu0 %v10080_v58 }
 0x1ff   :  { %9678 = vmatmul.mubr.msk.f32.vlgmr.msra.gmra.mxu1 %vm391_vm1, %v747_v9  ;;  %9684 = vmatprep.subr.bf16.mxu0 %v10081_v19 }
 0x202   :  { %9685 = vmatpush3.bf16.msra.mxu0 %v10081_v19 }
 0x203   :  { %9686 = vmatprep.subr.bf16.mxu0 %v10082_v59 }
 0x206   :  { %9687 = vmatpush3.bf16.msra.mxu0 %v10082_v59 }
 0x2af   :  { %v596_v33 = vpop.f32.mrf.mxu1 }
 0x2b0   :  { %v597_v60 = vadd.f32 1e-05, %v596_v33 }
 0x2b1   :  { %v9641_v61 = vpop.f32.mrf.mxu1 }
 0x2b2   :  { %10213 = vrsqrt.f32 %v597_v60 }
 0x2bf   :  { %v10214_v13 = vpop.eup %10213  ;;  %v817_v40 = vpop.f32.mrf.mxu1 }
 0x2c0   :  { %v604_v17 = vrot.slane %v10214_v13, %v11529_v28  ;;  %v818_v18 = vadd.f32 1e-05, %v817_v40 }
 0x2c1   :  { %v9679_v24 = vpop.f32.mrf.mxu1 }
 0x2c2   :  { %10215 = vrsqrt.f32 %v818_v18  ;;  %v605_v22 = vmul.f32 %v604_v17, %v11533_v36  ;;  %v606_v23 = vmul.f32 %v604_v17, %v11536_v37  ;;  %v607_v30 = vmul.f32 %v604_v17, %v11539_v38 }
 0x2c3   :  { %v608_v32 = vmul.f32 %v604_v17, %v11542_v39  ;;  %v609_v42 = vmul.f32 %v604_v17, %v11545_v41  ;;  %v610_v43 = vmul.f32 %v604_v17, %v11554_v5  ;;  %v611_v10 = vmul.f32 %v604_v17, %v11561_v45 }
 0x2c4   :  { %v841_v6 = vmul.f32 %v8665_v21, %v605_v22  ;;  %v842_v34 = vmul.f32 %v8665_v21, %v606_v23  ;;  %v843_v7 = vmul.f32 %v8665_v21, %v607_v30  ;;  %v612_v36 = vmul.f32 %v604_v17, %v11567_v48  ;;  %v11678_v22 = vld [vmem:[#allocation9] ss:$0 sm:$0xff] }
 0x2c5   :  { %v844_v44 = vmul.f32 %v8665_v21, %v608_v32  ;;  %v845_v46 = vmul.f32 %v8665_v21, %v609_v42  ;;  %v846_v47 = vmul.f32 %v8665_v21, %v610_v43  ;;  %v847_v51 = vmul.f32 %v8665_v21, %v611_v10 }
 0x2c6   :  { %v864_v37 = vadd.f32 %v8666_v31, %v841_v6  ;;  %v865_v11 = vadd.f32 %v8666_v31, %v842_v34  ;;  %v866_v38 = vadd.f32 %v8666_v31, %v843_v7  ;;  %v848_v5 = vmul.f32 %v8665_v21, %v612_v36 }
 0x2c7   :  { %v867_v49 = vadd.f32 %v8666_v31, %v844_v44  ;;  %v868_v35 = vadd.f32 %v8666_v31, %v845_v46  ;;  %v869_v39 = vadd.f32 %v8666_v31, %v846_v47  ;;  %v870_v45 = vadd.f32 %v8666_v31, %v847_v51 }
 0x2c8   :  { %v888_v50 = vpack.c.bf16 %v865_v11, %v864_v37  ;;  %v871_v26 = vadd.f32 %v8666_v31, %v848_v5 }
 0x2c9   :  { %v889_v41 = vpack.c.bf16 %v867_v49, %v866_v38  ;;  %v890_v52 = vpack.c.bf16 %v869_v39, %v868_v35 }
 0x2ca   :  { %9688 = vmatprep.mubr.msk.bf16.mxu0 %vm391_vm1, %v888_v50  ;;  %v891_v54 = vpack.c.bf16 %v871_v26, %v870_v45 }
 0x2cb   :  { %9689 = vmatmul.mubr.msk.bf16.vlgmr.msra.gmra.mxu0 %vm391_vm1, %v889_v41 }
 0x2cc   :  { %9692 = vmatprep.mubr.msk.bf16.mxu0 %vm391_vm1, %v890_v52 }
 0x2cf   :  { %v10216_v48 = vpop.eup %10215 }
 0x2d0   :  { %v825_v53 = vrot.slane %v10216_v48, %v11529_v28 }
 0x2d2   :  { %v826_v55 = vmul.f32 %v825_v53, %v11582_v62  ;;  %v827_v27 = vmul.f32 %v825_v53, %v11585_v63  ;;  %v828_v56 = vmul.f32 %v825_v53, %v11588_v8  ;;  %v829_v57 = vmul.f32 %v825_v53, %v11591_v12 }
 0x2d3   :  { %9693 = vmatmul.mubr.msk.bf16.gmra.mxu0 %vm391_vm1, %v891_v54  ;;  %v830_v1 = vmul.f32 %v825_v53, %v11594_v15  ;;  %v831_v2 = vmul.f32 %v825_v53, %v11597_v16  ;;  %v832_v62 = vmul.f32 %v825_v53, %v11608_v29  ;;  %v833_v63 = vmul.f32 %v825_v53, %v11616_v4 }
 0x2d4   :  { %v849_v3 = vmul.f32 %v8665_v21, %v826_v55  ;;  %v850_v9 = vmul.f32 %v8665_v21, %v827_v27  ;;  %v851_v14 = vmul.f32 %v8665_v21, %v828_v56  ;;  %v852_v58 = vmul.f32 %v8665_v21, %v829_v57 }
 0x2d5   :  { %v853_v19 = vmul.f32 %v8665_v21, %v830_v1  ;;  %v854_v59 = vmul.f32 %v8665_v21, %v831_v2  ;;  %v855_v17 = vmul.f32 %v8665_v21, %v832_v62  ;;  %v856_v16 = vmul.f32 %v8665_v21, %v833_v63 }
 0x2d6   :  { %v872_v33 = vadd.f32 %v8666_v31, %v849_v3  ;;  %v873_v8 = vadd.f32 %v8666_v31, %v850_v9  ;;  %v874_v60 = vadd.f32 %v8666_v31, %v851_v14  ;;  %v875_v12 = vadd.f32 %v8666_v31, %v852_v58 }
 0x2d7   :  { %v876_v61 = vadd.f32 %v8666_v31, %v853_v19  ;;  %v877_v13 = vadd.f32 %v8666_v31, %v854_v59  ;;  %v878_v29 = vadd.f32 %v8666_v31, %v855_v17  ;;  %v879_v24 = vadd.f32 %v8666_v31, %v856_v16 }
 0x2d8   :  { %v892_v40 = vpack.c.bf16 %v873_v8, %v872_v33  ;;  %v893_v15 = vpack.c.bf16 %v875_v12, %v874_v60 }
 0x2d9   :  { %v894_v18 = vpack.c.bf16 %v877_v13, %v876_v61  ;;  %v895_v4 = vpack.c.bf16 %v879_v24, %v878_v29 }
 0x2da   :  { %9696 = vmatprep.mubr.msk.bf16.mxu0 %vm391_vm1, %v892_v40 }
 0x2db   :  { %9697 = vmatmul.mubr.msk.bf16.gmra.mxu0 %vm391_vm1, %v893_v15 }
 0x2dc   :  { %9700 = vmatprep.mubr.msk.bf16.mxu0 %vm391_vm1, %v894_v18 }
 0x2e3   :  { %9701 = vmatmul.mubr.msk.bf16.gmra.mxu0 %vm391_vm1, %v895_v4 }
 0x38b   :  { %v9690_v23 = vpop.f32.mrf.mxu0 }
 0x38c   :  { %v11681_v30 = vadd.f32 %v9690_v23, %v11678_v22 }
 0x38d   :  { %v985_v32 = vpop.f32.mrf.mxu0 }
 0x38e   :  { %v11684_v21 = vadd.f32 %v11678_v22, %v985_v32  ;;  %v1056_v42 = vsel %vm391_vm1, %v11681_v30, 0.0 }
 0x38f   :  { %1057 = vadd.xlane.f32.xlu1 %v1056_v42  ;;  %v9691_v43 = vpop.f32.mrf.mxu0 }
 0x390   :  { %v11689_v31 = vadd.f32 %v9691_v43, %v11678_v22  ;;  %v1050_v6 = vsel %vm391_vm1, %v11684_v21, 0.0 }
 0x391   :  { %v988_v34 = vpop.f32.mrf.mxu0  ;;  %1051 = vadd.xlane.f32.xlu0 %v1050_v6 }
 0x392   :  { %15302 = vst [vmem:[#allocation50_spill] sm:$0xff] %v11689_v31  ;;  %v11694_v7 = vadd.f32 %v11678_v22, %v988_v34  ;;  %v1059_v10 = vsel %vm391_vm1, %v11689_v31, 0.0 }
 0x393   :  { %1060 = vadd.xlane.f32.xlu1 %v1059_v10  ;;  %v9694_v44 = vpop.f32.mrf.mxu0 }
 0x394   :  { %15303 = vst [vmem:[#allocation51_spill] sm:$0xff] %v11694_v7  ;;  %v1053_v46 = vsel %vm391_vm1, %v11694_v7, 0.0  ;;  %v11704_v11 = vadd.f32 %v9694_v44, %v11678_v22 }
 0x395   :  { %v1001_v47 = vpop.f32.mrf.mxu0  ;;  %1054 = vadd.xlane.f32.xlu0 %v1053_v46 }
 0x396   :  { %v11701_v36 = vadd.f32 %v11678_v22, %v1001_v47  ;;  %15305 = vst [vmem:[#allocation53_spill] sm:$0xff] %v11704_v11  ;;  %v1068_v51 = vsel %vm391_vm1, %v11704_v11, 0.0 }
 0x397   :  { %v9695_v37 = vpop.f32.mrf.mxu0 }
 0x398   :  { %15304 = vst [vmem:[#allocation52_spill] sm:$0xff] %v11701_v36  ;;  %v1062_v38 = vsel %vm391_vm1, %v11701_v36, 0.0  ;;  %v11712_v50 = vadd.f32 %v9695_v37, %v11678_v22 }
 0x399   :  { %v1004_v49 = vpop.f32.mrf.mxu0  ;;  %1063 = vadd.xlane.f32.xlu0 %v1062_v38 }
 0x39a   :  { %v11709_v35 = vadd.f32 %v11678_v22, %v1004_v49  ;;  %15307 = vst [vmem:[#allocation55_spill] sm:$0xff] %v11712_v50  ;;  %v1071_v48 = vsel %vm391_vm1, %v11712_v50, 0.0 }
 0x39b   :  { %v9698_v39 = vpop.f32.mrf.mxu0 }
 0x39c   :  { %15306 = vst [vmem:[#allocation54_spill] sm:$0xff] %v11709_v35  ;;  %v1065_v41 = vsel %vm391_vm1, %v11709_v35, 0.0  ;;  %v11722_v26 = vadd.f32 %v9698_v39, %v11678_v22 }
 0x39d   :  { %v1017_v5 = vpop.f32.mrf.mxu0  ;;  %1066 = vadd.xlane.f32.xlu1 %v1065_v41  ;;  %1069 = vadd.xlane.f32.xlu0 %v1068_v51 }
 0x39e   :  { %v11719_v52 = vadd.f32 %v11678_v22, %v1017_v5  ;;  %15309 = vst [vmem:[#allocation57_spill] sm:$0xff] %v11722_v26  ;;  %v1080_v57 = vsel %vm391_vm1, %v11722_v26, 0.0 }
 0x39f   :  { %v9699_v45 = vpop.f32.mrf.mxu0 }
 0x3a0   :  { %15308 = vst [vmem:[#allocation56_spill] sm:$0xff] %v11719_v52  ;;  %v1074_v53 = vsel %vm391_vm1, %v11719_v52, 0.0  ;;  %v11732_v27 = vadd.f32 %v9699_v45, %v11678_v22 }
 0x3a1   :  { %v1020_v54 = vpop.f32.mrf.mxu0  ;;  %1072 = vadd.xlane.f32.xlu1 %v1071_v48  ;;  %1075 = vadd.xlane.f32.xlu0 %v1074_v53 }
 0x3a2   :  { %v11729_v55 = vadd.f32 %v11678_v22, %v1020_v54  ;;  %15311 = vst [vmem:[#allocation59_spill] sm:$0xff] %v11732_v27  ;;  %v1083_v1 = vsel %vm391_vm1, %v11732_v27, 0.0 }
 0x3a3   :  { %v9702_v2 = vpop.f32.mrf.mxu0 }
 0x3a4   :  { %15310 = vst [vmem:[#allocation58_spill] sm:$0xff] %v11729_v55  ;;  %v1077_v56 = vsel %vm391_vm1, %v11729_v55, 0.0  ;;  %v11769_v34 = vadd.f32 %v9702_v2, %v11678_v22 }
 0x3a5   :  { %1078 = vadd.xlane.f32.xlu1 %v1077_v56  ;;  %1081 = vadd.xlane.f32.xlu0 %v1080_v57  ;;  %v1033_v9 = vpop.f32.mrf.mxu0 }
 0x3a6   :  { %v11746_v12 = vadd.f32 %v11678_v22, %v1033_v9  ;;  %15314 = vst [vmem:[#allocation62_spill] sm:$0xff] %v11769_v34  ;;  %v1092_v53 = vsel %vm391_vm1, %v11769_v34, 0.0 }
 0x3a7   :  { %v9703_v19 = vpop.f32.mrf.mxu0 }
 0x3a8   :  { %15312 = vst [vmem:[#allocation60_spill] sm:$0xff] %v11746_v12  ;;  %v1086_v24 = vsel %vm391_vm1, %v11746_v12, 0.0  ;;  %v11780_v41 = vadd.f32 %v9703_v19, %v11678_v22 }
 0x3a9   :  { %1084 = vadd.xlane.f32.xlu1 %v1083_v1  ;;  %v1036_v61 = vpop.f32.mrf.mxu0 }
 0x3aa   :  { %v11758_v29 = vadd.f32 %v11678_v22, %v1036_v61  ;;  %15315 = vst [vmem:[#allocation63_spill] sm:$0xff] %v11780_v41  ;;  %v1095_v2 = vsel %vm391_vm1, %v11780_v41, 0.0 }
 0x3ac   :  { %15313 = vst [vmem:[#allocation61_spill] sm:$0xff] %v11758_v29  ;;  %v1089_v37 = vsel %vm391_vm1, %v11758_v29, 0.0 }
 0x418   :  { %v1058_v3 = vpop.xlane.xlu1 %1057 }
 0x419   :  { %v1101_v59 = vmul.f32 0.015625, %v1058_v3 }
 0x41a   :  { %v1052_v14 = vpop.xlane.xlu0 %1051 }
 0x41b   :  { %v1099_v58 = vmul.f32 0.015625, %v1052_v14  ;;  %v11749_v13 = vsub.f32 %v11681_v30, %v1101_v59 }
 0x41c   :  { %v1061_v63 = vpop.xlane.xlu1 %1060 }
 0x41d   :  { %v11741_v62 = vsub.f32 %v11684_v21, %v1099_v58  ;;  %v1102_v40 = vmul.f32 0.015625, %v1061_v63  ;;  %v1133_v42 = vmul.f32 %v11749_v13, %v11749_v13 }
 0x41e   :  { %v1055_v33 = vpop.xlane.xlu0 %1054 }
 0x41f   :  { %v1100_v8 = vmul.f32 0.015625, %v1055_v33  ;;  %v1131_v60 = vmul.f32 %v11741_v62, %v11741_v62  ;;  %v11763_v4 = vsub.f32 %v11689_v31, %v1102_v40  ;;  %v1153_v47 = vsel %vm391_vm1, %v1133_v42, 0.0  ;;  %v10730_v31 = vld [vmem:[%s15317_s28 + $0x70] sm:$0xff]  }
 0x421   :  { %v11752_v15 = vsub.f32 %v11694_v7, %v1100_v8  ;;  %v1147_v17 = vsel %vm391_vm1, %v1131_v60, 0.0  ;;  %v1134_v38 = vmul.f32 %v11763_v4, %v11763_v4 }
 0x422   :  { %1148 = vadd.xlane.f32.xlu0 %v1147_v17  ;;  %v1064_v16 = vpop.xlane.xlu0 %1063 }
 0x423   :  { %v1132_v18 = vmul.f32 %v11752_v15, %v11752_v15  ;;  %v1103_v23 = vmul.f32 0.015625, %v1064_v16  ;;  %v1156_v54 = vsel %vm391_vm1, %v1134_v38, 0.0  ;;  %v10086_v38 = vld [vmem:[%s15316_s29 + $0x20] ss:$8 sps:$4 sm:$0xff]  }
 0x425   :  { %v1150_v32 = vsel %vm391_vm1, %v1132_v18, 0.0  ;;  %v11772_v46 = vsub.f32 %v11701_v36, %v1103_v23 }
 0x426   :  { %v1067_v43 = vpop.xlane.xlu1 %1066  ;;  %1087 = vadd.xlane.f32.xlu0 %v1086_v24  ;;  %1151 = vadd.xlane.f32.xlu1 %v1150_v32  ;;  %v1070_v6 = vpop.xlane.xlu0 %1069 }
 0x427   :  { %v1104_v10 = vmul.f32 0.015625, %v1067_v43  ;;  %v1105_v44 = vmul.f32 0.015625, %v1070_v6  ;;  %v1135_v56 = vmul.f32 %v11772_v46, %v11772_v46  ;;  %v10085_v43 = vld [vmem:[%s15316_s29 + $0x34] ss:$8 sps:$4 sm:$0xff]   ;;  %v10083_v6 = vld [vmem:[%s15316_s29 + $0x30] ss:$8 sps:$4 sm:$0xff]  }
 0x428   :  { %1403 = vmatprep.subr.bf16.mxu1 %v10085_v43 }
 0x429   :  { %v11783_v51 = vsub.f32 %v11709_v35, %v1104_v10  ;;  %v11786_v5 = vsub.f32 %v11704_v11, %v1105_v44  ;;  %v1159_v59 = vsel %vm391_vm1, %v1135_v56, 0.0  ;;  %1404 = vmatpush1.bf16.msra.mxu1 %v10083_v6 }
 0x42a   :  { %v1073_v49 = vpop.xlane.xlu1 %1072  ;;  %1154 = vadd.xlane.f32.xlu0 %v1153_v47  ;;  %1090 = vadd.xlane.f32.xlu1 %v1089_v37  ;;  %v1076_v39 = vpop.xlane.xlu0 %1075  ;;  %v10088_v37 = vld [vmem:[%s15316_s29 + $0x24] ss:$8 sps:$4 sm:$0xff]  }
 0x42b   :  { %v1106_v45 = vmul.f32 0.015625, %v1073_v49  ;;  %v1107_v48 = vmul.f32 0.015625, %v1076_v39  ;;  %v1136_v3 = vmul.f32 %v11783_v51, %v11783_v51  ;;  %v1137_v9 = vmul.f32 %v11786_v5, %v11786_v5  ;;  %1405 = vmatprep.subr.bf16.mxu1 %v10088_v37  ;;  %v10091_v39 = vld [vmem:[%s15316_s29 + $0x14] ss:$8 sps:$4 sm:$0xff]  }
 0x42d   :  { %v11794_v1 = vsub.f32 %v11712_v50, %v1106_v45  ;;  %v11803_v14 = vsub.f32 %v11719_v52, %v1107_v48  ;;  %v1162_v33 = vsel %vm391_vm1, %v1136_v3, 0.0  ;;  %v1165_v8 = vsel %vm391_vm1, %v1137_v9, 0.0  ;;  %1406 = vmatpush1.bf16.msra.mxu1 %v10086_v38  ;;  %v10089_v45 = vld [vmem:[%s15316_s29 + $0x10] ss:$8 sps:$4 sm:$0xff]   ;;  %v10094_v48 = vld [vmem:[%s15316_s29 + $0x4] ss:$8 sps:$4 sm:$0xff]  }
 0x42e   :  { %v1079_v57 = vpop.xlane.xlu1 %1078  ;;  %1093 = vadd.xlane.f32.xlu0 %v1092_v53  ;;  %1157 = vadd.xlane.f32.xlu1 %v1156_v54  ;;  %v1082_v22 = vpop.xlane.xlu0 %1081  ;;  %v10092_v53 = vld [vmem:[%s15316_s29] ss:$8 sps:$4 sm:$0xff]   ;;  %v15212_v54 = vmov 0  }
 0x42f   :  { %v1108_v58 = vmul.f32 0.015625, %v1079_v57  ;;  %v1109_v19 = vmul.f32 0.015625, %v1082_v22  ;;  %v1138_v60 = vmul.f32 %v11794_v1, %v11794_v1  ;;  %v1139_v16 = vmul.f32 %v11803_v14, %v11803_v14  ;;  %1407 = vmatprep.subr.bf16.mxu1 %v10091_v39  ;;  %1427 = vmatprep.mubr.bf16.mxu1 %v15212_v54 }
 0x431   :  { %v11811_v61 = vsub.f32 %v11729_v55, %v1108_v58  ;;  %v11814_v40 = vsub.f32 %v11722_v26, %v1109_v19  ;;  %v1168_v18 = vsel %vm391_vm1, %v1138_v60, 0.0  ;;  %v1171_v23 = vsel %vm391_vm1, %v1139_v16, 0.0  ;;  %1408 = vmatpush1.bf16.msra.mxu1 %v10089_v45 }
 0x432   :  { %v1085_v63 = vpop.xlane.xlu1 %1084  ;;  %1096 = vadd.xlane.f32.xlu1 %v1095_v2  ;;  %1160 = vadd.xlane.f32.xlu0 %v1159_v59 }
 0x433   :  { %v1110_v17 = vmul.f32 0.015625, %v1085_v63  ;;  %v1140_v32 = vmul.f32 %v11811_v61, %v11811_v61  ;;  %v1141_v42 = vmul.f32 %v11814_v40, %v11814_v40  ;;  %1409 = vmatprep.subr.bf16.mxu1 %v10094_v48 }
 0x435   :  { %v11820_v24 = vsub.f32 %v11732_v27, %v1110_v17  ;;  %v1174_v10 = vsel %vm391_vm1, %v1140_v32, 0.0  ;;  %v1177_v44 = vsel %vm391_vm1, %v1141_v42, 0.0  ;;  %1410 = vmatpush1.bf16.msra.mxu1 %v10092_v53 }
 0x436   :  { %1163 = vadd.xlane.f32.xlu1 %v1162_v33  ;;  %1166 = vadd.xlane.f32.xlu0 %v1165_v8 }
 0x437   :  { %v1142_v47 = vmul.f32 %v11820_v24, %v11820_v24 }
 0x439   :  { %v1180_v49 = vsel %vm391_vm1, %v1142_v47, 0.0 }
 0x43a   :  { %1169 = vadd.xlane.f32.xlu1 %v1168_v18  ;;  %1172 = vadd.xlane.f32.xlu0 %v1171_v23 }
 0x43e   :  { %1175 = vadd.xlane.f32.xlu1 %v1174_v10  ;;  %1178 = vadd.xlane.f32.xlu0 %v1177_v44 }
 0x442   :  { %1181 = vadd.xlane.f32.xlu1 %v1180_v49 }
 0x4ab   :  { %v1149_v56 = vpop.xlane.xlu0 %1148 }
 0x4ac   :  { %v1195_v57 = vmul.f32 0.015625, %v1149_v56 }
 0x4ae   :  { %v1211_v22 = vadd.f32 1e-05, %v1195_v57 }
 0x4af   :  { %v1152_v2 = vpop.xlane.xlu1 %1151  ;;  %v1088_v3 = vpop.xlane.xlu0 %1087 }
 0x4b0   :  { %10217 = vrsqrt.f32 %v1211_v22  ;;  %v1196_v9 = vmul.f32 0.015625, %v1152_v2  ;;  %v1111_v58 = vmul.f32 0.015625, %v1088_v3  ;;  %v11863_v3 = vld [vmem:[#allocation10] ss:$0 sm:$0xff] }
 0x4b2   :  { %v1212_v19 = vadd.f32 1e-05, %v1196_v9  ;;  %v11842_v59 = vsub.f32 %v11746_v12, %v1111_v58 }
 0x4b3   :  { %v1091_v63 = vpop.xlane.xlu1 %1090  ;;  %v1155_v33 = vpop.xlane.xlu0 %1154 }
 0x4b4   :  { %10219 = vrsqrt.f32 %v1212_v19  ;;  %v1112_v8 = vmul.f32 0.015625, %v1091_v63  ;;  %v1197_v60 = vmul.f32 0.015625, %v1155_v33  ;;  %v1143_v17 = vmul.f32 %v11842_v59, %v11842_v59 }
 0x4b6   :  { %v11847_v16 = vsub.f32 %v11758_v29, %v1112_v8  ;;  %v1213_v18 = vadd.f32 1e-05, %v1197_v60  ;;  %v1183_v23 = vsel %vm391_vm1, %v1143_v17, 0.0  ;;  %v11867_v60 = vld [vmem:[#allocation12] ss:$0 sm:$0xff] }
 0x4b7   :  { %v1158_v32 = vpop.xlane.xlu1 %1157  ;;  %1184 = vadd.xlane.f32.xlu0 %v1183_v23  ;;  %v1094_v42 = vpop.xlane.xlu0 %1093 }
 0x4b8   :  { %10221 = vrsqrt.f32 %v1213_v18  ;;  %v1198_v43 = vmul.f32 0.015625, %v1158_v32  ;;  %v1113_v6 = vmul.f32 0.015625, %v1094_v42  ;;  %v1144_v10 = vmul.f32 %v11847_v16, %v11847_v16 }
 0x4ba   :  { %v1214_v44 = vadd.f32 1e-05, %v1198_v43  ;;  %v11853_v47 = vsub.f32 %v11769_v34, %v1113_v6  ;;  %v1186_v37 = vsel %vm391_vm1, %v1144_v10, 0.0 }
 0x4bb   :  { %1187 = vadd.xlane.f32.xlu1 %v1186_v37  ;;  %v1097_v38 = vpop.xlane.xlu1 %1096  ;;  %v1161_v49 = vpop.xlane.xlu0 %1160 }
 0x4bc   :  { %10223 = vrsqrt.f32 %v1214_v44  ;;  %v1114_v39 = vmul.f32 0.015625, %v1097_v38  ;;  %v1199_v45 = vmul.f32 0.015625, %v1161_v49  ;;  %v1145_v48 = vmul.f32 %v11853_v47, %v11853_v47 }
 0x4bd   :  { %v10218_v53 = vpop.eup %10217 }
 0x4be   :  { %v1243_v56 = vmul.f32 %v10218_v53, %v11741_v62  ;;  %v11860_v57 = vsub.f32 %v11780_v41, %v1114_v39  ;;  %v1215_v22 = vadd.f32 1e-05, %v1199_v45  ;;  %v1189_v2 = vsel %vm391_vm1, %v1145_v48, 0.0 }
 0x4bf   :  { %v1164_v9 = vpop.xlane.xlu1 %1163  ;;  %1190 = vadd.xlane.f32.xlu0 %v1189_v2  ;;  %v1167_v58 = vpop.xlane.xlu0 %1166 }
 0x4c0   :  { %10225 = vrsqrt.f32 %v1215_v22  ;;  %v1200_v19 = vmul.f32 0.015625, %v1164_v9  ;;  %v1201_v63 = vmul.f32 0.015625, %v1167_v58  ;;  %v1146_v33 = vmul.f32 %v11860_v57, %v11860_v57 }
 0x4c1   :  { %v10220_v8 = vpop.eup %10219  ;;  %v1265_v62 = vmul.f32 %v11863_v3, %v1243_v56 }
 0x4c2   :  { %v1244_v17 = vmul.f32 %v10220_v8, %v11752_v15  ;;  %v1216_v18 = vadd.f32 1e-05, %v1200_v19  ;;  %v1217_v23 = vadd.f32 1e-05, %v1201_v63  ;;  %v1192_v32 = vsel %vm391_vm1, %v1146_v33, 0.0 }
 0x4c3   :  { %1193 = vadd.xlane.f32.xlu1 %v1192_v32  ;;  %v1170_v42 = vpop.xlane.xlu1 %1169  ;;  %v1173_v43 = vpop.xlane.xlu0 %1172  ;;  %v1287_v38 = vadd.f32 %v11867_v60, %v1265_v62 }
 0x4c4   :  { %10227 = vrsqrt.f32 %v1216_v18  ;;  %v1202_v6 = vmul.f32 0.015625, %v1170_v42  ;;  %v1266_v10 = vmul.f32 %v11863_v3, %v1244_v17  ;;  %v1203_v37 = vmul.f32 0.015625, %v1173_v43  ;;  %v11885_v42 = vld [vmem:[%s15317_s28 + $0x78] sm:$0xff]  }
 0x4c5   :  { %v10222_v44 = vpop.eup %10221  ;;  %10229 = vrsqrt.f32 %v1217_v23 }
 0x4c6   :  { %v1218_v49 = vadd.f32 1e-05, %v1202_v6  ;;  %v1288_v39 = vadd.f32 %v11867_v60, %v1266_v10  ;;  %v1245_v15 = vmul.f32 %v10222_v44, %v11749_v13  ;;  %v1219_v22 = vadd.f32 1e-05, %v1203_v37  ;;  %v11888_v10 = vld [vmem:[%s15317_s28 + $0x38] sm:$0xff]  }
 0x4c7   :  { %v1176_v45 = vpop.xlane.xlu1 %1175  ;;  %v1179_v9 = vpop.xlane.xlu0 %1178 }
 0x4c8   :  { %10231 = vrsqrt.f32 %v1218_v49  ;;  %v1204_v48 = vmul.f32 0.015625, %v1176_v45  ;;  %v1311_v53 = vpack.c.bf16 %v1288_v39, %v1287_v38  ;;  %v1267_v19 = vmul.f32 %v11863_v3, %v1245_v15  ;;  %v11898_v49 = vld [vmem:[%s15317_s28 + $0x30] sm:$0xff]  }
 0x4c9   :  { %v10224_v56 = vpop.eup %10223  ;;  %v1205_v62 = vmul.f32 0.015625, %v1179_v9 }
 0x4ca   :  { %v1220_v2 = vadd.f32 1e-05, %v1204_v48  ;;  %8690 = vmatmul.mubr.msk.bf16.vlgmr.msra.gmra.mxu1 %vm391_vm1, %v1311_v53  ;;  %v1246_v58 = vmul.f32 %v10224_v56, %v11763_v4  ;;  %v1289_v17 = vadd.f32 %v11867_v60, %v1267_v19 }
 0x4cb   :  { %v1182_v63 = vpop.xlane.xlu1 %1181  ;;  %1437 = vmatprep.mubr.bf16.mxu1 %v15212_v54  ;;  %v1221_v6 = vadd.f32 1e-05, %v1205_v62 }
 0x4cc   :  { %10233 = vrsqrt.f32 %v1220_v2  ;;  %v1206_v13 = vmul.f32 0.015625, %v1182_v63  ;;  %v1268_v33 = vmul.f32 %v11863_v3, %v1246_v58  ;;  %v11913_v2 = vld [vmem:[%s15317_s28 + $0x70] sm:$0xff]   ;;  %v11918_v58 = vld [vmem:[%s15317_s28 + $0x20] sm:$0xff]  }
 0x4cd   :  { %v10226_v8 = vpop.eup %10225  ;;  %10235 = vrsqrt.f32 %v1219_v22 }
 0x4ce   :  { %v1290_v18 = vadd.f32 %v11867_v60, %v1268_v33  ;;  %v1247_v4 = vmul.f32 %v10226_v8, %v11772_v46  ;;  %v1222_v23 = vadd.f32 1e-05, %v1206_v13  ;;  %v11928_v13 = vld [vmem:[%s15317_s28 + $0x68] sm:$0xff]   ;;  %v11933_v33 = vld [vmem:[%s15317_s28 + $0x18] sm:$0xff]  }
 0x4d0   :  { %v1312_v32 = vpack.c.bf16 %v1290_v18, %v1289_v17  ;;  %v1269_v37 = vmul.f32 %v11863_v3, %v1247_v4  ;;  %10237 = vrsqrt.f32 %v1222_v23  ;;  %v11946_v23 = vld [vmem:[%s15317_s28 + $0x10] sm:$0xff]  }
 0x4d1   :  { %v10228_v43 = vpop.eup %10227  ;;  %10239 = vrsqrt.f32 %v1221_v6 }
 0x4d2   :  { %8691 = vmatmul.mubr.msk.bf16.gmra.mxu1 %vm391_vm1, %v1312_v32  ;;  %v1248_v44 = vmul.f32 %v10228_v43, %v11783_v51  ;;  %v10230_v38 = vpop.eup %10229  ;;  %v11903_v51 = vld [vmem:[%s15317_s28 + $0x28] sm:$0xff]   ;;  %v1291_v15 = vadd.f32 %v11867_v60, %v1269_v37 }
 0x4d3   :  { %1447 = vmatprep.mubr.bf16.mxu1 %v15212_v54  ;;  %v1249_v48 = vmul.f32 %v10230_v38, %v11786_v5  ;;  %v11961_v37 = vld [vmem:[%s15317_s28 + $0x8] sm:$0xff]  }
 0x4d4   :  { %v1270_v46 = vmul.f32 %v11863_v3, %v1248_v44  ;;  %1635 = vrot.lane.b32.xlu1 %v11885_v42, %s11127_s0  ;;  %v11956_v44 = vld [vmem:[%s15317_s28 + $0x58] sm:$0xff]  }
 0x4d5   :  { %v10232_v39 = vpop.eup %10231  ;;  %1619 = vrot.lane.b32.xlu0 %v11888_v10, %s11127_s0  ;;  %v1271_v5 = vmul.f32 %v11863_v3, %v1249_v48 }
 0x4d6   :  { %v1292_v45 = vadd.f32 %v11867_v60, %v1270_v46  ;;  %v1250_v53 = vmul.f32 %v10232_v39, %v11794_v1 }
 0x4d7   :  { %v1293_v8 = vadd.f32 %v11867_v60, %v1271_v5 }
 0x4d8   :  { %v1313_v56 = vpack.c.bf16 %v1292_v45, %v1291_v15  ;;  %v1272_v22 = vmul.f32 %v11863_v3, %v1250_v53  ;;  %1617 = vrot.lane.b32.xlu1 %v11898_v49, %s11127_s0  ;;  %v11974_v45 = vld [vmem:[%s15317_s28] sm:$0xff]   ;;  %v11983_v53 = vld [vmem:[%s15317_s28 + $0x48] sm:$0xff]  }
 0x4d9   :  { %v10234_v9 = vpop.eup %10233  ;;  %1615 = vrot.lane.b32.xlu0 %v11903_v51, %s11127_s0 }
 0x4da   :  { %8692 = vmatmul.mubr.msk.bf16.gmra.mxu1 %vm391_vm1, %v1313_v56  ;;  %v10236_v1 = vpop.eup %10235  ;;  %v1294_v19 = vadd.f32 %v11867_v60, %v1272_v22  ;;  %v1252_v63 = vmul.f32 %v10234_v9, %v11811_v61  ;;  %v11941_v61 = vld [vmem:[%s15317_s28 + $0x60] sm:$0xff]  }
 0x4db   :  { %1457 = vmatprep.mubr.bf16.mxu1 %v15212_v54  ;;  %v1251_v62 = vmul.f32 %v10236_v1, %v11803_v14  ;;  %v11991_v9 = vld [vmem:[%s15317_s28 + $0x40] sm:$0xff]  }
 0x4dc   :  { %1633 = vrot.lane.b32.xlu1 %v11913_v2, %s11127_s0  ;;  %v1314_v17 = vpack.c.bf16 %v1294_v19, %v1293_v8  ;;  %v1274_v18 = vmul.f32 %v11863_v3, %v1252_v63 }
 0x4dd   :  { %1613 = vrot.lane.b32.xlu0 %v11918_v58, %s11127_s0  ;;  %v10238_v4 = vpop.eup %10237  ;;  %v1273_v14 = vmul.f32 %v11863_v3, %v1251_v62 }
 0x4de   :  { %v10240_v32 = vpop.eup %10239  ;;  %v1296_v43 = vadd.f32 %v11867_v60, %v1274_v18  ;;  %v1254_v6 = vmul.f32 %v10238_v4, %v11820_v24  ;;  %v11969_v24 = vld [vmem:[%s15317_s28 + $0x50] sm:$0xff]  }
 0x4df   :  { %v1295_v38 = vadd.f32 %v11867_v60, %v1273_v14  ;;  %v1253_v46 = vmul.f32 %v10240_v32, %v11814_v40 }
 0x4e0   :  { %1631 = vrot.lane.b32.xlu1 %v11928_v13, %s11127_s0  ;;  %v1276_v15 = vmul.f32 %v11863_v3, %v1254_v6 }
 0x4e1   :  { %1611 = vrot.lane.b32.xlu0 %v11933_v33, %s11127_s0  ;;  %v1315_v39 = vpack.c.bf16 %v1296_v43, %v1295_v38  ;;  %v1275_v48 = vmul.f32 %v11863_v3, %v1253_v46 }
 0x4e2   :  { %8693 = vmatmul.mubr.msk.bf16.gmra.mxu1 %vm391_vm1, %v1314_v17  ;;  %v1298_v40 = vadd.f32 %v11867_v60, %v1276_v15 }
 0x4e3   :  { %1467 = vmatprep.mubr.bf16.mxu1 %v15212_v54  ;;  %v1297_v56 = vadd.f32 %v11867_v60, %v1275_v48 }
 0x4e4   :  { %1629 = vrot.lane.b32.xlu1 %v11941_v61, %s11127_s0 }
 0x4e5   :  { %1609 = vrot.lane.b32.xlu0 %v11946_v23, %s11127_s0  ;;  %v1316_v22 = vpack.c.bf16 %v1298_v40, %v1297_v56 }
 0x4e8   :  { %1627 = vrot.lane.b32.xlu1 %v11956_v44, %s11127_s0 }
 0x4e9   :  { %1607 = vrot.lane.b32.xlu0 %v11961_v37, %s11127_s0 }
 0x4ea   :  { %8694 = vmatmul.mubr.msk.bf16.gmra.mxu1 %vm391_vm1, %v1315_v39 }
 0x4eb   :  { %1477 = vmatprep.mubr.bf16.mxu1 %v15212_v54 }
 0x4ec   :  { %1625 = vrot.lane.b32.xlu1 %v11969_v24, %s11127_s0 }
 0x4ed   :  { %1605 = vrot.lane.b32.xlu0 %v11974_v45, %s11127_s0 }
 0x4f0   :  { %1623 = vrot.lane.b32.xlu1 %v11983_v53, %s11127_s0 }
 0x4f2   :  { %8695 = vmatmul.mubr.msk.bf16.gmra.mxu1 %vm391_vm1, %v1316_v22 }
 0x4f3   :  { %1487 = vmatprep.mubr.bf16.mxu1 %v15212_v54 }
 0x4f4   :  { %1621 = vrot.lane.b32.xlu1 %v11991_v9, %s11127_s0 }
 0x540   :  { %v1185_v5 = vpop.xlane.xlu0 %1184 }
 0x541   :  { %v1207_v1 = vmul.f32 0.015625, %v1185_v5 }
 0x543   :  { %v1223_v19 = vadd.f32 1e-05, %v1207_v1 }
 0x544   :  { %v1188_v63 = vpop.xlane.xlu1 %1187 }
 0x545   :  { %10241 = vrsqrt.f32 %v1223_v19  ;;  %v1208_v8 = vmul.f32 0.015625, %v1188_v63 }
 0x547   :  { %v1224_v62 = vadd.f32 1e-05, %v1208_v8 }
 0x548   :  { %v1191_v17 = vpop.xlane.xlu0 %1190 }
 0x549   :  { %10243 = vrsqrt.f32 %v1224_v62  ;;  %v1209_v18 = vmul.f32 0.015625, %v1191_v17 }
 0x54b   :  { %v1225_v4 = vadd.f32 1e-05, %v1209_v18 }
 0x54c   :  { %v1194_v32 = vpop.xlane.xlu1 %1193 }
 0x54d   :  { %10245 = vrsqrt.f32 %v1225_v4  ;;  %v1210_v14 = vmul.f32 0.015625, %v1194_v32 }
 0x54f   :  { %v1226_v43 = vadd.f32 1e-05, %v1210_v14 }
 0x551   :  { %10247 = vrsqrt.f32 %v1226_v43 }
 0x552   :  { %v10242_v6 = vpop.eup %10241 }
 0x553   :  { %v1255_v38 = vmul.f32 %v10242_v6, %v11842_v59 }
 0x555   :  { %v1277_v15 = vmul.f32 %v11863_v3, %v1255_v38 }
 0x556   :  { %v10244_v46 = vpop.eup %10243 }
 0x557   :  { %v1256_v39 = vmul.f32 %v10244_v46, %v11847_v16  ;;  %v1299_v56 = vadd.f32 %v11867_v60, %v1277_v15 }
 0x559   :  { %v1278_v48 = vmul.f32 %v11863_v3, %v1256_v39 }
 0x55a   :  { %v10246_v40 = vpop.eup %10245 }
 0x55b   :  { %v1300_v22 = vadd.f32 %v11867_v60, %v1278_v48  ;;  %v1257_v5 = vmul.f32 %v10246_v40, %v11853_v47  ;;  %v1319_v47 = vld [vmem:[%s15297_s18] sm:$0x3] }
 0x55c   :  { %v12014_v4 = vrot.slane %v1319_v47, %v11529_v28 }
 0x55d   :  { %v1317_v1 = vpack.c.bf16 %v1300_v22, %v1299_v56  ;;  %v1279_v16 = vmul.f32 %v11863_v3, %v1257_v5  ;;  %v12026_v5 = vpop.permute.xlu0 %1619 }
 0x55e   :  { %v10248_v19 = vpop.eup %10247 }
 0x55f   :  { %8696 = vmatmul.mubr.msk.bf16.gmra.mxu1 %vm391_vm1, %v1317_v1  ;;  %v1258_v59 = vmul.f32 %v10248_v19, %v11860_v57  ;;  %v1301_v8 = vadd.f32 %v11867_v60, %v1279_v16  ;;  %v12031_v16 = vrot.slane %v1319_v47, %v11523_v20 }
 0x560   :  { %1497 = vmatprep.mubr.bf16.mxu1 %v15212_v54 }
 0x561   :  { %v1280_v63 = vmul.f32 %v11863_v3, %v1258_v59 }
 0x563   :  { %v1302_v62 = vadd.f32 %v11867_v60, %v1280_v63  ;;  %v12022_v60 = vpop.permute.xlu1 %1635 }
 0x564   :  { %15318 = vst [vmem:[#allocation64_spill] sm:$0xff] %v12022_v60 }
 0x565   :  { %v1318_v17 = vpack.c.bf16 %v1302_v62, %v1301_v8  ;;  %v12033_v8 = vpop.permute.xlu0 %1615 }
 0x567   :  { %8697 = vmatmul.mubr.msk.bf16.gmra.mxu1 %vm391_vm1, %v1318_v17  ;;  %v12024_v48 = vpop.permute.xlu1 %1617 }
 0x56b   :  { %v12028_v1 = vpop.permute.xlu1 %1633 }
 0x56f   :  { %v12035_v62 = vpop.permute.xlu1 %1631 }
 0x58a   :  { %v1429_v18 = vpop.f32.mrf.mxu1 }
 0x58b   :  { %v1430_v14 = vadd.f32 %v1429_v18, %v12014_v4 }
 0x58c   :  { %v1431_v32 = vpop.f32.mrf.mxu1 }
 0x58e   :  { %v1433_v57 = vpop.f32.mrf.mxu1 }
 0x58f   :  { %v1434_v43 = vadd.f32 %v1433_v57, %v12014_v4 }
 0x590   :  { %v1435_v6 = vpop.f32.mrf.mxu1 }
 0x591   :  { %v12018_v3 = vpack.c.bf16 %v1434_v43, %v1430_v14 }
 0x592   :  { %v1439_v38 = vpop.f32.mrf.mxu1 }
 0x593   :  { %9098 = vmatprep.mubr.msk.bf16.mxu0 %vm391_vm1, %v12018_v3 }
 0x594   :  { %v1441_v46 = vpop.f32.mrf.mxu1 }
 0x596   :  { %v1443_v39 = vpop.f32.mrf.mxu1 }
 0x598   :  { %v1445_v15 = vpop.f32.mrf.mxu1 }
 0x599   :  { %v1446_v41 = vadd.f32 %v1445_v15, %v12031_v16 }
 0x59a   :  { %v1449_v40 = vpop.f32.mrf.mxu1 }
 0x59b   :  { %v1450_v47 = vadd.f32 %v1449_v40, %v12014_v4 }
 0x59c   :  { %v1451_v56 = vpop.f32.mrf.mxu1 }
 0x59d   :  { %v1452_v54 = vadd.f32 %v1451_v56, %v12031_v16 }
 0x59e   :  { %v1453_v22 = vpop.f32.mrf.mxu1 }
 0x59f   :  { %v1454_v57 = vadd.f32 %v1453_v22, %v12014_v4 }
 0x5a0   :  { %v1455_v19 = vpop.f32.mrf.mxu1 }
 0x5a1   :  { %v1456_v17 = vadd.f32 %v1455_v19, %v12031_v16  ;;  %v1444_v19 = vadd.f32 %v1443_v39, %v12014_v4  ;;  %v1442_v39 = vadd.f32 %v1441_v46, %v12031_v16 }
 0x5a2   :  { %v1459_v59 = vpop.f32.mrf.mxu1 }
 0x5a3   :  { %v1460_v14 = vadd.f32 %v1459_v59, %v12014_v4  ;;  %v12049_v22 = vpack.c.bf16 %v1456_v17, %v1452_v54  ;;  %v12051_v59 = vpack.c.bf16 %v1454_v57, %v1450_v47  ;;  %v1436_v54 = vadd.f32 %v1435_v6, %v12031_v16 }
 0x5a4   :  { %v1461_v63 = vpop.f32.mrf.mxu1  ;;  %v12074_v17 = vpack.c.bf16 %v1446_v41, %v1442_v39  ;;  %v1432_v6 = vadd.f32 %v1431_v32, %v12031_v16 }
 0x5a5   :  { %v1462_v25 = vadd.f32 %v1461_v63, %v12031_v16  ;;  %v12059_v63 = vpop.permute.xlu1 %1629  ;;  %v1667_v57 = vmul.bf16 %v12028_v1, %v12051_v59  ;;  %v1691_v41 = vmul.bf16 %v11898_v49, %v12049_v22 }
 0x5a6   :  { %v1463_v18 = vpop.f32.mrf.mxu1  ;;  %v1698_v32 = vmul.bf16 %v11928_v13, %v12074_v17  ;;  %v1690_v39 = vmul.bf16 %v11903_v51, %v12074_v17 }
 0x5a7   :  { %v1464_v43 = vadd.f32 %v1463_v18, %v12014_v4 }
 0x5a8   :  { %v1465_v0 = vpop.f32.mrf.mxu1  ;;  %v1755_v13 = vsel %vm391_vm1, %v1698_v32, %v12035_v62  ;;  %v1723_v51 = vsel %vm391_vm1, %v1690_v39, %v12033_v8  ;;  %v1694_v39 = vmul.bf16 %v11983_v53, %v12074_v17  ;;  %v1686_v53 = vmul.bf16 %v11961_v37, %v12074_v17 }
 0x5a9   :  { %v12044_v28 = vpack.c.bf16 %v1464_v43, %v1460_v14  ;;  %v1466_v20 = vadd.f32 %v1465_v0, %v12031_v16  ;;  %v12061_v14 = vpop.permute.xlu0 %1613  ;;  %v1440_v0 = vadd.f32 %v1439_v38, %v12014_v4  ;;  %v1699_v38 = vmul.bf16 %v11913_v2, %v12049_v22  ;;  %v12091_v2 = vpop.permute.xlu1 %1627 }
 0x5aa   :  { %v1659_v43 = vmul.bf16 %v12024_v48, %v12051_v59 }
 0x5ab   :  { %v12053_v18 = vpack.c.bf16 %v1466_v20, %v1462_v25  ;;  %v1668_v56 = vmul.bf16 %v12022_v60, %v12044_v28  ;;  %v1660_v40 = vmul.bf16 %v12026_v5, %v12044_v28  ;;  %v12072_v15 = vpack.c.bf16 %v1444_v19, %v1440_v0 }
 0x5ac   :  { %v12095_v19 = vpack.c.bf16 %v1436_v54, %v1432_v6  ;;  %v1727_v0 = vsel %vm391_vm1, %v1691_v41, %v12024_v48  ;;  %v1657_v54 = vmul.bf16 %v12061_v14, %v12018_v3 }
 0x5ad   :  { %1811 = vrot.lane.b32.xlu1 %v1668_v56, %s11127_s0  ;;  %1795 = vrot.lane.b32.xlu0 %v1660_v40, %s11127_s0  ;;  %v1700_v20 = vmul.bf16 %v11885_v42, %v12053_v18  ;;  %v1692_v25 = vmul.bf16 %v11888_v10, %v12053_v18  ;;  %v12093_v47 = vpop.permute.xlu0 %1611  ;;  %v1759_v56 = vsel %vm391_vm1, %v1699_v38, %v12028_v1  ;;  %v12119_v38 = vpop.permute.xlu1 %1625 }
 0x5ae   :  { %v1666_v40 = vmul.bf16 %v12035_v62, %v12072_v15  ;;  %v1658_v49 = vmul.bf16 %v12033_v8, %v12072_v15  ;;  %v1656_v6 = vmul.bf16 %v12093_v47, %v12044_v28  ;;  %v1685_v37 = vmul.bf16 %v11974_v45, %v12095_v19 }
 0x5af   :  { %v1763_v46 = vsel %vm391_vm1, %v1700_v20, %v12022_v60  ;;  %v1731_v10 = vsel %vm391_vm1, %v1692_v25, %v12026_v5  ;;  %v1697_v20 = vmul.bf16 %v11941_v61, %v12095_v19  ;;  %v1665_v25 = vmul.bf16 %v12059_v63, %v12018_v3 }
 0x5b0   :  { %9106 = vmatprep.subr.bf16.mxu1 %v1763_v46  ;;  %v1689_v61 = vmul.bf16 %v11918_v58, %v12095_v19  ;;  %v1688_v58 = vmul.bf16 %v11933_v33, %v12053_v18 }
 0x5b1   :  { %1809 = vrot.lane.b32.xlu1 %v1667_v57, %s11127_s0  ;;  %1793 = vrot.lane.b32.xlu0 %v1659_v43, %s11127_s0  ;;  %v12121_v46 = vpop.permute.xlu0 %1609  ;;  %v1751_v57 = vsel %vm391_vm1, %v1697_v20, %v12059_v63  ;;  %v1696_v43 = vmul.bf16 %v11956_v44, %v12053_v18  ;;  %v1687_v18 = vmul.bf16 %v11946_v23, %v12049_v22 }
 0x5b2   :  { %9107 = vmatpush3.bf16.msra.mxu1 %v1731_v10  ;;  %15319 = vst [vmem:[#allocation65_spill] sm:$0xff] %v12121_v46  ;;  %v1664_v10 = vmul.bf16 %v12091_v2, %v12044_v28  ;;  %v1719_v41 = vsel %vm391_vm1, %v1689_v61, %v12061_v14  ;;  %v1715_v33 = vsel %vm391_vm1, %v1688_v58, %v12093_v47 }
 0x5b3   :  { %9108 = vmatprep.subr.bf16.mxu1 %v1759_v56  ;;  %v12143_v56 = vpop.permute.xlu1 %1623  ;;  %v1747_v32 = vsel %vm391_vm1, %v1696_v43, %v12091_v2  ;;  %v1711_v23 = vsel %vm391_vm1, %v1687_v18, %v12121_v46 }
 0x5b4   :  { %15320 = vst [vmem:[#allocation66_spill] sm:$0xff] %v12143_v56 }
 0x5b5   :  { %1807 = vrot.lane.b32.xlu1 %v1666_v40, %s11127_s0  ;;  %1791 = vrot.lane.b32.xlu0 %v1658_v49, %s11127_s0  ;;  %v12145_v44 = vpop.permute.xlu0 %1607  ;;  %v1695_v40 = vmul.bf16 %v11969_v24, %v12049_v22  ;;  %v1663_v49 = vmul.bf16 %v12119_v38, %v12051_v59  ;;  %v1739_v22 = vsel %vm391_vm1, %v1694_v39, %v12143_v56 }
 0x5b6   :  { %9109 = vmatpush3.bf16.msra.mxu1 %v1727_v0  ;;  %15321 = vst [vmem:[#allocation67_spill] sm:$0xff] %v12145_v44  ;;  %v1655_v0 = vmul.bf16 %v12121_v46, %v12051_v59  ;;  %v1654_v20 = vmul.bf16 %v12145_v44, %v12072_v15  ;;  %v1707_v43 = vsel %vm391_vm1, %v1686_v53, %v12145_v44 }
 0x5b7   :  { %9110 = vmatprep.subr.bf16.mxu1 %v1755_v13  ;;  %v1743_v24 = vsel %vm391_vm1, %v1695_v40, %v12119_v38  ;;  %v1662_v13 = vmul.bf16 %v12143_v56, %v12072_v15 }
 0x5b9   :  { %1805 = vrot.lane.b32.xlu1 %v1665_v25, %s11127_s0  ;;  %1789 = vrot.lane.b32.xlu0 %v1657_v54, %s11127_s0  ;;  %v12169_v25 = vpop.permute.xlu1 %1621  ;;  %v12171_v54 = vpop.permute.xlu0 %1605 }
 0x5ba   :  { %9111 = vmatpush3.bf16.msra.mxu1 %v1723_v51  ;;  %15322 = vst [vmem:[#allocation68_spill] sm:$0xff] %v12169_v25  ;;  %15323 = vst [vmem:[#allocation69_spill] sm:$0xff] %v12171_v54  ;;  %v1693_v51 = vmul.bf16 %v11991_v9, %v12095_v19  ;;  %v1661_v61 = vmul.bf16 %v12169_v25, %v12018_v3  ;;  %v1703_v17 = vsel %vm391_vm1, %v1685_v37, %v12171_v54 }
 0x5bb   :  { %9112 = vmatprep.subr.bf16.mxu1 %v1751_v57  ;;  %v1653_v57 = vmul.bf16 %v12171_v54, %v12018_v3 }
 0x5bc   :  { %v1735_v9 = vsel %vm391_vm1, %v1693_v51, %v12169_v25 }
 0x5bd   :  { %1803 = vrot.lane.b32.xlu1 %v1664_v10, %s11127_s0  ;;  %1787 = vrot.lane.b32.xlu0 %v1656_v6, %s11127_s0  ;;  %v1469_v10 = vpop.f32.mrf.mxu1 }
 0x5be   :  { %9113 = vmatpush3.bf16.msra.mxu1 %v1719_v41 }
 0x5bf   :  { %9114 = vmatprep.subr.bf16.mxu1 %v1747_v32  ;;  %v12197_v6 = vpop.f32.mrf.mxu1 }
 0x5c1   :  { %1801 = vrot.lane.b32.xlu1 %v1663_v49, %s11127_s0  ;;  %1785 = vrot.lane.b32.xlu0 %v1655_v0, %s11127_s0  ;;  %v1473_v41 = vpop.f32.mrf.mxu1 }
 0x5c2   :  { %9115 = vmatpush3.bf16.msra.mxu1 %v1715_v33 }
 0x5c3   :  { %9116 = vmatprep.subr.bf16.mxu1 %v1743_v24  ;;  %v12199_v58 = vpop.f32.mrf.mxu1 }
 0x5c5   :  { %1799 = vrot.lane.b32.xlu1 %v1662_v13, %s11127_s0  ;;  %1783 = vrot.lane.b32.xlu0 %v1654_v20, %s11127_s0  ;;  %v1479_v32 = vpop.f32.mrf.mxu1 }
 0x5c6   :  { %9117 = vmatpush3.bf16.msra.mxu1 %v1711_v23 }
 0x5c7   :  { %9118 = vmatprep.subr.bf16.mxu1 %v1739_v22  ;;  %v12201_v40 = vpop.f32.mrf.mxu1 }
 0x5c9   :  { %1797 = vrot.lane.b32.xlu1 %v1661_v61, %s11127_s0  ;;  %1781 = vrot.lane.b32.xlu0 %v1653_v57, %s11127_s0  ;;  %v1483_v49 = vpop.f32.mrf.mxu1 }
 0x5ca   :  { %9119 = vmatpush3.bf16.msra.mxu1 %v1707_v43 }
 0x5cb   :  { %9120 = vmatprep.subr.bf16.mxu1 %v1735_v9  ;;  %v12203_v45 = vpop.f32.mrf.mxu1 }
 0x5ce   :  { %9121 = vmatpush3.bf16.msra.mxu1 %v1703_v17 }
 0x61f   :  { %v1812_v19 = vpop.permute.xlu1 %1811  ;;  %v1489_v0 = vpop.f32.mrf.mxu1 }
 0x620   :  { %v1796_v33 = vpop.permute.xlu0 %1795  ;;  %9984 = vmatprep.subr.msk.bf16.mxu0 %vm391_vm1, %v1812_v19  ;;  %v1490_v19 = vadd.f32 %v1489_v0, %v12014_v4 }
 0x621   :  { %v1847_v18 = vsel %vm391_vm1, %v1796_v33, 0  ;;  %v12207_v24 = vpop.f32.mrf.mxu1 }
 0x622   :  { %9083 = vmatpush3.bf16.xpose.msra.mxu0 %v1847_v18 }
 0x623   :  { %v1810_v39 = vpop.permute.xlu1 %1809  ;;  %v1493_v13 = vpop.f32.mrf.mxu1 }
 0x624   :  { %9985 = vmatprep.subr.msk.bf16.mxu0 %vm391_vm1, %v1810_v39  ;;  %v1794_v23 = vpop.permute.xlu0 %1793  ;;  %v1494_v43 = vadd.f32 %v1493_v13, %v12014_v4 }
 0x625   :  { %v12210_v20 = vpop.f32.mrf.mxu1  ;;  %v1844_v22 = vsel %vm391_vm1, %v1794_v23, 0 }
 0x627   :  { %v1499_v53 = vpop.f32.mrf.mxu1  ;;  %v1808_v61 = vpop.permute.xlu1 %1807 }
 0x628   :  { %v1500_v37 = vadd.f32 %v1499_v53, %v12014_v4  ;;  %v1792_v33 = vpop.permute.xlu0 %1791 }
 0x629   :  { %v1501_v51 = vpop.f32.mrf.mxu1  ;;  %v1841_v0 = vsel %vm391_vm1, %v1792_v33, 0 }
 0x62a   :  { %9085 = vmatpush3.bf16.xpose.msra.mxu0 %v1844_v22  ;;  %v1502_v18 = vadd.f32 %v1501_v51, %v12031_v16  ;;  %v1484_v22 = vadd.f32 %v1483_v49, %v12014_v4  ;;  %v1480_v51 = vadd.f32 %v1479_v32, %v12014_v4 }
 0x62b   :  { %9986 = vmatprep.subr.msk.bf16.mxu0 %vm391_vm1, %v1808_v61  ;;  %v1503_v57 = vpop.f32.mrf.mxu1  ;;  %v12223_v61 = vpack.c.bf16 %v1494_v43, %v1490_v19  ;;  %v1474_v43 = vadd.f32 %v1473_v41, %v12014_v4 }
 0x62c   :  { %v1504_v9 = vadd.f32 %v1503_v57, %v12014_v4  ;;  %v1806_v57 = vpop.permute.xlu1 %1805  ;;  %v1790_v19 = vpop.permute.xlu0 %1789 }
 0x62d   :  { %v1505_v17 = vpop.f32.mrf.mxu1  ;;  %v2161_v32 = vmul.bf16 %v12223_v61, %v12028_v1 }
 0x62e   :  { %v12219_v39 = vpack.c.bf16 %v1504_v9, %v1500_v37  ;;  %v1506_v23 = vadd.f32 %v1505_v17, %v12031_v16  ;;  %v12239_v37 = vpack.c.bf16 %v1484_v22, %v1480_v51  ;;  %v2153_v17 = vmul.bf16 %v12223_v61, %v12024_v48 }
 0x630   :  { %v12225_v29 = vpack.c.bf16 %v1506_v23, %v1502_v18  ;;  %v2162_v13 = vmul.bf16 %v12219_v39, %v12022_v60  ;;  %v2154_v53 = vmul.bf16 %v12219_v39, %v12026_v5  ;;  %v2160_v33 = vmul.bf16 %v12239_v37, %v12035_v62  ;;  %v1804_v22 = vpop.permute.xlu1 %1803 }
 0x631   :  { %v1838_v18 = vsel %vm391_vm1, %v1790_v19, 0  ;;  %v2152_v23 = vmul.bf16 %v12239_v37, %v12033_v8  ;;  %v2150_v51 = vmul.bf16 %v12219_v39, %v12093_v47 }
 0x632   :  { %9087 = vmatpush3.bf16.xpose.msra.mxu0 %v1841_v0  ;;  %2273 = vrot.lane.b32.xlu1 %v2162_v13, %s11127_s0  ;;  %v2178_v49 = vmul.bf16 %v11885_v42, %v12225_v29  ;;  %v1470_v42 = vadd.f32 %v1469_v10, %v12014_v4  ;;  %v1788_v13 = vpop.permute.xlu0 %1787 }
 0x633   :  { %2257 = vrot.lane.b32.xlu0 %v2154_v53, %s11127_s0  ;;  %9987 = vmatprep.subr.msk.bf16.mxu0 %vm391_vm1, %v1806_v57  ;;  %v2158_v53 = vmul.bf16 %v12219_v39, %v12091_v2  ;;  %v1835_v0 = vsel %vm391_vm1, %v1788_v13, 0 }
 0x634   :  { %v2225_v9 = vsel %vm391_vm1, %v2178_v49, %v12022_v60  ;;  %v12250_v41 = vpack.c.bf16 %v1474_v43, %v1470_v42  ;;  %v1802_v57 = vpop.permute.xlu1 %1801  ;;  %v2157_v49 = vmul.bf16 %v12223_v61, %v12119_v38  ;;  %v2149_v43 = vmul.bf16 %v12223_v61, %v12121_v46 }
 0x635   :  { %9170 = vmatprep.subr.bf16.mxu1 %v2225_v9  ;;  %v2148_v42 = vmul.bf16 %v12239_v37, %v12145_v44 }
 0x636   :  { %2271 = vrot.lane.b32.xlu1 %v2161_v32, %s11127_s0  ;;  %v2159_v4 = vmul.bf16 %v12250_v41, %v12059_v63  ;;  %v2151_v10 = vmul.bf16 %v12250_v41, %v12061_v14  ;;  %v1786_v9 = vpop.permute.xlu0 %1785  ;;  %v2156_v32 = vmul.bf16 %v12239_v37, %v12143_v56 }
 0x637   :  { %2255 = vrot.lane.b32.xlu0 %v2153_v17, %s11127_s0  ;;  %v1832_v17 = vsel %vm391_vm1, %v1786_v9, 0 }
 0x638   :  { %v1800_v19 = vpop.permute.xlu1 %1799 }
 0x63a   :  { %9089 = vmatpush3.bf16.xpose.msra.mxu0 %v1838_v18  ;;  %2269 = vrot.lane.b32.xlu1 %v2160_v33, %s11127_s0  ;;  %v2155_v33 = vmul.bf16 %v12250_v41, %v12169_v25  ;;  %v2147_v18 = vmul.bf16 %v12250_v41, %v12171_v54 }
 0x63b   :  { %2253 = vrot.lane.b32.xlu0 %v2152_v23, %s11127_s0  ;;  %9988 = vmatprep.subr.msk.bf16.mxu0 %vm391_vm1, %v1804_v22  ;;  %v1784_v23 = vpop.permute.xlu0 %1783 }
 0x63c   :  { %v1829_v22 = vsel %vm391_vm1, %v1784_v23, 0 }
 0x63e   :  { %2267 = vrot.lane.b32.xlu1 %v2159_v4, %s11127_s0  ;;  %v1798_v4 = vpop.permute.xlu1 %1797 }
 0x63f   :  { %2251 = vrot.lane.b32.xlu0 %v2151_v10, %s11127_s0  ;;  %v1782_v10 = vpop.permute.xlu0 %1781 }
 0x640   :  { %v1826_v13 = vsel %vm391_vm1, %v1782_v10, 0 }
 0x642   :  { %9091 = vmatpush3.bf16.xpose.msra.mxu0 %v1835_v0  ;;  %2265 = vrot.lane.b32.xlu1 %v2158_v53, %s11127_s0 }
 0x643   :  { %2249 = vrot.lane.b32.xlu0 %v2150_v51, %s11127_s0  ;;  %9989 = vmatprep.subr.msk.bf16.mxu0 %vm391_vm1, %v1802_v57 }
 0x646   :  { %2263 = vrot.lane.b32.xlu1 %v2157_v49, %s11127_s0 }
 0x647   :  { %2247 = vrot.lane.b32.xlu0 %v2149_v43, %s11127_s0 }
 0x64a   :  { %9093 = vmatpush3.bf16.xpose.msra.mxu0 %v1832_v17  ;;  %2261 = vrot.lane.b32.xlu1 %v2156_v32, %s11127_s0 }
 0x64b   :  { %2245 = vrot.lane.b32.xlu0 %v2148_v42, %s11127_s0  ;;  %9990 = vmatprep.subr.msk.bf16.mxu0 %vm391_vm1, %v1800_v19 }
 0x64e   :  { %2259 = vrot.lane.b32.xlu1 %v2155_v33, %s11127_s0 }
 0x64f   :  { %2243 = vrot.lane.b32.xlu0 %v2147_v18, %s11127_s0 }
 0x652   :  { %9095 = vmatpush3.bf16.xpose.msra.mxu0 %v1829_v22 }
 0x653   :  { %9991 = vmatprep.subr.msk.bf16.mxu0 %vm391_vm1, %v1798_v4 }
 0x65a   :  { %9097 = vmatpush3.bf16.xpose.msra.mxu0 %v1826_v13 }
 0x661   :  { %9099 = vmatmul.mubr.msk.bf16.vlgmr.msra.gmra.mxu0 %vm391_vm1, %v12018_v3 }
 0x662   :  { %9100 = vmatprep.mubr.msk.bf16.mxu0 %vm391_vm1, %v12072_v15 }
 0x669   :  { %9101 = vmatmul.mubr.msk.bf16.gmra.mxu0 %vm391_vm1, %v12072_v15 }
 0x66a   :  { %9102 = vmatprep.mubr.msk.bf16.mxu0 %vm391_vm1, %v12051_v59 }
 0x671   :  { %9103 = vmatmul.mubr.msk.bf16.gmra.mxu0 %vm391_vm1, %v12051_v59 }
 0x672   :  { %9104 = vmatprep.mubr.msk.bf16.mxu0 %vm391_vm1, %v12044_v28 }
 0x679   :  { %9105 = vmatmul.mubr.msk.bf16.gmra.mxu0 %vm391_vm1, %v12044_v28 }
 0x67a   :  { %9162 = vmatprep.mubr.msk.bf16.mxu0 %vm391_vm1, %v12250_v41 }
 0x6a4   :  { %v2274_v3 = vpop.permute.xlu1 %2273 }
 0x6a5   :  { %v2258_v53 = vpop.permute.xlu0 %2257  ;;  %9992 = vmatprep.subr.msk.bf16.mxu0 %vm391_vm1, %v2274_v3 }
 0x6a6   :  { %v2309_v15 = vsel %vm391_vm1, %v2258_v53, 0 }
 0x6a7   :  { %9147 = vmatpush3.bf16.xpose.msra.mxu0 %v2309_v15 }
 0x6a8   :  { %v2272_v0 = vpop.permute.xlu1 %2271 }
 0x6a9   :  { %9993 = vmatprep.subr.msk.bf16.mxu0 %vm391_vm1, %v2272_v0  ;;  %v2256_v59 = vpop.permute.xlu0 %2255 }
 0x6aa   :  { %v2306_v51 = vsel %vm391_vm1, %v2256_v59, 0 }
 0x6ac   :  { %v2270_v57 = vpop.permute.xlu1 %2269 }
 0x6ad   :  { %v2254_v28 = vpop.permute.xlu0 %2253 }
 0x6ae   :  { %v2303_v49 = vsel %vm391_vm1, %v2254_v28, 0 }
 0x6af   :  { %9149 = vmatpush3.bf16.xpose.msra.mxu0 %v2306_v51 }
 0x6b0   :  { %9994 = vmatprep.subr.msk.bf16.mxu0 %vm391_vm1, %v2270_v57  ;;  %v2268_v43 = vpop.permute.xlu1 %2267 }
 0x6b1   :  { %v2252_v9 = vpop.permute.xlu0 %2251 }
 0x6b2   :  { %v2300_v32 = vsel %vm391_vm1, %v2252_v9, 0 }
 0x6b4   :  { %v2266_v17 = vpop.permute.xlu1 %2265 }
 0x6b5   :  { %v2250_v42 = vpop.permute.xlu0 %2249 }
 0x6b6   :  { %v2297_v19 = vsel %vm391_vm1, %v2250_v42, 0 }
 0x6b7   :  { %9151 = vmatpush3.bf16.xpose.msra.mxu0 %v2303_v49 }
 0x6b8   :  { %9995 = vmatprep.subr.msk.bf16.mxu0 %vm391_vm1, %v2268_v43  ;;  %v2264_v33 = vpop.permute.xlu1 %2263 }
 0x6b9   :  { %v2248_v18 = vpop.permute.xlu0 %2247 }
 0x6ba   :  { %v2294_v23 = vsel %vm391_vm1, %v2248_v18, 0 }
 0x6bc   :  { %v2262_v22 = vpop.permute.xlu1 %2261 }
 0x6bd   :  { %v2246_v4 = vpop.permute.xlu0 %2245 }
 0x6be   :  { %v2291_v10 = vsel %vm391_vm1, %v2246_v4, 0 }
 0x6bf   :  { %9153 = vmatpush3.bf16.xpose.msra.mxu0 %v2300_v32 }
 0x6c0   :  { %9996 = vmatprep.subr.msk.bf16.mxu0 %vm391_vm1, %v2266_v17  ;;  %v2260_v13 = vpop.permute.xlu1 %2259 }
 0x6c1   :  { %v2244_v3 = vpop.permute.xlu0 %2243 }
 0x6c2   :  { %v2288_v53 = vsel %vm391_vm1, %v2244_v3, 0 }
 0x6c7   :  { %9155 = vmatpush3.bf16.xpose.msra.mxu0 %v2297_v19 }
 0x6c8   :  { %9997 = vmatprep.subr.msk.bf16.mxu0 %vm391_vm1, %v2264_v33 }
 0x6cf   :  { %9157 = vmatpush3.bf16.xpose.msra.mxu0 %v2294_v23 }
 0x6d0   :  { %9998 = vmatprep.subr.msk.bf16.mxu0 %vm391_vm1, %v2262_v22 }
 0x6d7   :  { %9159 = vmatpush3.bf16.xpose.msra.mxu0 %v2291_v10 }
 0x6d8   :  { %9999 = vmatprep.subr.msk.bf16.mxu0 %vm391_vm1, %v2260_v13 }
 0x6df   :  { %9161 = vmatpush3.bf16.xpose.msra.mxu0 %v2288_v53 }
 0x6e6   :  { %9163 = vmatmul.mubr.msk.bf16.vlgmr.msra.gmra.mxu0 %vm391_vm1, %v12250_v41 }
 0x6e7   :  { %9164 = vmatprep.mubr.msk.bf16.mxu0 %vm391_vm1, %v12239_v37 }
 0x6ee   :  { %9165 = vmatmul.mubr.msk.bf16.gmra.mxu0 %vm391_vm1, %v12239_v37 }
 0x6ef   :  { %9166 = vmatprep.mubr.msk.bf16.mxu0 %vm391_vm1, %v12223_v61 }
 0x6f6   :  { %9167 = vmatmul.mubr.msk.bf16.gmra.mxu0 %vm391_vm1, %v12223_v61 }
 0x6f7   :  { %9168 = vmatprep.mubr.msk.bf16.mxu0 %vm391_vm1, %v12219_v39 }
 0x6fe   :  { %9169 = vmatmul.mubr.msk.bf16.gmra.mxu0 %vm391_vm1, %v12219_v39 }
 0x721   :  { %v1907_v15 = vpop.f32.mrf.mxu0 }
 0x723   :  { %v1909_v41 = vpop.f32.mrf.mxu0 }
 0x724   :  { %v1946_v0 = vmax.f32 %v1907_v15, %v1909_v41 }
 0x725   :  { %v1911_v59 = vpop.f32.mrf.mxu0 }
 0x726   :  { %1947 = vmax.xlane.f32.xlu0 %v1946_v0 }
 0x727   :  { %v1913_v51 = vpop.f32.mrf.mxu0 }
 0x728   :  { %v1949_v57 = vmax.f32 %v1911_v59, %v1913_v51 }
 0x729   :  { %v1917_v37 = vpop.f32.mrf.mxu0 }
 0x72a   :  { %1950 = vmax.xlane.f32.xlu1 %v1949_v57 }
 0x72b   :  { %v1919_v28 = vpop.f32.mrf.mxu0 }
 0x72c   :  { %v1952_v49 = vmax.f32 %v1917_v37, %v1919_v28 }
 0x72d   :  { %v12343_v43 = vpop.f32.mrf.mxu0 }
 0x72e   :  { %1953 = vmax.xlane.f32.xlu0 %v1952_v49 }
 0x72f   :  { %v12345_v61 = vpop.f32.mrf.mxu0 }
 0x730   :  { %v1955_v9 = vmax.f32 %v12343_v43, %v12345_v61 }
 0x731   :  { %v12349_v39 = vpop.f32.mrf.mxu0 }
 0x732   :  { %1956 = vmax.xlane.f32.xlu0 %v1955_v9 }
 0x733   :  { %v12351_v32 = vpop.f32.mrf.mxu0 }
 0x734   :  { %v1958_v17 = vmax.f32 %v12349_v39, %v12351_v32 }
 0x735   :  { %v12355_v42 = vpop.f32.mrf.mxu0 }
 0x736   :  { %1959 = vmax.xlane.f32.xlu0 %v1958_v17 }
 0x737   :  { %v12357_v19 = vpop.f32.mrf.mxu0 }
 0x738   :  { %v1961_v33 = vmax.f32 %v12355_v42, %v12357_v19 }
 0x739   :  { %v12361_v18 = vpop.f32.mrf.mxu0 }
 0x73a   :  { %1962 = vmax.xlane.f32.xlu1 %v1961_v33 }
 0x73b   :  { %v12363_v23 = vpop.f32.mrf.mxu0 }
 0x73c   :  { %v1964_v22 = vmax.f32 %v12361_v18, %v12363_v23 }
 0x73d   :  { %v12367_v4 = vpop.f32.mrf.mxu0 }
 0x73e   :  { %1965 = vmax.xlane.f32.xlu0 %v1964_v22 }
 0x73f   :  { %v12369_v10 = vpop.f32.mrf.mxu0 }
 0x740   :  { %v1967_v13 = vmax.f32 %v12367_v4, %v12369_v10 }
 0x742   :  { %1968 = vmax.xlane.f32.xlu1 %v1967_v13 }
 0x7a6   :  { %v12373_v3 = vpop.f32.mrf.mxu0 }
 0x7a8   :  { %v12375_v53 = vpop.f32.mrf.mxu0 }
 0x7a9   :  { %v2408_v0 = vmax.f32 %v12373_v3, %v12375_v53 }
 0x7aa   :  { %v12379_v57 = vpop.f32.mrf.mxu0 }
 0x7ab   :  { %2409 = vmax.xlane.f32.xlu0 %v2408_v0 }
 0x7ac   :  { %v12381_v49 = vpop.f32.mrf.mxu0 }
 0x7ad   :  { %v2411_v9 = vmax.f32 %v12379_v57, %v12381_v49 }
 0x7ae   :  { %v12385_v17 = vpop.f32.mrf.mxu0 }
 0x7af   :  { %2412 = vmax.xlane.f32.xlu1 %v2411_v9  ;;  %v1948_v33 = vpop.xlane.xlu0 %1947 }
 0x7b0   :  { %v1970_v22 = vsub.f32 %v1907_v15, %v1948_v33  ;;  %v1971_v13 = vsub.f32 %v1909_v41, %v1948_v33  ;;  %v12387_v60 = vpop.f32.mrf.mxu0 }
 0x7b1   :  { %v2414_v34 = vmax.f32 %v12385_v17, %v12387_v60 }
 0x7b2   :  { %v1986_v12 = vmul.f32 1.442695, %v1970_v22  ;;  %v12391_v27 = vpop.f32.mrf.mxu0  ;;  %v1988_v0 = vmul.f32 1.442695, %v1971_v13 }
 0x7b3   :  { %v1951_v55 = vpop.xlane.xlu1 %1950  ;;  %2415 = vmax.xlane.f32.xlu0 %v2414_v34 }
 0x7b4   :  { %v1972_v26 = vsub.f32 %v1911_v59, %v1951_v55  ;;  %v1973_v52 = vsub.f32 %v1913_v51, %v1951_v55  ;;  %v12393_v50 = vpop.f32.mrf.mxu0  ;;  %10249 = vpow2.f32 %v1986_v12 }
 0x7b5   :  { %v2417_v9 = vmax.f32 %v12391_v27, %v12393_v50  ;;  %10251 = vpow2.f32 %v1988_v0 }
 0x7b6   :  { %v1990_v15 = vmul.f32 1.442695, %v1972_v26  ;;  %v1992_v41 = vmul.f32 1.442695, %v1973_v52  ;;  %v12397_v33 = vpop.f32.mrf.mxu0 }
 0x7b7   :  { %2418 = vmax.xlane.f32.xlu1 %v2417_v9  ;;  %v1954_v22 = vpop.xlane.xlu0 %1953 }
 0x7b8   :  { %10253 = vpow2.f32 %v1990_v15  ;;  %v1974_v35 = vsub.f32 %v1917_v37, %v1954_v22  ;;  %v1975_v13 = vsub.f32 %v1919_v28, %v1954_v22  ;;  %v12399_v11 = vpop.f32.mrf.mxu0 }
 0x7b9   :  { %10255 = vpow2.f32 %v1992_v41  ;;  %v2420_v55 = vmax.f32 %v12397_v33, %v12399_v11 }
 0x7ba   :  { %v1994_v34 = vmul.f32 1.442695, %v1974_v35  ;;  %v12403_v59 = vpop.f32.mrf.mxu0  ;;  %v1996_v12 = vmul.f32 1.442695, %v1975_v13  ;;  %v1496_v35 = vadd.f32 %v12210_v20, %v12031_v16  ;;  %v1492_v13 = vadd.f32 %v12207_v24, %v12031_v16 }
 0x7bb   :  { %2421 = vmax.xlane.f32.xlu0 %v2420_v55  ;;  %v1957_v52 = vpop.xlane.xlu0 %1956 }
 0x7bc   :  { %v1976_v26 = vsub.f32 %v12343_v43, %v1957_v52  ;;  %v1977_v51 = vsub.f32 %v12345_v61, %v1957_v52  ;;  %v12407_v0 = vpop.f32.mrf.mxu0  ;;  %10257 = vpow2.f32 %v1994_v34  ;;  %v1486_v52 = vadd.f32 %v12203_v45, %v12031_v16 }
 0x7bd   :  { %v2423_v37 = vmax.f32 %v12403_v59, %v12407_v0  ;;  %10259 = vpow2.f32 %v1996_v12  ;;  %v1482_v45 = vadd.f32 %v12201_v40, %v12031_v16 }
 0x7be   :  { %v1998_v28 = vmul.f32 1.442695, %v1976_v26  ;;  %v2000_v9 = vmul.f32 1.442695, %v1977_v51  ;;  %v12411_v15 = vpop.f32.mrf.mxu0 }
 0x7bf   :  { %2424 = vmax.xlane.f32.xlu1 %v2423_v37  ;;  %v1960_v41 = vpop.xlane.xlu0 %1959 }
 0x7c0   :  { %10261 = vpow2.f32 %v1998_v28  ;;  %v1978_v43 = vsub.f32 %v12349_v39, %v1960_v41  ;;  %v1979_v61 = vsub.f32 %v12351_v32, %v1960_v41  ;;  %v12417_v22 = vpop.f32.mrf.mxu0  ;;  %v12427_v39 = vpack.c.bf16 %v1496_v35, %v1492_v13 }
 0x7c1   :  { %10263 = vpow2.f32 %v2000_v9  ;;  %v2426_v55 = vmax.f32 %v12411_v15, %v12417_v22  ;;  %v10250_v12 = vpop.eup %10249  ;;  %v1476_v41 = vadd.f32 %v12199_v58, %v12031_v16 }
 0x7c2   :  { %v2002_v34 = vmul.f32 1.442695, %v1978_v43  ;;  %v12423_v20 = vpop.f32.mrf.mxu0  ;;  %v2004_v32 = vmul.f32 1.442695, %v1979_v61  ;;  %v10252_v51 = vpop.eup %10251  ;;  %v10729_v43 = vld [vmem:[%s15317_s28 + $0x38] sm:$0xff]   ;;  %v2177_v40 = vmul.bf16 %v10730_v31, %v12427_v39 }
 0x7c3   :  { %v1963_v26 = vpop.xlane.xlu1 %1962  ;;  %2427 = vmax.xlane.f32.xlu0 %v2426_v55  ;;  %v2170_v61 = vmul.bf16 %v10729_v43, %v12225_v29 }
 0x7c4   :  { %v1980_v24 = vsub.f32 %v12355_v42, %v1963_v26  ;;  %v1981_v37 = vsub.f32 %v12357_v19, %v1963_v26  ;;  %v12431_v28 = vpop.f32.mrf.mxu0  ;;  %10265 = vpow2.f32 %v2002_v34  ;;  %v12441_v26 = vpack.c.bf16 %v1486_v52, %v1482_v45 }
 0x7c5   :  { %v10254_v9 = vpop.eup %10253  ;;  %v2429_v35 = vmax.f32 %v12423_v20, %v12431_v28  ;;  %10267 = vpow2.f32 %v2004_v32  ;;  %v1472_v34 = vadd.f32 %v12197_v6, %v12031_v16  ;;  %v2201_v31 = vsel %vm391_vm1, %v2170_v61, %v12026_v5  ;;  %v10732_v6 = vld [vmem:[%s15317_s28 + $0x68] sm:$0xff]  }
 0x7c6   :  { %v10256_v13 = vpop.eup %10255  ;;  %v2006_v42 = vmul.f32 1.442695, %v1980_v24  ;;  %v2008_v19 = vmul.f32 1.442695, %v1981_v37  ;;  %v2018_v55 = vpack.c.bf16 %v10254_v9, %v10250_v12  ;;  %v10731_v12 = vld [vmem:[%s15317_s28 + $0x30] sm:$0xff]  }
 0x7c7   :  { %2430 = vmax.xlane.f32.xlu1 %v2429_v35  ;;  %v1966_v58 = vpop.xlane.xlu0 %1965  ;;  %v2019_v36 = vpack.c.bf16 %v10256_v13, %v10252_v51  ;;  %v2169_v52 = vmul.bf16 %v10731_v12, %v12427_v39  ;;  %v12453_v24 = vpack.c.bf16 %v1476_v41, %v1472_v34  ;;  %v10733_v35 = vld [vmem:[%s15317_s28 + $0x28] sm:$0xff]   ;;  %v10735_v34 = vld [vmem:[%s15317_s28 + $0x20] sm:$0xff]  }
 0x7c8   :  { %10269 = vpow2.f32 %v2006_v42  ;;  %v1982_v7 = vsub.f32 %v12361_v18, %v1966_v58  ;;  %v1983_v43 = vsub.f32 %v12363_v23, %v1966_v58  ;;  %v2222_v23 = vsel %vm391_vm1, %v2177_v40, %v12028_v1  ;;  %v10734_v58 = vld [vmem:[%s15317_s28 + $0x60] sm:$0xff]  }
 0x7c9   :  { %10271 = vpow2.f32 %v2008_v19  ;;  %2058 = vmatprep.mubr.bf16.mxu1 %v2019_v36  ;;  %v10258_v51 = vpop.eup %10257  ;;  %v2176_v36 = vmul.bf16 %v10732_v6, %v12441_v26  ;;  %v2198_v41 = vsel %vm391_vm1, %v2169_v52, %v12024_v48  ;;  %v2168_v61 = vmul.bf16 %v10733_v35, %v12441_v26 }
 0x7ca   :  { %v2010_v32 = vmul.f32 1.442695, %v1982_v7  ;;  %2059 = vmatmul.mubr.bf16.vlgmr.msra.gmra.mxu1 %v2018_v55  ;;  %v2012_v18 = vmul.f32 1.442695, %v1983_v43  ;;  %v10260_v37 = vpop.eup %10259  ;;  %v2175_v40 = vmul.bf16 %v10734_v58, %v12453_v24  ;;  %v2167_v12 = vmul.bf16 %v10735_v34, %v12453_v24 }
 0x7cb   :  { %9171 = vmatpush3.bf16.msra.mxu1 %v2201_v31  ;;  %v1969_v16 = vpop.xlane.xlu1 %1968  ;;  %v2195_v43 = vsel %vm391_vm1, %v2168_v61, %v12033_v8  ;;  %v10736_v31 = vld [vmem:[%s15317_s28 + $0x58] sm:$0xff]  }
 0x7cc   :  { %9172 = vmatprep.subr.bf16.mxu1 %v2222_v23  ;;  %v1984_v7 = vsub.f32 %v12367_v4, %v1969_v16  ;;  %v1985_v9 = vsub.f32 %v12369_v10, %v1969_v16  ;;  %10273 = vpow2.f32 %v2010_v32  ;;  %v2219_v4 = vsel %vm391_vm1, %v2176_v36, %v12035_v62 }
 0x7cd   :  { %v10262_v45 = vpop.eup %10261  ;;  %10275 = vpow2.f32 %v2012_v18  ;;  %v2216_v32 = vsel %vm391_vm1, %v2175_v40, %v12059_v63  ;;  %v2192_v6 = vsel %vm391_vm1, %v2167_v12, %v12061_v14  ;;  %v10741_v12 = vld [vmem:[%s15317_s28 + $0x8] sm:$0xff]  }
 0x7ce   :  { %v10264_v13 = vpop.eup %10263  ;;  %v2014_v42 = vmul.f32 1.442695, %v1984_v7  ;;  %v2016_v19 = vmul.f32 1.442695, %v1985_v9  ;;  %v2020_v55 = vpack.c.bf16 %v10262_v45, %v10258_v51  ;;  %v2174_v51 = vmul.bf16 %v10736_v31, %v12225_v29  ;;  %v10742_v31 = vld [vmem:[%s15317_s28 + $0x40] sm:$0xff]  }
 0x7cf   :  { %9173 = vmatpush3.bf16.msra.mxu1 %v2198_v41  ;;  %v2021_v10 = vpack.c.bf16 %v10264_v13, %v10260_v37  ;;  %v10737_v37 = vld [vmem:[%s15317_s28 + $0x18] sm:$0xff]   ;;  %v10738_v41 = vld [vmem:[%s15317_s28 + $0x50] sm:$0xff]  }
 0x7d0   :  { %10277 = vpow2.f32 %v2014_v42  ;;  %9174 = vmatprep.subr.bf16.mxu1 %v2219_v4  ;;  %v2166_v7 = vmul.bf16 %v10737_v37, %v12225_v29  ;;  %v2213_v9 = vsel %vm391_vm1, %v2174_v51, %v12091_v2  ;;  %v2173_v35 = vmul.bf16 %v10738_v41, %v12427_v39  ;;  %v10739_v13 = vld [vmem:[%s15317_s28 + $0x10] sm:$0xff]  }
 0x7d1   :  { %10279 = vpow2.f32 %v2016_v19  ;;  %2066 = vmatprep.mubr.bf16.mxu1 %v2021_v10  ;;  %v10266_v52 = vpop.eup %10265  ;;  %v2165_v42 = vmul.bf16 %v10739_v13, %v12427_v39  ;;  %v2164_v39 = vmul.bf16 %v10741_v12, %v12441_v26  ;;  %v2171_v51 = vmul.bf16 %v10742_v31, %v12453_v24 }
 0x7d2   :  { %2067 = vmatmul.mubr.bf16.gmra.mxu1 %v2020_v55  ;;  %v10268_v18 = vpop.eup %10267  ;;  %v2189_v61 = vsel %vm391_vm1, %v2166_v7, %v12093_v47  ;;  %v2210_v29 = vsel %vm391_vm1, %v2173_v35, %v12119_v38  ;;  %v10740_v55 = vld [vmem:[%s15317_s28 + $0x48] sm:$0xff]  }
 0x7d3   :  { %9175 = vmatpush3.bf16.msra.mxu1 %v2195_v43  ;;  %v2172_v4 = vmul.bf16 %v10740_v55, %v12441_v26  ;;  %v2186_v43 = vsel %vm391_vm1, %v2165_v42, %v12121_v46  ;;  %v2204_v26 = vsel %vm391_vm1, %v2171_v51, %v12169_v25 }
 0x7d4   :  { %9176 = vmatprep.subr.bf16.mxu1 %v2216_v32 }
 0x7d5   :  { %v10270_v23 = vpop.eup %10269 }
 0x7d6   :  { %v10272_v16 = vpop.eup %10271  ;;  %v2022_v36 = vpack.c.bf16 %v10270_v23, %v10266_v52  ;;  %v2207_v52 = vsel %vm391_vm1, %v2172_v4, %v12143_v56  ;;  %v10743_v23 = vld [vmem:[%s15317_s28] sm:$0xff]  }
 0x7d7   :  { %9177 = vmatpush3.bf16.msra.mxu1 %v2192_v6  ;;  %v2023_v45 = vpack.c.bf16 %v10272_v16, %v10268_v18  ;;  %v2183_v18 = vsel %vm391_vm1, %v2164_v39, %v12145_v44  ;;  %v2163_v16 = vmul.bf16 %v10743_v23, %v12453_v24 }
 0x7d8   :  { %9178 = vmatprep.subr.bf16.mxu1 %v2213_v9 }
 0x7d9   :  { %2074 = vmatprep.mubr.bf16.mxu1 %v2023_v45  ;;  %v10274_v19 = vpop.eup %10273  ;;  %v2180_v6 = vsel %vm391_vm1, %v2163_v16, %v12171_v54  ;;  %v12793_v54 = vld [vmem:[#allocation15] ss:$0 sm:$0xff] }
 0x7da   :  { %2075 = vmatmul.mubr.bf16.gmra.mxu1 %v2022_v36  ;;  %v10276_v10 = vpop.eup %10275 }
 0x7db   :  { %9179 = vmatpush3.bf16.msra.mxu1 %v2189_v61 }
 0x7dc   :  { %9180 = vmatprep.subr.bf16.mxu1 %v2210_v29 }
 0x7dd   :  { %v10278_v58 = vpop.eup %10277 }
 0x7de   :  { %v10280_v40 = vpop.eup %10279  ;;  %v2024_v34 = vpack.c.bf16 %v10278_v58, %v10274_v19 }
 0x7df   :  { %9181 = vmatpush3.bf16.msra.mxu1 %v2186_v43  ;;  %v2025_v32 = vpack.c.bf16 %v10280_v40, %v10276_v10 }
 0x7e0   :  { %9182 = vmatprep.subr.bf16.mxu1 %v2207_v52 }
 0x7e1   :  { %2082 = vmatprep.mubr.bf16.mxu1 %v2025_v32 }
 0x7e2   :  { %2083 = vmatmul.mubr.bf16.gmra.mxu1 %v2024_v34 }
 0x7e3   :  { %9183 = vmatpush3.bf16.msra.mxu1 %v2183_v18 }
 0x7e4   :  { %9184 = vmatprep.subr.bf16.mxu1 %v2204_v26 }
 0x7e7   :  { %9185 = vmatpush3.bf16.msra.mxu1 %v2180_v6 }
 0x834   :  { %v2410_v36 = vpop.xlane.xlu0 %2409 }
 0x835   :  { %v2432_v37 = vsub.f32 %v12373_v3, %v2410_v36  ;;  %v2433_v7 = vsub.f32 %v12375_v53, %v2410_v36 }
 0x837   :  { %v2448_v9 = vmul.f32 1.442695, %v2432_v37  ;;  %v2450_v45 = vmul.f32 1.442695, %v2433_v7 }
 0x838   :  { %v2413_v41 = vpop.xlane.xlu1 %2412 }
 0x839   :  { %v2434_v35 = vsub.f32 %v12379_v57, %v2413_v41  ;;  %v2435_v24 = vsub.f32 %v12381_v49, %v2413_v41  ;;  %10281 = vpow2.f32 %v2448_v9 }
 0x83a   :  { %10283 = vpow2.f32 %v2450_v45 }
 0x83b   :  { %v2452_v61 = vmul.f32 1.442695, %v2434_v35  ;;  %v2454_v13 = vmul.f32 1.442695, %v2435_v24 }
 0x83c   :  { %v2416_v42 = vpop.xlane.xlu0 %2415 }
 0x83d   :  { %10285 = vpow2.f32 %v2452_v61  ;;  %v2436_v19 = vsub.f32 %v12385_v17, %v2416_v42  ;;  %v2437_v29 = vsub.f32 %v12387_v60, %v2416_v42 }
 0x83e   :  { %10287 = vpow2.f32 %v2454_v13 }
 0x83f   :  { %v2456_v3 = vmul.f32 1.442695, %v2436_v19  ;;  %v2458_v53 = vmul.f32 1.442695, %v2437_v29 }
 0x840   :  { %v2419_v55 = vpop.xlane.xlu1 %2418 }
 0x841   :  { %v2438_v4 = vsub.f32 %v12391_v27, %v2419_v55  ;;  %v2439_v57 = vsub.f32 %v12393_v50, %v2419_v55  ;;  %10289 = vpow2.f32 %v2456_v3 }
 0x842   :  { %10291 = vpow2.f32 %v2458_v53 }
 0x843   :  { %v2460_v49 = vmul.f32 1.442695, %v2438_v4  ;;  %v2462_v10 = vmul.f32 1.442695, %v2439_v57 }
 0x844   :  { %v2422_v58 = vpop.xlane.xlu0 %2421 }
 0x845   :  { %10293 = vpow2.f32 %v2460_v49  ;;  %v2440_v40 = vsub.f32 %v12397_v33, %v2422_v58  ;;  %v2441_v17 = vsub.f32 %v12399_v11, %v2422_v58 }
 0x846   :  { %10295 = vpow2.f32 %v2462_v10  ;;  %v10282_v43 = vpop.eup %10281 }
 0x847   :  { %v2464_v60 = vmul.f32 1.442695, %v2440_v40  ;;  %v2466_v34 = vmul.f32 1.442695, %v2441_v17  ;;  %v10284_v39 = vpop.eup %10283  ;;  %v10111_v40 = vld [vmem:[%s15324_s13 + $0x18] sm:$0xff]  }
 0x848   :  { %v2425_v12 = vpop.xlane.xlu1 %2424  ;;  %9704 = vmatprep.subr.bf16.mxu1 %v10111_v40 }
 0x849   :  { %v2442_v27 = vsub.f32 %v12403_v59, %v2425_v12  ;;  %v2443_v50 = vsub.f32 %v12407_v0, %v2425_v12  ;;  %10297 = vpow2.f32 %v2464_v60 }
 0x84a   :  { %v10286_v52 = vpop.eup %10285  ;;  %10299 = vpow2.f32 %v2466_v34  ;;  %v10112_v34 = vld [vmem:[%s15324_s13 + $0x10] sm:$0xff]  }
 0x84b   :  { %v10288_v32 = vpop.eup %10287  ;;  %v2468_v31 = vmul.f32 1.442695, %v2442_v27  ;;  %v2470_v51 = vmul.f32 1.442695, %v2443_v50  ;;  %v2480_v18 = vpack.c.bf16 %v10286_v52, %v10282_v43  ;;  %v10113_v50 = vld [vmem:[%s15324_s13 + $0x8] sm:$0xff]  }
 0x84c   :  { %v2428_v33 = vpop.xlane.xlu0 %2427  ;;  %v2481_v23 = vpack.c.bf16 %v10288_v32, %v10284_v39 }
 0x84d   :  { %10301 = vpow2.f32 %v2468_v31  ;;  %v2444_v11 = vsub.f32 %v12411_v15, %v2428_v33  ;;  %v2445_v16 = vsub.f32 %v12417_v22, %v2428_v33 }
 0x84e   :  { %10303 = vpow2.f32 %v2470_v51  ;;  %2520 = vmatprep.mubr.bf16.mxu1 %v2481_v23  ;;  %v10290_v59 = vpop.eup %10289  ;;  %v10114_v51 = vld [vmem:[%s15324_s13] sm:$0xff]  }
 0x84f   :  { %v2472_v26 = vmul.f32 1.442695, %v2444_v11  ;;  %2521 = vmatmul.mubr.bf16.vlgmr.msra.gmra.mxu1 %v2480_v18  ;;  %v2474_v0 = vmul.f32 1.442695, %v2445_v16  ;;  %v10292_v36 = vpop.eup %10291  ;;  %v15325_v16 = vmov 0.0  }
 0x850   :  { %v2431_v6 = vpop.xlane.xlu1 %2430  ;;  %9705 = vmatpush3.bf16.msra.mxu1 %v10111_v40 }
 0x851   :  { %v2446_v37 = vsub.f32 %v12423_v20, %v2431_v6  ;;  %v2447_v7 = vsub.f32 %v12431_v28, %v2431_v6  ;;  %10305 = vpow2.f32 %v2472_v26  ;;  %9706 = vmatprep.subr.bf16.mxu1 %v10112_v34 }
 0x852   :  { %v10294_v9 = vpop.eup %10293  ;;  %10307 = vpow2.f32 %v2474_v0 }
 0x853   :  { %v10296_v45 = vpop.eup %10295  ;;  %v2476_v41 = vmul.f32 1.442695, %v2446_v37  ;;  %v2478_v35 = vmul.f32 1.442695, %v2447_v7  ;;  %v2482_v15 = vpack.c.bf16 %v10294_v9, %v10290_v59 }
 0x854   :  { %v2483_v22 = vpack.c.bf16 %v10296_v45, %v10292_v36  ;;  %9707 = vmatpush3.bf16.msra.mxu1 %v10112_v34 }
 0x855   :  { %10309 = vpow2.f32 %v2476_v41  ;;  %9708 = vmatprep.subr.bf16.mxu1 %v10113_v50 }
 0x856   :  { %10311 = vpow2.f32 %v2478_v35  ;;  %2528 = vmatprep.mubr.bf16.mxu1 %v2483_v22  ;;  %v10298_v24 = vpop.eup %10297 }
 0x857   :  { %2529 = vmatmul.mubr.bf16.gmra.mxu1 %v2482_v15  ;;  %v10300_v61 = vpop.eup %10299 }
 0x858   :  { %9709 = vmatpush3.bf16.msra.mxu1 %v10113_v50 }
 0x859   :  { %9710 = vmatprep.subr.bf16.mxu1 %v10114_v51 }
 0x85a   :  { %v10302_v13 = vpop.eup %10301 }
 0x85b   :  { %v10304_v42 = vpop.eup %10303  ;;  %v2484_v19 = vpack.c.bf16 %v10302_v13, %v10298_v24 }
 0x85c   :  { %v2485_v20 = vpack.c.bf16 %v10304_v42, %v10300_v61  ;;  %9711 = vmatpush3.bf16.msra.mxu1 %v10114_v51 }
 0x85d   :  { %9752 = vmatprep.subr.bf16.mxu1 %v15325_v16 }
 0x85e   :  { %2536 = vmatprep.mubr.bf16.mxu1 %v2485_v20  ;;  %v10306_v28 = vpop.eup %10305 }
 0x85f   :  { %2537 = vmatmul.mubr.bf16.gmra.mxu1 %v2484_v19  ;;  %v10308_v29 = vpop.eup %10307 }
 0x862   :  { %v10310_v3 = vpop.eup %10309 }
 0x863   :  { %v10312_v53 = vpop.eup %10311  ;;  %v2486_v55 = vpack.c.bf16 %v10310_v3, %v10306_v28 }
 0x864   :  { %v2487_v4 = vpack.c.bf16 %v10312_v53, %v10308_v29 }
 0x866   :  { %2544 = vmatprep.mubr.bf16.mxu1 %v2487_v4 }
 0x867   :  { %2545 = vmatmul.mubr.bf16.gmra.mxu1 %v2486_v55 }
 0x88a   :  { %v9122_v57 = vpop.f32.mrf.mxu1 }
 0x88c   :  { %v9123_v49 = vpop.f32.mrf.mxu1 }
 0x88d   :  { %v12525_v10 = vadd.f32 %v9123_v49, %v9122_v57 }
 0x88e   :  { %v9125_v58 = vpop.f32.mrf.mxu1 }
 0x88f   :  { %10313 = vrcp.f32 %v12525_v10 }
 0x890   :  { %v9126_v17 = vpop.f32.mrf.mxu1 }
 0x891   :  { %v9127_v60 = vadd.f32 %v9126_v17, %v9125_v58 }
 0x892   :  { %v9128_v43 = vpop.f32.mrf.mxu1 }
 0x893   :  { %10315 = vrcp.f32 %v9127_v60 }
 0x894   :  { %v9129_v12 = vpop.f32.mrf.mxu1 }
 0x895   :  { %v12530_v39 = vadd.f32 %v9129_v12, %v9128_v43 }
 0x896   :  { %v9131_v27 = vpop.f32.mrf.mxu1 }
 0x897   :  { %10317 = vrcp.f32 %v12530_v39 }
 0x898   :  { %v9132_v52 = vpop.f32.mrf.mxu1 }
 0x899   :  { %v9133_v32 = vadd.f32 %v9132_v52, %v9131_v27 }
 0x89a   :  { %v9134_v31 = vpop.f32.mrf.mxu1 }
 0x89b   :  { %10319 = vrcp.f32 %v9133_v32 }
 0x89c   :  { %v10314_v18 = vpop.eup %10313  ;;  %v9135_v33 = vpop.f32.mrf.mxu1 }
 0x89d   :  { %v12535_v23 = vadd.f32 %v9135_v33, %v9134_v31  ;;  %2107 = vrot.lane.b32.xlu0 %v10314_v18, %s11127_s0 }
 0x89e   :  { %v9137_v11 = vpop.f32.mrf.mxu1 }
 0x89f   :  { %10321 = vrcp.f32 %v12535_v23 }
 0x8a0   :  { %v10316_v26 = vpop.eup %10315  ;;  %v9138_v59 = vpop.f32.mrf.mxu1 }
 0x8a1   :  { %v9139_v0 = vadd.f32 %v9138_v59, %v9137_v11  ;;  %2109 = vrot.lane.b32.xlu1 %v10316_v26, %s11127_s0 }
 0x8a2   :  { %v9140_v6 = vpop.f32.mrf.mxu1 }
 0x8a3   :  { %10323 = vrcp.f32 %v9139_v0 }
 0x8a4   :  { %v10318_v36 = vpop.eup %10317  ;;  %v9141_v37 = vpop.f32.mrf.mxu1 }
 0x8a5   :  { %v12541_v7 = vadd.f32 %v9141_v37, %v9140_v6  ;;  %2111 = vrot.lane.b32.xlu1 %v10318_v36, %s11127_s0 }
 0x8a6   :  { %v9143_v9 = vpop.f32.mrf.mxu1 }
 0x8a7   :  { %10325 = vrcp.f32 %v12541_v7 }
 0x8a8   :  { %v10320_v45 = vpop.eup %10319  ;;  %v9144_v41 = vpop.f32.mrf.mxu1 }
 0x8a9   :  { %v12545_v35 = vadd.f32 %v9144_v41, %v9143_v9  ;;  %2113 = vrot.lane.b32.xlu1 %v10320_v45, %s11127_s0 }
 0x8ab   :  { %10327 = vrcp.f32 %v12545_v35 }
 0x8ac   :  { %v10322_v15 = vpop.eup %10321 }
 0x8ad   :  { %2115 = vrot.lane.b32.xlu0 %v10322_v15, %s11127_s0 }
 0x8b0   :  { %v10324_v22 = vpop.eup %10323 }
 0x8b1   :  { %2117 = vrot.lane.b32.xlu1 %v10324_v22, %s11127_s0 }
 0x8b4   :  { %v10326_v24 = vpop.eup %10325 }
 0x8b5   :  { %2119 = vrot.lane.b32.xlu0 %v10326_v24, %s11127_s0 }
 0x8b8   :  { %v10328_v61 = vpop.eup %10327 }
 0x8b9   :  { %2121 = vrot.lane.b32.xlu1 %v10328_v61, %s11127_s0 }
 0x90f   :  { %v9186_v13 = vpop.f32.mrf.mxu1  ;;  %v2108_v42 = vpop.permute.xlu0 %2107 }
 0x910   :  { %v2131_v3 = vmul.f32 %v12525_v10, %v2108_v42 }
 0x911   :  { %v9187_v19 = vpop.f32.mrf.mxu1 }
 0x912   :  { %v12553_v20 = vadd.f32 %v9187_v19, %v9186_v13 }
 0x913   :  { %v2110_v28 = vpop.permute.xlu1 %2109  ;;  %v9189_v29 = vpop.f32.mrf.mxu1 }
 0x914   :  { %10329 = vrcp.f32 %v12553_v20  ;;  %v2132_v53 = vmul.f32 %v9127_v60, %v2110_v28 }
 0x915   :  { %v9190_v55 = vpop.f32.mrf.mxu1 }
 0x916   :  { %v2601_v4 = vpack.c.bf16 %v2132_v53, %v2131_v3  ;;  %v12557_v57 = vadd.f32 %v9190_v55, %v9189_v29 }
 0x917   :  { %v2112_v49 = vpop.permute.xlu1 %2111  ;;  %v9192_v58 = vpop.f32.mrf.mxu1 }
 0x918   :  { %10331 = vrcp.f32 %v12557_v57  ;;  %9712 = vmatprep.mubr.msk.bf16.mxu1 %vm391_vm1, %v2601_v4  ;;  %v2133_v10 = vmul.f32 %v12530_v39, %v2112_v49 }
 0x919   :  { %v9193_v40 = vpop.f32.mrf.mxu1 }
 0x91a   :  { %v12561_v17 = vadd.f32 %v9193_v40, %v9192_v58 }
 0x91b   :  { %v2114_v43 = vpop.permute.xlu1 %2113  ;;  %v9195_v34 = vpop.f32.mrf.mxu1 }
 0x91c   :  { %10333 = vrcp.f32 %v12561_v17  ;;  %v2134_v60 = vmul.f32 %v9133_v32, %v2114_v43 }
 0x91d   :  { %v9196_v12 = vpop.f32.mrf.mxu1 }
 0x91e   :  { %v2602_v27 = vpack.c.bf16 %v2134_v60, %v2133_v10  ;;  %v9197_v50 = vadd.f32 %v9196_v12, %v9195_v34 }
 0x91f   :  { %v9198_v52 = vpop.f32.mrf.mxu1  ;;  %v2116_v51 = vpop.permute.xlu0 %2115 }
 0x920   :  { %10335 = vrcp.f32 %v9197_v50  ;;  %9713 = vmatmul.mubr.msk.bf16.vlgmr.msra.gmra.mxu1 %vm391_vm1, %v2602_v27  ;;  %v2135_v39 = vmul.f32 %v12535_v23, %v2116_v51 }
 0x921   :  { %v10330_v31 = vpop.eup %10329  ;;  %v9199_v18 = vpop.f32.mrf.mxu1 }
 0x922   :  { %v9200_v33 = vadd.f32 %v9199_v18, %v9198_v52  ;;  %2569 = vrot.lane.b32.xlu0 %v10330_v31, %s11127_s0 }
 0x923   :  { %v2118_v11 = vpop.permute.xlu1 %2117  ;;  %v9201_v26 = vpop.f32.mrf.mxu1 }
 0x924   :  { %10337 = vrcp.f32 %v9200_v33  ;;  %v2136_v59 = vmul.f32 %v9139_v0, %v2118_v11 }
 0x925   :  { %v10332_v32 = vpop.eup %10331  ;;  %v9202_v6 = vpop.f32.mrf.mxu1 }
 0x926   :  { %v2603_v36 = vpack.c.bf16 %v2136_v59, %v2135_v39  ;;  %v9203_v37 = vadd.f32 %v9202_v6, %v9201_v26  ;;  %2571 = vrot.lane.b32.xlu1 %v10332_v32, %s11127_s0 }
 0x927   :  { %v9204_v9 = vpop.f32.mrf.mxu1  ;;  %v2120_v41 = vpop.permute.xlu0 %2119 }
 0x928   :  { %10339 = vrcp.f32 %v9203_v37  ;;  %9716 = vmatprep.mubr.msk.bf16.mxu1 %vm391_vm1, %v2603_v36  ;;  %v2137_v0 = vmul.f32 %v12541_v7, %v2120_v41 }
 0x929   :  { %v10334_v45 = vpop.eup %10333  ;;  %v9205_v15 = vpop.f32.mrf.mxu1 }
 0x92a   :  { %v9206_v22 = vadd.f32 %v9205_v15, %v9204_v9  ;;  %2573 = vrot.lane.b32.xlu0 %v10334_v45, %s11127_s0  ;;  %v15326_v15 = vld [vmem:[#allocation51_spill] sm:$0xff] }
 0x92b   :  { %v2122_v24 = vpop.permute.xlu1 %2121  ;;  %v9207_v23 = vpop.f32.mrf.mxu1 }
 0x92c   :  { %10341 = vrcp.f32 %v9206_v22  ;;  %v2138_v61 = vmul.f32 %v12545_v35, %v2122_v24  ;;  %v15327_v24 = vld [vmem:[#allocation50_spill] sm:$0xff] }
 0x92d   :  { %v10336_v13 = vpop.eup %10335  ;;  %v9208_v42 = vpop.f32.mrf.mxu1 }
 0x92e   :  { %v2604_v19 = vpack.c.bf16 %v2138_v61, %v2137_v0  ;;  %v9209_v28 = vadd.f32 %v9208_v42, %v9207_v23  ;;  %2575 = vrot.lane.b32.xlu1 %v10336_v13, %s11127_s0 }
 0x930   :  { %10343 = vrcp.f32 %v9209_v28  ;;  %9717 = vmatmul.mubr.msk.bf16.gmra.mxu1 %vm391_vm1, %v2604_v19 }
 0x931   :  { %v10338_v29 = vpop.eup %10337 }
 0x932   :  { %2577 = vrot.lane.b32.xlu0 %v10338_v29, %s11127_s0  ;;  %v15328_v29 = vld [vmem:[#allocation52_spill] sm:$0xff] }
 0x935   :  { %v10340_v3 = vpop.eup %10339 }
 0x936   :  { %2579 = vrot.lane.b32.xlu1 %v10340_v3, %s11127_s0 }
 0x939   :  { %v10342_v53 = vpop.eup %10341 }
 0x93a   :  { %2581 = vrot.lane.b32.xlu0 %v10342_v53, %s11127_s0 }
 0x93d   :  { %v10344_v7 = vpop.eup %10343 }
 0x93e   :  { %2583 = vrot.lane.b32.xlu1 %v10344_v7, %s11127_s0  ;;  %v15329_v7 = vld [vmem:[#allocation53_spill] sm:$0xff] }
 0x994   :  { %v2570_v35 = vpop.permute.xlu0 %2569 }
 0x995   :  { %v2593_v4 = vmul.f32 %v12553_v20, %v2570_v35 }
 0x998   :  { %v2572_v55 = vpop.permute.xlu1 %2571 }
 0x999   :  { %v2594_v49 = vmul.f32 %v12557_v57, %v2572_v55 }
 0x99b   :  { %v2605_v58 = vpack.c.bf16 %v2594_v49, %v2593_v4 }
 0x99c   :  { %v2574_v40 = vpop.permute.xlu0 %2573 }
 0x99d   :  { %9720 = vmatprep.mubr.msk.bf16.mxu1 %vm391_vm1, %v2605_v58  ;;  %v2595_v34 = vmul.f32 %v12561_v17, %v2574_v40  ;;  %v15330_v58 = vld [vmem:[#allocation54_spill] sm:$0xff] }
 0x9a0   :  { %v2576_v43 = vpop.permute.xlu1 %2575 }
 0x9a1   :  { %v2596_v10 = vmul.f32 %v9197_v50, %v2576_v43  ;;  %v12588_v50 = vld [vmem:[#allocation13] ss:$0 sm:$0xff]  ;;  %v15331_v43 = vld [vmem:[#allocation55_spill] sm:$0xff] }
 0x9a3   :  { %v2606_v60 = vpack.c.bf16 %v2596_v10, %v2595_v34 }
 0x9a4   :  { %v2578_v12 = vpop.permute.xlu0 %2577 }
 0x9a5   :  { %9721 = vmatmul.mubr.msk.bf16.gmra.mxu1 %vm391_vm1, %v2606_v60  ;;  %v2597_v52 = vmul.f32 %v9200_v33, %v2578_v12 }
 0x9a8   :  { %v2580_v27 = vpop.permute.xlu1 %2579 }
 0x9a9   :  { %v2598_v31 = vmul.f32 %v9203_v37, %v2580_v27 }
 0x9ab   :  { %v2607_v51 = vpack.c.bf16 %v2598_v31, %v2597_v52 }
 0x9ac   :  { %v2582_v20 = vpop.permute.xlu0 %2581 }
 0x9ad   :  { %9724 = vmatprep.mubr.msk.bf16.mxu1 %vm391_vm1, %v2607_v51  ;;  %v2599_v18 = vmul.f32 %v9206_v22, %v2582_v20 }
 0x9b0   :  { %v2584_v57 = vpop.permute.xlu1 %2583 }
 0x9b1   :  { %v2600_v11 = vmul.f32 %v9209_v28, %v2584_v57  ;;  %v15332_v57 = vld [vmem:[#allocation56_spill] sm:$0xff] }
 0x9b3   :  { %v2608_v26 = vpack.c.bf16 %v2600_v11, %v2599_v18 }
 0x9b5   :  { %9725 = vmatmul.mubr.msk.bf16.gmra.mxu1 %vm391_vm1, %v2608_v26  ;;  %v15333_v26 = vld [vmem:[#allocation57_spill] sm:$0xff] }
 0x9b6   :  { %9756 = vmatprep.mubr.msk.bf16.mxu1 %vm11148_vm0, %v15325_v16 }
 0x9e0   :  { %v9714_v17 = vpop.f32.mrf.mxu1 }
 0x9e1   :  { %v2706_v33 = vadd.f32 %v9714_v17, %v12588_v50 }
 0x9e2   :  { %v2697_v39 = vpop.f32.mrf.mxu1 }
 0x9e3   :  { %v2698_v59 = vadd.f32 %v12588_v50, %v2697_v39  ;;  %v12596_v37 = vadd.f32 %v2706_v33, %v11681_v30 }
 0x9e4   :  { %v9715_v32 = vpop.f32.mrf.mxu1 }
 0x9e5   :  { %v12593_v6 = vadd.f32 %v2698_v59, %v11684_v21  ;;  %v2709_v9 = vadd.f32 %v9715_v32, %v12588_v50  ;;  %v2784_v30 = vsel %vm391_vm1, %v12596_v37, 0.0  ;;  %v15334_v32 = vld [vmem:[#allocation58_spill] sm:$0xff] }
 0x9e6   :  { %v2700_v36 = vpop.f32.mrf.mxu1 }
 0x9e7   :  { %v2701_v45 = vadd.f32 %v12588_v50, %v2700_v36  ;;  %v2778_v41 = vsel %vm391_vm1, %v12593_v6, 0.0  ;;  %v12606_v23 = vadd.f32 %v2709_v9, %v15327_v24  ;;  %v15335_v9 = vld [vmem:[#allocation59_spill] sm:$0xff] }
 0x9e8   :  { %2779 = vadd.xlane.f32.xlu0 %v2778_v41 }
 0x9e9   :  { %v12603_v22 = vadd.f32 %v2701_v45, %v15326_v15  ;;  %v2787_v0 = vsel %vm391_vm1, %v12606_v23, 0.0 }
 0x9eb   :  { %v2781_v21 = vsel %vm391_vm1, %v12603_v22, 0.0 }
 0x9ec   :  { %2782 = vadd.xlane.f32.xlu1 %v2781_v21  ;;  %2785 = vadd.xlane.f32.xlu0 %v2784_v30 }
 0x9f0   :  { %2788 = vadd.xlane.f32.xlu0 %v2787_v0  ;;  %v9718_v61 = vpop.f32.mrf.mxu1 }
 0x9f1   :  { %v2722_v42 = vadd.f32 %v9718_v61, %v12588_v50 }
 0x9f2   :  { %v2713_v13 = vpop.f32.mrf.mxu1 }
 0x9f3   :  { %v2714_v19 = vadd.f32 %v12588_v50, %v2713_v13  ;;  %v12620_v35 = vadd.f32 %v2722_v42, %v15329_v7 }
 0x9f4   :  { %v9719_v28 = vpop.f32.mrf.mxu1 }
 0x9f5   :  { %v12617_v3 = vadd.f32 %v2714_v19, %v15328_v29  ;;  %v2725_v55 = vadd.f32 %v9719_v28, %v12588_v50  ;;  %v2796_v60 = vsel %vm391_vm1, %v12620_v35, 0.0 }
 0x9f6   :  { %v2716_v53 = vpop.f32.mrf.mxu1 }
 0x9f7   :  { %v2717_v4 = vadd.f32 %v12588_v50, %v2716_v53  ;;  %v2790_v49 = vsel %vm391_vm1, %v12617_v3, 0.0  ;;  %v12630_v34 = vadd.f32 %v2725_v55, %v15331_v43  ;;  %v15336_v53 = vld [vmem:[#allocation60_spill] sm:$0xff]  ;;  %v15337_v43 = vld [vmem:[#allocation62_spill] sm:$0xff] }
 0x9f8   :  { %2791 = vadd.xlane.f32.xlu0 %v2790_v49 }
 0x9f9   :  { %v12627_v40 = vadd.f32 %v2717_v4, %v15330_v58  ;;  %v2799_v12 = vsel %vm391_vm1, %v12630_v34, 0.0 }
 0x9fb   :  { %v2793_v10 = vsel %vm391_vm1, %v12627_v40, 0.0 }
 0x9fc   :  { %2794 = vadd.xlane.f32.xlu1 %v2793_v10  ;;  %2797 = vadd.xlane.f32.xlu0 %v2796_v60 }
 0xa00   :  { %2800 = vadd.xlane.f32.xlu1 %v2799_v12 }
 0xa65   :  { %v9722_v27 = vpop.f32.mrf.mxu1 }
 0xa66   :  { %v2738_v31 = vadd.f32 %v9722_v27, %v12588_v50 }
 0xa67   :  { %v2729_v52 = vpop.f32.mrf.mxu1 }
 0xa68   :  { %v2730_v51 = vadd.f32 %v12588_v50, %v2729_v52  ;;  %v12644_v17 = vadd.f32 %v2738_v31, %v15333_v26  ;;  %v15338_v31 = vld [vmem:[#allocation61_spill] sm:$0xff] }
 0xa69   :  { %v9723_v20 = vpop.f32.mrf.mxu1 }
 0xa6a   :  { %v12641_v18 = vadd.f32 %v2730_v51, %v15332_v57  ;;  %v2741_v39 = vadd.f32 %v9723_v20, %v12588_v50  ;;  %v2808_v15 = vsel %vm391_vm1, %v12644_v17, 0.0 }
 0xa6b   :  { %v2732_v11 = vpop.f32.mrf.mxu1 }
 0xa6c   :  { %v2733_v33 = vadd.f32 %v12588_v50, %v2732_v11  ;;  %v2802_v59 = vsel %vm391_vm1, %v12641_v18, 0.0  ;;  %v12654_v45 = vadd.f32 %v2741_v39, %v15335_v9  ;;  %v15339_v39 = vld [vmem:[#allocation63_spill] sm:$0xff] }
 0xa6d   :  { %2803 = vadd.xlane.f32.xlu0 %v2802_v59 }
 0xa6e   :  { %v12651_v36 = vadd.f32 %v2733_v33, %v15334_v32  ;;  %v2811_v21 = vsel %vm391_vm1, %v12654_v45, 0.0 }
 0xa70   :  { %v2805_v41 = vsel %vm391_vm1, %v12651_v36, 0.0 }
 0xa71   :  { %2806 = vadd.xlane.f32.xlu1 %v2805_v41  ;;  %2809 = vadd.xlane.f32.xlu0 %v2808_v15  ;;  %v2780_v24 = vpop.xlane.xlu0 %2779 }
 0xa72   :  { %v2826_v61 = vmul.f32 0.015625, %v2780_v24 }
 0xa74   :  { %v12668_v55 = vsub.f32 %v12593_v6, %v2826_v61 }
 0xa75   :  { %2812 = vadd.xlane.f32.xlu1 %v2811_v21  ;;  %v9726_v30 = vpop.f32.mrf.mxu1  ;;  %v2786_v0 = vpop.xlane.xlu0 %2785 }
 0xa76   :  { %v2783_v42 = vpop.xlane.xlu1 %2782  ;;  %v2754_v19 = vadd.f32 %v9726_v30, %v12588_v50  ;;  %v2828_v49 = vmul.f32 0.015625, %v2786_v0  ;;  %v2858_v11 = vmul.f32 %v12668_v55, %v12668_v55 }
 0xa77   :  { %v2745_v13 = vpop.f32.mrf.mxu1  ;;  %v2827_v4 = vmul.f32 0.015625, %v2783_v42 }
 0xa78   :  { %v2746_v28 = vadd.f32 %v12588_v50, %v2745_v13  ;;  %v12671_v10 = vadd.f32 %v2754_v19, %v15337_v43  ;;  %v12686_v26 = vsub.f32 %v12596_v37, %v2828_v49  ;;  %v2874_v30 = vsel %vm391_vm1, %v2858_v11, 0.0 }
 0xa79   :  { %v9727_v29 = vpop.f32.mrf.mxu1  ;;  %v2789_v12 = vpop.xlane.xlu0 %2788  ;;  %v12681_v20 = vsub.f32 %v12603_v22, %v2827_v4 }
 0xa7a   :  { %v12665_v7 = vadd.f32 %v2746_v28, %v15336_v53  ;;  %v2757_v60 = vadd.f32 %v9727_v29, %v12588_v50  ;;  %v2829_v57 = vmul.f32 0.015625, %v2789_v12  ;;  %v2820_v59 = vsel %vm391_vm1, %v12671_v10, 0.0 }
 0xa7b   :  { %v2748_v58 = vpop.f32.mrf.mxu1  ;;  %v2859_v15 = vmul.f32 %v12681_v20, %v12681_v20  ;;  %v2860_v0 = vmul.f32 %v12686_v26, %v12686_v26 }
 0xa7c   :  { %v2749_v27 = vadd.f32 %v12588_v50, %v2748_v58  ;;  %v2814_v52 = vsel %vm391_vm1, %v12665_v7, 0.0  ;;  %v12689_v33 = vadd.f32 %v2757_v60, %v15339_v39  ;;  %v12696_v41 = vsub.f32 %v12606_v23, %v2829_v57 }
 0xa7d   :  { %2815 = vadd.xlane.f32.xlu0 %v2814_v52  ;;  %v2877_v28 = vsel %vm391_vm1, %v2859_v15, 0.0  ;;  %v2880_v49 = vsel %vm391_vm1, %v2860_v0, 0.0  ;;  %v10117_v15 = vld [vmem:[%s15341_s14 + $0x18] sm:$0xff]  }
 0xa7e   :  { %v12678_v51 = vadd.f32 %v2749_v27, %v15338_v31  ;;  %v2823_v21 = vsel %vm391_vm1, %v12689_v33, 0.0  ;;  %v2861_v29 = vmul.f32 %v12696_v41, %v12696_v41  ;;  %9728 = vmatprep.subr.bf16.mxu0 %v10117_v15 }
 0xa7f   :  { %9729 = vmatpush3.bf16.msra.mxu0 %v10117_v15 }
 0xa80   :  { %v2817_v50 = vsel %vm391_vm1, %v12678_v51, 0.0  ;;  %v2883_v12 = vsel %vm391_vm1, %v2861_v29, 0.0 }
 0xa81   :  { %2818 = vadd.xlane.f32.xlu1 %v2817_v50  ;;  %2821 = vadd.xlane.f32.xlu0 %v2820_v59  ;;  %v2792_v32 = vpop.xlane.xlu0 %2791 }
 0xa82   :  { %v2830_v9 = vmul.f32 0.015625, %v2792_v32  ;;  %v10115_v32 = vld [vmem:[%s15340_s1 + $0x8] sm:$0xff]  }
 0xa83   :  { %9753 = vmatpush3.bf16.msra.mxu1 %v10115_v32 }
 0xa84   :  { %v12701_v24 = vsub.f32 %v12617_v3, %v2830_v9  ;;  %9754 = vmatprep.subr.bf16.mxu1 %v15325_v16  ;;  %v10116_v9 = vld [vmem:[%s15340_s1] sm:$0xff]  }
 0xa85   :  { %v2795_v61 = vpop.xlane.xlu1 %2794  ;;  %2824 = vadd.xlane.f32.xlu1 %v2823_v21  ;;  %2875 = vadd.xlane.f32.xlu0 %v2874_v30  ;;  %v2798_v13 = vpop.xlane.xlu0 %2797  ;;  %v344_v21 = vld [vmem:[#allocation2] sm:$0xff]  ;;  %v345_v30 = vld [vmem:[#allocation2 + $0x8] sm:$0xff] }
 0xa86   :  { %v2831_v42 = vmul.f32 0.015625, %v2795_v61  ;;  %v2832_v19 = vmul.f32 0.015625, %v2798_v13  ;;  %v2862_v58 = vmul.f32 %v12701_v24, %v12701_v24  ;;  %v12738_v0 = vpack.c.bf16 %v345_v30, %v344_v21  ;;  %v10118_v61 = vld [vmem:[%s15341_s14 + $0x10] sm:$0xff]   ;;  %v10119_v13 = vld [vmem:[%s15341_s14 + $0x8] sm:$0xff]  }
 0xa87   :  { %9755 = vmatpush3.bf16.msra.mxu1 %v10116_v9  ;;  %9730 = vmatprep.subr.bf16.mxu0 %v10118_v61 }
 0xa88   :  { %v12712_v53 = vsub.f32 %v12627_v40, %v2831_v42  ;;  %v12715_v4 = vsub.f32 %v12620_v35, %v2832_v19  ;;  %v2886_v52 = vsel %vm391_vm1, %v2862_v58, 0.0  ;;  %15342 = vst [vmem:[#allocation51_spill] sm:$0xff] %v12738_v0  ;;  %9731 = vmatpush3.bf16.msra.mxu0 %v10118_v61  ;;  %v10120_v42 = vld [vmem:[%s15341_s14] sm:$0xff]  }
 0xa89   :  { %v2801_v43 = vpop.xlane.xlu1 %2800  ;;  %2878 = vadd.xlane.f32.xlu1 %v2877_v28  ;;  %2881 = vadd.xlane.f32.xlu0 %v2880_v49 }
 0xa8a   :  { %v2833_v60 = vmul.f32 0.015625, %v2801_v43  ;;  %v2863_v31 = vmul.f32 %v12712_v53, %v12712_v53  ;;  %v2864_v57 = vmul.f32 %v12715_v4, %v12715_v4  ;;  %9757 = vmatmul.mubr.msk.bf16.vlgmr.msra.gmra.mxu1 %vm3221_vm2, %v12738_v0  ;;  %9732 = vmatprep.subr.bf16.mxu0 %v10119_v13 }
 0xa8c   :  { %v12722_v27 = vsub.f32 %v12630_v34, %v2833_v60  ;;  %v2889_v11 = vsel %vm391_vm1, %v2863_v31, 0.0  ;;  %v2892_v39 = vsel %vm391_vm1, %v2864_v57, 0.0  ;;  %9733 = vmatpush3.bf16.msra.mxu0 %v10119_v13 }
 0xa8d   :  { %2884 = vadd.xlane.f32.xlu1 %v2883_v12  ;;  %2887 = vadd.xlane.f32.xlu0 %v2886_v52 }
 0xa8e   :  { %v2865_v50 = vmul.f32 %v12722_v27, %v12722_v27  ;;  %9734 = vmatprep.subr.bf16.mxu0 %v10120_v42 }
 0xa90   :  { %v2895_v59 = vsel %vm391_vm1, %v2865_v50, 0.0  ;;  %9735 = vmatpush3.bf16.msra.mxu0 %v10120_v42 }
 0xa91   :  { %2890 = vadd.xlane.f32.xlu1 %v2889_v11  ;;  %2893 = vadd.xlane.f32.xlu0 %v2892_v39 }
 0xa95   :  { %2896 = vadd.xlane.f32.xlu1 %v2895_v59 }
 0xaf6   :  { %v2804_v19 = vpop.xlane.xlu0 %2803 }
 0xaf7   :  { %v2834_v28 = vmul.f32 0.015625, %v2804_v19 }
 0xaf9   :  { %v12746_v29 = vsub.f32 %v12641_v18, %v2834_v28 }
 0xafa   :  { %v2807_v49 = vpop.xlane.xlu1 %2806  ;;  %v2810_v58 = vpop.xlane.xlu0 %2809 }
 0xafb   :  { %v2835_v43 = vmul.f32 0.015625, %v2807_v49  ;;  %v2836_v60 = vmul.f32 0.015625, %v2810_v58  ;;  %v2866_v12 = vmul.f32 %v12746_v29, %v12746_v29 }
 0xafd   :  { %v12751_v52 = vsub.f32 %v12651_v36, %v2835_v43  ;;  %v12754_v31 = vsub.f32 %v12644_v17, %v2836_v60  ;;  %v2898_v57 = vsel %vm391_vm1, %v2866_v12, 0.0 }
 0xafe   :  { %v2813_v11 = vpop.xlane.xlu1 %2812  ;;  %2899 = vadd.xlane.f32.xlu0 %v2898_v57 }
 0xaff   :  { %v2837_v39 = vmul.f32 0.015625, %v2813_v11  ;;  %v2867_v50 = vmul.f32 %v12751_v52, %v12751_v52  ;;  %v2868_v59 = vmul.f32 %v12754_v31, %v12754_v31 }
 0xb01   :  { %v12762_v32 = vsub.f32 %v12654_v45, %v2837_v39  ;;  %v2901_v9 = vsel %vm391_vm1, %v2867_v50, 0.0  ;;  %v2904_v15 = vsel %vm391_vm1, %v2868_v59, 0.0 }
 0xb02   :  { %2902 = vadd.xlane.f32.xlu1 %v2901_v9  ;;  %2905 = vadd.xlane.f32.xlu0 %v2904_v15 }
 0xb03   :  { %v2869_v21 = vmul.f32 %v12762_v32, %v12762_v32 }
 0xb05   :  { %v2907_v30 = vsel %vm391_vm1, %v2869_v21, 0.0 }
 0xb06   :  { %2908 = vadd.xlane.f32.xlu1 %v2907_v30  ;;  %v2816_v61 = vpop.xlane.xlu0 %2815 }
 0xb07   :  { %v2838_v13 = vmul.f32 0.015625, %v2816_v61 }
 0xb09   :  { %v12770_v42 = vsub.f32 %v12665_v7, %v2838_v13 }
 0xb0a   :  { %v2819_v19 = vpop.xlane.xlu1 %2818  ;;  %v2822_v28 = vpop.xlane.xlu0 %2821 }
 0xb0b   :  { %v2839_v49 = vmul.f32 0.015625, %v2819_v19  ;;  %v2840_v58 = vmul.f32 0.015625, %v2822_v28  ;;  %v2870_v43 = vmul.f32 %v12770_v42, %v12770_v42 }
 0xb0d   :  { %v12775_v60 = vsub.f32 %v12678_v51, %v2839_v49  ;;  %v12778_v12 = vsub.f32 %v12671_v10, %v2840_v58  ;;  %v2910_v57 = vsel %vm391_vm1, %v2870_v43, 0.0 }
 0xb0e   :  { %v2825_v11 = vpop.xlane.xlu1 %2824  ;;  %2911 = vadd.xlane.f32.xlu0 %v2910_v57  ;;  %v2876_v39 = vpop.xlane.xlu0 %2875 }
 0xb0f   :  { %v2841_v50 = vmul.f32 0.015625, %v2825_v11  ;;  %v2922_v59 = vmul.f32 0.015625, %v2876_v39  ;;  %v2871_v9 = vmul.f32 %v12775_v60, %v12775_v60  ;;  %v2872_v15 = vmul.f32 %v12778_v12, %v12778_v12 }
 0xb11   :  { %v12786_v21 = vsub.f32 %v12689_v33, %v2841_v50  ;;  %v2938_v30 = vadd.f32 1e-05, %v2922_v59  ;;  %v2913_v61 = vsel %vm391_vm1, %v2871_v9, 0.0  ;;  %v2916_v13 = vsel %vm391_vm1, %v2872_v15, 0.0 }
 0xb12   :  { %v2879_v19 = vpop.xlane.xlu1 %2878  ;;  %2914 = vadd.xlane.f32.xlu1 %v2913_v61  ;;  %2917 = vadd.xlane.f32.xlu0 %v2916_v13  ;;  %v2882_v28 = vpop.xlane.xlu0 %2881 }
 0xb13   :  { %10345 = vrsqrt.f32 %v2938_v30  ;;  %v2923_v49 = vmul.f32 0.015625, %v2879_v19  ;;  %v2924_v58 = vmul.f32 0.015625, %v2882_v28  ;;  %v2873_v43 = vmul.f32 %v12786_v21, %v12786_v21 }
 0xb15   :  { %v2939_v57 = vadd.f32 1e-05, %v2923_v49  ;;  %v2940_v11 = vadd.f32 1e-05, %v2924_v58  ;;  %v2919_v39 = vsel %vm391_vm1, %v2873_v43, 0.0 }
 0xb16   :  { %2920 = vadd.xlane.f32.xlu1 %v2919_v39  ;;  %v2885_v50 = vpop.xlane.xlu1 %2884  ;;  %v2888_v59 = vpop.xlane.xlu0 %2887 }
 0xb17   :  { %10347 = vrsqrt.f32 %v2939_v57  ;;  %v2925_v9 = vmul.f32 0.015625, %v2885_v50  ;;  %v2926_v15 = vmul.f32 0.015625, %v2888_v59 }
 0xb18   :  { %10349 = vrsqrt.f32 %v2940_v11 }
 0xb19   :  { %v2941_v61 = vadd.f32 1e-05, %v2925_v9  ;;  %v2942_v13 = vadd.f32 1e-05, %v2926_v15 }
 0xb1a   :  { %v2891_v0 = vpop.xlane.xlu1 %2890  ;;  %v2894_v30 = vpop.xlane.xlu0 %2893 }
 0xb1b   :  { %10351 = vrsqrt.f32 %v2941_v61  ;;  %v2927_v19 = vmul.f32 0.015625, %v2891_v0  ;;  %v2928_v28 = vmul.f32 0.015625, %v2894_v30  ;;  %v12797_v0 = vld [vmem:[#allocation16] ss:$0 sm:$0xff]  ;;  %v12804_v30 = vld [vmem:[#allocation4 + $0x8] sm:$0xff]  }
 0xb1c   :  { %10353 = vrsqrt.f32 %v2942_v13  ;;  %v12802_v13 = vld [vmem:[#allocation4] sm:$0xff]  }
 0xb1d   :  { %v2943_v16 = vadd.f32 1e-05, %v2927_v19  ;;  %v2944_v49 = vadd.f32 1e-05, %v2928_v28 }
 0xb1e   :  { %v2897_v58 = vpop.xlane.xlu1 %2896 }
 0xb1f   :  { %10355 = vrsqrt.f32 %v2943_v16  ;;  %v2929_v43 = vmul.f32 0.015625, %v2897_v58 }
 0xb20   :  { %v10346_v39 = vpop.eup %10345  ;;  %10357 = vrsqrt.f32 %v2944_v49 }
 0xb21   :  { %v2945_v57 = vadd.f32 1e-05, %v2929_v43  ;;  %v2970_v11 = vmul.f32 %v10346_v39, %v12668_v55 }
 0xb23   :  { %10359 = vrsqrt.f32 %v2945_v57  ;;  %v2992_v59 = vmul.f32 %v12793_v54, %v2970_v11 }
 0xb24   :  { %v10348_v50 = vpop.eup %10347 }
 0xb25   :  { %v10350_v9 = vpop.eup %10349  ;;  %v2971_v15 = vmul.f32 %v10348_v50, %v12681_v20  ;;  %v3014_v55 = vadd.f32 %v12797_v0, %v2992_v59 }
 0xb26   :  { %v2972_v61 = vmul.f32 %v10350_v9, %v12686_v26 }
 0xb27   :  { %v2993_v16 = vmul.f32 %v12793_v54, %v2971_v15  ;;  %3301 = vrot.lane.b32.xlu1 %v12802_v13, %s11127_s0 }
 0xb28   :  { %v10352_v19 = vpop.eup %10351  ;;  %v2994_v49 = vmul.f32 %v12793_v54, %v2972_v61  ;;  %3303 = vrot.lane.b32.xlu0 %v12804_v30, %s11127_s0 }
 0xb29   :  { %v10354_v28 = vpop.eup %10353  ;;  %v2973_v58 = vmul.f32 %v10352_v19, %v12696_v41  ;;  %v3015_v43 = vadd.f32 %v12797_v0, %v2993_v16 }
 0xb2a   :  { %v2974_v20 = vmul.f32 %v10354_v28, %v12701_v24  ;;  %v3016_v50 = vadd.f32 %v12797_v0, %v2994_v49 }
 0xb2b   :  { %v2995_v26 = vmul.f32 %v12793_v54, %v2973_v58  ;;  %v3038_v39 = vpack.c.bf16 %v3015_v43, %v3014_v55 }
 0xb2c   :  { %v10356_v57 = vpop.eup %10355  ;;  %v2996_v9 = vmul.f32 %v12793_v54, %v2974_v20 }
 0xb2d   :  { %v10358_v11 = vpop.eup %10357  ;;  %9736 = vmatprep.mubr.msk.bf16.mxu0 %vm391_vm1, %v3038_v39  ;;  %v3017_v41 = vadd.f32 %v12797_v0, %v2995_v26  ;;  %v2975_v59 = vmul.f32 %v10356_v57, %v12712_v53  ;;  %v8750_v26 = vld [vmem:[#allocation19] ss:$0 sm:$0xff] }
 0xb2e   :  { %v2976_v15 = vmul.f32 %v10358_v11, %v12715_v4  ;;  %v3018_v19 = vadd.f32 %v12797_v0, %v2996_v9 }
 0xb2f   :  { %v3039_v61 = vpack.c.bf16 %v3017_v41, %v3016_v50  ;;  %v2997_v24 = vmul.f32 %v12793_v54, %v2975_v59 }
 0xb30   :  { %v10360_v16 = vpop.eup %10359  ;;  %v2998_v49 = vmul.f32 %v12793_v54, %v2976_v15 }
 0xb31   :  { %9737 = vmatmul.mubr.msk.bf16.vlgmr.msra.gmra.mxu0 %vm391_vm1, %v3039_v61  ;;  %v3019_v55 = vadd.f32 %v12797_v0, %v2997_v24  ;;  %v2977_v28 = vmul.f32 %v10360_v16, %v12722_v27 }
 0xb32   :  { %v3020_v4 = vadd.f32 %v12797_v0, %v2998_v49 }
 0xb33   :  { %v3040_v58 = vpack.c.bf16 %v3019_v55, %v3018_v19  ;;  %v2999_v53 = vmul.f32 %v12793_v54, %v2977_v28 }
 0xb35   :  { %9740 = vmatprep.mubr.msk.bf16.mxu0 %vm391_vm1, %v3040_v58  ;;  %v3021_v43 = vadd.f32 %v12797_v0, %v2999_v53 }
 0xb37   :  { %v3041_v20 = vpack.c.bf16 %v3021_v43, %v3020_v4 }
 0xb39   :  { %9741 = vmatmul.mubr.msk.bf16.gmra.mxu0 %vm391_vm1, %v3041_v20 }
 0xb4a   :  { %v3259_v39 = vpop.f32.mrf.mxu1 }
 0xb4b   :  { %v3260_v57 = vadd.f32 %v8750_v26, %v3259_v39 }
 0xb4c   :  { %v9758_v11 = vpop.f32.mrf.mxu1 }
 0xb4d   :  { %v3279_v50 = vpack.c.bf16 %v3260_v57, %v3260_v57 }
 0xb4e   :  { %v3262_v24 = vpop.f32.mrf.mxu1 }
 0xb4f   :  { %v3281_v27 = vrot.slane %v3279_v50, 4  ;;  %v3263_v16 = vadd.f32 %v8750_v26, %v3262_v24 }
 0xb50   :  { %v9759_v55 = vpop.f32.mrf.mxu1 }
 0xb51   :  { %v12834_v41 = vsel %vm3282_vm3, %v3279_v50, %v3281_v27  ;;  %v3587_v49 = vpack.c.bf16 %v3263_v16, %v3263_v16 }
 0xb52   :  { %v3300_v59 = vmul.bf16 %v12804_v30, %v12834_v41  ;;  %v3299_v15 = vmul.bf16 %v12802_v13, %v12834_v41 }
 0xb53   :  { %v3589_v53 = vrot.slane %v3587_v49, 4 }
 0xb54   :  { %10000 = vmatprep.subr.msk.bf16.mxu1 %vm391_vm1, %v3300_v59  ;;  %v3339_v9 = vsel %vm391_vm1, %v3300_v59, 0  ;;  %v3336_v61 = vsel %vm391_vm1, %v3299_v15, 0 }
 0xb55   :  { %9761 = vmatpush3.bf16.xpose.msra.mxu1 %v3339_v9  ;;  %v12845_v57 = vsel %vm3282_vm3, %v3587_v49, %v3589_v53 }
 0xb56   :  { %10001 = vmatprep.subr.msk.bf16.mxu1 %vm391_vm1, %v3299_v15  ;;  %v12849_v11 = vmul.bf16 %v12804_v30, %v12845_v57 }
 0xb5d   :  { %9763 = vmatpush3.bf16.xpose.msra.mxu1 %v3336_v61 }
 0xb5e   :  { %10002 = vmatprep.subr.msk.bf16.mxu1 %vm391_vm1, %v12849_v11 }
 0xb87   :  { %v2900_v19 = vpop.xlane.xlu0 %2899 }
 0xb88   :  { %v2930_v28 = vmul.f32 0.015625, %v2900_v19 }
 0xb8a   :  { %v2946_v58 = vadd.f32 1e-05, %v2930_v28 }
 0xb8b   :  { %v2903_v4 = vpop.xlane.xlu1 %2902  ;;  %v2906_v43 = vpop.xlane.xlu0 %2905 }
 0xb8c   :  { %10361 = vrsqrt.f32 %v2946_v58  ;;  %v2931_v20 = vmul.f32 0.015625, %v2903_v4  ;;  %v2932_v39 = vmul.f32 0.015625, %v2906_v43 }
 0xb8e   :  { %v2947_v50 = vadd.f32 1e-05, %v2931_v20  ;;  %v2948_v26 = vadd.f32 1e-05, %v2932_v39 }
 0xb8f   :  { %v2909_v27 = vpop.xlane.xlu1 %2908 }
 0xb90   :  { %10363 = vrsqrt.f32 %v2947_v50  ;;  %v2933_v59 = vmul.f32 0.015625, %v2909_v27 }
 0xb91   :  { %10365 = vrsqrt.f32 %v2948_v26 }
 0xb92   :  { %v2949_v9 = vadd.f32 1e-05, %v2933_v59 }
 0xb94   :  { %10367 = vrsqrt.f32 %v2949_v9 }
 0xb97   :  { %v2912_v15 = vpop.xlane.xlu0 %2911 }
 0xb98   :  { %v2934_v61 = vmul.f32 0.015625, %v2912_v15 }
 0xb99   :  { %v10362_v24 = vpop.eup %10361 }
 0xb9a   :  { %v2950_v16 = vadd.f32 1e-05, %v2934_v61  ;;  %v2978_v19 = vmul.f32 %v10362_v24, %v12746_v29 }
 0xb9b   :  { %v2915_v55 = vpop.xlane.xlu1 %2914  ;;  %v2918_v30 = vpop.xlane.xlu0 %2917 }
 0xb9c   :  { %10369 = vrsqrt.f32 %v2950_v16  ;;  %v2935_v28 = vmul.f32 0.015625, %v2915_v55  ;;  %v2936_v49 = vmul.f32 0.015625, %v2918_v30  ;;  %v3000_v53 = vmul.f32 %v12793_v54, %v2978_v19 }
 0xb9d   :  { %v10364_v58 = vpop.eup %10363 }
 0xb9e   :  { %v10366_v4 = vpop.eup %10365  ;;  %v2951_v43 = vadd.f32 1e-05, %v2935_v28  ;;  %v2952_v20 = vadd.f32 1e-05, %v2936_v49  ;;  %v2979_v39 = vmul.f32 %v10364_v58, %v12751_v52  ;;  %v3022_v9 = vadd.f32 %v12797_v0, %v3000_v53 }
 0xb9f   :  { %v2921_v50 = vpop.xlane.xlu1 %2920  ;;  %v2980_v26 = vmul.f32 %v10366_v4, %v12754_v31 }
 0xba0   :  { %10371 = vrsqrt.f32 %v2951_v43  ;;  %v2937_v27 = vmul.f32 0.015625, %v2921_v50  ;;  %v3001_v29 = vmul.f32 %v12793_v54, %v2979_v39 }
 0xba1   :  { %v10368_v59 = vpop.eup %10367  ;;  %10373 = vrsqrt.f32 %v2952_v20  ;;  %v3002_v16 = vmul.f32 %v12793_v54, %v2980_v26 }
 0xba2   :  { %v2953_v15 = vadd.f32 1e-05, %v2937_v27  ;;  %v3023_v61 = vadd.f32 %v12797_v0, %v3001_v29  ;;  %v2981_v24 = vmul.f32 %v10368_v59, %v12762_v32 }
 0xba3   :  { %v3024_v31 = vadd.f32 %v12797_v0, %v3002_v16  ;;  %v8737_v16 = vld [vmem:[#allocation18] ss:$0 sm:$0xff] }
 0xba4   :  { %10375 = vrsqrt.f32 %v2953_v15  ;;  %v3042_v52 = vpack.c.bf16 %v3023_v61, %v3022_v9  ;;  %v3003_v19 = vmul.f32 %v12793_v54, %v2981_v24 }
 0xba6   :  { %9744 = vmatprep.mubr.msk.bf16.mxu0 %vm391_vm1, %v3042_v52  ;;  %v3025_v55 = vadd.f32 %v12797_v0, %v3003_v19 }
 0xba8   :  { %v3043_v30 = vpack.c.bf16 %v3025_v55, %v3024_v31 }
 0xba9   :  { %v10370_v28 = vpop.eup %10369 }
 0xbaa   :  { %9745 = vmatmul.mubr.msk.bf16.gmra.mxu0 %vm391_vm1, %v3043_v30  ;;  %v2982_v49 = vmul.f32 %v10370_v28, %v12770_v42 }
 0xbac   :  { %v3004_v4 = vmul.f32 %v12793_v54, %v2982_v49 }
 0xbad   :  { %v10372_v58 = vpop.eup %10371 }
 0xbae   :  { %v10374_v32 = vpop.eup %10373  ;;  %v2983_v53 = vmul.f32 %v10372_v58, %v12775_v60  ;;  %v3026_v50 = vadd.f32 %v12797_v0, %v3004_v4  ;;  %v3626_v58 = vsel %vm391_vm1, %v12849_v11, 0 }
 0xbaf   :  { %v2984_v43 = vmul.f32 %v10374_v32, %v12778_v12 }
 0xbb0   :  { %v3005_v20 = vmul.f32 %v12793_v54, %v2983_v53 }
 0xbb1   :  { %v10376_v39 = vpop.eup %10375  ;;  %v3006_v29 = vmul.f32 %v12793_v54, %v2984_v43 }
 0xbb2   :  { %v3027_v26 = vadd.f32 %v12797_v0, %v3005_v20  ;;  %v2985_v27 = vmul.f32 %v10376_v39, %v12786_v21 }
 0xbb3   :  { %v3028_v60 = vadd.f32 %v12797_v0, %v3006_v29 }
 0xbb4   :  { %v3044_v42 = vpack.c.bf16 %v3027_v26, %v3026_v50  ;;  %v3007_v59 = vmul.f32 %v12793_v54, %v2985_v27 }
 0xbb6   :  { %9748 = vmatprep.mubr.msk.bf16.mxu0 %vm391_vm1, %v3044_v42  ;;  %v3029_v12 = vadd.f32 %v12797_v0, %v3007_v59  ;;  %v3594_v0 = vmul.bf16 %v12802_v13, %v12845_v57 }
 0xbb8   :  { %v3045_v9 = vpack.c.bf16 %v3029_v12, %v3028_v60  ;;  %v3623_v11 = vsel %vm391_vm1, %v3594_v0, 0 }
 0xbba   :  { %9749 = vmatmul.mubr.msk.bf16.gmra.mxu0 %vm391_vm1, %v3045_v9 }
 0xbf1   :  { %v9738_v15 = vpop.f32.mrf.mxu0 }
 0xbf2   :  { %v3144_v55 = vadd.f32 %v9738_v15, %v8737_v16 }
 0xbf3   :  { %v3135_v61 = vpop.f32.mrf.mxu0 }
 0xbf4   :  { %v3136_v19 = vadd.f32 %v8737_v16, %v3135_v61 }
 0xbf5   :  { %v9739_v24 = vpop.f32.mrf.mxu0 }
 0xbf6   :  { %v3147_v52 = vadd.f32 %v9739_v24, %v8737_v16 }
 0xbf7   :  { %v3138_v21 = vpop.f32.mrf.mxu0 }
 0xbf8   :  { %v3139_v31 = vadd.f32 %v8737_v16, %v3138_v21  ;;  %v3276_v28 = vpack.c.bf16 %v3147_v52, %v3144_v55 }
 0xbf9   :  { %v9742_v30 = vpop.f32.mrf.mxu0 }
 0xbfa   :  { %v3275_v54 = vpack.c.bf16 %v3139_v31, %v3136_v19  ;;  %v3160_v39 = vadd.f32 %v9742_v30, %v8737_v16 }
 0xbfb   :  { %v3151_v49 = vpop.f32.mrf.mxu0 }
 0xbfc   :  { %9764 = vmatprep.mubr.msk.bf16.mxu1 %vm391_vm1, %v3275_v54  ;;  %v3152_v43 = vadd.f32 %v8737_v16, %v3151_v49 }
 0xbfd   :  { %v9743_v32 = vpop.f32.mrf.mxu0  ;;  %9765 = vmatmul.mubr.msk.bf16.vlgmr.msra.gmra.mxu1 %vm391_vm1, %v3276_v28 }
 0xbfe   :  { %9785 = vmatpush3.bf16.xpose.msra.mxu1 %v3626_v58  ;;  %v3163_v53 = vadd.f32 %v9743_v32, %v8737_v16 }
 0xbff   :  { %v3154_v4 = vpop.f32.mrf.mxu0  ;;  %10003 = vmatprep.subr.msk.bf16.mxu1 %vm391_vm1, %v3594_v0 }
 0xc00   :  { %v3155_v20 = vadd.f32 %v8737_v16, %v3154_v4  ;;  %v3278_v26 = vpack.c.bf16 %v3163_v53, %v3160_v39  ;;  %v12899_v39 = vpop.permute.xlu1 %3301 }
 0xc01   :  { %15343 = vst [vmem:[#allocation50_spill] sm:$0xff] %v12899_v39 }
 0xc02   :  { %v3277_v50 = vpack.c.bf16 %v3155_v20, %v3152_v43 }
 0xc04   :  { %9768 = vmatprep.mubr.msk.bf16.mxu1 %vm391_vm1, %v3277_v50  ;;  %v3307_v50 = vmul.bf16 %v12899_v39, %v12834_v41 }
 0xc05   :  { %9769 = vmatmul.mubr.msk.bf16.gmra.mxu1 %vm391_vm1, %v3278_v26  ;;  %v12903_v26 = vpop.permute.xlu0 %3303 }
 0xc06   :  { %9787 = vmatpush3.bf16.xpose.msra.mxu1 %v3623_v11  ;;  %15344 = vst [vmem:[#allocation52_spill] sm:$0xff] %v12903_v26  ;;  %v3308_v11 = vmul.bf16 %v12903_v26, %v12834_v41 }
 0xc6a   :  { %v9746_v13 = vpop.f32.mrf.mxu0 }
 0xc6b   :  { %v3176_v9 = vadd.f32 %v9746_v13, %v8737_v16 }
 0xc6c   :  { %v3167_v27 = vpop.f32.mrf.mxu0 }
 0xc6d   :  { %v3168_v60 = vadd.f32 %v8737_v16, %v3167_v27 }
 0xc6e   :  { %v9747_v29 = vpop.f32.mrf.mxu0 }
 0xc6f   :  { %v3179_v42 = vadd.f32 %v9747_v29, %v8737_v16 }
 0xc70   :  { %v3170_v59 = vpop.f32.mrf.mxu0 }
 0xc71   :  { %v3171_v12 = vadd.f32 %v8737_v16, %v3170_v59  ;;  %v3584_v61 = vpack.c.bf16 %v3179_v42, %v3176_v9 }
 0xc73   :  { %v3583_v15 = vpack.c.bf16 %v3171_v12, %v3168_v60 }
 0xc75   :  { %9788 = vmatprep.mubr.msk.bf16.mxu1 %vm391_vm1, %v3583_v15 }
 0xc76   :  { %9789 = vmatmul.mubr.msk.bf16.vlgmr.msra.gmra.mxu1 %vm391_vm1, %v3584_v61 }
 0xc7a   :  { %v9750_v24 = vpop.f32.mrf.mxu0 }
 0xc7b   :  { %v3192_v54 = vadd.f32 %v9750_v24, %v8737_v16 }
 0xc7c   :  { %v3183_v52 = vpop.f32.mrf.mxu0 }
 0xc7d   :  { %v3184_v55 = vadd.f32 %v8737_v16, %v3183_v52 }
 0xc7e   :  { %v9751_v21 = vpop.f32.mrf.mxu0 }
 0xc7f   :  { %v3195_v19 = vadd.f32 %v9751_v21, %v8737_v16 }
 0xc80   :  { %v3186_v31 = vpop.f32.mrf.mxu0 }
 0xc81   :  { %v3187_v30 = vadd.f32 %v8737_v16, %v3186_v31  ;;  %v3586_v49 = vpack.c.bf16 %v3195_v19, %v3192_v54 }
 0xc83   :  { %v3585_v28 = vpack.c.bf16 %v3187_v30, %v3184_v55 }
 0xc85   :  { %9792 = vmatprep.mubr.msk.bf16.mxu1 %vm391_vm1, %v3585_v28 }
 0xc86   :  { %9793 = vmatmul.mubr.msk.bf16.gmra.mxu1 %vm391_vm1, %v3586_v49 }
 0xcbd   :  { %v9766_v58 = vpop.f32.mrf.mxu1 }
 0xcbe   :  { %v3412_v0 = vsel %vm3221_vm2, %v9766_v58, -inf }
 0xcbf   :  { %3413 = vmax.xlane.f32.xlu0 %v3412_v0  ;;  %v3375_v32 = vpop.f32.mrf.mxu1 }
 0xcc0   :  { %v3406_v53 = vsel %vm3221_vm2, %v3375_v32, -inf }
 0xcc1   :  { %3407 = vmax.xlane.f32.xlu1 %v3406_v53  ;;  %v9767_v4 = vpop.f32.mrf.mxu1 }
 0xcc2   :  { %v3415_v20 = vsel %vm3221_vm2, %v9767_v4, -inf }
 0xcc3   :  { %v3378_v43 = vpop.f32.mrf.mxu1 }
 0xcc4   :  { %v3409_v16 = vsel %vm3221_vm2, %v3378_v43, -inf }
 0xcc5   :  { %3416 = vmax.xlane.f32.xlu1 %v3415_v20  ;;  %3410 = vmax.xlane.f32.xlu0 %v3409_v16  ;;  %v12909_v13 = vpop.f32.mrf.mxu1 }
 0xcc6   :  { %v3424_v59 = vsel %vm3221_vm2, %v12909_v13, -inf }
 0xcc7   :  { %v12911_v27 = vpop.f32.mrf.mxu1 }
 0xcc8   :  { %v3418_v12 = vsel %vm3221_vm2, %v12911_v27, -inf }
 0xcc9   :  { %v12913_v29 = vpop.f32.mrf.mxu1 }
 0xcca   :  { %v3427_v42 = vsel %vm3221_vm2, %v12913_v29, -inf }
 0xccb   :  { %v12919_v60 = vpop.f32.mrf.mxu1 }
 0xccc   :  { %v3421_v41 = vsel %vm3221_vm2, %v12919_v60, -inf }
 0xcd6   :  { %3311 = vrot.lane.b32.xlu1 %v3307_v50, %s11127_s0 }
 0xcdb   :  { %3313 = vrot.lane.b32.xlu0 %v3308_v11, %s11127_s0 }
 0xcfa   :  { %3428 = vmax.xlane.f32.xlu1 %v3427_v42  ;;  %3425 = vmax.xlane.f32.xlu0 %v3424_v59 }
 0xcfe   :  { %3422 = vmax.xlane.f32.xlu1 %v3421_v41  ;;  %3419 = vmax.xlane.f32.xlu0 %v3418_v12 }
 0xd36   :  { %v12925_v9 = vpop.f32.mrf.mxu1 }
 0xd37   :  { %v3699_v15 = vsel %vm3221_vm2, %v12925_v9, -inf }
 0xd38   :  { %v12929_v61 = vpop.f32.mrf.mxu1  ;;  %3700 = vmax.xlane.f32.xlu0 %v3699_v15 }
 0xd39   :  { %v3693_v24 = vsel %vm3221_vm2, %v12929_v61, -inf }
 0xd3a   :  { %3694 = vmax.xlane.f32.xlu1 %v3693_v24  ;;  %v12933_v52 = vpop.f32.mrf.mxu1 }
 0xd3b   :  { %v3702_v19 = vsel %vm3221_vm2, %v12933_v52, -inf }
 0xd3c   :  { %v12935_v21 = vpop.f32.mrf.mxu1 }
 0xd3d   :  { %v3696_v31 = vsel %vm3221_vm2, %v12935_v21, -inf }
 0xd3e   :  { %3703 = vmax.xlane.f32.xlu1 %v3702_v19  ;;  %3697 = vmax.xlane.f32.xlu0 %v3696_v31 }
 0xd46   :  { %v12941_v55 = vpop.f32.mrf.mxu1 }
 0xd47   :  { %v3711_v30 = vsel %vm3221_vm2, %v12941_v55, -inf }
 0xd48   :  { %v12945_v54 = vpop.f32.mrf.mxu1  ;;  %3712 = vmax.xlane.f32.xlu0 %v3711_v30  ;;  %v3414_v28 = vpop.xlane.xlu0 %3413 }
 0xd49   :  { %v3432_v49 = vsub.f32 %v9766_v58, %v3414_v28  ;;  %v3705_v50 = vsel %vm3221_vm2, %v12945_v54, -inf }
 0xd4a   :  { %v3408_v0 = vpop.xlane.xlu1 %3407  ;;  %v12947_v53 = vpop.f32.mrf.mxu1 }
 0xd4b   :  { %v3430_v20 = vsub.f32 %v3375_v32, %v3408_v0  ;;  %v3714_v16 = vsel %vm3221_vm2, %v12947_v53, -inf  ;;  %v3442_v42 = vmul.f32 1.442695, %v3432_v49  ;;  %v3596_v0 = vmul.bf16 %v12845_v57, %v12899_v39 }
 0xd4c   :  { %3715 = vmax.xlane.f32.xlu1 %v3714_v16  ;;  %v12953_v11 = vpop.f32.mrf.mxu1  ;;  %3706 = vmax.xlane.f32.xlu0 %v3705_v50  ;;  %v3597_v16 = vmul.bf16 %v12845_v57, %v12903_v26 }
 0xd4d   :  { %v3438_v59 = vmul.f32 1.442695, %v3430_v20  ;;  %v3708_v24 = vsel %vm3221_vm2, %v12953_v11, -inf  ;;  %10377 = vpow2.f32 %v3442_v42 }
 0xd4e   :  { %v3417_v41 = vpop.xlane.xlu1 %3416  ;;  %v3411_v12 = vpop.xlane.xlu0 %3410 }
 0xd4f   :  { %v3433_v15 = vsub.f32 %v9767_v4, %v3417_v41  ;;  %v3431_v58 = vsub.f32 %v3378_v43, %v3411_v12  ;;  %10379 = vpow2.f32 %v3438_v59 }
 0xd50   :  { %3709 = vmax.xlane.f32.xlu1 %v3708_v24 }
 0xd51   :  { %v3444_v32 = vmul.f32 1.442695, %v3433_v15  ;;  %v3440_v19 = vmul.f32 1.442695, %v3431_v58 }
 0xd52   :  { %v3312_v31 = vpop.permute.xlu1 %3311  ;;  %v3314_v30 = vpop.permute.xlu0 %3313 }
 0xd53   :  { %10381 = vpow2.f32 %v3444_v32  ;;  %v3321_v28 = vsel %vm391_vm1, %v3314_v30, %v12903_v26  ;;  %v3317_v4 = vsel %vm391_vm1, %v3312_v31, %v12899_v39 }
 0xd54   :  { %10383 = vpow2.f32 %v3440_v19  ;;  %9772 = vmatprep.subr.bf16.mxu0 %v3321_v28 }
 0xd55   :  { %9773 = vmatpush3.bf16.msra.mxu0 %v3321_v28 }
 0xd56   :  { %9774 = vmatprep.subr.bf16.mxu0 %v3317_v4 }
 0xd59   :  { %9775 = vmatpush3.bf16.msra.mxu0 %v3317_v4 }
 0xd5a   :  { %v10378_v43 = vpop.eup %10377 }
 0xd5c   :  { %v10380_v49 = vpop.eup %10379 }
 0xd60   :  { %v10382_v20 = vpop.eup %10381 }
 0xd61   :  { %v10384_v50 = vpop.eup %10383  ;;  %v3455_v42 = vpack.c.bf16 %v10382_v20, %v10378_v43  ;;  %3600 = vrot.lane.b32.xlu1 %v3596_v0, %s11127_s0 }
 0xd62   :  { %3602 = vrot.lane.b32.xlu0 %v3597_v16, %s11127_s0  ;;  %v3454_v59 = vpack.c.bf16 %v10384_v50, %v10380_v49 }
 0xd64   :  { %9776 = vmatprep.mubr.msk.bf16.mxu0 %vm3221_vm2, %v3454_v59 }
 0xd65   :  { %9777 = vmatmul.mubr.msk.bf16.vlgmr.msra.gmra.mxu0 %vm3221_vm2, %v3455_v42 }
 0xd83   :  { %v3429_v41 = vpop.xlane.xlu1 %3428  ;;  %v3426_v12 = vpop.xlane.xlu0 %3425 }
 0xd84   :  { %v3437_v15 = vsub.f32 %v12913_v29, %v3429_v41  ;;  %v3436_v58 = vsub.f32 %v12909_v13, %v3426_v12 }
 0xd86   :  { %v3452_v24 = vmul.f32 1.442695, %v3437_v15  ;;  %v3450_v32 = vmul.f32 1.442695, %v3436_v58 }
 0xd87   :  { %v3423_v57 = vpop.xlane.xlu1 %3422  ;;  %v3420_v19 = vpop.xlane.xlu0 %3419 }
 0xd88   :  { %v3435_v31 = vsub.f32 %v12919_v60, %v3423_v57  ;;  %v3434_v30 = vsub.f32 %v12911_v27, %v3420_v19  ;;  %10385 = vpow2.f32 %v3452_v24 }
 0xd89   :  { %10387 = vpow2.f32 %v3450_v32 }
 0xd8a   :  { %v3448_v28 = vmul.f32 1.442695, %v3435_v31  ;;  %v3446_v4 = vmul.f32 1.442695, %v3434_v30 }
 0xd8c   :  { %10389 = vpow2.f32 %v3448_v28 }
 0xd8d   :  { %10391 = vpow2.f32 %v3446_v4 }
 0xd95   :  { %v10386_v43 = vpop.eup %10385 }
 0xd96   :  { %v10388_v49 = vpop.eup %10387 }
 0xd97   :  { %v3457_v13 = vpack.c.bf16 %v10386_v43, %v10388_v49 }
 0xd99   :  { %v10390_v0 = vpop.eup %10389 }
 0xd9a   :  { %v10392_v29 = vpop.eup %10391 }
 0xd9b   :  { %v3456_v20 = vpack.c.bf16 %v10390_v0, %v10392_v29 }
 0xd9d   :  { %9780 = vmatprep.mubr.msk.bf16.mxu0 %vm3221_vm2, %v3456_v20 }
 0xd9e   :  { %9781 = vmatmul.mubr.msk.bf16.gmra.mxu0 %vm3221_vm2, %v3457_v13 }
 0xdc1   :  { %v3701_v16 = vpop.xlane.xlu0 %3700 }
 0xdc2   :  { %v3719_v58 = vsub.f32 %v12925_v9, %v3701_v16 }
 0xdc3   :  { %v3695_v60 = vpop.xlane.xlu1 %3694 }
 0xdc4   :  { %v3717_v27 = vsub.f32 %v12929_v61, %v3695_v60  ;;  %v3729_v32 = vmul.f32 1.442695, %v3719_v58  ;;  %v10123_v58 = vld [vmem:[%s15345_s2 + $0x18] sm:$0xff]  }
 0xdc5   :  { %9808 = vmatprep.subr.bf16.mxu1 %v10123_v58 }
 0xdc6   :  { %v3725_v59 = vmul.f32 1.442695, %v3717_v27  ;;  %9809 = vmatpush3.bf16.msra.mxu1 %v10123_v58 }
 0xdc7   :  { %v3704_v50 = vpop.xlane.xlu1 %3703  ;;  %v3698_v42 = vpop.xlane.xlu0 %3697 }
 0xdc8   :  { %v3718_v41 = vsub.f32 %v12935_v21, %v3698_v42  ;;  %v3720_v12 = vsub.f32 %v12933_v52, %v3704_v50  ;;  %10393 = vpow2.f32 %v3725_v59 }
 0xdca   :  { %v3727_v15 = vmul.f32 1.442695, %v3718_v41  ;;  %v3731_v24 = vmul.f32 1.442695, %v3720_v12 }
 0xdcc   :  { %10395 = vpow2.f32 %v3727_v15  ;;  %v15346_v15 = vmov 0  }
 0xdcd   :  { %10397 = vpow2.f32 %v3731_v24 }
 0xdce   :  { %10399 = vpow2.f32 %v3729_v32 }
 0xdd1   :  { %v3713_v57 = vpop.xlane.xlu0 %3712 }
 0xdd2   :  { %v3723_v21 = vsub.f32 %v12941_v55, %v3713_v57  ;;  %v10124_v57 = vld [vmem:[%s15345_s2 + $0x10] sm:$0xff]  }
 0xdd3   :  { %9810 = vmatprep.subr.bf16.mxu1 %v10124_v57 }
 0xdd4   :  { %v3737_v20 = vmul.f32 1.442695, %v3723_v21  ;;  %9811 = vmatpush3.bf16.msra.mxu1 %v10124_v57 }
 0xdd5   :  { %v3716_v19 = vpop.xlane.xlu1 %3715  ;;  %v3707_v31 = vpop.xlane.xlu0 %3706 }
 0xdd6   :  { %v3724_v61 = vsub.f32 %v12947_v53, %v3716_v19  ;;  %v3721_v30 = vsub.f32 %v12945_v54, %v3707_v31  ;;  %v10394_v52 = vpop.eup %10393 }
 0xdd8   :  { %v3739_v28 = vmul.f32 1.442695, %v3724_v61  ;;  %v3733_v4 = vmul.f32 1.442695, %v3721_v30  ;;  %v10125_v61 = vld [vmem:[%s15345_s2 + $0x8] sm:$0xff]   ;;  %v10126_v30 = vld [vmem:[%s15345_s2] sm:$0xff]  }
 0xdd9   :  { %v3710_v43 = vpop.xlane.xlu1 %3709  ;;  %v3603_v9 = vpop.permute.xlu0 %3602  ;;  %9812 = vmatprep.subr.bf16.mxu1 %v10125_v61 }
 0xdda   :  { %v10396_v49 = vpop.eup %10395  ;;  %v3722_v0 = vsub.f32 %v12953_v11, %v3710_v43  ;;  %v3608_v29 = vsel %vm391_vm1, %v3603_v9, %v12903_v26  ;;  %10401 = vpow2.f32 %v3739_v28  ;;  %9813 = vmatpush3.bf16.msra.mxu1 %v10125_v61  ;;  %v13565_v26 = vld [vmem:[#allocation12 + $0x1] ss:$0 sm:$0xff] }
 0xddb   :  { %9796 = vmatprep.subr.bf16.mxu0 %v3608_v29  ;;  %v3741_v13 = vpack.c.bf16 %v10396_v49, %v10394_v52  ;;  %10403 = vpow2.f32 %v3733_v4  ;;  %v10398_v54 = vpop.eup %10397  ;;  %9814 = vmatprep.subr.bf16.mxu1 %v10126_v30 }
 0xddc   :  { %v3735_v53 = vmul.f32 1.442695, %v3722_v0  ;;  %9797 = vmatpush3.bf16.msra.mxu0 %v3608_v29  ;;  %v10400_v11 = vpop.eup %10399 }
 0xddd   :  { %9800 = vmatprep.mubr.msk.bf16.mxu0 %vm3221_vm2, %v3741_v13  ;;  %v3601_v55 = vpop.permute.xlu1 %3600  ;;  %v3742_v60 = vpack.c.bf16 %v10398_v54, %v10400_v11 }
 0xdde   :  { %10405 = vpow2.f32 %v3735_v53  ;;  %v3605_v16 = vsel %vm391_vm1, %v3601_v55, %v12899_v39  ;;  %9815 = vmatpush3.bf16.msra.mxu1 %v10126_v30 }
 0xddf   :  { %10407 = vpow2.f32 %v3737_v20  ;;  %9798 = vmatprep.subr.bf16.mxu0 %v3605_v16 }
 0xde0   :  { %9799 = vmatpush3.bf16.msra.mxu0 %v3605_v16 }
 0xde3   :  { %9801 = vmatmul.mubr.msk.bf16.vlgmr.msra.gmra.mxu0 %vm3221_vm2, %v3742_v60 }
 0xde7   :  { %v10402_v27 = vpop.eup %10401 }
 0xde8   :  { %v10404_v50 = vpop.eup %10403 }
 0xdeb   :  { %v10406_v42 = vpop.eup %10405 }
 0xdec   :  { %v10408_v59 = vpop.eup %10407  ;;  %v3743_v41 = vpack.c.bf16 %v10406_v42, %v10404_v50 }
 0xded   :  { %v3744_v12 = vpack.c.bf16 %v10402_v27, %v10408_v59 }
 0xdee   :  { %9804 = vmatprep.mubr.msk.bf16.mxu0 %vm3221_vm2, %v3743_v41 }
 0xdef   :  { %9805 = vmatmul.mubr.msk.bf16.gmra.mxu0 %vm3221_vm2, %v3744_v12 }
 0xdf0   :  { %4423 = vmatprep.mubr.bf16.mxu0 %v15346_v15 }
 0xe25   :  { %v9778_v24 = vpop.f32.mrf.mxu0 }
 0xe26   :  { %10409 = vrcp.f32 %v9778_v24 }
 0xe27   :  { %v3504_v32 = vpop.f32.mrf.mxu0 }
 0xe28   :  { %10411 = vrcp.f32 %v3504_v32 }
 0xe29   :  { %v9779_v19 = vpop.f32.mrf.mxu0 }
 0xe2b   :  { %v3507_v31 = vpop.f32.mrf.mxu0 }
 0xe2c   :  { %10413 = vrcp.f32 %v3507_v31 }
 0xe2d   :  { %10415 = vrcp.f32 %v9779_v19 }
 0xe33   :  { %v10410_v21 = vpop.eup %10409 }
 0xe34   :  { %3555 = vrot.lane.b32.xlu0 %v10410_v21, %s11127_s0 }
 0xe35   :  { %v10412_v28 = vpop.eup %10411 }
 0xe36   :  { %3551 = vrot.lane.b32.xlu1 %v10412_v28, %s11127_s0 }
 0xe39   :  { %v10414_v52 = vpop.eup %10413 }
 0xe3a   :  { %3553 = vrot.lane.b32.xlu1 %v10414_v52, %s11127_s0  ;;  %v10416_v4 = vpop.eup %10415 }
 0xe3e   :  { %3557 = vrot.lane.b32.xlu1 %v10416_v4, %s11127_s0 }
 0xe5e   :  { %v13000_v43 = vpop.f32.mrf.mxu0 }
 0xe60   :  { %v3520_v9 = vpop.f32.mrf.mxu0 }
 0xe61   :  { %10417 = vrcp.f32 %v3520_v9 }
 0xe62   :  { %v13002_v49 = vpop.f32.mrf.mxu0  ;;  %10419 = vrcp.f32 %v13000_v43 }
 0xe64   :  { %v3523_v0 = vpop.f32.mrf.mxu0 }
 0xe65   :  { %10421 = vrcp.f32 %v3523_v0 }
 0xe66   :  { %10423 = vrcp.f32 %v13002_v49 }
 0xe6e   :  { %v10418_v29 = vpop.eup %10417 }
 0xe6f   :  { %3559 = vrot.lane.b32.xlu0 %v10418_v29, %s11127_s0  ;;  %v10420_v20 = vpop.eup %10419 }
 0xe72   :  { %v10422_v13 = vpop.eup %10421 }
 0xe73   :  { %3563 = vrot.lane.b32.xlu0 %v10420_v20, %s11127_s0  ;;  %3561 = vrot.lane.b32.xlu1 %v10422_v13, %s11127_s0  ;;  %v10424_v53 = vpop.eup %10423 }
 0xe77   :  { %3565 = vrot.lane.b32.xlu1 %v10424_v53, %s11127_s0 }
 0xea3   :  { %v13010_v55 = vpop.f32.mrf.mxu0 }
 0xea5   :  { %v3791_v54 = vpop.f32.mrf.mxu0 }
 0xea6   :  { %10425 = vrcp.f32 %v3791_v54  ;;  %v3556_v59 = vpop.permute.xlu0 %3555 }
 0xea7   :  { %v9803_v16 = vpop.f32.mrf.mxu0  ;;  %10427 = vrcp.f32 %v13010_v55  ;;  %v3577_v57 = vmul.f32 %v9778_v24, %v3556_v59 }
 0xea8   :  { %v3552_v11 = vpop.permute.xlu1 %3551 }
 0xea9   :  { %v3794_v60 = vpop.f32.mrf.mxu0  ;;  %v3575_v50 = vmul.f32 %v3552_v11, %v3504_v32 }
 0xeaa   :  { %10429 = vrcp.f32 %v3794_v60 }
 0xeab   :  { %10431 = vrcp.f32 %v9803_v16 }
 0xeac   :  { %v3554_v27 = vpop.permute.xlu1 %3553 }
 0xead   :  { %v3576_v42 = vmul.f32 %v3554_v27, %v3507_v31 }
 0xeaf   :  { %v3870_v41 = vpack.c.bf16 %v3576_v42, %v3575_v50  ;;  %v9806_v12 = vpop.f32.mrf.mxu0 }
 0xeb0   :  { %v3558_v58 = vpop.permute.xlu1 %3557 }
 0xeb1   :  { %v3578_v61 = vmul.f32 %v9779_v19, %v3558_v58  ;;  %9816 = vmatprep.mubr.msk.bf16.mxu1 %vm391_vm1, %v3870_v41  ;;  %v3807_v30 = vpop.f32.mrf.mxu0 }
 0xeb2   :  { %10433 = vrcp.f32 %v3807_v30 }
 0xeb3   :  { %v10426_v21 = vpop.eup %10425  ;;  %v3871_v28 = vpack.c.bf16 %v3578_v61, %v3577_v57  ;;  %v9807_v52 = vpop.f32.mrf.mxu0  ;;  %10435 = vrcp.f32 %v9806_v12 }
 0xeb4   :  { %3838 = vrot.lane.b32.xlu0 %v10426_v21, %s11127_s0  ;;  %v10428_v31 = vpop.eup %10427 }
 0xeb5   :  { %9817 = vmatmul.mubr.msk.bf16.vlgmr.msra.gmra.mxu1 %vm391_vm1, %v3871_v28  ;;  %v3810_v32 = vpop.f32.mrf.mxu0 }
 0xeb6   :  { %10437 = vrcp.f32 %v3810_v32 }
 0xeb7   :  { %v10430_v4 = vpop.eup %10429  ;;  %10439 = vrcp.f32 %v9807_v52 }
 0xeb8   :  { %3842 = vrot.lane.b32.xlu0 %v10428_v31, %s11127_s0  ;;  %3840 = vrot.lane.b32.xlu1 %v10430_v4, %s11127_s0  ;;  %v10432_v24 = vpop.eup %10431 }
 0xebc   :  { %3844 = vrot.lane.b32.xlu1 %v10432_v24, %s11127_s0 }
 0xebf   :  { %v10434_v19 = vpop.eup %10433 }
 0xec0   :  { %3846 = vrot.lane.b32.xlu0 %v10434_v19, %s11127_s0  ;;  %v10436_v29 = vpop.eup %10435 }
 0xec3   :  { %v10438_v20 = vpop.eup %10437 }
 0xec4   :  { %3850 = vrot.lane.b32.xlu0 %v10436_v29, %s11127_s0  ;;  %3848 = vrot.lane.b32.xlu1 %v10438_v20, %s11127_s0  ;;  %v10440_v13 = vpop.eup %10439 }
 0xec8   :  { %3852 = vrot.lane.b32.xlu1 %v10440_v13, %s11127_s0 }
 0xee1   :  { %v3560_v53 = vpop.permute.xlu0 %3559 }
 0xee2   :  { %v3579_v27 = vmul.f32 %v3560_v53, %v3520_v9 }
 0xee5   :  { %v3562_v11 = vpop.permute.xlu1 %3561  ;;  %v3564_v42 = vpop.permute.xlu0 %3563 }
 0xee6   :  { %v3580_v50 = vmul.f32 %v3562_v11, %v3523_v0  ;;  %v3581_v58 = vmul.f32 %v13000_v43, %v3564_v42 }
 0xee8   :  { %v3872_v59 = vpack.c.bf16 %v3580_v50, %v3579_v27 }
 0xee9   :  { %v3566_v41 = vpop.permute.xlu1 %3565 }
 0xeea   :  { %v3582_v57 = vmul.f32 %v13002_v49, %v3566_v41  ;;  %9820 = vmatprep.mubr.msk.bf16.mxu1 %vm391_vm1, %v3872_v59 }
 0xeec   :  { %v3873_v61 = vpack.c.bf16 %v3582_v57, %v3581_v58 }
 0xeee   :  { %9821 = vmatmul.mubr.msk.bf16.gmra.mxu1 %vm391_vm1, %v3873_v61 }
 0xf26   :  { %v3839_v21 = vpop.permute.xlu0 %3838 }
 0xf27   :  { %v3862_v31 = vmul.f32 %v3839_v21, %v3791_v54 }
 0xf2a   :  { %v3841_v28 = vpop.permute.xlu1 %3840  ;;  %v3843_v24 = vpop.permute.xlu0 %3842 }
 0xf2b   :  { %v3863_v4 = vmul.f32 %v3841_v28, %v3794_v60  ;;  %v3864_v0 = vmul.f32 %v13010_v55, %v3843_v24 }
 0xf2d   :  { %v3874_v19 = vpack.c.bf16 %v3863_v4, %v3862_v31 }
 0xf2e   :  { %v3845_v9 = vpop.permute.xlu1 %3844 }
 0xf2f   :  { %v3865_v29 = vmul.f32 %v9803_v16, %v3845_v9  ;;  %9824 = vmatprep.mubr.msk.bf16.mxu1 %vm391_vm1, %v3874_v19  ;;  %v13032_v16 = vld [vmem:[#allocation21] ss:$0 sm:$0xff] }
 0xf31   :  { %v3875_v43 = vpack.c.bf16 %v3865_v29, %v3864_v0 }
 0xf32   :  { %v3847_v20 = vpop.permute.xlu0 %3846 }
 0xf33   :  { %9825 = vmatmul.mubr.msk.bf16.gmra.mxu1 %vm391_vm1, %v3875_v43  ;;  %v3866_v13 = vmul.f32 %v3847_v20, %v3807_v30 }
 0xf36   :  { %v3849_v49 = vpop.permute.xlu1 %3848  ;;  %v3851_v11 = vpop.permute.xlu0 %3850 }
 0xf37   :  { %v3867_v53 = vmul.f32 %v3849_v49, %v3810_v32  ;;  %v3868_v54 = vmul.f32 %v9806_v12, %v3851_v11 }
 0xf39   :  { %v3876_v27 = vpack.c.bf16 %v3867_v53, %v3866_v13 }
 0xf3a   :  { %v3853_v50 = vpop.permute.xlu1 %3852 }
 0xf3b   :  { %v3869_v60 = vmul.f32 %v9807_v52, %v3853_v50  ;;  %9828 = vmatprep.mubr.msk.bf16.mxu1 %vm391_vm1, %v3876_v27 }
 0xf3d   :  { %v3877_v42 = vpack.c.bf16 %v3869_v60, %v3868_v54 }
 0xf3f   :  { %9829 = vmatmul.mubr.msk.bf16.gmra.mxu1 %vm391_vm1, %v3877_v42 }
 0xf75   :  { %v9818_v55 = vpop.f32.mrf.mxu1 }
 0xf76   :  { %v3975_v41 = vadd.f32 %v9818_v55, %v13032_v16 }
 0xf77   :  { %v3966_v59 = vpop.f32.mrf.mxu1 }
 0xf78   :  { %v3967_v58 = vadd.f32 %v13032_v16, %v3966_v59  ;;  %v13040_v12 = vadd.f32 %v3975_v41, %v12596_v37 }
 0xf79   :  { %v9819_v30 = vpop.f32.mrf.mxu1 }
 0xf7a   :  { %v13037_v32 = vadd.f32 %v3967_v58, %v12593_v6  ;;  %v3978_v52 = vadd.f32 %v9819_v30, %v13032_v16  ;;  %v4053_v37 = vsel %vm391_vm1, %v13040_v12, 0.0 }
 0xf7b   :  { %v3969_v57 = vpop.f32.mrf.mxu1 }
 0xf7c   :  { %v3970_v61 = vadd.f32 %v13032_v16, %v3969_v57  ;;  %v4047_v21 = vsel %vm391_vm1, %v13037_v32, 0.0  ;;  %v13050_v31 = vadd.f32 %v3978_v52, %v12606_v23 }
 0xf7d   :  { %4048 = vadd.xlane.f32.xlu0 %v4047_v21 }
 0xf7e   :  { %v13047_v28 = vadd.f32 %v3970_v61, %v12603_v22  ;;  %v4056_v4 = vsel %vm391_vm1, %v13050_v31, 0.0 }
 0xf80   :  { %v4050_v6 = vsel %vm391_vm1, %v13047_v28, 0.0 }
 0xf81   :  { %4051 = vadd.xlane.f32.xlu1 %v4050_v6  ;;  %4054 = vadd.xlane.f32.xlu0 %v4053_v37 }
 0xf85   :  { %4057 = vadd.xlane.f32.xlu0 %v4056_v4 }
 0xfae   :  { %v9822_v24 = vpop.f32.mrf.mxu1 }
 0xfaf   :  { %v3991_v22 = vadd.f32 %v9822_v24, %v13032_v16 }
 0xfb0   :  { %v3982_v19 = vpop.f32.mrf.mxu1 }
 0xfb1   :  { %v3983_v9 = vadd.f32 %v13032_v16, %v3982_v19  ;;  %v13064_v43 = vadd.f32 %v3991_v22, %v12620_v35 }
 0xfb2   :  { %v9823_v23 = vpop.f32.mrf.mxu1 }
 0xfb3   :  { %v13061_v0 = vadd.f32 %v3983_v9, %v12617_v3  ;;  %v3994_v20 = vadd.f32 %v9823_v23, %v13032_v16  ;;  %v4065_v35 = vsel %vm391_vm1, %v13064_v43, 0.0 }
 0xfb4   :  { %v3985_v29 = vpop.f32.mrf.mxu1 }
 0xfb5   :  { %v3986_v49 = vadd.f32 %v13032_v16, %v3985_v29  ;;  %v4059_v13 = vsel %vm391_vm1, %v13061_v0, 0.0  ;;  %v13074_v11 = vadd.f32 %v3994_v20, %v12630_v34 }
 0xfb6   :  { %4060 = vadd.xlane.f32.xlu0 %v4059_v13 }
 0xfb7   :  { %v13071_v53 = vadd.f32 %v3986_v49, %v12627_v40  ;;  %v4068_v27 = vsel %vm391_vm1, %v13074_v11, 0.0 }
 0xfb9   :  { %v4062_v3 = vsel %vm391_vm1, %v13071_v53, 0.0 }
 0xfba   :  { %4063 = vadd.xlane.f32.xlu1 %v4062_v3  ;;  %4066 = vadd.xlane.f32.xlu0 %v4065_v35 }
 0xfbe   :  { %4069 = vadd.xlane.f32.xlu1 %v4068_v27 }
 0xff3   :  { %v9826_v50 = vpop.f32.mrf.mxu1 }
 0xff4   :  { %v4007_v40 = vadd.f32 %v9826_v50, %v13032_v16 }
 0xff5   :  { %v3998_v54 = vpop.f32.mrf.mxu1 }
 0xff6   :  { %v3999_v60 = vadd.f32 %v13032_v16, %v3998_v54  ;;  %v13088_v59 = vadd.f32 %v4007_v40, %v12644_v17 }
 0xff7   :  { %v9827_v34 = vpop.f32.mrf.mxu1 }
 0xff8   :  { %v13085_v42 = vadd.f32 %v3999_v60, %v12641_v18  ;;  %v4010_v41 = vadd.f32 %v9827_v34, %v13032_v16  ;;  %v4077_v17 = vsel %vm391_vm1, %v13088_v59, 0.0 }
 0xff9   :  { %v4001_v55 = vpop.f32.mrf.mxu1 }
 0xffa   :  { %v4002_v58 = vadd.f32 %v13032_v16, %v4001_v55  ;;  %v4071_v30 = vsel %vm391_vm1, %v13085_v42, 0.0  ;;  %v13098_v52 = vadd.f32 %v4010_v41, %v12654_v45 }
 0xffb   :  { %4072 = vadd.xlane.f32.xlu0 %v4071_v30 }
 0xffc   :  { %v13095_v57 = vadd.f32 %v4002_v58, %v12651_v36  ;;  %v4080_v36 = vsel %vm391_vm1, %v13098_v52, 0.0 }
 0xffe   :  { %v4074_v18 = vsel %vm391_vm1, %v13095_v57, 0.0 }
 0xfff   :  { %4075 = vadd.xlane.f32.xlu1 %v4074_v18  ;;  %4078 = vadd.xlane.f32.xlu0 %v4077_v17  ;;  %v9830_v61 = vpop.f32.mrf.mxu1 }
0x1000   :  { %v4023_v6 = vadd.f32 %v9830_v61, %v13032_v16 }
0x1001   :  { %v4014_v21 = vpop.f32.mrf.mxu1 }
0x1002   :  { %v4015_v37 = vadd.f32 %v13032_v16, %v4014_v21  ;;  %v13112_v19 = vadd.f32 %v4023_v6, %v12671_v10  ;;  %v10129_v6 = vld [vmem:[%s15347_s9 + $0x34] ss:$8 sps:$4 sm:$0xff]  }
0x1003   :  { %4081 = vadd.xlane.f32.xlu1 %v4080_v36  ;;  %v9831_v45 = vpop.f32.mrf.mxu1  ;;  %4399 = vmatprep.subr.bf16.mxu0 %v10129_v6  ;;  %v10132_v36 = vld [vmem:[%s15347_s9 + $0x24] ss:$8 sps:$4 sm:$0xff]  }
0x1004   :  { %v13109_v4 = vadd.f32 %v4015_v37, %v12665_v7  ;;  %v4026_v22 = vadd.f32 %v9831_v45, %v13032_v16  ;;  %v4089_v35 = vsel %vm391_vm1, %v13112_v19, 0.0  ;;  %v10127_v37 = vld [vmem:[%s15347_s9 + $0x30] ss:$8 sps:$4 sm:$0xff]   ;;  %v10130_v45 = vld [vmem:[%s15347_s9 + $0x20] ss:$8 sps:$4 sm:$0xff]  }
0x1005   :  { %v4017_v24 = vpop.f32.mrf.mxu1  ;;  %4400 = vmatpush1.bf16.msra.mxu0 %v10127_v37 }
0x1006   :  { %v4018_v9 = vadd.f32 %v13032_v16, %v4017_v24  ;;  %v4049_v23 = vpop.xlane.xlu0 %4048  ;;  %v4083_v29 = vsel %vm391_vm1, %v13109_v4, 0.0  ;;  %v13125_v13 = vadd.f32 %v4026_v22, %v12689_v33  ;;  %4401 = vmatprep.subr.bf16.mxu0 %v10132_v36  ;;  %v10135_v24 = vld [vmem:[%s15347_s9 + $0x14] ss:$8 sps:$4 sm:$0xff]   ;;  %v10133_v22 = vld [vmem:[%s15347_s9 + $0x10] ss:$8 sps:$4 sm:$0xff]  }
0x1007   :  { %v4095_v20 = vmul.f32 0.015625, %v4049_v23  ;;  %4084 = vadd.xlane.f32.xlu0 %v4083_v29  ;;  %v10138_v23 = vld [vmem:[%s15347_s9 + $0x4] ss:$8 sps:$4 sm:$0xff]  }
0x1008   :  { %v13119_v49 = vadd.f32 %v4018_v9, %v12678_v51  ;;  %v4092_v60 = vsel %vm391_vm1, %v13125_v13, 0.0  ;;  %v10136_v9 = vld [vmem:[%s15347_s9] ss:$8 sps:$4 sm:$0xff]  }
0x1009   :  { %v13122_v7 = vsub.f32 %v13037_v32, %v4095_v20  ;;  %4402 = vmatpush1.bf16.msra.mxu0 %v10130_v45 }
0x100a   :  { %v4052_v10 = vpop.xlane.xlu1 %4051  ;;  %v4055_v3 = vpop.xlane.xlu0 %4054  ;;  %v4086_v16 = vsel %vm391_vm1, %v13119_v49, 0.0  ;;  %4403 = vmatprep.subr.bf16.mxu0 %v10135_v24 }
0x100b   :  { %v4096_v27 = vmul.f32 0.015625, %v4052_v10  ;;  %v4097_v50 = vmul.f32 0.015625, %v4055_v3  ;;  %4087 = vadd.xlane.f32.xlu1 %v4086_v16  ;;  %4090 = vadd.xlane.f32.xlu0 %v4089_v35  ;;  %v4127_v51 = vmul.f32 %v13122_v7, %v13122_v7 }
0x100d   :  { %v13134_v54 = vsub.f32 %v13047_v28, %v4096_v27  ;;  %v13137_v33 = vsub.f32 %v13040_v12, %v4097_v50  ;;  %v4143_v34 = vsel %vm391_vm1, %v4127_v51, 0.0  ;;  %4404 = vmatpush1.bf16.msra.mxu0 %v10133_v22 }
0x100e   :  { %v4058_v40 = vpop.xlane.xlu0 %4057  ;;  %4405 = vmatprep.subr.bf16.mxu0 %v10138_v23 }
0x100f   :  { %v4098_v55 = vmul.f32 0.015625, %v4058_v40  ;;  %4093 = vadd.xlane.f32.xlu1 %v4092_v60  ;;  %4144 = vadd.xlane.f32.xlu0 %v4143_v34  ;;  %v4128_v41 = vmul.f32 %v13134_v54, %v13134_v54  ;;  %v4129_v58 = vmul.f32 %v13137_v33, %v13137_v33 }
0x1011   :  { %v13147_v30 = vsub.f32 %v13050_v31, %v4098_v55  ;;  %v4146_v18 = vsel %vm391_vm1, %v4128_v41, 0.0  ;;  %v4149_v17 = vsel %vm391_vm1, %v4129_v58, 0.0  ;;  %4406 = vmatpush1.bf16.msra.mxu0 %v10136_v9 }
0x1013   :  { %4147 = vadd.xlane.f32.xlu1 %v4146_v18  ;;  %4150 = vadd.xlane.f32.xlu0 %v4149_v17  ;;  %v4130_v61 = vmul.f32 %v13147_v30, %v13147_v30 }
0x1015   :  { %v4152_v21 = vsel %vm391_vm1, %v4130_v61, 0.0 }
0x1017   :  { %4153 = vadd.xlane.f32.xlu1 %v4152_v21 }
0x103f   :  { %v4061_v29 = vpop.xlane.xlu0 %4060 }
0x1040   :  { %v4099_v20 = vmul.f32 0.015625, %v4061_v29 }
0x1042   :  { %v13163_v10 = vsub.f32 %v13061_v0, %v4099_v20 }
0x1043   :  { %v4064_v3 = vpop.xlane.xlu1 %4063  ;;  %v4067_v16 = vpop.xlane.xlu0 %4066 }
0x1044   :  { %v4100_v35 = vmul.f32 0.015625, %v4064_v3  ;;  %v4101_v27 = vmul.f32 0.015625, %v4067_v16  ;;  %v4131_v50 = vmul.f32 %v13163_v10, %v13163_v10 }
0x1046   :  { %v13168_v51 = vsub.f32 %v13071_v53, %v4100_v35  ;;  %v13171_v40 = vsub.f32 %v13064_v43, %v4101_v27  ;;  %v4155_v60 = vsel %vm391_vm1, %v4131_v50, 0.0 }
0x1047   :  { %v4070_v34 = vpop.xlane.xlu1 %4069  ;;  %4156 = vadd.xlane.f32.xlu0 %v4155_v60 }
0x1048   :  { %v4102_v55 = vmul.f32 0.015625, %v4070_v34  ;;  %v4132_v41 = vmul.f32 %v13168_v51, %v13168_v51  ;;  %v4133_v58 = vmul.f32 %v13171_v40, %v13171_v40 }
0x104a   :  { %v13179_v18 = vsub.f32 %v13074_v11, %v4102_v55  ;;  %v4158_v17 = vsel %vm391_vm1, %v4132_v41, 0.0  ;;  %v4161_v61 = vsel %vm391_vm1, %v4133_v58, 0.0 }
0x104b   :  { %4159 = vadd.xlane.f32.xlu1 %v4158_v17  ;;  %4162 = vadd.xlane.f32.xlu0 %v4161_v61 }
0x104c   :  { %v4134_v21 = vmul.f32 %v13179_v18, %v13179_v18 }
0x104e   :  { %v4164_v6 = vsel %vm391_vm1, %v4134_v21, 0.0 }
0x104f   :  { %4165 = vadd.xlane.f32.xlu1 %v4164_v6 }
0x1084   :  { %v4073_v37 = vpop.xlane.xlu0 %4072 }
0x1085   :  { %v4103_v36 = vmul.f32 0.015625, %v4073_v37 }
0x1087   :  { %v13187_v45 = vsub.f32 %v13085_v42, %v4103_v36 }
0x1088   :  { %v4076_v24 = vpop.xlane.xlu1 %4075  ;;  %v4079_v22 = vpop.xlane.xlu0 %4078 }
0x1089   :  { %v4104_v9 = vmul.f32 0.015625, %v4076_v24  ;;  %v4105_v23 = vmul.f32 0.015625, %v4079_v22  ;;  %v4135_v29 = vmul.f32 %v13187_v45, %v13187_v45 }
0x108b   :  { %v13192_v20 = vsub.f32 %v13095_v57, %v4104_v9  ;;  %v13195_v3 = vsub.f32 %v13088_v59, %v4105_v23  ;;  %v4167_v16 = vsel %vm391_vm1, %v4135_v29, 0.0 }
0x108c   :  { %v4082_v35 = vpop.xlane.xlu1 %4081  ;;  %4168 = vadd.xlane.f32.xlu0 %v4167_v16 }
0x108d   :  { %v4106_v27 = vmul.f32 0.015625, %v4082_v35  ;;  %v4136_v50 = vmul.f32 %v13192_v20, %v13192_v20  ;;  %v4137_v60 = vmul.f32 %v13195_v3, %v13195_v3 }
0x108f   :  { %v13203_v34 = vsub.f32 %v13098_v52, %v4106_v27  ;;  %v4170_v55 = vsel %vm391_vm1, %v4136_v50, 0.0  ;;  %v4173_v41 = vsel %vm391_vm1, %v4137_v60, 0.0 }
0x1090   :  { %4171 = vadd.xlane.f32.xlu1 %v4170_v55  ;;  %4174 = vadd.xlane.f32.xlu0 %v4173_v41  ;;  %v4085_v58 = vpop.xlane.xlu0 %4084 }
0x1091   :  { %v4107_v17 = vmul.f32 0.015625, %v4085_v58  ;;  %v4138_v61 = vmul.f32 %v13203_v34, %v13203_v34 }
0x1093   :  { %v13210_v21 = vsub.f32 %v13109_v4, %v4107_v17  ;;  %v4176_v6 = vsel %vm391_vm1, %v4138_v61, 0.0 }
0x1094   :  { %v4088_v37 = vpop.xlane.xlu1 %4087  ;;  %4177 = vadd.xlane.f32.xlu1 %v4176_v6  ;;  %v4091_v36 = vpop.xlane.xlu0 %4090 }
0x1095   :  { %v4108_v24 = vmul.f32 0.015625, %v4088_v37  ;;  %v4109_v22 = vmul.f32 0.015625, %v4091_v36  ;;  %v4139_v9 = vmul.f32 %v13210_v21, %v13210_v21 }
0x1097   :  { %v13216_v23 = vsub.f32 %v13119_v49, %v4108_v24  ;;  %v13219_v29 = vsub.f32 %v13112_v19, %v4109_v22  ;;  %v4179_v16 = vsel %vm391_vm1, %v4139_v9, 0.0 }
0x1098   :  { %v4094_v35 = vpop.xlane.xlu1 %4093  ;;  %4180 = vadd.xlane.f32.xlu0 %v4179_v16  ;;  %v4145_v27 = vpop.xlane.xlu0 %4144 }
0x1099   :  { %v4110_v50 = vmul.f32 0.015625, %v4094_v35  ;;  %v4191_v60 = vmul.f32 0.015625, %v4145_v27  ;;  %v4140_v55 = vmul.f32 %v13216_v23, %v13216_v23  ;;  %v4141_v41 = vmul.f32 %v13219_v29, %v13219_v29 }
0x109b   :  { %v13227_v58 = vsub.f32 %v13125_v13, %v4110_v50  ;;  %v4207_v17 = vadd.f32 1e-05, %v4191_v60  ;;  %v4182_v61 = vsel %vm391_vm1, %v4140_v55, 0.0  ;;  %v4185_v6 = vsel %vm391_vm1, %v4141_v41, 0.0 }
0x109c   :  { %v4148_v37 = vpop.xlane.xlu1 %4147  ;;  %4183 = vadd.xlane.f32.xlu1 %v4182_v61  ;;  %4186 = vadd.xlane.f32.xlu0 %v4185_v6  ;;  %v4151_v36 = vpop.xlane.xlu0 %4150 }
0x109d   :  { %10441 = vrsqrt.f32 %v4207_v17  ;;  %v4192_v24 = vmul.f32 0.015625, %v4148_v37  ;;  %v4193_v22 = vmul.f32 0.015625, %v4151_v36  ;;  %v4142_v9 = vmul.f32 %v13227_v58, %v13227_v58  ;;  %v13235_v17 = vld [vmem:[#allocation22] ss:$0 sm:$0xff] }
0x109f   :  { %v4208_v16 = vadd.f32 1e-05, %v4192_v24  ;;  %v4209_v35 = vadd.f32 1e-05, %v4193_v22  ;;  %v4188_v27 = vsel %vm391_vm1, %v4142_v9, 0.0 }
0x10a0   :  { %4189 = vadd.xlane.f32.xlu1 %v4188_v27  ;;  %v4154_v50 = vpop.xlane.xlu1 %4153  ;;  %v13239_v22 = vld [vmem:[#allocation24] ss:$0 sm:$0xff] }
0x10a1   :  { %10443 = vrsqrt.f32 %v4208_v16  ;;  %v4194_v60 = vmul.f32 0.015625, %v4154_v50 }
0x10a2   :  { %10445 = vrsqrt.f32 %v4209_v35 }
0x10a3   :  { %v4210_v55 = vadd.f32 1e-05, %v4194_v60 }
0x10a5   :  { %10447 = vrsqrt.f32 %v4210_v55 }
0x10aa   :  { %v10442_v41 = vpop.eup %10441 }
0x10ab   :  { %v4239_v61 = vmul.f32 %v10442_v41, %v13122_v7 }
0x10ad   :  { %v4261_v37 = vmul.f32 %v13235_v17, %v4239_v61 }
0x10ae   :  { %v10444_v6 = vpop.eup %10443 }
0x10af   :  { %v4240_v36 = vmul.f32 %v10444_v6, %v13134_v54  ;;  %v10446_v24 = vpop.eup %10445  ;;  %v4283_v35 = vadd.f32 %v13239_v22, %v4261_v37  ;;  %v10141_v37 = vld [vmem:[%s15348_s7 + $0x70] sm:$0xff]  }
0x10b0   :  { %v4241_v27 = vmul.f32 %v10446_v24, %v13137_v33  ;;  %v10139_v33 = vld [vmem:[%s15348_s7 + $0x78] sm:$0xff]  }
0x10b1   :  { %v4262_v9 = vmul.f32 %v13235_v17, %v4240_v36  ;;  %9273 = vmatprep.subr.bf16.mxu1 %v10139_v33  ;;  %v10142_v36 = vld [vmem:[%s15348_s7 + $0x30] sm:$0xff]  }
0x10b2   :  { %v10448_v16 = vpop.eup %10447  ;;  %v4263_v55 = vmul.f32 %v13235_v17, %v4241_v27 }
0x10b3   :  { %v4284_v7 = vadd.f32 %v13239_v22, %v4262_v9  ;;  %v4242_v50 = vmul.f32 %v10448_v16, %v13147_v30  ;;  %v10140_v30 = vld [vmem:[%s15348_s7 + $0x38] sm:$0xff]   ;;  %v10143_v9 = vld [vmem:[%s15348_s7 + $0x68] sm:$0xff]  }
0x10b4   :  { %v4285_v61 = vadd.f32 %v13239_v22, %v4263_v55  ;;  %9274 = vmatpush3.bf16.msra.mxu1 %v10140_v30  ;;  %v10147_v30 = vld [vmem:[%s15348_s7 + $0x58] sm:$0xff]  }
0x10b5   :  { %v4307_v60 = vpack.c.bf16 %v4284_v7, %v4283_v35  ;;  %v4264_v54 = vmul.f32 %v13235_v17, %v4242_v50  ;;  %9275 = vmatprep.subr.bf16.mxu1 %v10141_v37  ;;  %v10144_v7 = vld [vmem:[%s15348_s7 + $0x28] sm:$0xff]  }
0x10b7   :  { %8795 = vmatmul.mubr.msk.bf16.vlgmr.msra.gmra.mxu0 %vm391_vm1, %v4307_v60  ;;  %v4286_v41 = vadd.f32 %v13239_v22, %v4264_v54  ;;  %v10145_v60 = vld [vmem:[%s15348_s7 + $0x60] sm:$0xff]  }
0x10b8   :  { %4433 = vmatprep.mubr.bf16.mxu0 %v15346_v15  ;;  %9276 = vmatpush3.bf16.msra.mxu1 %v10142_v36 }
0x10b9   :  { %v4308_v6 = vpack.c.bf16 %v4286_v41, %v4285_v61  ;;  %9277 = vmatprep.subr.bf16.mxu1 %v10143_v9 }
0x10bc   :  { %9278 = vmatpush3.bf16.msra.mxu1 %v10144_v7 }
0x10bd   :  { %9279 = vmatprep.subr.bf16.mxu1 %v10145_v60 }
0x10bf   :  { %8796 = vmatmul.mubr.msk.bf16.gmra.mxu0 %vm391_vm1, %v4308_v6  ;;  %v10146_v6 = vld [vmem:[%s15348_s7 + $0x20] sm:$0xff]  }
0x10c0   :  { %4443 = vmatprep.mubr.bf16.mxu0 %v15346_v15  ;;  %9280 = vmatpush3.bf16.msra.mxu1 %v10146_v6 }
0x10c1   :  { %9281 = vmatprep.subr.bf16.mxu1 %v10147_v30 }
0x10d0   :  { %v4157_v24 = vpop.xlane.xlu0 %4156 }
0x10d1   :  { %v4195_v16 = vmul.f32 0.015625, %v4157_v24  ;;  %v10148_v24 = vld [vmem:[%s15348_s7 + $0x18] sm:$0xff]  }
0x10d2   :  { %9282 = vmatpush3.bf16.msra.mxu1 %v10148_v24  ;;  %v10151_v24 = vld [vmem:[%s15348_s7 + $0x48] sm:$0xff]  }
0x10d3   :  { %v4211_v35 = vadd.f32 1e-05, %v4195_v16 }
0x10d4   :  { %v4160_v27 = vpop.xlane.xlu1 %4159  ;;  %v4163_v50 = vpop.xlane.xlu0 %4162 }
0x10d5   :  { %10449 = vrsqrt.f32 %v4211_v35  ;;  %v4196_v54 = vmul.f32 0.015625, %v4160_v27  ;;  %v4197_v55 = vmul.f32 0.015625, %v4163_v50 }
0x10d7   :  { %v4212_v41 = vadd.f32 1e-05, %v4196_v54  ;;  %v4213_v61 = vadd.f32 1e-05, %v4197_v55 }
0x10d8   :  { %v4166_v33 = vpop.xlane.xlu1 %4165 }
0x10d9   :  { %10451 = vrsqrt.f32 %v4212_v41  ;;  %v4198_v37 = vmul.f32 0.015625, %v4166_v33 }
0x10da   :  { %10453 = vrsqrt.f32 %v4213_v61 }
0x10db   :  { %v4214_v36 = vadd.f32 1e-05, %v4198_v37 }
0x10dd   :  { %10455 = vrsqrt.f32 %v4214_v36  ;;  %v10150_v36 = vld [vmem:[%s15348_s7 + $0x10] sm:$0xff]  }
0x10e2   :  { %v10450_v9 = vpop.eup %10449 }
0x10e3   :  { %v4243_v16 = vmul.f32 %v10450_v9, %v13163_v10  ;;  %v10152_v9 = vld [vmem:[%s15348_s7 + $0x8] sm:$0xff]  }
0x10e5   :  { %v4265_v7 = vmul.f32 %v13235_v17, %v4243_v16  ;;  %v10153_v16 = vld [vmem:[%s15348_s7 + $0x40] sm:$0xff]  }
0x10e6   :  { %v10452_v35 = vpop.eup %10451 }
0x10e7   :  { %v4244_v27 = vmul.f32 %v10452_v35, %v13168_v51  ;;  %v10454_v50 = vpop.eup %10453  ;;  %v4287_v55 = vadd.f32 %v13239_v22, %v4265_v7  ;;  %v10154_v35 = vld [vmem:[%s15348_s7] sm:$0xff]  }
0x10e8   :  { %v4245_v61 = vmul.f32 %v10454_v50, %v13171_v40 }
0x10e9   :  { %v4266_v60 = vmul.f32 %v13235_v17, %v4244_v27 }
0x10ea   :  { %v10456_v54 = vpop.eup %10455  ;;  %v4267_v33 = vmul.f32 %v13235_v17, %v4245_v61 }
0x10eb   :  { %v4288_v41 = vadd.f32 %v13239_v22, %v4266_v60  ;;  %v4246_v10 = vmul.f32 %v10456_v54, %v13179_v18  ;;  %v10149_v18 = vld [vmem:[%s15348_s7 + $0x50] sm:$0xff]  }
0x10ec   :  { %v4289_v37 = vadd.f32 %v13239_v22, %v4267_v33  ;;  %9283 = vmatprep.subr.bf16.mxu1 %v10149_v18 }
0x10ed   :  { %v4309_v6 = vpack.c.bf16 %v4288_v41, %v4287_v55  ;;  %v4268_v51 = vmul.f32 %v13235_v17, %v4246_v10  ;;  %9284 = vmatpush3.bf16.msra.mxu1 %v10150_v36 }
0x10ee   :  { %9285 = vmatprep.subr.bf16.mxu1 %v10151_v24 }
0x10ef   :  { %8797 = vmatmul.mubr.msk.bf16.gmra.mxu0 %vm391_vm1, %v4309_v6  ;;  %v4290_v30 = vadd.f32 %v13239_v22, %v4268_v51 }
0x10f0   :  { %4453 = vmatprep.mubr.bf16.mxu0 %v15346_v15 }
0x10f1   :  { %v4310_v40 = vpack.c.bf16 %v4290_v30, %v4289_v37  ;;  %9286 = vmatpush3.bf16.msra.mxu1 %v10152_v9 }
0x10f2   :  { %9287 = vmatprep.subr.bf16.mxu1 %v10153_v16 }
0x10f5   :  { %9288 = vmatpush3.bf16.msra.mxu1 %v10154_v35 }
0x10f7   :  { %8798 = vmatmul.mubr.msk.bf16.gmra.mxu0 %vm391_vm1, %v4310_v40 }
0x10f8   :  { %4463 = vmatprep.mubr.bf16.mxu0 %v15346_v15 }
0x1115   :  { %v4169_v27 = vpop.xlane.xlu0 %4168 }
0x1116   :  { %v4199_v7 = vmul.f32 0.015625, %v4169_v27 }
0x1118   :  { %v4215_v50 = vadd.f32 1e-05, %v4199_v7 }
0x1119   :  { %v4172_v60 = vpop.xlane.xlu1 %4171  ;;  %v4175_v54 = vpop.xlane.xlu0 %4174 }
0x111a   :  { %10457 = vrsqrt.f32 %v4215_v50  ;;  %v4200_v55 = vmul.f32 0.015625, %v4172_v60  ;;  %v4201_v41 = vmul.f32 0.015625, %v4175_v54 }
0x111c   :  { %v4216_v61 = vadd.f32 1e-05, %v4200_v55  ;;  %v4217_v10 = vadd.f32 1e-05, %v4201_v41 }
0x111d   :  { %v4178_v6 = vpop.xlane.xlu1 %4177 }
0x111e   :  { %10459 = vrsqrt.f32 %v4216_v61  ;;  %v4202_v51 = vmul.f32 0.015625, %v4178_v6 }
0x111f   :  { %10461 = vrsqrt.f32 %v4217_v10 }
0x1120   :  { %v4218_v33 = vadd.f32 1e-05, %v4202_v51 }
0x1121   :  { %v4181_v30 = vpop.xlane.xlu0 %4180 }
0x1122   :  { %10463 = vrsqrt.f32 %v4218_v33  ;;  %v4203_v37 = vmul.f32 0.015625, %v4181_v30 }
0x1124   :  { %v4219_v40 = vadd.f32 1e-05, %v4203_v37 }
0x1125   :  { %v4184_v18 = vpop.xlane.xlu1 %4183  ;;  %v4187_v36 = vpop.xlane.xlu0 %4186 }
0x1126   :  { %v4204_v24 = vmul.f32 0.015625, %v4184_v18  ;;  %v4205_v16 = vmul.f32 0.015625, %v4187_v36  ;;  %10465 = vrsqrt.f32 %v4219_v40 }
0x1127   :  { %v10458_v9 = vpop.eup %10457 }
0x1128   :  { %v4220_v35 = vadd.f32 1e-05, %v4204_v24  ;;  %v4247_v27 = vmul.f32 %v10458_v9, %v13187_v45  ;;  %v4221_v54 = vadd.f32 1e-05, %v4205_v16 }
0x1129   :  { %v4190_v7 = vpop.xlane.xlu1 %4189 }
0x112a   :  { %10467 = vrsqrt.f32 %v4220_v35  ;;  %v4206_v50 = vmul.f32 0.015625, %v4190_v7  ;;  %v4269_v61 = vmul.f32 %v13235_v17, %v4247_v27 }
0x112b   :  { %v10460_v60 = vpop.eup %10459 }
0x112c   :  { %v4222_v55 = vadd.f32 1e-05, %v4206_v50  ;;  %v4248_v41 = vmul.f32 %v10460_v60, %v13192_v20  ;;  %v10462_v10 = vpop.eup %10461  ;;  %v4291_v33 = vadd.f32 %v13239_v22, %v4269_v61 }
0x112d   :  { %v4249_v30 = vmul.f32 %v10462_v10, %v13195_v3 }
0x112e   :  { %10469 = vrsqrt.f32 %v4222_v55  ;;  %v4270_v6 = vmul.f32 %v13235_v17, %v4248_v41 }
0x112f   :  { %v10464_v51 = vpop.eup %10463  ;;  %10471 = vrsqrt.f32 %v4221_v54  ;;  %v4271_v20 = vmul.f32 %v13235_v17, %v4249_v30 }
0x1130   :  { %v4292_v45 = vadd.f32 %v13239_v22, %v4270_v6  ;;  %v4250_v37 = vmul.f32 %v10464_v51, %v13203_v34 }
0x1131   :  { %v4293_v16 = vadd.f32 %v13239_v22, %v4271_v20 }
0x1132   :  { %v4311_v40 = vpack.c.bf16 %v4292_v45, %v4291_v33  ;;  %v4272_v18 = vmul.f32 %v13235_v17, %v4250_v37  ;;  %v15350_v45 = vld [vmem:[#allocation47_spill] sm:$0xff]  ;;  %v15351_v37 = vld [vmem:[#allocation49_spill] sm:$0xff] }
0x1133   :  { %v10466_v36 = vpop.eup %10465 }
0x1134   :  { %8799 = vmatmul.mubr.msk.bf16.gmra.mxu0 %vm391_vm1, %v4311_v40  ;;  %v4294_v24 = vadd.f32 %v13239_v22, %v4272_v18  ;;  %v4251_v35 = vmul.f32 %v10466_v36, %v13210_v21 }
0x1135   :  { %4473 = vmatprep.mubr.bf16.mxu0 %v15346_v15 }
0x1136   :  { %v4312_v34 = vpack.c.bf16 %v4294_v24, %v4293_v16  ;;  %v4273_v60 = vmul.f32 %v13235_v17, %v4251_v35 }
0x1137   :  { %v10468_v9 = vpop.eup %10467 }
0x1138   :  { %v4252_v3 = vmul.f32 %v10468_v9, %v13216_v23  ;;  %v4295_v23 = vadd.f32 %v13239_v22, %v4273_v60 }
0x113a   :  { %v4274_v27 = vmul.f32 %v13235_v17, %v4252_v3 }
0x113b   :  { %v10470_v7 = vpop.eup %10469 }
0x113c   :  { %v10472_v50 = vpop.eup %10471  ;;  %8800 = vmatmul.mubr.msk.bf16.gmra.mxu0 %vm391_vm1, %v4312_v34  ;;  %v4254_v54 = vmul.f32 %v10470_v7, %v13227_v58  ;;  %v4296_v55 = vadd.f32 %v13239_v22, %v4274_v27 }
0x113d   :  { %4483 = vmatprep.mubr.bf16.mxu0 %v15346_v15  ;;  %v4253_v21 = vmul.f32 %v10472_v50, %v13219_v29  ;;  %v4315_v29 = vld [vmem:[%s15349_s10] sm:$0x3] }
0x113e   :  { %v4313_v41 = vpack.c.bf16 %v4296_v55, %v4295_v23  ;;  %v4276_v61 = vmul.f32 %v13235_v17, %v4254_v54  ;;  %v13320_v30 = vrot.slane %v4315_v29, %v15350_v45  ;;  %v13323_v40 = vrot.slane %v4315_v29, %v15351_v37 }
0x113f   :  { %v4275_v10 = vmul.f32 %v13235_v17, %v4253_v21 }
0x1140   :  { %v4298_v6 = vadd.f32 %v13239_v22, %v4276_v61 }
0x1141   :  { %v4297_v51 = vadd.f32 %v13239_v22, %v4275_v10 }
0x1143   :  { %v4314_v58 = vpack.c.bf16 %v4298_v6, %v4297_v51 }
0x1144   :  { %8801 = vmatmul.mubr.msk.bf16.gmra.mxu0 %vm391_vm1, %v4313_v41 }
0x1145   :  { %4493 = vmatprep.mubr.bf16.mxu0 %v15346_v15 }
0x114c   :  { %8802 = vmatmul.mubr.msk.bf16.gmra.mxu0 %vm391_vm1, %v4314_v58 }
0x114d   :  { %5198 = vmatprep.mubr.bf16.mxu0 %v15346_v15 }
0x1177   :  { %v4425_v33 = vpop.f32.mrf.mxu0 }
0x1178   :  { %v4426_v22 = vadd.f32 %v4425_v33, %v13323_v40 }
0x1179   :  { %v4427_v17 = vpop.f32.mrf.mxu0 }
0x117a   :  { %v4428_v20 = vadd.f32 %v4427_v17, %v13320_v30  ;;  %v4504_v27 = vmax.f32 %v4426_v22, 0.0 }
0x117b   :  { %v4429_v18 = vpop.f32.mrf.mxu0 }
0x117c   :  { %v4430_v36 = vadd.f32 %v4429_v18, %v13323_v40  ;;  %v4505_v3 = vmax.f32 %v4428_v20, 0.0 }
0x117d   :  { %v4431_v24 = vpop.f32.mrf.mxu0 }
0x117e   :  { %v4432_v9 = vadd.f32 %v4431_v24, %v13320_v30  ;;  %v4506_v16 = vmax.f32 %v4430_v36, 0.0 }
0x117f   :  { %v4435_v35 = vpop.f32.mrf.mxu0 }
0x1180   :  { %v4507_v34 = vmax.f32 %v4432_v9, 0.0  ;;  %v4568_v60 = vpack.c.bf16 %v4506_v16, %v4504_v27  ;;  %v4436_v23 = vadd.f32 %v4435_v35, %v13323_v40 }
0x1181   :  { %v4437_v7 = vpop.f32.mrf.mxu0 }
0x1182   :  { %v4569_v50 = vpack.c.bf16 %v4507_v34, %v4505_v3  ;;  %v4438_v55 = vadd.f32 %v4437_v7, %v13320_v30  ;;  %v4508_v58 = vmax.f32 %v4436_v23, 0.0 }
0x1183   :  { %v4439_v54 = vpop.f32.mrf.mxu0 }
0x1184   :  { %v4440_v21 = vadd.f32 %v4439_v54, %v13323_v40  ;;  %4712 = vmatprep.mubr.bf16.mxu1 %v4569_v50  ;;  %v4509_v6 = vmax.f32 %v4438_v55, 0.0 }
0x1185   :  { %v4441_v41 = vpop.f32.mrf.mxu0  ;;  %4713 = vmatmul.mubr.bf16.vlgmr.msra.gmra.mxu1 %v4568_v60 }
0x1186   :  { %v4442_v61 = vadd.f32 %v4441_v41, %v13320_v30  ;;  %v4510_v10 = vmax.f32 %v4440_v21, 0.0 }
0x1188   :  { %v4511_v51 = vmax.f32 %v4442_v61, 0.0  ;;  %v4570_v33 = vpack.c.bf16 %v4510_v10, %v4508_v58 }
0x118a   :  { %v4571_v29 = vpack.c.bf16 %v4511_v51, %v4509_v6 }
0x118c   :  { %4720 = vmatprep.mubr.bf16.mxu1 %v4571_v29 }
0x118d   :  { %4721 = vmatmul.mubr.bf16.gmra.mxu1 %v4570_v33 }
0x11af   :  { %v4445_v17 = vpop.f32.mrf.mxu0 }
0x11b0   :  { %v4446_v24 = vadd.f32 %v4445_v17, %v13323_v40 }
0x11b1   :  { %v4447_v18 = vpop.f32.mrf.mxu0 }
0x11b2   :  { %v4448_v36 = vadd.f32 %v4447_v18, %v13320_v30  ;;  %v4512_v7 = vmax.f32 %v4446_v24, 0.0 }
0x11b3   :  { %v4449_v20 = vpop.f32.mrf.mxu0 }
0x11b4   :  { %v4450_v22 = vadd.f32 %v4449_v20, %v13323_v40  ;;  %v4513_v34 = vmax.f32 %v4448_v36, 0.0 }
0x11b5   :  { %v4451_v9 = vpop.f32.mrf.mxu0 }
0x11b6   :  { %v4452_v16 = vadd.f32 %v4451_v9, %v13320_v30  ;;  %v4514_v35 = vmax.f32 %v4450_v22, 0.0 }
0x11b7   :  { %v4455_v3 = vpop.f32.mrf.mxu0 }
0x11b8   :  { %v4515_v27 = vmax.f32 %v4452_v16, 0.0  ;;  %v4572_v54 = vpack.c.bf16 %v4514_v35, %v4512_v7  ;;  %v4456_v41 = vadd.f32 %v4455_v3, %v13323_v40 }
0x11b9   :  { %v4457_v50 = vpop.f32.mrf.mxu0 }
0x11ba   :  { %v4573_v60 = vpack.c.bf16 %v4515_v27, %v4513_v34  ;;  %v4458_v21 = vadd.f32 %v4457_v50, %v13320_v30  ;;  %v4516_v29 = vmax.f32 %v4456_v41, 0.0 }
0x11bb   :  { %v4459_v55 = vpop.f32.mrf.mxu0 }
0x11bc   :  { %v4460_v23 = vadd.f32 %v4459_v55, %v13323_v40  ;;  %4728 = vmatprep.mubr.bf16.mxu1 %v4573_v60  ;;  %v4517_v51 = vmax.f32 %v4458_v21, 0.0 }
0x11bd   :  { %v4461_v61 = vpop.f32.mrf.mxu0  ;;  %4729 = vmatmul.mubr.bf16.gmra.mxu1 %v4572_v54 }
0x11be   :  { %v4462_v10 = vadd.f32 %v4461_v61, %v13320_v30  ;;  %v4518_v6 = vmax.f32 %v4460_v23, 0.0 }
0x11c0   :  { %v4519_v58 = vmax.f32 %v4462_v10, 0.0  ;;  %v4574_v17 = vpack.c.bf16 %v4518_v6, %v4516_v29 }
0x11c2   :  { %v4575_v33 = vpack.c.bf16 %v4519_v58, %v4517_v51 }
0x11c4   :  { %4736 = vmatprep.mubr.bf16.mxu1 %v4575_v33 }
0x11c5   :  { %4737 = vmatmul.mubr.bf16.gmra.mxu1 %v4574_v17 }
0x11f4   :  { %v4465_v18 = vpop.f32.mrf.mxu0 }
0x11f5   :  { %v4466_v9 = vadd.f32 %v4465_v18, %v13323_v40 }
0x11f6   :  { %v4467_v20 = vpop.f32.mrf.mxu0 }
0x11f7   :  { %v4468_v22 = vadd.f32 %v4467_v20, %v13320_v30  ;;  %v4520_v50 = vmax.f32 %v4466_v9, 0.0 }
0x11f8   :  { %v4469_v36 = vpop.f32.mrf.mxu0 }
0x11f9   :  { %v4470_v24 = vadd.f32 %v4469_v36, %v13323_v40  ;;  %v4521_v27 = vmax.f32 %v4468_v22, 0.0 }
0x11fa   :  { %v4471_v16 = vpop.f32.mrf.mxu0 }
0x11fb   :  { %v4472_v35 = vadd.f32 %v4471_v16, %v13320_v30  ;;  %v4522_v3 = vmax.f32 %v4470_v24, 0.0 }
0x11fc   :  { %v4475_v34 = vpop.f32.mrf.mxu0 }
0x11fd   :  { %v4523_v7 = vmax.f32 %v4472_v35, 0.0  ;;  %v4576_v55 = vpack.c.bf16 %v4522_v3, %v4520_v50  ;;  %v4476_v61 = vadd.f32 %v4475_v34, %v13323_v40 }
0x11fe   :  { %v4477_v60 = vpop.f32.mrf.mxu0 }
0x11ff   :  { %v4577_v54 = vpack.c.bf16 %v4523_v7, %v4521_v27  ;;  %v4478_v23 = vadd.f32 %v4477_v60, %v13320_v30  ;;  %v4524_v17 = vmax.f32 %v4476_v61, 0.0 }
0x1200   :  { %v4479_v21 = vpop.f32.mrf.mxu0 }
0x1201   :  { %v4480_v41 = vadd.f32 %v4479_v21, %v13323_v40  ;;  %4744 = vmatprep.mubr.bf16.mxu1 %v4577_v54  ;;  %v4525_v29 = vmax.f32 %v4478_v23, 0.0 }
0x1202   :  { %v4481_v10 = vpop.f32.mrf.mxu0  ;;  %4745 = vmatmul.mubr.bf16.gmra.mxu1 %v4576_v55 }
0x1203   :  { %v4482_v6 = vadd.f32 %v4481_v10, %v13320_v30  ;;  %v4526_v51 = vmax.f32 %v4480_v41, 0.0 }
0x1204   :  { %v4485_v58 = vpop.f32.mrf.mxu0 }
0x1205   :  { %v4527_v33 = vmax.f32 %v4482_v6, 0.0  ;;  %v4578_v36 = vpack.c.bf16 %v4526_v51, %v4524_v17  ;;  %v4486_v16 = vadd.f32 %v4485_v58, %v13323_v40 }
0x1206   :  { %v4487_v18 = vpop.f32.mrf.mxu0 }
0x1207   :  { %v4579_v20 = vpack.c.bf16 %v4527_v33, %v4525_v29  ;;  %v4488_v24 = vadd.f32 %v4487_v18, %v13320_v30  ;;  %v4528_v60 = vmax.f32 %v4486_v16, 0.0 }
0x1208   :  { %v4489_v22 = vpop.f32.mrf.mxu0 }
0x1209   :  { %v4490_v9 = vadd.f32 %v4489_v22, %v13323_v40  ;;  %4752 = vmatprep.mubr.bf16.mxu1 %v4579_v20  ;;  %v4529_v7 = vmax.f32 %v4488_v24, 0.0 }
0x120a   :  { %v4491_v35 = vpop.f32.mrf.mxu0  ;;  %4753 = vmatmul.mubr.bf16.gmra.mxu1 %v4578_v36 }
0x120b   :  { %v4492_v3 = vadd.f32 %v4491_v35, %v13320_v30  ;;  %v4530_v34 = vmax.f32 %v4490_v9, 0.0  ;;  %v13358_v9 = vld [vmem:[%s11298_s30] ss:$0 sm:$0xff] }
0x120c   :  { %v4495_v27 = vpop.f32.mrf.mxu0 }
0x120d   :  { %v4531_v50 = vmax.f32 %v4492_v3, 0.0  ;;  %v4580_v21 = vpack.c.bf16 %v4530_v34, %v4528_v60  ;;  %v4496_v10 = vadd.f32 %v4495_v27, %v13323_v40 }
0x120e   :  { %v4497_v54 = vpop.f32.mrf.mxu0 }
0x120f   :  { %v4581_v55 = vpack.c.bf16 %v4531_v50, %v4529_v7  ;;  %v4498_v41 = vadd.f32 %v4497_v54, %v13320_v30  ;;  %v4532_v17 = vmax.f32 %v4496_v10, 0.0 }
0x1210   :  { %v4499_v23 = vpop.f32.mrf.mxu0 }
0x1211   :  { %v4500_v61 = vadd.f32 %v4499_v23, %v13323_v40  ;;  %4760 = vmatprep.mubr.bf16.mxu1 %v4581_v55  ;;  %v4533_v29 = vmax.f32 %v4498_v41, 0.0 }
0x1212   :  { %v4501_v6 = vpop.f32.mrf.mxu0  ;;  %4761 = vmatmul.mubr.bf16.gmra.mxu1 %v4580_v21 }
0x1213   :  { %v4502_v51 = vadd.f32 %v4501_v6, %v13320_v30  ;;  %v4534_v58 = vmax.f32 %v4500_v61, 0.0 }
0x1215   :  { %v4535_v33 = vmax.f32 %v4502_v51, 0.0  ;;  %v4582_v20 = vpack.c.bf16 %v4534_v58, %v4532_v17 }
0x1217   :  { %v4583_v18 = vpack.c.bf16 %v4535_v33, %v4533_v29 }
0x1219   :  { %4768 = vmatprep.mubr.bf16.mxu1 %v4583_v18 }
0x121a   :  { %4769 = vmatmul.mubr.bf16.gmra.mxu1 %v4582_v20 }
0x1245   :  { %v9289_v36 = vpop.f32.mrf.mxu1 }
0x1247   :  { %v9290_v22 = vpop.f32.mrf.mxu1 }
0x1248   :  { %v9291_v24 = vadd.f32 %v9290_v22, %v9289_v36 }
0x1249   :  { %v9292_v16 = vpop.f32.mrf.mxu1 }
0x124a   :  { %v4777_v40 = vadd.f32 %v9291_v24, %v13037_v32 }
0x124b   :  { %v9293_v35 = vpop.f32.mrf.mxu1 }
0x124c   :  { %v13362_v3 = vadd.f32 %v13358_v9, %v4777_v40  ;;  %v9294_v30 = vadd.f32 %v9293_v35, %v9292_v16 }
0x124d   :  { %v9295_v34 = vpop.f32.mrf.mxu1 }
0x124e   :  { %15352 = vst [vmem:[#allocation53_spill] sm:$0xff] %v13362_v3  ;;  %v4778_v27 = vadd.f32 %v9294_v30, %v13047_v28  ;;  %v4820_v7 = vsel %vm391_vm1, %v13362_v3, 0.0 }
0x124f   :  { %4821 = vadd.xlane.f32.xlu0 %v4820_v7  ;;  %v9296_v50 = vpop.f32.mrf.mxu1 }
0x1250   :  { %v13368_v60 = vadd.f32 %v13358_v9, %v4778_v27  ;;  %v9297_v54 = vadd.f32 %v9296_v50, %v9295_v34 }
0x1251   :  { %v9298_v55 = vpop.f32.mrf.mxu1 }
0x1252   :  { %15353 = vst [vmem:[#allocation54_spill] sm:$0xff] %v13368_v60  ;;  %v4779_v32 = vadd.f32 %v9297_v54, %v13040_v12  ;;  %v4823_v21 = vsel %vm391_vm1, %v13368_v60, 0.0 }
0x1253   :  { %4824 = vadd.xlane.f32.xlu1 %v4823_v21  ;;  %v9299_v23 = vpop.f32.mrf.mxu1 }
0x1254   :  { %v13374_v41 = vadd.f32 %v13358_v9, %v4779_v32  ;;  %v9300_v28 = vadd.f32 %v9299_v23, %v9298_v55 }
0x1256   :  { %15354 = vst [vmem:[#allocation55_spill] sm:$0xff] %v13374_v41  ;;  %v4780_v61 = vadd.f32 %v9300_v28, %v13050_v31  ;;  %v4826_v10 = vsel %vm391_vm1, %v13374_v41, 0.0 }
0x1257   :  { %4827 = vadd.xlane.f32.xlu0 %v4826_v10 }
0x1258   :  { %v13380_v6 = vadd.f32 %v13358_v9, %v4780_v61 }
0x125a   :  { %15355 = vst [vmem:[#allocation56_spill] sm:$0xff] %v13380_v6  ;;  %v4829_v12 = vsel %vm391_vm1, %v13380_v6, 0.0 }
0x125b   :  { %4830 = vadd.xlane.f32.xlu1 %v4829_v12 }
0x127d   :  { %v9301_v51 = vpop.f32.mrf.mxu1 }
0x127f   :  { %v9302_v58 = vpop.f32.mrf.mxu1 }
0x1280   :  { %v9303_v29 = vadd.f32 %v9302_v58, %v9301_v51 }
0x1281   :  { %v9304_v33 = vpop.f32.mrf.mxu1 }
0x1282   :  { %v4781_v17 = vadd.f32 %v9303_v29, %v13061_v0 }
0x1283   :  { %v9305_v18 = vpop.f32.mrf.mxu1 }
0x1284   :  { %v13386_v31 = vadd.f32 %v13358_v9, %v4781_v17  ;;  %v9306_v20 = vadd.f32 %v9305_v18, %v9304_v33 }
0x1285   :  { %v9307_v36 = vpop.f32.mrf.mxu1 }
0x1286   :  { %15356 = vst [vmem:[#allocation57_spill] sm:$0xff] %v13386_v31  ;;  %v4782_v22 = vadd.f32 %v9306_v20, %v13071_v53  ;;  %v4832_v24 = vsel %vm391_vm1, %v13386_v31, 0.0 }
0x1287   :  { %4833 = vadd.xlane.f32.xlu0 %v4832_v24  ;;  %v9308_v16 = vpop.f32.mrf.mxu1 }
0x1288   :  { %v13392_v40 = vadd.f32 %v13358_v9, %v4782_v22  ;;  %v9309_v35 = vadd.f32 %v9308_v16, %v9307_v36 }
0x1289   :  { %v9310_v30 = vpop.f32.mrf.mxu1 }
0x128a   :  { %15357 = vst [vmem:[#allocation58_spill] sm:$0xff] %v13392_v40  ;;  %v4783_v0 = vadd.f32 %v9309_v35, %v13064_v43  ;;  %v4835_v34 = vsel %vm391_vm1, %v13392_v40, 0.0 }
0x128b   :  { %4836 = vadd.xlane.f32.xlu1 %v4835_v34  ;;  %v9311_v27 = vpop.f32.mrf.mxu1 }
0x128c   :  { %v13398_v7 = vadd.f32 %v13358_v9, %v4783_v0  ;;  %v9312_v53 = vadd.f32 %v9311_v27, %v9310_v30 }
0x128e   :  { %15358 = vst [vmem:[#allocation59_spill] sm:$0xff] %v13398_v7  ;;  %v4784_v50 = vadd.f32 %v9312_v53, %v13074_v11  ;;  %v4838_v54 = vsel %vm391_vm1, %v13398_v7, 0.0 }
0x128f   :  { %4839 = vadd.xlane.f32.xlu0 %v4838_v54 }
0x1290   :  { %v13404_v55 = vadd.f32 %v13358_v9, %v4784_v50 }
0x1292   :  { %15359 = vst [vmem:[#allocation60_spill] sm:$0xff] %v13404_v55  ;;  %v4841_v43 = vsel %vm391_vm1, %v13404_v55, 0.0 }
0x1293   :  { %4842 = vadd.xlane.f32.xlu1 %v4841_v43 }
0x12c2   :  { %v9313_v32 = vpop.f32.mrf.mxu1 }
0x12c4   :  { %v9314_v21 = vpop.f32.mrf.mxu1 }
0x12c5   :  { %v9315_v23 = vadd.f32 %v9314_v21, %v9313_v32 }
0x12c6   :  { %v9316_v28 = vpop.f32.mrf.mxu1 }
0x12c7   :  { %v4785_v61 = vadd.f32 %v9315_v23, %v13085_v42 }
0x12c8   :  { %v9317_v10 = vpop.f32.mrf.mxu1 }
0x12c9   :  { %v13410_v11 = vadd.f32 %v13358_v9, %v4785_v61  ;;  %v9318_v12 = vadd.f32 %v9317_v10, %v9316_v28 }
0x12ca   :  { %v9319_v51 = vpop.f32.mrf.mxu1 }
0x12cb   :  { %15360 = vst [vmem:[#allocation62_spill] sm:$0xff] %v13410_v11  ;;  %v4786_v58 = vadd.f32 %v9318_v12, %v13095_v57  ;;  %v4844_v29 = vsel %vm391_vm1, %v13410_v11, 0.0 }
0x12cc   :  { %4845 = vadd.xlane.f32.xlu0 %v4844_v29  ;;  %v9320_v33 = vpop.f32.mrf.mxu1 }
0x12cd   :  { %v13416_v17 = vadd.f32 %v13358_v9, %v4786_v58  ;;  %v9321_v18 = vadd.f32 %v9320_v33, %v9319_v51 }
0x12ce   :  { %v9322_v20 = vpop.f32.mrf.mxu1 }
0x12cf   :  { %15361 = vst [vmem:[#allocation61_spill] sm:$0xff] %v13416_v17  ;;  %v4787_v42 = vadd.f32 %v9321_v18, %v13088_v59  ;;  %v4847_v36 = vsel %vm391_vm1, %v13416_v17, 0.0 }
0x12d0   :  { %4848 = vadd.xlane.f32.xlu1 %v4847_v36  ;;  %v9323_v22 = vpop.f32.mrf.mxu1 }
0x12d1   :  { %v13422_v24 = vadd.f32 %v13358_v9, %v4787_v42  ;;  %v9324_v57 = vadd.f32 %v9323_v22, %v9322_v20 }
0x12d2   :  { %v9325_v16 = vpop.f32.mrf.mxu1 }
0x12d3   :  { %15362 = vst [vmem:[#allocation63_spill] sm:$0xff] %v13422_v24  ;;  %v4788_v35 = vadd.f32 %v9324_v57, %v13098_v52  ;;  %v4850_v30 = vsel %vm391_vm1, %v13422_v24, 0.0 }
0x12d4   :  { %4851 = vadd.xlane.f32.xlu0 %v4850_v30  ;;  %v9326_v0 = vpop.f32.mrf.mxu1 }
0x12d5   :  { %v13428_v34 = vadd.f32 %v13358_v9, %v4788_v35  ;;  %v9327_v59 = vadd.f32 %v9326_v0, %v9325_v16 }
0x12d6   :  { %v9328_v27 = vpop.f32.mrf.mxu1 }
0x12d7   :  { %15363 = vst [vmem:[#allocation70_spill] sm:$0xff] %v13428_v34  ;;  %v4789_v53 = vadd.f32 %v9327_v59, %v13109_v4  ;;  %v4853_v50 = vsel %vm391_vm1, %v13428_v34, 0.0 }
0x12d8   :  { %4854 = vadd.xlane.f32.xlu1 %v4853_v50  ;;  %v9329_v54 = vpop.f32.mrf.mxu1  ;;  %v4822_v43 = vpop.xlane.xlu0 %4821 }
0x12d9   :  { %v13434_v52 = vadd.f32 %v13358_v9, %v4789_v53  ;;  %v9330_v32 = vadd.f32 %v9329_v54, %v9328_v27  ;;  %v4868_v21 = vmul.f32 0.015625, %v4822_v43 }
0x12da   :  { %v9331_v23 = vpop.f32.mrf.mxu1 }
0x12db   :  { %15364 = vst [vmem:[#allocation71_spill] sm:$0xff] %v13434_v52  ;;  %v4790_v28 = vadd.f32 %v9330_v32, %v13119_v49  ;;  %v4856_v61 = vsel %vm391_vm1, %v13434_v52, 0.0  ;;  %v13443_v58 = vsub.f32 %v13362_v3, %v4868_v21 }
0x12dc   :  { %v4825_v10 = vpop.xlane.xlu1 %4824  ;;  %4857 = vadd.xlane.f32.xlu0 %v4856_v61  ;;  %v9332_v4 = vpop.f32.mrf.mxu1  ;;  %v10157_v61 = vld [vmem:[%s15316_s29 + $0x74] ss:$8 sps:$4 sm:$0xff]  }
0x12dd   :  { %v13440_v12 = vadd.f32 %v13358_v9, %v4790_v28  ;;  %v9333_v51 = vadd.f32 %v9332_v4, %v9331_v23  ;;  %v4869_v33 = vmul.f32 0.015625, %v4825_v10  ;;  %v4900_v16 = vmul.f32 %v13443_v58, %v13443_v58  ;;  %v10155_v10 = vld [vmem:[%s15316_s29 + $0x70] ss:$8 sps:$4 sm:$0xff]   ;;  %5174 = vmatprep.subr.bf16.mxu0 %v10157_v61  ;;  %v10160_v4 = vld [vmem:[%s15316_s29 + $0x64] ss:$8 sps:$4 sm:$0xff]  }
0x12de   :  { %v9334_v29 = vpop.f32.mrf.mxu1  ;;  %5175 = vmatpush1.bf16.msra.mxu0 %v10155_v10 }
0x12df   :  { %15365 = vst [vmem:[#allocation72_spill] sm:$0xff] %v13440_v12  ;;  %v4791_v18 = vadd.f32 %v9333_v51, %v13112_v19  ;;  %v4859_v49 = vsel %vm391_vm1, %v13440_v12, 0.0  ;;  %v13454_v35 = vsub.f32 %v13368_v60, %v4869_v33  ;;  %v4916_v50 = vsel %vm391_vm1, %v4900_v16, 0.0  ;;  %v10158_v51 = vld [vmem:[%s15316_s29 + $0x60] ss:$8 sps:$4 sm:$0xff]   ;;  %5176 = vmatprep.subr.bf16.mxu0 %v10160_v4 }
0x12e0   :  { %4860 = vadd.xlane.f32.xlu1 %v4859_v49  ;;  %v9335_v20 = vpop.f32.mrf.mxu1  ;;  %v4828_v42 = vpop.xlane.xlu0 %4827  ;;  %v10161_v33 = vld [vmem:[%s15316_s29 + $0x50] ss:$8 sps:$4 sm:$0xff]   ;;  %v10164_v49 = vld [vmem:[%s15316_s29 + $0x40] ss:$8 sps:$4 sm:$0xff]  }
0x12e1   :  { %v13449_v36 = vadd.f32 %v13358_v9, %v4791_v18  ;;  %v9336_v22 = vadd.f32 %v9335_v20, %v9334_v29  ;;  %v4870_v57 = vmul.f32 0.015625, %v4828_v42  ;;  %v4901_v43 = vmul.f32 %v13454_v35, %v13454_v35  ;;  %v10163_v29 = vld [vmem:[%s15316_s29 + $0x54] ss:$8 sps:$4 sm:$0xff]   ;;  %v10166_v18 = vld [vmem:[%s15316_s29 + $0x44] ss:$8 sps:$4 sm:$0xff]  }
0x12e2   :  { %5177 = vmatpush1.bf16.msra.mxu0 %v10158_v51 }
0x12e3   :  { %15366 = vst [vmem:[#allocation73_spill] sm:$0xff] %v13449_v36  ;;  %v4792_v30 = vadd.f32 %v9336_v22, %v13125_v13  ;;  %v13458_v19 = vsub.f32 %v13374_v41, %v4870_v57  ;;  %v4862_v0 = vsel %vm391_vm1, %v13449_v36, 0.0  ;;  %v4919_v32 = vsel %vm391_vm1, %v4901_v43, 0.0  ;;  %5178 = vmatprep.subr.bf16.mxu0 %v10163_v29 }
0x12e4   :  { %v4831_v59 = vpop.xlane.xlu1 %4830  ;;  %4863 = vadd.xlane.f32.xlu0 %v4862_v0 }
0x12e5   :  { %v13463_v27 = vadd.f32 %v13358_v9, %v4792_v30  ;;  %v4871_v53 = vmul.f32 0.015625, %v4831_v59  ;;  %v4902_v9 = vmul.f32 %v13458_v19, %v13458_v19 }
0x12e6   :  { %5179 = vmatpush1.bf16.msra.mxu0 %v10161_v33 }
0x12e7   :  { %15367 = vst [vmem:[#allocation74_spill] sm:$0xff] %v13463_v27  ;;  %v13467_v54 = vsub.f32 %v13380_v6, %v4871_v53  ;;  %v4865_v13 = vsel %vm391_vm1, %v13463_v27, 0.0  ;;  %v4922_v21 = vsel %vm391_vm1, %v4902_v9, 0.0  ;;  %5180 = vmatprep.subr.bf16.mxu0 %v10166_v18 }
0x12e8   :  { %4866 = vadd.xlane.f32.xlu1 %v4865_v13  ;;  %4917 = vadd.xlane.f32.xlu0 %v4916_v50 }
0x12e9   :  { %v4903_v23 = vmul.f32 %v13467_v54, %v13467_v54 }
0x12ea   :  { %5181 = vmatpush1.bf16.msra.mxu0 %v10164_v49 }
0x12eb   :  { %v4925_v28 = vsel %vm391_vm1, %v4903_v23, 0.0 }
0x12ec   :  { %4920 = vadd.xlane.f32.xlu1 %v4919_v32  ;;  %4923 = vadd.xlane.f32.xlu0 %v4922_v21 }
0x12f0   :  { %4926 = vadd.xlane.f32.xlu1 %v4925_v28 }
0x1310   :  { %v4834_v20 = vpop.xlane.xlu0 %4833 }
0x1311   :  { %v4872_v42 = vmul.f32 0.015625, %v4834_v20 }
0x1313   :  { %v13489_v22 = vsub.f32 %v13386_v31, %v4872_v42 }
0x1314   :  { %v4837_v57 = vpop.xlane.xlu1 %4836 }
0x1315   :  { %v4873_v16 = vmul.f32 0.015625, %v4837_v57  ;;  %v4904_v30 = vmul.f32 %v13489_v22, %v13489_v22 }
0x1317   :  { %v13494_v0 = vsub.f32 %v13392_v40, %v4873_v16  ;;  %v4928_v59 = vsel %vm391_vm1, %v4904_v30, 0.0 }
0x1318   :  { %4929 = vadd.xlane.f32.xlu0 %v4928_v59  ;;  %v4840_v53 = vpop.xlane.xlu0 %4839 }
0x1319   :  { %v4874_v50 = vmul.f32 0.015625, %v4840_v53  ;;  %v4905_v13 = vmul.f32 %v13494_v0, %v13494_v0 }
0x131b   :  { %v13500_v43 = vsub.f32 %v13398_v7, %v4874_v50  ;;  %v4931_v9 = vsel %vm391_vm1, %v4905_v13, 0.0 }
0x131c   :  { %v4843_v32 = vpop.xlane.xlu1 %4842  ;;  %4932 = vadd.xlane.f32.xlu1 %v4931_v9 }
0x131d   :  { %v4875_v21 = vmul.f32 0.015625, %v4843_v32  ;;  %v4906_v23 = vmul.f32 %v13500_v43, %v13500_v43 }
0x131f   :  { %v13506_v28 = vsub.f32 %v13404_v55, %v4875_v21  ;;  %v4934_v61 = vsel %vm391_vm1, %v4906_v23, 0.0 }
0x1320   :  { %4935 = vadd.xlane.f32.xlu0 %v4934_v61 }
0x1321   :  { %v4907_v10 = vmul.f32 %v13506_v28, %v13506_v28 }
0x1323   :  { %v4937_v4 = vsel %vm391_vm1, %v4907_v10, 0.0 }
0x1324   :  { %4938 = vadd.xlane.f32.xlu1 %v4937_v4 }
0x1355   :  { %v4846_v51 = vpop.xlane.xlu0 %4845 }
0x1356   :  { %v4876_v29 = vmul.f32 0.015625, %v4846_v51 }
0x1358   :  { %v13513_v33 = vsub.f32 %v13410_v11, %v4876_v29 }
0x1359   :  { %v4849_v18 = vpop.xlane.xlu1 %4848 }
0x135a   :  { %v4877_v49 = vmul.f32 0.015625, %v4849_v18  ;;  %v4908_v20 = vmul.f32 %v13513_v33, %v13513_v33 }
0x135c   :  { %v13518_v42 = vsub.f32 %v13416_v17, %v4877_v49  ;;  %v4940_v57 = vsel %vm391_vm1, %v4908_v20, 0.0 }
0x135d   :  { %4941 = vadd.xlane.f32.xlu0 %v4940_v57  ;;  %v4852_v16 = vpop.xlane.xlu0 %4851 }
0x135e   :  { %v4878_v30 = vmul.f32 0.015625, %v4852_v16  ;;  %v4909_v59 = vmul.f32 %v13518_v42, %v13518_v42 }
0x1360   :  { %v13524_v53 = vsub.f32 %v13422_v24, %v4878_v30  ;;  %v4943_v50 = vsel %vm391_vm1, %v4909_v59, 0.0 }
0x1361   :  { %v4855_v13 = vpop.xlane.xlu1 %4854  ;;  %4944 = vadd.xlane.f32.xlu1 %v4943_v50 }
0x1362   :  { %v4879_v9 = vmul.f32 0.015625, %v4855_v13  ;;  %v4910_v32 = vmul.f32 %v13524_v53, %v13524_v53 }
0x1364   :  { %v13530_v21 = vsub.f32 %v13428_v34, %v4879_v9  ;;  %v4946_v23 = vsel %vm391_vm1, %v4910_v32, 0.0  ;;  %v13952_v34 = vld [vmem:[%s15317_s28 + $0x8] sm:$0xff]  }
0x1365   :  { %4947 = vadd.xlane.f32.xlu0 %v4946_v23  ;;  %v4858_v61 = vpop.xlane.xlu0 %4857 }
0x1366   :  { %v4880_v10 = vmul.f32 0.015625, %v4858_v61  ;;  %v4911_v4 = vmul.f32 %v13530_v21, %v13530_v21 }
0x1368   :  { %v13536_v51 = vsub.f32 %v13434_v52, %v4880_v10  ;;  %v4949_v29 = vsel %vm391_vm1, %v4911_v4, 0.0  ;;  %v13922_v52 = vld [vmem:[%s15317_s28 + $0x50] sm:$0xff]  }
0x1369   :  { %v4861_v18 = vpop.xlane.xlu1 %4860  ;;  %4950 = vadd.xlane.f32.xlu1 %v4949_v29 }
0x136a   :  { %v4881_v49 = vmul.f32 0.015625, %v4861_v18  ;;  %v4912_v20 = vmul.f32 %v13536_v51, %v13536_v51 }
0x136c   :  { %v13542_v57 = vsub.f32 %v13440_v12, %v4881_v49  ;;  %v4952_v16 = vsel %vm391_vm1, %v4912_v20, 0.0 }
0x136d   :  { %4953 = vadd.xlane.f32.xlu0 %v4952_v16  ;;  %v4864_v30 = vpop.xlane.xlu0 %4863 }
0x136e   :  { %v4882_v59 = vmul.f32 0.015625, %v4864_v30  ;;  %v4913_v50 = vmul.f32 %v13542_v57, %v13542_v57 }
0x1370   :  { %v13548_v13 = vsub.f32 %v13449_v36, %v4882_v59  ;;  %v4955_v9 = vsel %vm391_vm1, %v4913_v50, 0.0 }
0x1371   :  { %4956 = vadd.xlane.f32.xlu1 %v4955_v9  ;;  %v4867_v32 = vpop.xlane.xlu1 %4866  ;;  %v4918_v23 = vpop.xlane.xlu0 %4917 }
0x1372   :  { %v4883_v61 = vmul.f32 0.015625, %v4867_v32  ;;  %v4964_v10 = vmul.f32 0.015625, %v4918_v23  ;;  %v4914_v4 = vmul.f32 %v13548_v13, %v13548_v13 }
0x1374   :  { %v13554_v29 = vsub.f32 %v13463_v27, %v4883_v61  ;;  %v4980_v18 = vadd.f32 1e-05, %v4964_v10  ;;  %v4958_v49 = vsel %vm391_vm1, %v4914_v4, 0.0 }
0x1375   :  { %v4921_v20 = vpop.xlane.xlu1 %4920  ;;  %4959 = vadd.xlane.f32.xlu0 %v4958_v49  ;;  %v4924_v16 = vpop.xlane.xlu0 %4923 }
0x1376   :  { %10473 = vrsqrt.f32 %v4980_v18  ;;  %v4965_v30 = vmul.f32 0.015625, %v4921_v20  ;;  %v4966_v59 = vmul.f32 0.015625, %v4924_v16  ;;  %v4915_v50 = vmul.f32 %v13554_v29, %v13554_v29  ;;  %v13561_v18 = vld [vmem:[#allocation10 + $0x1] ss:$0 sm:$0xff] }
0x1378   :  { %v4981_v9 = vadd.f32 1e-05, %v4965_v30  ;;  %v4982_v32 = vadd.f32 1e-05, %v4966_v59  ;;  %v4961_v23 = vsel %vm391_vm1, %v4915_v50, 0.0 }
0x1379   :  { %4962 = vadd.xlane.f32.xlu1 %v4961_v23  ;;  %v4927_v45 = vpop.xlane.xlu1 %4926 }
0x137a   :  { %10475 = vrsqrt.f32 %v4981_v9  ;;  %v4967_v61 = vmul.f32 0.015625, %v4927_v45 }
0x137b   :  { %10477 = vrsqrt.f32 %v4982_v32 }
0x137c   :  { %v4983_v10 = vadd.f32 1e-05, %v4967_v61 }
0x137e   :  { %10479 = vrsqrt.f32 %v4983_v10 }
0x1383   :  { %v10474_v4 = vpop.eup %10473 }
0x1384   :  { %v5012_v49 = vmul.f32 %v10474_v4, %v13443_v58 }
0x1386   :  { %v5034_v16 = vmul.f32 %v13561_v18, %v5012_v49 }
0x1387   :  { %v10476_v20 = vpop.eup %10475 }
0x1388   :  { %v5013_v30 = vmul.f32 %v10476_v20, %v13454_v35  ;;  %v10478_v59 = vpop.eup %10477  ;;  %v5056_v45 = vadd.f32 %v13565_v26, %v5034_v16 }
0x1389   :  { %v5014_v23 = vmul.f32 %v10478_v59, %v13458_v19 }
0x138a   :  { %v5035_v50 = vmul.f32 %v13561_v18, %v5013_v30 }
0x138b   :  { %v10480_v9 = vpop.eup %10479  ;;  %v5036_v35 = vmul.f32 %v13561_v18, %v5014_v23 }
0x138c   :  { %v5057_v32 = vadd.f32 %v13565_v26, %v5035_v50  ;;  %v5015_v58 = vmul.f32 %v10480_v9, %v13467_v54 }
0x138d   :  { %v5058_v49 = vadd.f32 %v13565_v26, %v5036_v35 }
0x138e   :  { %v5081_v61 = vpack.c.bf16 %v5057_v32, %v5056_v45  ;;  %v5037_v10 = vmul.f32 %v13561_v18, %v5015_v58 }
0x1390   :  { %8839 = vmatmul.mubr.msk.bf16.vlgmr.msra.gmra.mxu0 %vm391_vm1, %v5081_v61  ;;  %v5059_v4 = vadd.f32 %v13565_v26, %v5037_v10 }
0x1391   :  { %5208 = vmatprep.mubr.bf16.mxu0 %v15346_v15 }
0x1392   :  { %v5082_v20 = vpack.c.bf16 %v5059_v4, %v5058_v49 }
0x1398   :  { %8840 = vmatmul.mubr.msk.bf16.gmra.mxu0 %vm391_vm1, %v5082_v20 }
0x1399   :  { %5218 = vmatprep.mubr.bf16.mxu0 %v15346_v15 }
0x13a1   :  { %v4930_v19 = vpop.xlane.xlu0 %4929 }
0x13a2   :  { %v4968_v54 = vmul.f32 0.015625, %v4930_v19 }
0x13a4   :  { %v4984_v16 = vadd.f32 1e-05, %v4968_v54 }
0x13a5   :  { %v4933_v30 = vpop.xlane.xlu1 %4932 }
0x13a6   :  { %10481 = vrsqrt.f32 %v4984_v16  ;;  %v4969_v59 = vmul.f32 0.015625, %v4933_v30 }
0x13a8   :  { %v4985_v50 = vadd.f32 1e-05, %v4969_v59 }
0x13a9   :  { %v4936_v9 = vpop.xlane.xlu0 %4935 }
0x13aa   :  { %10483 = vrsqrt.f32 %v4985_v50  ;;  %v4970_v45 = vmul.f32 0.015625, %v4936_v9 }
0x13ac   :  { %v4986_v32 = vadd.f32 1e-05, %v4970_v45 }
0x13ad   :  { %v4939_v23 = vpop.xlane.xlu1 %4938 }
0x13ae   :  { %10485 = vrsqrt.f32 %v4986_v32  ;;  %v4971_v58 = vmul.f32 0.015625, %v4939_v23 }
0x13b0   :  { %v4987_v61 = vadd.f32 1e-05, %v4971_v58 }
0x13b2   :  { %10487 = vrsqrt.f32 %v4987_v61 }
0x13b3   :  { %v10482_v10 = vpop.eup %10481 }
0x13b4   :  { %v5016_v35 = vmul.f32 %v10482_v10, %v13489_v22 }
0x13b6   :  { %v5038_v20 = vmul.f32 %v13561_v18, %v5016_v35 }
0x13b7   :  { %v10484_v4 = vpop.eup %10483 }
0x13b8   :  { %v5017_v49 = vmul.f32 %v10484_v4, %v13494_v0  ;;  %v5060_v30 = vadd.f32 %v13565_v26, %v5038_v20 }
0x13ba   :  { %v5039_v19 = vmul.f32 %v13561_v18, %v5017_v49 }
0x13bb   :  { %v10486_v54 = vpop.eup %10485 }
0x13bc   :  { %v5018_v16 = vmul.f32 %v10486_v54, %v13500_v43  ;;  %v5061_v59 = vadd.f32 %v13565_v26, %v5039_v19 }
0x13be   :  { %v5083_v50 = vpack.c.bf16 %v5061_v59, %v5060_v30  ;;  %v5040_v22 = vmul.f32 %v13561_v18, %v5018_v16 }
0x13bf   :  { %v10488_v9 = vpop.eup %10487 }
0x13c0   :  { %v5019_v45 = vmul.f32 %v10488_v9, %v13506_v28  ;;  %8841 = vmatmul.mubr.msk.bf16.gmra.mxu0 %vm391_vm1, %v5083_v50  ;;  %v5062_v32 = vadd.f32 %v13565_v26, %v5040_v22 }
0x13c1   :  { %5228 = vmatprep.mubr.bf16.mxu0 %v15346_v15 }
0x13c2   :  { %v5041_v0 = vmul.f32 %v13561_v18, %v5019_v45 }
0x13c4   :  { %v5063_v43 = vadd.f32 %v13565_v26, %v5041_v0 }
0x13c6   :  { %v5084_v23 = vpack.c.bf16 %v5063_v43, %v5062_v32 }
0x13c8   :  { %8842 = vmatmul.mubr.msk.bf16.gmra.mxu0 %vm391_vm1, %v5084_v23 }
0x13c9   :  { %5238 = vmatprep.mubr.bf16.mxu0 %v15346_v15 }
0x13e6   :  { %v4942_v58 = vpop.xlane.xlu0 %4941 }
0x13e7   :  { %v4972_v61 = vmul.f32 0.015625, %v4942_v58 }
0x13e9   :  { %v4988_v28 = vadd.f32 1e-05, %v4972_v61 }
0x13ea   :  { %v4945_v10 = vpop.xlane.xlu1 %4944 }
0x13eb   :  { %10489 = vrsqrt.f32 %v4988_v28  ;;  %v4973_v35 = vmul.f32 0.015625, %v4945_v10 }
0x13ed   :  { %v4989_v4 = vadd.f32 1e-05, %v4973_v35 }
0x13ee   :  { %v4948_v49 = vpop.xlane.xlu0 %4947 }
0x13ef   :  { %10491 = vrsqrt.f32 %v4989_v4  ;;  %v4974_v20 = vmul.f32 0.015625, %v4948_v49 }
0x13f1   :  { %v4990_v19 = vadd.f32 1e-05, %v4974_v20 }
0x13f2   :  { %v4951_v54 = vpop.xlane.xlu1 %4950 }
0x13f3   :  { %10493 = vrsqrt.f32 %v4990_v19  ;;  %v4975_v16 = vmul.f32 0.015625, %v4951_v54 }
0x13f5   :  { %v4991_v30 = vadd.f32 1e-05, %v4975_v16 }
0x13f6   :  { %v4954_v59 = vpop.xlane.xlu0 %4953 }
0x13f7   :  { %10495 = vrsqrt.f32 %v4991_v30  ;;  %v4976_v50 = vmul.f32 0.015625, %v4954_v59 }
0x13f8   :  { %v10490_v9 = vpop.eup %10489 }
0x13f9   :  { %v5020_v45 = vmul.f32 %v10490_v9, %v13513_v33  ;;  %v4992_v22 = vadd.f32 1e-05, %v4976_v50 }
0x13fa   :  { %v4957_v0 = vpop.xlane.xlu1 %4956 }
0x13fb   :  { %10497 = vrsqrt.f32 %v4992_v22  ;;  %v4977_v32 = vmul.f32 0.015625, %v4957_v0  ;;  %v5042_v61 = vmul.f32 %v13561_v18, %v5020_v45 }
0x13fc   :  { %v10492_v43 = vpop.eup %10491 }
0x13fd   :  { %v5021_v23 = vmul.f32 %v10492_v43, %v13518_v42  ;;  %v4993_v58 = vadd.f32 1e-05, %v4977_v32  ;;  %v5064_v33 = vadd.f32 %v13565_v26, %v5042_v61 }
0x13fe   :  { %v4960_v28 = vpop.xlane.xlu0 %4959 }
0x13ff   :  { %10499 = vrsqrt.f32 %v4993_v58  ;;  %v4978_v10 = vmul.f32 0.015625, %v4960_v28  ;;  %v5043_v35 = vmul.f32 %v13561_v18, %v5021_v23 }
0x1400   :  { %v10494_v4 = vpop.eup %10493 }
0x1401   :  { %v5022_v49 = vmul.f32 %v10494_v4, %v13524_v53  ;;  %v4994_v20 = vadd.f32 1e-05, %v4978_v10  ;;  %v5065_v19 = vadd.f32 %v13565_v26, %v5043_v35 }
0x1402   :  { %v4963_v54 = vpop.xlane.xlu1 %4962 }
0x1403   :  { %10501 = vrsqrt.f32 %v4994_v20  ;;  %v4979_v16 = vmul.f32 0.015625, %v4963_v54  ;;  %v5085_v42 = vpack.c.bf16 %v5065_v19, %v5064_v33  ;;  %v5044_v9 = vmul.f32 %v13561_v18, %v5022_v49 }
0x1404   :  { %v10496_v30 = vpop.eup %10495 }
0x1405   :  { %v5023_v59 = vmul.f32 %v10496_v30, %v13530_v21  ;;  %v4995_v50 = vadd.f32 1e-05, %v4979_v16  ;;  %8843 = vmatmul.mubr.msk.bf16.gmra.mxu0 %vm391_vm1, %v5085_v42  ;;  %v5066_v0 = vadd.f32 %v13565_v26, %v5044_v9  ;;  %v10744_v42 = vld [vmem:[%s15297_s18 + $0x2] sm:$0x3] }
0x1406   :  { %5248 = vmatprep.mubr.bf16.mxu0 %v15346_v15  ;;  %v13629_v30 = vrot.slane %v10744_v42, %v15351_v37 }
0x1407   :  { %10503 = vrsqrt.f32 %v4995_v50  ;;  %v5045_v53 = vmul.f32 %v13561_v18, %v5023_v59 }
0x1408   :  { %v10498_v45 = vpop.eup %10497 }
0x1409   :  { %v5024_v22 = vmul.f32 %v10498_v45, %v13536_v51  ;;  %v5067_v32 = vadd.f32 %v13565_v26, %v5045_v53 }
0x140b   :  { %v5086_v43 = vpack.c.bf16 %v5067_v32, %v5066_v0  ;;  %v5046_v58 = vmul.f32 %v13561_v18, %v5024_v22 }
0x140c   :  { %v10500_v23 = vpop.eup %10499 }
0x140d   :  { %v5025_v21 = vmul.f32 %v10500_v23, %v13542_v57  ;;  %8844 = vmatmul.mubr.msk.bf16.gmra.mxu0 %vm391_vm1, %v5086_v43  ;;  %v5068_v10 = vadd.f32 %v13565_v26, %v5046_v58 }
0x140e   :  { %5258 = vmatprep.mubr.bf16.mxu0 %v15346_v15 }
0x140f   :  { %v5047_v61 = vmul.f32 %v13561_v18, %v5025_v21 }
0x1410   :  { %v10502_v28 = vpop.eup %10501 }
0x1411   :  { %v5026_v51 = vmul.f32 %v10502_v28, %v13548_v13  ;;  %v5069_v35 = vadd.f32 %v13565_v26, %v5047_v61 }
0x1413   :  { %v5087_v4 = vpack.c.bf16 %v5069_v35, %v5068_v10  ;;  %v5048_v20 = vmul.f32 %v13561_v18, %v5026_v51 }
0x1414   :  { %v10504_v49 = vpop.eup %10503 }
0x1415   :  { %v5027_v57 = vmul.f32 %v10504_v49, %v13554_v29  ;;  %8845 = vmatmul.mubr.msk.bf16.gmra.mxu0 %vm391_vm1, %v5087_v4  ;;  %v5070_v19 = vadd.f32 %v13565_v26, %v5048_v20 }
0x1416   :  { %5268 = vmatprep.mubr.bf16.mxu0 %v15346_v15 }
0x1417   :  { %v5049_v33 = vmul.f32 %v13561_v18, %v5027_v57 }
0x1419   :  { %v5071_v13 = vadd.f32 %v13565_v26, %v5049_v33 }
0x141b   :  { %v5088_v54 = vpack.c.bf16 %v5071_v13, %v5070_v19  ;;  %v15368_v13 = vld [vmem:[#allocation64_spill] sm:$0xff] }
0x141c   :  { %15371 = vst [vmem:[#allocation64_spill] sm:$0xff] %v13952_v34 }
0x141d   :  { %8846 = vmatmul.mubr.msk.bf16.gmra.mxu0 %vm391_vm1, %v5088_v54 }
0x1450   :  { %v5200_v16 = vpop.f32.mrf.mxu0 }
0x1451   :  { %v5201_v50 = vadd.f32 %v5200_v16, %v13629_v30 }
0x1452   :  { %v13631_v29 = vpop.f32.mrf.mxu0 }
0x1454   :  { %v5204_v59 = vpop.f32.mrf.mxu0 }
0x1455   :  { %v5205_v9 = vadd.f32 %v5204_v59, %v13629_v30 }
0x1456   :  { %v13639_v26 = vpop.f32.mrf.mxu0 }
0x1457   :  { %v13635_v18 = vpack.c.bf16 %v5205_v9, %v5201_v50 }
0x1458   :  { %v5210_v53 = vpop.f32.mrf.mxu0 }
0x1459   :  { %9353 = vmatprep.mubr.msk.bf16.mxu1 %vm391_vm1, %v13635_v18  ;;  %v5211_v49 = vadd.f32 %v5210_v53, %v13629_v30  ;;  %v5302_v9 = vmul.bf16 %v13635_v18, %v12061_v14 }
0x145a   :  { %v13641_v45 = vpop.f32.mrf.mxu0 }
0x145c   :  { %v5214_v22 = vpop.f32.mrf.mxu0 }
0x145d   :  { %v5215_v51 = vadd.f32 %v5214_v22, %v13629_v30 }
0x145e   :  { %v13643_v0 = vpop.f32.mrf.mxu0 }
0x145f   :  { %v13659_v33 = vpack.c.bf16 %v5215_v51, %v5211_v49 }
0x1461   :  { %v5303_v59 = vmul.bf16 %v13659_v33, %v12033_v8  ;;  %v5311_v53 = vmul.bf16 %v13659_v33, %v12035_v62 }
0x1480   :  { %v5220_v32 = vpop.f32.mrf.mxu0 }
0x1481   :  { %v5221_v57 = vadd.f32 %v5220_v32, %v13629_v30  ;;  %v5310_v32 = vmul.bf16 %v13635_v18, %v12059_v63 }
0x1482   :  { %v13645_v43 = vpop.f32.mrf.mxu0 }
0x1484   :  { %v5224_v23 = vpop.f32.mrf.mxu0 }
0x1485   :  { %v5225_v10 = vadd.f32 %v5224_v23, %v13629_v30 }
0x1486   :  { %v13647_v21 = vpop.f32.mrf.mxu0 }
0x1487   :  { %v13661_v19 = vpack.c.bf16 %v5225_v10, %v5221_v57 }
0x1488   :  { %v5230_v58 = vpop.f32.mrf.mxu0 }
0x1489   :  { %v5231_v35 = vadd.f32 %v5230_v58, %v13629_v30  ;;  %v5304_v42 = vmul.bf16 %v13661_v19, %v12024_v48  ;;  %v5312_v50 = vmul.bf16 %v13661_v19, %v12028_v1 }
0x148a   :  { %v13649_v61 = vpop.f32.mrf.mxu0 }
0x148c   :  { %v5234_v28 = vpop.f32.mrf.mxu0 }
0x148d   :  { %v5235_v4 = vadd.f32 %v5234_v28, %v13629_v30 }
0x148e   :  { %v13693_v58 = vpop.f32.mrf.mxu0 }
0x148f   :  { %v13657_v20 = vpack.c.bf16 %v5235_v4, %v5231_v35 }
0x1491   :  { %v5313_v54 = vmul.bf16 %v13657_v20, %v15368_v13  ;;  %v5305_v16 = vmul.bf16 %v13657_v20, %v12026_v5  ;;  %v5301_v22 = vmul.bf16 %v13657_v20, %v12093_v47  ;;  %v5309_v23 = vmul.bf16 %v13657_v20, %v12091_v2 }
0x1493   :  { %5424 = vrot.lane.b32.xlu1 %v5313_v54, %s11127_s0  ;;  %5408 = vrot.lane.b32.xlu0 %v5305_v16, %s11127_s0 }
0x1497   :  { %5406 = vrot.lane.b32.xlu1 %v5304_v42, %s11127_s0  ;;  %5404 = vrot.lane.b32.xlu0 %v5303_v59, %s11127_s0 }
0x149b   :  { %5422 = vrot.lane.b32.xlu1 %v5312_v50, %s11127_s0  ;;  %5402 = vrot.lane.b32.xlu0 %v5302_v9, %s11127_s0  ;;  %v15369_v50 = vld [vmem:[#allocation48_spill] sm:$0xff] }
0x149f   :  { %5420 = vrot.lane.b32.xlu1 %v5311_v53, %s11127_s0  ;;  %5400 = vrot.lane.b32.xlu0 %v5301_v22, %s11127_s0 }
0x14a3   :  { %5418 = vrot.lane.b32.xlu1 %v5310_v32, %s11127_s0 }
0x14a7   :  { %5416 = vrot.lane.b32.xlu1 %v5309_v23, %s11127_s0 }
0x14c5   :  { %v5240_v28 = vpop.f32.mrf.mxu0 }
0x14c6   :  { %v5241_v35 = vadd.f32 %v5240_v28, %v13629_v30 }
0x14c7   :  { %v13695_v51 = vpop.f32.mrf.mxu0 }
0x14c9   :  { %v5244_v10 = vpop.f32.mrf.mxu0 }
0x14ca   :  { %v5245_v4 = vadd.f32 %v5244_v10, %v13629_v30 }
0x14cb   :  { %v13699_v49 = vpop.f32.mrf.mxu0 }
0x14cc   :  { %v13701_v57 = vpack.c.bf16 %v5245_v4, %v5241_v35 }
0x14cd   :  { %v5250_v54 = vpop.f32.mrf.mxu0 }
0x14ce   :  { %9417 = vmatprep.mubr.msk.bf16.mxu0 %vm391_vm1, %v13701_v57 }
0x14cf   :  { %v5252_v16 = vpop.f32.mrf.mxu0 }
0x14d0   :  { %v5253_v9 = vadd.f32 %v5252_v16, %v15369_v50 }
0x14d1   :  { %v5254_v42 = vpop.f32.mrf.mxu0 }
0x14d3   :  { %v5256_v59 = vpop.f32.mrf.mxu0 }
0x14d4   :  { %v5257_v53 = vadd.f32 %v5256_v59, %v15369_v50 }
0x14d5   :  { %v5260_v22 = vpop.f32.mrf.mxu0 }
0x14d6   :  { %v13707_v32 = vpack.c.bf16 %v5257_v53, %v5253_v9 }
0x14d7   :  { %v5262_v23 = vpop.f32.mrf.mxu0 }
0x14d8   :  { %v5263_v35 = vadd.f32 %v5262_v23, %v15369_v50 }
0x14d9   :  { %v5264_v28 = vpop.f32.mrf.mxu0 }
0x14da   :  { %v5265_v9 = vadd.f32 %v5264_v28, %v13629_v30  ;;  %v5255_v28 = vadd.f32 %v5254_v42, %v13629_v30  ;;  %v5299_v42 = vmul.bf16 %v13659_v33, %v12145_v44 }
0x14db   :  { %v5266_v10 = vpop.f32.mrf.mxu0 }
0x14dc   :  { %v5267_v4 = vadd.f32 %v5266_v10, %v15369_v50  ;;  %v5261_v10 = vadd.f32 %v5260_v22, %v13629_v30 }
0x14dd   :  { %v5270_v37 = vpop.f32.mrf.mxu0 }
0x14de   :  { %v13711_v15 = vpack.c.bf16 %v5267_v4, %v5263_v35  ;;  %v5271_v16 = vadd.f32 %v5270_v37, %v13629_v30  ;;  %v13727_v35 = vpack.c.bf16 %v5265_v9, %v5261_v10  ;;  %v5308_v37 = vmul.bf16 %v13661_v19, %v12119_v38 }
0x14df   :  { %v13713_v39 = vpop.f32.mrf.mxu0  ;;  %v5307_v9 = vmul.bf16 %v13659_v33, %v12143_v56 }
0x14e0   :  { %v5774_v22 = vmul.bf16 %v13727_v35, %v12028_v1  ;;  %v5766_v4 = vmul.bf16 %v13727_v35, %v12024_v48 }
0x14e1   :  { %v5274_v27 = vpop.f32.mrf.mxu0 }
0x14e2   :  { %v5275_v59 = vadd.f32 %v5274_v27, %v13629_v30  ;;  %v5300_v27 = vmul.bf16 %v13661_v19, %v12121_v46 }
0x14e4   :  { %v13717_v12 = vpack.c.bf16 %v5275_v59, %v5271_v16  ;;  %v5251_v16 = vadd.f32 %v5250_v54, %v13629_v30  ;;  %v5306_v54 = vmul.bf16 %v13635_v18, %v12169_v25 }
0x14e6   :  { %v5775_v53 = vmul.bf16 %v13717_v12, %v15368_v13  ;;  %v5767_v23 = vmul.bf16 %v13717_v12, %v12026_v5  ;;  %v13743_v59 = vpack.c.bf16 %v5255_v28, %v5251_v16  ;;  %v5771_v28 = vmul.bf16 %v13717_v12, %v12091_v2 }
0x14e8   :  { %5886 = vrot.lane.b32.xlu1 %v5775_v53, %s11127_s0  ;;  %5870 = vrot.lane.b32.xlu0 %v5767_v23, %s11127_s0  ;;  %v5773_v53 = vmul.bf16 %v13743_v59, %v12035_v62  ;;  %v5765_v30 = vmul.bf16 %v13743_v59, %v12033_v8  ;;  %v15370_v23 = vld [vmem:[#allocation69_spill] sm:$0xff] }
0x14e9   :  { %v5298_v10 = vmul.bf16 %v13635_v18, %v15370_v23 }
0x14ec   :  { %5414 = vrot.lane.b32.xlu1 %v5308_v37, %s11127_s0  ;;  %5398 = vrot.lane.b32.xlu0 %v5300_v27, %s11127_s0  ;;  %v5772_v37 = vmul.bf16 %v13701_v57, %v12059_v63  ;;  %v5764_v27 = vmul.bf16 %v13701_v57, %v12061_v14 }
0x14f0   :  { %5884 = vrot.lane.b32.xlu1 %v5774_v22, %s11127_s0  ;;  %5868 = vrot.lane.b32.xlu0 %v5766_v4, %s11127_s0  ;;  %v5763_v22 = vmul.bf16 %v13717_v12, %v12093_v47 }
0x14f4   :  { %5412 = vrot.lane.b32.xlu1 %v5307_v9, %s11127_s0  ;;  %5396 = vrot.lane.b32.xlu0 %v5299_v42, %s11127_s0  ;;  %v5770_v42 = vmul.bf16 %v13727_v35, %v12119_v38 }
0x14f8   :  { %5882 = vrot.lane.b32.xlu1 %v5773_v53, %s11127_s0  ;;  %5866 = vrot.lane.b32.xlu0 %v5765_v30, %s11127_s0  ;;  %v5762_v53 = vmul.bf16 %v13727_v35, %v12121_v46 }
0x14fc   :  { %5410 = vrot.lane.b32.xlu1 %v5306_v54, %s11127_s0  ;;  %5394 = vrot.lane.b32.xlu0 %v5298_v10, %s11127_s0  ;;  %v5769_v54 = vmul.bf16 %v13743_v59, %v12143_v56  ;;  %v5761_v10 = vmul.bf16 %v13743_v59, %v12145_v44 }
0x1500   :  { %5880 = vrot.lane.b32.xlu1 %v5772_v37, %s11127_s0  ;;  %5864 = vrot.lane.b32.xlu0 %v5764_v27, %s11127_s0 }
0x1504   :  { %5878 = vrot.lane.b32.xlu1 %v5771_v28, %s11127_s0  ;;  %5862 = vrot.lane.b32.xlu0 %v5763_v22, %s11127_s0  ;;  %v5768_v28 = vmul.bf16 %v13701_v57, %v12169_v25  ;;  %v5760_v22 = vmul.bf16 %v13701_v57, %v15370_v23 }
0x1505   :  { %v5425_v4 = vpop.permute.xlu1 %5424  ;;  %v5409_v16 = vpop.permute.xlu0 %5408 }
0x1506   :  { %v5460_v9 = vsel %vm391_vm1, %v5409_v16, 0  ;;  %10004 = vmatprep.subr.msk.bf16.mxu1 %vm391_vm1, %v5425_v4 }
0x1507   :  { %9338 = vmatpush3.bf16.xpose.msra.mxu1 %v5460_v9 }
0x1508   :  { %5876 = vrot.lane.b32.xlu1 %v5770_v42, %s11127_s0  ;;  %5860 = vrot.lane.b32.xlu0 %v5762_v53, %s11127_s0 }
0x1509   :  { %v5407_v30 = vpop.permute.xlu1 %5406  ;;  %v5405_v16 = vpop.permute.xlu0 %5404 }
0x150a   :  { %v5457_v27 = vsel %vm391_vm1, %v5407_v30, 0  ;;  %v5454_v9 = vsel %vm391_vm1, %v5405_v16, 0 }
0x150c   :  { %5874 = vrot.lane.b32.xlu1 %v5769_v54, %s11127_s0  ;;  %5858 = vrot.lane.b32.xlu0 %v5761_v10, %s11127_s0 }
0x150d   :  { %v5423_v37 = vpop.permute.xlu1 %5422  ;;  %v5403_v53 = vpop.permute.xlu0 %5402 }
0x150e   :  { %10005 = vmatprep.subr.msk.bf16.mxu1 %vm391_vm1, %v5423_v37  ;;  %v5451_v30 = vsel %vm391_vm1, %v5403_v53, 0 }
0x150f   :  { %9340 = vmatpush3.bf16.xpose.msra.mxu1 %v5457_v27 }
0x1510   :  { %5872 = vrot.lane.b32.xlu1 %v5768_v28, %s11127_s0  ;;  %5856 = vrot.lane.b32.xlu0 %v5760_v22, %s11127_s0 }
0x1511   :  { %v5421_v4 = vpop.permute.xlu1 %5420  ;;  %v5401_v10 = vpop.permute.xlu0 %5400 }
0x1512   :  { %10006 = vmatprep.subr.msk.bf16.mxu1 %vm391_vm1, %v5421_v4  ;;  %v5448_v37 = vsel %vm391_vm1, %v5401_v10, 0  ;;  %v5233_v10 = vadd.f32 %v13649_v61, %v15369_v50  ;;  %v13822_v61 = vld [vmem:[%s15317_s28 + $0x78] sm:$0xff]  }
0x1515   :  { %v5419_v42 = vpop.permute.xlu1 %5418 }
0x1517   :  { %9342 = vmatpush3.bf16.xpose.msra.mxu1 %v5454_v9 }
0x1518   :  { %10007 = vmatprep.subr.msk.bf16.mxu1 %vm391_vm1, %v5419_v42 }
0x1519   :  { %v5417_v54 = vpop.permute.xlu1 %5416 }
0x151f   :  { %9344 = vmatpush3.bf16.xpose.msra.mxu1 %v5451_v30 }
0x1520   :  { %10008 = vmatprep.subr.msk.bf16.mxu1 %vm391_vm1, %v5417_v54  ;;  %v5237_v54 = vadd.f32 %v13693_v58, %v15369_v50  ;;  %v5227_v58 = vadd.f32 %v13647_v21, %v15369_v50  ;;  %v5217_v21 = vadd.f32 %v13643_v0, %v15369_v50 }
0x1527   :  { %9346 = vmatpush3.bf16.xpose.msra.mxu1 %v5448_v37 }
0x155a   :  { %v5887_v27 = vpop.permute.xlu1 %5886  ;;  %v5871_v28 = vpop.permute.xlu0 %5870 }
0x155b   :  { %v5922_v22 = vsel %vm391_vm1, %v5871_v28, 0  ;;  %10012 = vmatprep.subr.msk.bf16.mxu0 %vm391_vm1, %v5887_v27 }
0x155c   :  { %9402 = vmatpush3.bf16.xpose.msra.mxu0 %v5922_v22  ;;  %v13815_v22 = vpack.c.bf16 %v5237_v54, %v5233_v10 }
0x155e   :  { %v5415_v4 = vpop.permute.xlu1 %5414  ;;  %v5399_v16 = vpop.permute.xlu0 %5398 }
0x155f   :  { %v5445_v9 = vsel %vm391_vm1, %v5399_v16, 0  ;;  %10009 = vmatprep.subr.msk.bf16.mxu1 %vm391_vm1, %v5415_v4 }
0x1560   :  { %9348 = vmatpush3.bf16.xpose.msra.mxu1 %v5445_v9 }
0x1562   :  { %v5885_v42 = vpop.permute.xlu1 %5884  ;;  %v5869_v53 = vpop.permute.xlu0 %5868 }
0x1563   :  { %v5919_v30 = vsel %vm391_vm1, %v5869_v53, 0  ;;  %10013 = vmatprep.subr.msk.bf16.mxu0 %vm391_vm1, %v5885_v42  ;;  %v5329_v42 = vmul.bf16 %v13822_v61, %v13815_v22  ;;  %v5223_v53 = vadd.f32 %v13645_v43, %v15369_v50  ;;  %v5213_v43 = vadd.f32 %v13641_v45, %v15369_v50  ;;  %v13850_v45 = vld [vmem:[%s15317_s28 + $0x70] sm:$0xff]  }
0x1564   :  { %9404 = vmatpush3.bf16.xpose.msra.mxu0 %v5919_v30 }
0x1566   :  { %v5413_v37 = vpop.permute.xlu1 %5412  ;;  %v5397_v27 = vpop.permute.xlu0 %5396 }
0x1567   :  { %v5442_v28 = vsel %vm391_vm1, %v5397_v27, 0  ;;  %10010 = vmatprep.subr.msk.bf16.mxu1 %vm391_vm1, %v5413_v37  ;;  %v13832_v37 = vpack.c.bf16 %v5227_v58, %v5223_v53  ;;  %v5376_v27 = vsel %vm391_vm1, %v5329_v42, %v15368_v13  ;;  %v5207_v58 = vadd.f32 %v13639_v26, %v15369_v50 }
0x1568   :  { %9350 = vmatpush3.bf16.xpose.msra.mxu1 %v5442_v28  ;;  %v13847_v42 = vpack.c.bf16 %v5217_v21, %v5213_v43 }
0x1569   :  { %v5328_v53 = vmul.bf16 %v13850_v45, %v13832_v37 }
0x156a   :  { %v5883_v4 = vpop.permute.xlu1 %5882  ;;  %v5867_v16 = vpop.permute.xlu0 %5866 }
0x156b   :  { %v5916_v9 = vsel %vm391_vm1, %v5867_v16, 0  ;;  %10014 = vmatprep.subr.msk.bf16.mxu0 %vm391_vm1, %v5883_v4 }
0x156c   :  { %9406 = vmatpush3.bf16.xpose.msra.mxu0 %v5916_v9  ;;  %v13841_v9 = vld [vmem:[%s15317_s28 + $0x38] sm:$0xff]  }
0x156d   :  { %v5321_v0 = vmul.bf16 %v13841_v9, %v13815_v22 }
0x156e   :  { %v5411_v30 = vpop.permute.xlu1 %5410  ;;  %v5395_v54 = vpop.permute.xlu0 %5394 }
0x156f   :  { %v5439_v10 = vsel %vm391_vm1, %v5395_v54, 0  ;;  %10011 = vmatprep.subr.msk.bf16.mxu1 %vm391_vm1, %v5411_v30  ;;  %v5203_v30 = vadd.f32 %v13631_v29, %v15369_v50  ;;  %v5352_v26 = vsel %vm391_vm1, %v5321_v0, %v12026_v5  ;;  %v5373_v29 = vsel %vm391_vm1, %v5328_v53, %v12028_v1  ;;  %v13881_v0 = vld [vmem:[%s15317_s28 + $0x28] sm:$0xff]  }
0x1570   :  { %9352 = vmatpush3.bf16.xpose.msra.mxu1 %v5439_v10  ;;  %v13862_v10 = vld [vmem:[%s15317_s28 + $0x30] sm:$0xff]  }
0x1571   :  { %9361 = vmatprep.subr.bf16.mxu1 %v5376_v27  ;;  %v5320_v21 = vmul.bf16 %v13862_v10, %v13832_v37  ;;  %v13866_v27 = vpack.c.bf16 %v5207_v58, %v5203_v30  ;;  %v5319_v58 = vmul.bf16 %v13881_v0, %v13847_v42 }
0x1572   :  { %v5881_v28 = vpop.permute.xlu1 %5880  ;;  %v5865_v4 = vpop.permute.xlu0 %5864 }
0x1573   :  { %v5913_v16 = vsel %vm391_vm1, %v5865_v4, 0  ;;  %10015 = vmatprep.subr.msk.bf16.mxu0 %vm391_vm1, %v5881_v28 }
0x1574   :  { %9408 = vmatpush3.bf16.xpose.msra.mxu0 %v5913_v16  ;;  %v5349_v16 = vsel %vm391_vm1, %v5320_v21, %v12024_v48  ;;  %v5346_v21 = vsel %vm391_vm1, %v5319_v58, %v12033_v8 }
0x1576   :  { %v5879_v54 = vpop.permute.xlu1 %5878  ;;  %v5863_v43 = vpop.permute.xlu0 %5862 }
0x1577   :  { %9354 = vmatmul.mubr.msk.bf16.vlgmr.msra.gmra.mxu1 %vm391_vm1, %v13635_v18  ;;  %10016 = vmatprep.subr.msk.bf16.mxu0 %vm391_vm1, %v5879_v54  ;;  %v13873_v18 = vld [vmem:[%s15317_s28 + $0x68] sm:$0xff]   ;;  %v5910_v4 = vsel %vm391_vm1, %v5863_v43, 0  ;;  %v13888_v54 = vld [vmem:[%s15317_s28 + $0x60] sm:$0xff]  }
0x1578   :  { %9355 = vmatprep.mubr.msk.bf16.mxu1 %vm391_vm1, %v13659_v33  ;;  %9362 = vmatpush3.bf16.msra.mxu1 %v5352_v26  ;;  %v5327_v28 = vmul.bf16 %v13873_v18, %v13847_v42  ;;  %v5326_v26 = vmul.bf16 %v13888_v54, %v13866_v27  ;;  %v13898_v43 = vld [vmem:[%s15317_s28 + $0x20] sm:$0xff]  }
0x1579   :  { %9363 = vmatprep.subr.bf16.mxu1 %v5373_v29  ;;  %v5318_v29 = vmul.bf16 %v13898_v43, %v13866_v27 }
0x157a   :  { %v5877_v30 = vpop.permute.xlu1 %5876  ;;  %v5370_v53 = vsel %vm391_vm1, %v5327_v28, %v12035_v62  ;;  %v5861_v28 = vpop.permute.xlu0 %5860 }
0x157b   :  { %v5907_v58 = vsel %vm391_vm1, %v5861_v28, 0  ;;  %v5324_v28 = vmul.bf16 %v13922_v52, %v13832_v37 }
0x157c   :  { %9364 = vmatpush3.bf16.msra.mxu1 %v5349_v16  ;;  %9410 = vmatpush3.bf16.xpose.msra.mxu0 %v5910_v4  ;;  %v5367_v4 = vsel %vm391_vm1, %v5326_v26, %v12059_v63  ;;  %v13907_v16 = vld [vmem:[%s15317_s28 + $0x58] sm:$0xff]  }
0x157d   :  { %9365 = vmatprep.subr.bf16.mxu1 %v5370_v53  ;;  %10017 = vmatprep.subr.msk.bf16.mxu0 %vm391_vm1, %v5877_v30  ;;  %v5343_v30 = vsel %vm391_vm1, %v5318_v29, %v12061_v14  ;;  %v13915_v53 = vld [vmem:[%s15317_s28 + $0x18] sm:$0xff]   ;;  %v13932_v29 = vld [vmem:[%s15317_s28 + $0x10] sm:$0xff]  }
0x157e   :  { %v5875_v36 = vpop.permute.xlu1 %5874 }
0x157f   :  { %9356 = vmatmul.mubr.msk.bf16.gmra.mxu1 %vm391_vm1, %v13659_v33  ;;  %v5325_v33 = vmul.bf16 %v13907_v16, %v13815_v22 }
0x1580   :  { %9357 = vmatprep.mubr.msk.bf16.mxu1 %vm391_vm1, %v13661_v19  ;;  %9366 = vmatpush3.bf16.msra.mxu1 %v5346_v21  ;;  %v5317_v21 = vmul.bf16 %v13915_v53, %v13815_v22 }
0x1581   :  { %9367 = vmatprep.subr.bf16.mxu1 %v5367_v4  ;;  %v5364_v26 = vsel %vm391_vm1, %v5325_v33, %v12091_v2  ;;  %v5276_v4 = vpop.f32.mrf.mxu0  ;;  %v5316_v33 = vmul.bf16 %v13932_v29, %v13832_v37  ;;  %v5273_v37 = vadd.f32 %v13713_v39, %v15369_v50  ;;  %v13961_v39 = vld [vmem:[%s15317_s28 + $0x40] sm:$0xff]  }
0x1582   :  { %v5340_v22 = vsel %vm391_vm1, %v5317_v21, %v12093_v47  ;;  %v5873_v17 = vpop.permute.xlu1 %5872  ;;  %15372 = vst [vmem:[#allocation48_spill] sm:$0xff] %v13961_v39 }
0x1584   :  { %9368 = vmatpush3.bf16.msra.mxu1 %v5343_v30  ;;  %9412 = vmatpush3.bf16.xpose.msra.mxu0 %v5907_v58  ;;  %v5277_v58 = vadd.f32 %v5276_v4, %v15369_v50  ;;  %v5859_v30 = vpop.permute.xlu0 %5858  ;;  %v5337_v4 = vsel %vm391_vm1, %v5316_v33, %v12121_v46  ;;  %v13971_v33 = vld [vmem:[%s15317_s28] sm:$0xff]  }
0x1585   :  { %9369 = vmatprep.subr.bf16.mxu1 %v5364_v26  ;;  %10018 = vmatprep.subr.msk.bf16.mxu0 %vm391_vm1, %v5875_v36  ;;  %v5361_v36 = vsel %vm391_vm1, %v5324_v28, %v12119_v38  ;;  %v5904_v26 = vsel %vm391_vm1, %v5859_v30, 0  ;;  %v5315_v28 = vmul.bf16 %v13952_v34, %v13847_v42  ;;  %v5322_v30 = vmul.bf16 %v13961_v39, %v13866_v27 }
0x1586   :  { %15373 = vst [vmem:[#allocation75_spill] sm:$0xff] %v13971_v33 }
0x1587   :  { %9358 = vmatmul.mubr.msk.bf16.gmra.mxu1 %vm391_vm1, %v13661_v19  ;;  %v13942_v19 = vld [vmem:[%s15317_s28 + $0x48] sm:$0xff]  }
0x1588   :  { %9359 = vmatprep.mubr.msk.bf16.mxu1 %vm391_vm1, %v13657_v20  ;;  %9370 = vmatpush3.bf16.msra.mxu1 %v5340_v22  ;;  %v5323_v21 = vmul.bf16 %v13942_v19, %v13847_v42  ;;  %v13956_v22 = vpack.c.bf16 %v5277_v58, %v5273_v37  ;;  %v5334_v42 = vsel %vm391_vm1, %v5315_v28, %v12145_v44 }
0x1589   :  { %9371 = vmatprep.subr.bf16.mxu1 %v5361_v36  ;;  %v5314_v58 = vmul.bf16 %v13971_v33, %v13866_v27  ;;  %v5355_v37 = vsel %vm391_vm1, %v5322_v30, %v12169_v25 }
0x158a   :  { %v5358_v36 = vsel %vm391_vm1, %v5323_v21, %v12143_v56  ;;  %v5857_v21 = vpop.permute.xlu0 %5856 }
0x158c   :  { %9372 = vmatpush3.bf16.msra.mxu1 %v5337_v4  ;;  %9414 = vmatpush3.bf16.xpose.msra.mxu0 %v5904_v26  ;;  %v5791_v26 = vmul.bf16 %v13822_v61, %v13956_v22 }
0x158d   :  { %9373 = vmatprep.subr.bf16.mxu1 %v5358_v36  ;;  %10019 = vmatprep.subr.msk.bf16.mxu0 %vm391_vm1, %v5873_v17  ;;  %v5901_v17 = vsel %vm391_vm1, %v5857_v21, 0 }
0x158e   :  { %v5838_v4 = vsel %vm391_vm1, %v5791_v26, %v15368_v13 }
0x158f   :  { %9360 = vmatmul.mubr.msk.bf16.gmra.mxu1 %vm391_vm1, %v13657_v20  ;;  %v5331_v20 = vsel %vm391_vm1, %v5314_v58, %v15370_v23 }
0x1590   :  { %9374 = vmatpush3.bf16.msra.mxu1 %v5334_v42 }
0x1591   :  { %9375 = vmatprep.subr.bf16.mxu1 %v5355_v37 }
0x1594   :  { %9376 = vmatpush3.bf16.msra.mxu1 %v5331_v20  ;;  %9416 = vmatpush3.bf16.xpose.msra.mxu0 %v5901_v17 }
0x1595   :  { %9425 = vmatprep.subr.bf16.mxu1 %v5838_v4 }
0x159b   :  { %9418 = vmatmul.mubr.msk.bf16.vlgmr.msra.gmra.mxu0 %vm391_vm1, %v13701_v57 }
0x159c   :  { %9419 = vmatprep.mubr.msk.bf16.mxu0 %vm391_vm1, %v13743_v59 }
0x15a3   :  { %9420 = vmatmul.mubr.msk.bf16.gmra.mxu0 %vm391_vm1, %v13743_v59 }
0x15a4   :  { %9421 = vmatprep.mubr.msk.bf16.mxu0 %vm391_vm1, %v13727_v35 }
0x15ab   :  { %9422 = vmatmul.mubr.msk.bf16.gmra.mxu0 %vm391_vm1, %v13727_v35 }
0x15ac   :  { %9423 = vmatprep.mubr.msk.bf16.mxu0 %vm391_vm1, %v13717_v12 }
0x15b3   :  { %9424 = vmatmul.mubr.msk.bf16.gmra.mxu0 %vm391_vm1, %v13717_v12 }
0x1637   :  { %v13998_v13 = vpop.f32.mrf.mxu1 }
0x1639   :  { %v14000_v57 = vpop.f32.mrf.mxu1 }
0x163a   :  { %v5559_v61 = vmax.f32 %v13998_v13, %v14000_v57 }
0x163b   :  { %v14004_v59 = vpop.f32.mrf.mxu1 }
0x163c   :  { %5560 = vmax.xlane.f32.xlu0 %v5559_v61 }
0x163d   :  { %v14006_v27 = vpop.f32.mrf.mxu1 }
0x163e   :  { %v5562_v35 = vmax.f32 %v14004_v59, %v14006_v27 }
0x163f   :  { %v14010_v28 = vpop.f32.mrf.mxu1 }
0x1640   :  { %5563 = vmax.xlane.f32.xlu1 %v5562_v35 }
0x1641   :  { %v14012_v36 = vpop.f32.mrf.mxu1 }
0x1642   :  { %v5565_v12 = vmax.f32 %v14010_v28, %v14012_v36 }
0x1643   :  { %v14016_v30 = vpop.f32.mrf.mxu1 }
0x1644   :  { %5566 = vmax.xlane.f32.xlu0 %v5565_v12 }
0x1645   :  { %v14018_v42 = vpop.f32.mrf.mxu1 }
0x1646   :  { %v5568_v58 = vmax.f32 %v14016_v30, %v14018_v42 }
0x1647   :  { %v14022_v21 = vpop.f32.mrf.mxu1 }
0x1648   :  { %5569 = vmax.xlane.f32.xlu0 %v5568_v58 }
0x1649   :  { %v14024_v37 = vpop.f32.mrf.mxu1 }
0x164a   :  { %v5571_v26 = vmax.f32 %v14022_v21, %v14024_v37 }
0x164b   :  { %v14028_v17 = vpop.f32.mrf.mxu1 }
0x164c   :  { %5572 = vmax.xlane.f32.xlu0 %v5571_v26 }
0x164d   :  { %v14030_v20 = vpop.f32.mrf.mxu1 }
0x164e   :  { %v5574_v4 = vmax.f32 %v14028_v17, %v14030_v20 }
0x164f   :  { %v14034_v61 = vpop.f32.mrf.mxu1 }
0x1650   :  { %5575 = vmax.xlane.f32.xlu1 %v5574_v4 }
0x1651   :  { %v14036_v35 = vpop.f32.mrf.mxu1 }
0x1652   :  { %v5577_v12 = vmax.f32 %v14034_v61, %v14036_v35 }
0x1653   :  { %v14040_v58 = vpop.f32.mrf.mxu1 }
0x1654   :  { %5578 = vmax.xlane.f32.xlu0 %v5577_v12 }
0x1655   :  { %v14042_v24 = vpop.f32.mrf.mxu1 }
0x1656   :  { %v5580_v26 = vmax.f32 %v14040_v58, %v14042_v24 }
0x1658   :  { %5581 = vmax.xlane.f32.xlu1 %v5580_v26 }
0x165b   :  { %v14046_v11 = vpop.f32.mrf.mxu0 }
0x165d   :  { %v14048_v55 = vpop.f32.mrf.mxu0 }
0x165e   :  { %v6021_v4 = vmax.f32 %v14046_v11, %v14048_v55 }
0x165f   :  { %v14052_v40 = vpop.f32.mrf.mxu0 }
0x1660   :  { %6022 = vmax.xlane.f32.xlu0 %v6021_v4 }
0x1661   :  { %v14054_v7 = vpop.f32.mrf.mxu0 }
0x1662   :  { %v6024_v12 = vmax.f32 %v14052_v40, %v14054_v7 }
0x1663   :  { %v14058_v31 = vpop.f32.mrf.mxu0 }
0x1664   :  { %6025 = vmax.xlane.f32.xlu1 %v6024_v12 }
0x1665   :  { %v14060_v6 = vpop.f32.mrf.mxu0 }
0x1666   :  { %v6027_v26 = vmax.f32 %v14058_v31, %v14060_v6 }
0x1667   :  { %v14064_v60 = vpop.f32.mrf.mxu0 }
0x1668   :  { %15374 = vst [vmem:[#allocation76_spill] sm:$0xff] %v14064_v60  ;;  %6028 = vmax.xlane.f32.xlu0 %v6027_v26 }
0x1669   :  { %v14066_v41 = vpop.f32.mrf.mxu0 }
0x166a   :  { %15375 = vst [vmem:[#allocation77_spill] sm:$0xff] %v14066_v41  ;;  %v6030_v4 = vmax.f32 %v14064_v60, %v14066_v41 }
0x166b   :  { %v14070_v3 = vpop.f32.mrf.mxu0 }
0x166c   :  { %15376 = vst [vmem:[#allocation78_spill] sm:$0xff] %v14070_v3  ;;  %6031 = vmax.xlane.f32.xlu1 %v6030_v4 }
0x166d   :  { %v14072_v23 = vpop.f32.mrf.mxu0 }
0x166e   :  { %15377 = vst [vmem:[#allocation79_spill] sm:$0xff] %v14072_v23  ;;  %v6033_v12 = vmax.f32 %v14070_v3, %v14072_v23 }
0x166f   :  { %v14076_v25 = vpop.f32.mrf.mxu0 }
0x1670   :  { %15378 = vst [vmem:[#allocation80_spill] sm:$0xff] %v14076_v25  ;;  %6034 = vmax.xlane.f32.xlu0 %v6033_v12 }
0x1671   :  { %v14078_v44 = vpop.f32.mrf.mxu0 }
0x1672   :  { %15379 = vst [vmem:[#allocation81_spill] sm:$0xff] %v14078_v44  ;;  %v6036_v26 = vmax.f32 %v14076_v25, %v14078_v44 }
0x1673   :  { %v14082_v33 = vpop.f32.mrf.mxu0 }
0x1674   :  { %15380 = vst [vmem:[#allocation82_spill] sm:$0xff] %v14082_v33  ;;  %6037 = vmax.xlane.f32.xlu1 %v6036_v26 }
0x1675   :  { %v14084_v41 = vpop.f32.mrf.mxu0 }
0x1676   :  { %15381 = vst [vmem:[#allocation83_spill] sm:$0xff] %v14084_v41  ;;  %v6039_v4 = vmax.f32 %v14082_v33, %v14084_v41 }
0x1677   :  { %v14088_v60 = vpop.f32.mrf.mxu0 }
0x1678   :  { %6040 = vmax.xlane.f32.xlu0 %v6039_v4 }
0x1679   :  { %v14090_v23 = vpop.f32.mrf.mxu0 }
0x167a   :  { %15382 = vst [vmem:[#allocation84_spill] sm:$0xff] %v14090_v23  ;;  %v6042_v12 = vmax.f32 %v14088_v60, %v14090_v23 }
0x167c   :  { %6043 = vmax.xlane.f32.xlu1 %v6042_v12 }
0x16c5   :  { %v5561_v3 = vpop.xlane.xlu0 %5560 }
0x16c6   :  { %v5583_v44 = vsub.f32 %v13998_v13, %v5561_v3  ;;  %v5584_v25 = vsub.f32 %v14000_v57, %v5561_v3 }
0x16c8   :  { %v5599_v26 = vmul.f32 1.442695, %v5583_v44  ;;  %v5601_v39 = vmul.f32 1.442695, %v5584_v25 }
0x16c9   :  { %v5564_v56 = vpop.xlane.xlu1 %5563 }
0x16ca   :  { %v5585_v34 = vsub.f32 %v14004_v59, %v5564_v56  ;;  %v5586_v41 = vsub.f32 %v14006_v27, %v5564_v56  ;;  %10505 = vpow2.f32 %v5599_v26  ;;  %v5783_v26 = vmul.bf16 %v13841_v9, %v13956_v22 }
0x16cb   :  { %10507 = vpow2.f32 %v5601_v39  ;;  %v5243_v9 = vadd.f32 %v13695_v51, %v15369_v50  ;;  %v5789_v51 = vmul.bf16 %v13873_v18, %v13707_v32 }
0x16cc   :  { %v5603_v4 = vmul.f32 1.442695, %v5585_v34  ;;  %v5605_v33 = vmul.f32 1.442695, %v5586_v41 }
0x16cd   :  { %v5567_v46 = vpop.xlane.xlu0 %5566  ;;  %v5832_v18 = vsel %vm391_vm1, %v5789_v51, %v12035_v62 }
0x16ce   :  { %10509 = vpow2.f32 %v5603_v4  ;;  %v5587_v12 = vsub.f32 %v14010_v28, %v5567_v46  ;;  %v5588_v23 = vsub.f32 %v14012_v36, %v5567_v46 }
0x16cf   :  { %10511 = vpow2.f32 %v5605_v33 }
0x16d0   :  { %v5607_v13 = vmul.f32 1.442695, %v5587_v12  ;;  %v5609_v3 = vmul.f32 1.442695, %v5588_v23 }
0x16d1   :  { %v5570_v44 = vpop.xlane.xlu0 %5569 }
0x16d2   :  { %v5589_v25 = vsub.f32 %v14016_v30, %v5570_v44  ;;  %v5590_v57 = vsub.f32 %v14018_v42, %v5570_v44  ;;  %10513 = vpow2.f32 %v5607_v13 }
0x16d3   :  { %10515 = vpow2.f32 %v5609_v3 }
0x16d4   :  { %v5611_v56 = vmul.f32 1.442695, %v5589_v25  ;;  %v5613_v59 = vmul.f32 1.442695, %v5590_v57  ;;  %v5782_v57 = vmul.bf16 %v13862_v10, %v13711_v15 }
0x16d5   :  { %v5573_v41 = vpop.xlane.xlu0 %5572 }
0x16d6   :  { %10517 = vpow2.f32 %v5611_v56  ;;  %v5591_v34 = vsub.f32 %v14022_v21, %v5573_v41  ;;  %v5592_v39 = vsub.f32 %v14024_v37, %v5573_v41  ;;  %v5247_v37 = vadd.f32 %v13699_v49, %v15369_v50 }
0x16d7   :  { %10519 = vpow2.f32 %v5613_v59  ;;  %v10506_v33 = vpop.eup %10505  ;;  %v5814_v56 = vsel %vm391_vm1, %v5783_v26, %v12026_v5  ;;  %v5811_v5 = vsel %vm391_vm1, %v5782_v57, %v12024_v48  ;;  %v15383_v57 = vld [vmem:[#allocation65_spill] sm:$0xff] }
0x16d8   :  { %v5615_v46 = vmul.f32 1.442695, %v5591_v34  ;;  %v5617_v27 = vmul.f32 1.442695, %v5592_v39  ;;  %v10508_v28 = vpop.eup %10507 }
0x16d9   :  { %v5576_v23 = vpop.xlane.xlu1 %5575 }
0x16da   :  { %v5593_v36 = vsub.f32 %v14028_v17, %v5576_v23  ;;  %v5594_v30 = vsub.f32 %v14030_v20, %v5576_v23  ;;  %10521 = vpow2.f32 %v5615_v46  ;;  %v5790_v17 = vmul.bf16 %v13850_v45, %v13711_v15 }
0x16db   :  { %v10510_v42 = vpop.eup %10509  ;;  %10523 = vpow2.f32 %v5617_v27  ;;  %v14120_v45 = vpack.c.bf16 %v5247_v37, %v5243_v9  ;;  %v5781_v46 = vmul.bf16 %v13881_v0, %v13707_v32 }
0x16dc   :  { %v10512_v4 = vpop.eup %10511  ;;  %v5619_v12 = vmul.f32 1.442695, %v5593_v36  ;;  %v5621_v21 = vmul.f32 1.442695, %v5594_v30  ;;  %v5631_v13 = vpack.c.bf16 %v10510_v42, %v10506_v33 }
0x16dd   :  { %v5579_v3 = vpop.xlane.xlu0 %5578  ;;  %v5632_v44 = vpack.c.bf16 %v10512_v4, %v10508_v28  ;;  %v5808_v48 = vsel %vm391_vm1, %v5781_v46, %v12033_v8  ;;  %v5780_v0 = vmul.bf16 %v13898_v43, %v14120_v45 }
0x16de   :  { %10525 = vpow2.f32 %v5619_v12  ;;  %v5595_v20 = vsub.f32 %v14034_v61, %v5579_v3  ;;  %v5596_v25 = vsub.f32 %v14036_v35, %v5579_v3  ;;  %v5835_v61 = vsel %vm391_vm1, %v5790_v17, %v12028_v1 }
0x16df   :  { %10527 = vpow2.f32 %v5621_v21  ;;  %5671 = vmatprep.mubr.bf16.mxu1 %v5632_v44  ;;  %v10514_v59 = vpop.eup %10513  ;;  %v5805_v43 = vsel %vm391_vm1, %v5780_v0, %v12061_v14  ;;  %v5778_v14 = vmul.bf16 %v13932_v29, %v13711_v15  ;;  %v15393_v0 = vld [vmem:[#allocation79_spill] sm:$0xff] }
0x16e0   :  { %v5623_v49 = vmul.f32 1.442695, %v5595_v20  ;;  %5672 = vmatmul.mubr.bf16.vlgmr.msra.gmra.mxu1 %v5631_v13  ;;  %v5625_v41 = vmul.f32 1.442695, %v5596_v25  ;;  %v10516_v50 = vpop.eup %10515 }
0x16e1   :  { %9426 = vmatpush3.bf16.msra.mxu1 %v5814_v56  ;;  %v5582_v35 = vpop.xlane.xlu1 %5581 }
0x16e2   :  { %9427 = vmatprep.subr.bf16.mxu1 %v5835_v61  ;;  %v5597_v10 = vsub.f32 %v14040_v58, %v5582_v35  ;;  %v5598_v34 = vsub.f32 %v14042_v24, %v5582_v35  ;;  %10529 = vpow2.f32 %v5623_v49  ;;  %v5788_v24 = vmul.bf16 %v13888_v54, %v14120_v45 }
0x16e3   :  { %v10518_v39 = vpop.eup %10517  ;;  %10531 = vpow2.f32 %v5625_v41  ;;  %v5787_v54 = vmul.bf16 %v13907_v16, %v13956_v22  ;;  %v5799_v49 = vsel %vm391_vm1, %v5778_v14, %v15383_v57  ;;  %v15398_v14 = vld [vmem:[#allocation83_spill] sm:$0xff] }
0x16e4   :  { %v10520_v33 = vpop.eup %10519  ;;  %v5627_v1 = vmul.f32 1.442695, %v5597_v10  ;;  %v5629_v27 = vmul.f32 1.442695, %v5598_v34  ;;  %v5633_v23 = vpack.c.bf16 %v10518_v39, %v10514_v59  ;;  %v5829_v62 = vsel %vm391_vm1, %v5788_v24, %v12059_v63  ;;  %v15388_v34 = vld [vmem:[#allocation77_spill] sm:$0xff]  ;;  %v15392_v24 = vld [vmem:[#allocation78_spill] sm:$0xff] }
0x16e5   :  { %9428 = vmatpush3.bf16.msra.mxu1 %v5811_v5  ;;  %v5634_v58 = vpack.c.bf16 %v10520_v33, %v10516_v50  ;;  %v5779_v63 = vmul.bf16 %v13915_v53, %v13956_v22  ;;  %v5826_v16 = vsel %vm391_vm1, %v5787_v54, %v12091_v2  ;;  %v15387_v50 = vld [vmem:[#allocation76_spill] sm:$0xff]  ;;  %v15389_v5 = vld [vmem:[#allocation75_spill] sm:$0xff] }
0x16e6   :  { %10533 = vpow2.f32 %v5627_v1  ;;  %9429 = vmatprep.subr.bf16.mxu1 %v5832_v18  ;;  %v5776_v46 = vmul.bf16 %v15389_v5, %v14120_v45  ;;  %v15390_v1 = vld [vmem:[#allocation67_spill] sm:$0xff] }
0x16e7   :  { %10535 = vpow2.f32 %v5629_v27  ;;  %5679 = vmatprep.mubr.bf16.mxu1 %v5634_v58  ;;  %v10522_v28 = vpop.eup %10521  ;;  %v5802_v2 = vsel %vm391_vm1, %v5779_v63, %v12093_v47 }
0x16e8   :  { %5680 = vmatmul.mubr.bf16.gmra.mxu1 %v5633_v23  ;;  %v10524_v30 = vpop.eup %10523  ;;  %v15391_v23 = vld [vmem:[#allocation68_spill] sm:$0xff] }
0x16e9   :  { %9430 = vmatpush3.bf16.msra.mxu1 %v5808_v48  ;;  %v6023_v36 = vpop.xlane.xlu0 %6022 }
0x16ea   :  { %9431 = vmatprep.subr.bf16.mxu1 %v5829_v62  ;;  %v6045_v42 = vsub.f32 %v14046_v11, %v6023_v36  ;;  %v6046_v26 = vsub.f32 %v14048_v55, %v6023_v36  ;;  %v5786_v55 = vmul.bf16 %v13922_v52, %v13711_v15  ;;  %v15394_v62 = vld [vmem:[#allocation69_spill] sm:$0xff] }
0x16eb   :  { %v10526_v4 = vpop.eup %10525  ;;  %v5793_v36 = vsel %vm391_vm1, %v5776_v46, %v15394_v62 }
0x16ec   :  { %v10528_v8 = vpop.eup %10527  ;;  %v6061_v12 = vmul.f32 1.442695, %v6045_v42  ;;  %v5635_v21 = vpack.c.bf16 %v10526_v4, %v10522_v28  ;;  %v6063_v13 = vmul.f32 1.442695, %v6046_v26  ;;  %v5823_v52 = vsel %vm391_vm1, %v5786_v55, %v12119_v38  ;;  %v15384_v38 = vld [vmem:[#allocation64_spill] sm:$0xff] }
0x16ed   :  { %9432 = vmatpush3.bf16.msra.mxu1 %v5805_v43  ;;  %v6026_v37 = vpop.xlane.xlu1 %6025  ;;  %v5636_v3 = vpack.c.bf16 %v10528_v8, %v10524_v30  ;;  %v5777_v59 = vmul.bf16 %v15384_v38, %v13707_v32  ;;  %v15395_v4 = vld [vmem:[#allocation80_spill] sm:$0xff] }
0x16ee   :  { %9433 = vmatprep.subr.bf16.mxu1 %v5826_v16  ;;  %v6047_v11 = vsub.f32 %v14052_v40, %v6026_v37  ;;  %v6048_v44 = vsub.f32 %v14054_v7, %v6026_v37  ;;  %10537 = vpow2.f32 %v6061_v12  ;;  %v5785_v7 = vmul.bf16 %v13942_v19, %v13707_v32  ;;  %v15385_v19 = vld [vmem:[#allocation66_spill] sm:$0xff]  ;;  %v15396_v12 = vld [vmem:[#allocation81_spill] sm:$0xff] }
0x16ef   :  { %5687 = vmatprep.mubr.bf16.mxu1 %v5636_v3  ;;  %v10530_v17 = vpop.eup %10529  ;;  %10539 = vpow2.f32 %v6063_v13  ;;  %v5796_v27 = vsel %vm391_vm1, %v5777_v59, %v15390_v1 }
0x16f0   :  { %v6065_v53 = vmul.f32 1.442695, %v6047_v11  ;;  %v6067_v22 = vmul.f32 1.442695, %v6048_v44  ;;  %5688 = vmatmul.mubr.bf16.gmra.mxu1 %v5635_v21  ;;  %v10532_v20 = vpop.eup %10531  ;;  %v5820_v61 = vsel %vm391_vm1, %v5785_v7, %v15385_v19  ;;  %v15397_v11 = vld [vmem:[#allocation82_spill] sm:$0xff] }
0x16f1   :  { %9434 = vmatpush3.bf16.msra.mxu1 %v5802_v2  ;;  %v6029_v40 = vpop.xlane.xlu0 %6028 }
0x16f2   :  { %10541 = vpow2.f32 %v6065_v53  ;;  %9435 = vmatprep.subr.bf16.mxu1 %v5823_v52  ;;  %v6049_v15 = vsub.f32 %v14058_v31, %v6029_v40  ;;  %v6050_v29 = vsub.f32 %v14060_v6, %v6029_v40  ;;  %v15386_v6 = vld [vmem:[#allocation48_spill] sm:$0xff] }
0x16f3   :  { %v10534_v25 = vpop.eup %10533  ;;  %10543 = vpow2.f32 %v6067_v22  ;;  %v5784_v51 = vmul.bf16 %v15386_v6, %v14120_v45 }
0x16f4   :  { %v10536_v47 = vpop.eup %10535  ;;  %v6069_v9 = vmul.f32 1.442695, %v6049_v15  ;;  %v5637_v56 = vpack.c.bf16 %v10534_v25, %v10530_v17  ;;  %v6071_v41 = vmul.f32 1.442695, %v6050_v29 }
0x16f5   :  { %9436 = vmatpush3.bf16.msra.mxu1 %v5799_v49  ;;  %v6032_v35 = vpop.xlane.xlu1 %6031  ;;  %v5638_v31 = vpack.c.bf16 %v10536_v47, %v10532_v20  ;;  %v5817_v18 = vsel %vm391_vm1, %v5784_v51, %v15391_v23  ;;  %v15399_v20 = vld [vmem:[#allocation84_spill] sm:$0xff] }
0x16f6   :  { %9437 = vmatprep.subr.bf16.mxu1 %v5820_v61  ;;  %v6051_v10 = vsub.f32 %v15387_v50, %v6032_v35  ;;  %v6052_v39 = vsub.f32 %v15388_v34, %v6032_v35  ;;  %10545 = vpow2.f32 %v6069_v9 }
0x16f7   :  { %5695 = vmatprep.mubr.bf16.mxu1 %v5638_v31  ;;  %10547 = vpow2.f32 %v6071_v41 }
0x16f8   :  { %v6073_v32 = vmul.f32 1.442695, %v6051_v10  ;;  %v6075_v33 = vmul.f32 1.442695, %v6052_v39  ;;  %5696 = vmatmul.mubr.bf16.gmra.mxu1 %v5637_v56  ;;  %v10167_v10 = vld [vmem:[%s15324_s13 + $0x38] sm:$0xff]  }
0x16f9   :  { %9438 = vmatpush3.bf16.msra.mxu1 %v5796_v27  ;;  %v6035_v58 = vpop.xlane.xlu0 %6034  ;;  %9832 = vmatprep.subr.bf16.mxu0 %v10167_v10 }
0x16fa   :  { %10549 = vpow2.f32 %v6073_v32  ;;  %9439 = vmatprep.subr.bf16.mxu1 %v5817_v18  ;;  %v6053_v48 = vsub.f32 %v15392_v24, %v6035_v58  ;;  %v6054_v28 = vsub.f32 %v15393_v0, %v6035_v58  ;;  %9833 = vmatpush3.bf16.msra.mxu0 %v10167_v10  ;;  %v10169_v24 = vld [vmem:[%s15324_s13 + $0x28] sm:$0xff]  }
0x16fb   :  { %10551 = vpow2.f32 %v6075_v33  ;;  %v10538_v54 = vpop.eup %10537  ;;  %v10168_v33 = vld [vmem:[%s15324_s13 + $0x30] sm:$0xff]  }
0x16fc   :  { %v6077_v45 = vmul.f32 1.442695, %v6053_v48  ;;  %v6079_v30 = vmul.f32 1.442695, %v6054_v28  ;;  %v10540_v26 = vpop.eup %10539  ;;  %9834 = vmatprep.subr.bf16.mxu0 %v10168_v33 }
0x16fd   :  { %9440 = vmatpush3.bf16.msra.mxu1 %v5793_v36  ;;  %v6038_v42 = vpop.xlane.xlu1 %6037 }
0x16fe   :  { %v6055_v8 = vsub.f32 %v15395_v4, %v6038_v42  ;;  %v6056_v43 = vsub.f32 %v15396_v12, %v6038_v42  ;;  %10553 = vpow2.f32 %v6077_v45  ;;  %9835 = vmatpush3.bf16.msra.mxu0 %v10168_v33  ;;  %v10170_v45 = vld [vmem:[%s15324_s13 + $0x20] sm:$0xff]   ;;  %v15400_v42 = vmov 0.0  }
0x16ff   :  { %v10542_v21 = vpop.eup %10541  ;;  %10555 = vpow2.f32 %v6079_v30  ;;  %9836 = vmatprep.subr.bf16.mxu0 %v10169_v24 }
0x1700   :  { %v10544_v63 = vpop.eup %10543  ;;  %v6081_v13 = vmul.f32 1.442695, %v6055_v8  ;;  %v6083_v16 = vmul.f32 1.442695, %v6056_v43  ;;  %v6093_v37 = vpack.c.bf16 %v10542_v21, %v10538_v54 }
0x1701   :  { %v6041_v3 = vpop.xlane.xlu0 %6040  ;;  %v6094_v55 = vpack.c.bf16 %v10544_v63, %v10540_v26 }
0x1702   :  { %10557 = vpow2.f32 %v6081_v13  ;;  %v6057_v44 = vsub.f32 %v15397_v11, %v6041_v3  ;;  %v6058_v53 = vsub.f32 %v15398_v14, %v6041_v3  ;;  %9837 = vmatpush3.bf16.msra.mxu0 %v10169_v24 }
0x1703   :  { %10559 = vpow2.f32 %v6083_v16  ;;  %6133 = vmatprep.mubr.bf16.mxu1 %v6094_v55  ;;  %v10546_v2 = vpop.eup %10545  ;;  %9838 = vmatprep.subr.bf16.mxu0 %v10170_v45 }
0x1704   :  { %v6085_v22 = vmul.f32 1.442695, %v6057_v44  ;;  %6134 = vmatmul.mubr.bf16.vlgmr.msra.gmra.mxu1 %v6093_v37  ;;  %v6087_v17 = vmul.f32 1.442695, %v6058_v53  ;;  %v10548_v40 = vpop.eup %10547 }
0x1705   :  { %v6044_v52 = vpop.xlane.xlu1 %6043 }
0x1706   :  { %v6059_v7 = vsub.f32 %v14088_v60, %v6044_v52  ;;  %v6060_v15 = vsub.f32 %v15399_v20, %v6044_v52  ;;  %10561 = vpow2.f32 %v6085_v22  ;;  %9839 = vmatpush3.bf16.msra.mxu0 %v10170_v45 }
0x1707   :  { %v10550_v29 = vpop.eup %10549  ;;  %10563 = vpow2.f32 %v6087_v17  ;;  %9880 = vmatprep.subr.bf16.mxu0 %v15400_v42 }
0x1708   :  { %v10552_v25 = vpop.eup %10551  ;;  %v6089_v47 = vmul.f32 1.442695, %v6059_v7  ;;  %v6091_v9 = vmul.f32 1.442695, %v6060_v15  ;;  %v6095_v57 = vpack.c.bf16 %v10550_v29, %v10546_v2 }
0x1709   :  { %v6096_v49 = vpack.c.bf16 %v10552_v25, %v10548_v40 }
0x170a   :  { %10565 = vpow2.f32 %v6089_v47 }
0x170b   :  { %10567 = vpow2.f32 %v6091_v9  ;;  %6141 = vmatprep.mubr.bf16.mxu1 %v6096_v49  ;;  %v10554_v56 = vpop.eup %10553 }
0x170c   :  { %6142 = vmatmul.mubr.bf16.gmra.mxu1 %v6095_v57  ;;  %v10556_v38 = vpop.eup %10555 }
0x170f   :  { %v10558_v59 = vpop.eup %10557 }
0x1710   :  { %v10560_v41 = vpop.eup %10559  ;;  %v6097_v60 = vpack.c.bf16 %v10558_v59, %v10554_v56 }
0x1711   :  { %v6098_v19 = vpack.c.bf16 %v10560_v41, %v10556_v38 }
0x1713   :  { %6149 = vmatprep.mubr.bf16.mxu1 %v6098_v19  ;;  %v10562_v61 = vpop.eup %10561 }
0x1714   :  { %6150 = vmatmul.mubr.bf16.gmra.mxu1 %v6097_v60  ;;  %v10564_v35 = vpop.eup %10563 }
0x1717   :  { %v10566_v31 = vpop.eup %10565 }
0x1718   :  { %v10568_v6 = vpop.eup %10567  ;;  %v6099_v51 = vpack.c.bf16 %v10566_v31, %v10562_v61 }
0x1719   :  { %v6100_v50 = vpack.c.bf16 %v10568_v6, %v10564_v35 }
0x171b   :  { %6157 = vmatprep.mubr.bf16.mxu1 %v6100_v50 }
0x171c   :  { %6158 = vmatmul.mubr.bf16.gmra.mxu1 %v6099_v51 }
0x17a0   :  { %v9377_v34 = vpop.f32.mrf.mxu1 }
0x17a2   :  { %v9378_v39 = vpop.f32.mrf.mxu1 }
0x17a3   :  { %v14193_v5 = vadd.f32 %v9378_v39, %v9377_v34 }
0x17a4   :  { %v9380_v46 = vpop.f32.mrf.mxu1 }
0x17a5   :  { %10569 = vrcp.f32 %v14193_v5 }
0x17a6   :  { %v9381_v32 = vpop.f32.mrf.mxu1 }
0x17a7   :  { %v14197_v1 = vadd.f32 %v9381_v32, %v9380_v46 }
0x17a8   :  { %v9383_v27 = vpop.f32.mrf.mxu1 }
0x17a9   :  { %10571 = vrcp.f32 %v14197_v1 }
0x17aa   :  { %v9384_v23 = vpop.f32.mrf.mxu1 }
0x17ab   :  { %v14200_v18 = vadd.f32 %v9384_v23, %v9383_v27 }
0x17ac   :  { %v9386_v58 = vpop.f32.mrf.mxu1 }
0x17ad   :  { %10573 = vrcp.f32 %v14200_v18 }
0x17ae   :  { %v9387_v48 = vpop.f32.mrf.mxu1 }
0x17af   :  { %v14204_v0 = vadd.f32 %v9387_v48, %v9386_v58 }
0x17b0   :  { %v9389_v28 = vpop.f32.mrf.mxu1 }
0x17b1   :  { %10575 = vrcp.f32 %v14204_v0 }
0x17b2   :  { %v10570_v62 = vpop.eup %10569  ;;  %v9390_v36 = vpop.f32.mrf.mxu1 }
0x17b3   :  { %v14208_v54 = vadd.f32 %v9390_v36, %v9389_v28  ;;  %5720 = vrot.lane.b32.xlu0 %v10570_v62, %s11127_s0  ;;  %v10171_v36 = vld [vmem:[%s15340_s1 + $0x18] sm:$0xff]  }
0x17b4   :  { %v9392_v30 = vpop.f32.mrf.mxu1 }
0x17b5   :  { %10577 = vrcp.f32 %v14208_v54 }
0x17b6   :  { %v10572_v26 = vpop.eup %10571  ;;  %v9393_v4 = vpop.f32.mrf.mxu1 }
0x17b7   :  { %v14213_v8 = vadd.f32 %v9393_v4, %v9392_v30  ;;  %5722 = vrot.lane.b32.xlu1 %v10572_v26, %s11127_s0  ;;  %v10172_v4 = vld [vmem:[%s15340_s1 + $0x10] sm:$0xff]  }
0x17b8   :  { %v9395_v12 = vpop.f32.mrf.mxu1 }
0x17b9   :  { %10579 = vrcp.f32 %v14213_v8 }
0x17ba   :  { %v10574_v43 = vpop.eup %10573  ;;  %v9396_v21 = vpop.f32.mrf.mxu1 }
0x17bb   :  { %v14217_v63 = vadd.f32 %v9396_v21, %v9395_v12  ;;  %5724 = vrot.lane.b32.xlu1 %v10574_v43, %s11127_s0 }
0x17bc   :  { %v9398_v13 = vpop.f32.mrf.mxu1 }
0x17bd   :  { %10581 = vrcp.f32 %v14217_v63 }
0x17be   :  { %v10576_v16 = vpop.eup %10575  ;;  %v9399_v37 = vpop.f32.mrf.mxu1 }
0x17bf   :  { %v14221_v3 = vadd.f32 %v9399_v37, %v9398_v13  ;;  %5726 = vrot.lane.b32.xlu1 %v10576_v16, %s11127_s0 }
0x17c1   :  { %10583 = vrcp.f32 %v14221_v3 }
0x17c2   :  { %v10578_v55 = vpop.eup %10577 }
0x17c3   :  { %5728 = vrot.lane.b32.xlu0 %v10578_v55, %s11127_s0 }
0x17c4   :  { %v9441_v11 = vpop.f32.mrf.mxu1 }
0x17c6   :  { %v10580_v44 = vpop.eup %10579  ;;  %v9442_v14 = vpop.f32.mrf.mxu1 }
0x17c7   :  { %v14226_v53 = vadd.f32 %v9442_v14, %v9441_v11  ;;  %5730 = vrot.lane.b32.xlu1 %v10580_v44, %s11127_s0 }
0x17c8   :  { %v9444_v22 = vpop.f32.mrf.mxu1 }
0x17c9   :  { %10585 = vrcp.f32 %v14226_v53 }
0x17ca   :  { %v10582_v2 = vpop.eup %10581  ;;  %v9445_v17 = vpop.f32.mrf.mxu1 }
0x17cb   :  { %v14230_v52 = vadd.f32 %v9445_v17, %v9444_v22  ;;  %5732 = vrot.lane.b32.xlu0 %v10582_v2, %s11127_s0 }
0x17cc   :  { %v9447_v40 = vpop.f32.mrf.mxu1 }
0x17cd   :  { %10587 = vrcp.f32 %v14230_v52 }
0x17ce   :  { %v10584_v7 = vpop.eup %10583  ;;  %v9448_v20 = vpop.f32.mrf.mxu1 }
0x17cf   :  { %v14234_v15 = vadd.f32 %v9448_v20, %v9447_v40  ;;  %5734 = vrot.lane.b32.xlu1 %v10584_v7, %s11127_s0 }
0x17d0   :  { %v9450_v29 = vpop.f32.mrf.mxu1 }
0x17d1   :  { %10589 = vrcp.f32 %v14234_v15 }
0x17d2   :  { %v9451_v25 = vpop.f32.mrf.mxu1 }
0x17d3   :  { %v14238_v47 = vadd.f32 %v9451_v25, %v9450_v29 }
0x17d4   :  { %v9453_v9 = vpop.f32.mrf.mxu1 }
0x17d5   :  { %10591 = vrcp.f32 %v14238_v47 }
0x17d6   :  { %v10586_v57 = vpop.eup %10585  ;;  %v9454_v49 = vpop.f32.mrf.mxu1 }
0x17d7   :  { %v14241_v56 = vadd.f32 %v9454_v49, %v9453_v9  ;;  %6182 = vrot.lane.b32.xlu0 %v10586_v57, %s11127_s0  ;;  %v14288_v57 = vld [vmem:[#allocation13 + $0x1] ss:$0 sm:$0xff] }
0x17d8   :  { %v9456_v38 = vpop.f32.mrf.mxu1 }
0x17d9   :  { %10593 = vrcp.f32 %v14241_v56 }
0x17da   :  { %v10588_v59 = vpop.eup %10587  ;;  %v9457_v41 = vpop.f32.mrf.mxu1 }
0x17db   :  { %v14245_v60 = vadd.f32 %v9457_v41, %v9456_v38  ;;  %6184 = vrot.lane.b32.xlu1 %v10588_v59, %s11127_s0  ;;  %v15402_v41 = vld [vmem:[#allocation53_spill] sm:$0xff] }
0x17dc   :  { %v9459_v19 = vpop.f32.mrf.mxu1 }
0x17dd   :  { %10595 = vrcp.f32 %v14245_v60 }
0x17de   :  { %v10590_v61 = vpop.eup %10589  ;;  %v9460_v35 = vpop.f32.mrf.mxu1 }
0x17df   :  { %v14249_v31 = vadd.f32 %v9460_v35, %v9459_v19  ;;  %6186 = vrot.lane.b32.xlu0 %v10590_v61, %s11127_s0  ;;  %v15403_v61 = vld [vmem:[#allocation55_spill] sm:$0xff] }
0x17e0   :  { %v9462_v6 = vpop.f32.mrf.mxu1 }
0x17e1   :  { %10597 = vrcp.f32 %v14249_v31 }
0x17e2   :  { %v10592_v51 = vpop.eup %10591  ;;  %v9463_v50 = vpop.f32.mrf.mxu1 }
0x17e3   :  { %v9464_v10 = vadd.f32 %v9463_v50, %v9462_v6  ;;  %6188 = vrot.lane.b32.xlu1 %v10592_v51, %s11127_s0  ;;  %v15404_v51 = vld [vmem:[#allocation54_spill] sm:$0xff] }
0x17e5   :  { %10599 = vrcp.f32 %v9464_v10 }
0x17e6   :  { %v10594_v34 = vpop.eup %10593 }
0x17e7   :  { %6190 = vrot.lane.b32.xlu0 %v10594_v34, %s11127_s0 }
0x17ea   :  { %v10596_v39 = vpop.eup %10595 }
0x17eb   :  { %6192 = vrot.lane.b32.xlu1 %v10596_v39, %s11127_s0 }
0x17ee   :  { %v10598_v46 = vpop.eup %10597 }
0x17ef   :  { %6194 = vrot.lane.b32.xlu0 %v10598_v46, %s11127_s0 }
0x17f2   :  { %v10600_v32 = vpop.eup %10599 }
0x17f3   :  { %6196 = vrot.lane.b32.xlu1 %v10600_v32, %s11127_s0 }
0x1825   :  { %v5721_v33 = vpop.permute.xlu0 %5720 }
0x1826   :  { %v5744_v23 = vmul.f32 %v14193_v5, %v5721_v33 }
0x1829   :  { %v5723_v27 = vpop.permute.xlu1 %5722 }
0x182a   :  { %v5745_v58 = vmul.f32 %v14197_v1, %v5723_v27 }
0x182c   :  { %v6214_v24 = vpack.c.bf16 %v5745_v58, %v5744_v23 }
0x182d   :  { %v5725_v48 = vpop.permute.xlu1 %5724 }
0x182e   :  { %9840 = vmatprep.mubr.msk.bf16.mxu0 %vm391_vm1, %v6214_v24  ;;  %v5746_v45 = vmul.f32 %v14200_v18, %v5725_v48  ;;  %v15406_v48 = vld [vmem:[#allocation57_spill] sm:$0xff] }
0x1831   :  { %v5727_v28 = vpop.permute.xlu1 %5726 }
0x1832   :  { %v5747_v62 = vmul.f32 %v14204_v0, %v5727_v28 }
0x1834   :  { %v6215_v30 = vpack.c.bf16 %v5747_v62, %v5746_v45  ;;  %v15407_v62 = vld [vmem:[#allocation59_spill] sm:$0xff] }
0x1835   :  { %v5729_v26 = vpop.permute.xlu0 %5728 }
0x1836   :  { %9841 = vmatmul.mubr.msk.bf16.vlgmr.msra.gmra.mxu0 %vm391_vm1, %v6215_v30  ;;  %v5748_v1 = vmul.f32 %v14208_v54, %v5729_v26 }
0x1837   :  { %9881 = vmatpush3.bf16.msra.mxu0 %v10171_v36 }
0x1838   :  { %9882 = vmatprep.subr.bf16.mxu0 %v15400_v42 }
0x1839   :  { %v5731_v5 = vpop.permute.xlu1 %5730 }
0x183a   :  { %v5749_v12 = vmul.f32 %v14213_v8, %v5731_v5  ;;  %v15408_v5 = vld [vmem:[#allocation58_spill] sm:$0xff] }
0x183b   :  { %9883 = vmatpush3.bf16.msra.mxu0 %v10172_v4 }
0x183c   :  { %v6216_v43 = vpack.c.bf16 %v5749_v12, %v5748_v1  ;;  %v15409_v12 = vld [vmem:[#allocation60_spill] sm:$0xff] }
0x183d   :  { %v5733_v18 = vpop.permute.xlu0 %5732 }
0x183e   :  { %9844 = vmatprep.mubr.msk.bf16.mxu0 %vm391_vm1, %v6216_v43  ;;  %v5750_v21 = vmul.f32 %v14217_v63, %v5733_v18 }
0x1841   :  { %v5735_v0 = vpop.permute.xlu1 %5734 }
0x1842   :  { %v5751_v13 = vmul.f32 %v14221_v3, %v5735_v0 }
0x1844   :  { %v6217_v16 = vpack.c.bf16 %v5751_v13, %v5750_v21 }
0x1846   :  { %9845 = vmatmul.mubr.msk.bf16.gmra.mxu0 %vm391_vm1, %v6217_v16 }
0x1849   :  { %v6183_v37 = vpop.permute.xlu0 %6182 }
0x184a   :  { %v6206_v11 = vmul.f32 %v14226_v53, %v6183_v37 }
0x184d   :  { %v6185_v55 = vpop.permute.xlu1 %6184 }
0x184e   :  { %v6207_v54 = vmul.f32 %v14230_v52, %v6185_v55 }
0x1850   :  { %v6218_v8 = vpack.c.bf16 %v6207_v54, %v6206_v11  ;;  %v15410_v54 = vld [vmem:[#allocation62_spill] sm:$0xff] }
0x1851   :  { %v6187_v44 = vpop.permute.xlu0 %6186 }
0x1852   :  { %9848 = vmatprep.mubr.msk.bf16.mxu0 %vm391_vm1, %v6218_v8  ;;  %v6208_v22 = vmul.f32 %v14234_v15, %v6187_v44 }
0x1855   :  { %v6189_v14 = vpop.permute.xlu1 %6188 }
0x1856   :  { %v6209_v63 = vmul.f32 %v14238_v47, %v6189_v14  ;;  %v15401_v47 = vld [vmem:[#allocation51_spill] sm:$0xff] }
0x1857   :  { %v15411_v14 = vld [vmem:[#allocation63_spill] sm:$0xff] }
0x1858   :  { %v6219_v2 = vpack.c.bf16 %v6209_v63, %v6208_v22 }
0x1859   :  { %v6191_v3 = vpop.permute.xlu0 %6190 }
0x185a   :  { %9849 = vmatmul.mubr.msk.bf16.gmra.mxu0 %vm391_vm1, %v6219_v2  ;;  %v6210_v40 = vmul.f32 %v14241_v56, %v6191_v3 }
0x185d   :  { %v6193_v17 = vpop.permute.xlu1 %6192 }
0x185e   :  { %v6211_v53 = vmul.f32 %v14245_v60, %v6193_v17  ;;  %v15412_v17 = vld [vmem:[#allocation61_spill] sm:$0xff] }
0x1860   :  { %v6220_v7 = vpack.c.bf16 %v6211_v53, %v6210_v40  ;;  %v15413_v53 = vld [vmem:[#allocation70_spill] sm:$0xff] }
0x1861   :  { %v6195_v52 = vpop.permute.xlu0 %6194 }
0x1862   :  { %9852 = vmatprep.mubr.msk.bf16.mxu0 %vm391_vm1, %v6220_v7  ;;  %v6212_v29 = vmul.f32 %v14249_v31, %v6195_v52 }
0x1865   :  { %v6197_v20 = vpop.permute.xlu1 %6196 }
0x1866   :  { %v6213_v25 = vmul.f32 %v9464_v10, %v6197_v20  ;;  %v15405_v10 = vld [vmem:[#allocation56_spill] sm:$0xff] }
0x1868   :  { %v6221_v15 = vpack.c.bf16 %v6213_v25, %v6212_v29 }
0x186a   :  { %9853 = vmatmul.mubr.msk.bf16.gmra.mxu0 %vm391_vm1, %v6221_v15 }
0x186b   :  { %9884 = vmatprep.mubr.msk.bf16.mxu0 %vm11148_vm0, %v15400_v42 }
0x1872   :  { %9885 = vmatmul.mubr.msk.bf16.vlgmr.msra.gmra.mxu0 %vm3221_vm2, %v15401_v47 }
0x18f6   :  { %v9842_v9 = vpop.f32.mrf.mxu0 }
0x18f7   :  { %v6319_v56 = vadd.f32 %v9842_v9, %v14288_v57 }
0x18f8   :  { %v6310_v49 = vpop.f32.mrf.mxu0 }
0x18f9   :  { %v6311_v38 = vadd.f32 %v14288_v57, %v6310_v49  ;;  %v14296_v35 = vadd.f32 %v6319_v56, %v15403_v61  ;;  %v15414_v56 = vld [vmem:[#allocation71_spill] sm:$0xff] }
0x18fa   :  { %v9843_v59 = vpop.f32.mrf.mxu0 }
0x18fb   :  { %v14293_v60 = vadd.f32 %v6311_v38, %v15402_v41  ;;  %v6322_v42 = vadd.f32 %v9843_v59, %v14288_v57  ;;  %v6399_v46 = vsel %vm391_vm1, %v14296_v35, 0.0  ;;  %v15415_v41 = vld [vmem:[#allocation73_spill] sm:$0xff] }
0x18fc   :  { %v6313_v19 = vpop.f32.mrf.mxu0 }
0x18fd   :  { %v6314_v31 = vadd.f32 %v14288_v57, %v6313_v19  ;;  %v6393_v6 = vsel %vm391_vm1, %v14293_v60, 0.0  ;;  %v14306_v34 = vadd.f32 %v6322_v42, %v15405_v10 }
0x18fe   :  { %6394 = vadd.xlane.f32.xlu0 %v6393_v6 }
0x18ff   :  { %v14303_v50 = vadd.f32 %v6314_v31, %v15404_v51  ;;  %v6402_v32 = vsel %vm391_vm1, %v14306_v34, 0.0  ;;  %v15416_v51 = vld [vmem:[#allocation72_spill] sm:$0xff] }
0x1901   :  { %v6396_v39 = vsel %vm391_vm1, %v14303_v50, 0.0 }
0x1902   :  { %6397 = vadd.xlane.f32.xlu1 %v6396_v39  ;;  %6400 = vadd.xlane.f32.xlu0 %v6399_v46  ;;  %v15417_v46 = vld [vmem:[#allocation74_spill] sm:$0xff] }
0x1906   :  { %6403 = vadd.xlane.f32.xlu0 %v6402_v32  ;;  %v9846_v33 = vpop.f32.mrf.mxu0 }
0x1907   :  { %v6335_v23 = vadd.f32 %v9846_v33, %v14288_v57 }
0x1908   :  { %v6326_v27 = vpop.f32.mrf.mxu0 }
0x1909   :  { %v6327_v58 = vadd.f32 %v14288_v57, %v6326_v27  ;;  %v14320_v36 = vadd.f32 %v6335_v23, %v15407_v62 }
0x190a   :  { %v9847_v24 = vpop.f32.mrf.mxu0 }
0x190b   :  { %v14317_v28 = vadd.f32 %v6327_v58, %v15406_v48  ;;  %v6338_v30 = vadd.f32 %v9847_v24, %v14288_v57  ;;  %v6411_v0 = vsel %vm391_vm1, %v14320_v36, 0.0 }
0x190c   :  { %v6329_v45 = vpop.f32.mrf.mxu0 }
0x190d   :  { %v6330_v26 = vadd.f32 %v14288_v57, %v6329_v45  ;;  %v6405_v4 = vsel %vm391_vm1, %v14317_v28, 0.0  ;;  %v14330_v43 = vadd.f32 %v6338_v30, %v15409_v12 }
0x190e   :  { %6406 = vadd.xlane.f32.xlu0 %v6405_v4 }
0x190f   :  { %v14327_v1 = vadd.f32 %v6330_v26, %v15408_v5  ;;  %v6414_v21 = vsel %vm391_vm1, %v14330_v43, 0.0 }
0x1911   :  { %v6408_v18 = vsel %vm391_vm1, %v14327_v1, 0.0 }
0x1912   :  { %6409 = vadd.xlane.f32.xlu1 %v6408_v18  ;;  %6412 = vadd.xlane.f32.xlu0 %v6411_v0 }
0x1916   :  { %6415 = vadd.xlane.f32.xlu1 %v6414_v21 }
0x191a   :  { %v9850_v13 = vpop.f32.mrf.mxu0 }
0x191b   :  { %v6351_v37 = vadd.f32 %v9850_v13, %v14288_v57 }
0x191c   :  { %v6342_v16 = vpop.f32.mrf.mxu0 }
0x191d   :  { %v6343_v55 = vadd.f32 %v14288_v57, %v6342_v16  ;;  %v14344_v22 = vadd.f32 %v6351_v37, %v15411_v14 }
0x191e   :  { %v9851_v11 = vpop.f32.mrf.mxu0 }
0x191f   :  { %v14341_v8 = vadd.f32 %v6343_v55, %v15410_v54  ;;  %v6354_v63 = vadd.f32 %v9851_v11, %v14288_v57  ;;  %v6423_v20 = vsel %vm391_vm1, %v14344_v22, 0.0 }
0x1920   :  { %v6345_v44 = vpop.f32.mrf.mxu0 }
0x1921   :  { %v6346_v2 = vadd.f32 %v14288_v57, %v6345_v44  ;;  %v6417_v3 = vsel %vm391_vm1, %v14341_v8, 0.0  ;;  %v14354_v7 = vadd.f32 %v6354_v63, %v15413_v53 }
0x1922   :  { %6418 = vadd.xlane.f32.xlu0 %v6417_v3 }
0x1923   :  { %v14351_v40 = vadd.f32 %v6346_v2, %v15412_v17  ;;  %v6426_v29 = vsel %vm391_vm1, %v14354_v7, 0.0 }
0x1925   :  { %v6420_v52 = vsel %vm391_vm1, %v14351_v40, 0.0 }
0x1926   :  { %6421 = vadd.xlane.f32.xlu1 %v6420_v52  ;;  %6424 = vadd.xlane.f32.xlu0 %v6423_v20 }
0x192a   :  { %6427 = vadd.xlane.f32.xlu1 %v6426_v29  ;;  %v9854_v25 = vpop.f32.mrf.mxu0 }
0x192b   :  { %v6367_v47 = vadd.f32 %v9854_v25, %v14288_v57 }
0x192c   :  { %v6358_v15 = vpop.f32.mrf.mxu0 }
0x192d   :  { %v6359_v9 = vadd.f32 %v14288_v57, %v6358_v15  ;;  %v14368_v19 = vadd.f32 %v6367_v47, %v15415_v41 }
0x192e   :  { %v9855_v49 = vpop.f32.mrf.mxu0 }
0x192f   :  { %v14365_v38 = vadd.f32 %v6359_v9, %v15414_v56  ;;  %v6370_v61 = vadd.f32 %v9855_v49, %v14288_v57  ;;  %v6435_v27 = vsel %vm391_vm1, %v14368_v19, 0.0 }
0x1930   :  { %v6361_v59 = vpop.f32.mrf.mxu0 }
0x1931   :  { %v6362_v42 = vadd.f32 %v14288_v57, %v6361_v59  ;;  %v6429_v31 = vsel %vm391_vm1, %v14365_v38, 0.0  ;;  %v14380_v32 = vadd.f32 %v6370_v61, %v15417_v46  ;;  %v14386_v57 = vld [vmem:[#allocation19 + $0x1] ss:$0 sm:$0xff] }
0x1932   :  { %v14374_v6 = vpop.f32.mrf.mxu0  ;;  %6430 = vadd.xlane.f32.xlu0 %v6429_v31 }
0x1933   :  { %v14377_v10 = vadd.f32 %v6362_v42, %v15416_v51  ;;  %v6438_v48 = vsel %vm391_vm1, %v14380_v32, 0.0 }
0x1934   :  { %v9886_v39 = vpop.f32.mrf.mxu0 }
0x1935   :  { %v6432_v33 = vsel %vm391_vm1, %v14377_v10, 0.0 }
0x1936   :  { %v6877_v23 = vpop.f32.mrf.mxu0  ;;  %6433 = vadd.xlane.f32.xlu1 %v6432_v33  ;;  %6436 = vadd.xlane.f32.xlu0 %v6435_v27  ;;  %v10173_v33 = vld [vmem:[%s15341_s14 + $0x38] sm:$0xff]  }
0x1937   :  { %v14389_v58 = vadd.f32 %v14386_v57, %v6877_v23  ;;  %9856 = vmatprep.subr.bf16.mxu1 %v10173_v33 }
0x1938   :  { %v9887_v24 = vpop.f32.mrf.mxu0  ;;  %9857 = vmatpush3.bf16.msra.mxu1 %v10173_v33 }
0x193a   :  { %6439 = vadd.xlane.f32.xlu1 %v6438_v48  ;;  %v10174_v48 = vld [vmem:[%s15341_s14 + $0x30] sm:$0xff]  }
0x193b   :  { %9858 = vmatprep.subr.bf16.mxu1 %v10174_v48 }
0x193c   :  { %9859 = vmatpush3.bf16.msra.mxu1 %v10174_v48 }
0x1987   :  { %v6395_v45 = vpop.xlane.xlu0 %6394 }
0x1988   :  { %v6441_v62 = vmul.f32 0.015625, %v6395_v45 }
0x198a   :  { %v14394_v30 = vsub.f32 %v14293_v60, %v6441_v62 }
0x198b   :  { %v6398_v26 = vpop.xlane.xlu1 %6397  ;;  %v6401_v4 = vpop.xlane.xlu0 %6400 }
0x198c   :  { %v6442_v5 = vmul.f32 0.015625, %v6398_v26  ;;  %v6443_v12 = vmul.f32 0.015625, %v6401_v4  ;;  %v6473_v18 = vmul.f32 %v14394_v30, %v14394_v30 }
0x198e   :  { %v14399_v0 = vsub.f32 %v14303_v50, %v6442_v5  ;;  %v14402_v21 = vsub.f32 %v14296_v35, %v6443_v12  ;;  %v6489_v13 = vsel %vm391_vm1, %v6473_v18, 0.0 }
0x198f   :  { %6490 = vadd.xlane.f32.xlu0 %v6489_v13  ;;  %v6404_v16 = vpop.xlane.xlu0 %6403 }
0x1990   :  { %v6444_v37 = vmul.f32 0.015625, %v6404_v16  ;;  %v6474_v55 = vmul.f32 %v14399_v0, %v14399_v0  ;;  %v6475_v11 = vmul.f32 %v14402_v21, %v14402_v21  ;;  %v10175_v16 = vld [vmem:[%s15341_s14 + $0x28] sm:$0xff]  }
0x1991   :  { %9860 = vmatprep.subr.bf16.mxu1 %v10175_v16 }
0x1992   :  { %v14410_v54 = vsub.f32 %v14306_v34, %v6444_v37  ;;  %v6492_v44 = vsel %vm391_vm1, %v6474_v55, 0.0  ;;  %v6495_v14 = vsel %vm391_vm1, %v6475_v11, 0.0  ;;  %9861 = vmatpush3.bf16.msra.mxu1 %v10175_v16 }
0x1993   :  { %6493 = vadd.xlane.f32.xlu1 %v6492_v44  ;;  %6496 = vadd.xlane.f32.xlu0 %v6495_v14 }
0x1994   :  { %v6476_v63 = vmul.f32 %v14410_v54, %v14410_v54 }
0x1996   :  { %v6498_v2 = vsel %vm391_vm1, %v6476_v63, 0.0 }
0x1997   :  { %6499 = vadd.xlane.f32.xlu1 %v6498_v2  ;;  %v6407_v3 = vpop.xlane.xlu0 %6406 }
0x1998   :  { %v6445_v17 = vmul.f32 0.015625, %v6407_v3  ;;  %v10176_v3 = vld [vmem:[%s15341_s14 + $0x20] sm:$0xff]  }
0x1999   :  { %9862 = vmatprep.subr.bf16.mxu1 %v10176_v3 }
0x199a   :  { %v14418_v53 = vsub.f32 %v14317_v28, %v6445_v17  ;;  %9863 = vmatpush3.bf16.msra.mxu1 %v10176_v3 }
0x199b   :  { %v6410_v52 = vpop.xlane.xlu1 %6409  ;;  %v6413_v20 = vpop.xlane.xlu0 %6412 }
0x199c   :  { %v6446_v29 = vmul.f32 0.015625, %v6410_v52  ;;  %v6447_v25 = vmul.f32 0.015625, %v6413_v20  ;;  %v6477_v15 = vmul.f32 %v14418_v53, %v14418_v53 }
0x199e   :  { %v14423_v47 = vsub.f32 %v14327_v1, %v6446_v29  ;;  %v14426_v9 = vsub.f32 %v14320_v36, %v6447_v25  ;;  %v6501_v49 = vsel %vm391_vm1, %v6477_v15, 0.0 }
0x199f   :  { %v6416_v56 = vpop.xlane.xlu1 %6415  ;;  %6502 = vadd.xlane.f32.xlu0 %v6501_v49 }
0x19a0   :  { %v6448_v59 = vmul.f32 0.015625, %v6416_v56  ;;  %v6478_v41 = vmul.f32 %v14423_v47, %v14423_v47  ;;  %v6479_v61 = vmul.f32 %v14426_v9, %v14426_v9 }
0x19a2   :  { %v14434_v42 = vsub.f32 %v14330_v43, %v6448_v59  ;;  %v6504_v31 = vsel %vm391_vm1, %v6478_v41, 0.0  ;;  %v6507_v51 = vsel %vm391_vm1, %v6479_v61, 0.0 }
0x19a3   :  { %6505 = vadd.xlane.f32.xlu1 %v6504_v31  ;;  %6508 = vadd.xlane.f32.xlu0 %v6507_v51 }
0x19a4   :  { %v6480_v39 = vmul.f32 %v14434_v42, %v14434_v42 }
0x19a6   :  { %v6510_v46 = vsel %vm391_vm1, %v6480_v39, 0.0 }
0x19a7   :  { %6511 = vadd.xlane.f32.xlu1 %v6510_v46 }
0x19ab   :  { %v6419_v27 = vpop.xlane.xlu0 %6418 }
0x19ac   :  { %v6449_v23 = vmul.f32 0.015625, %v6419_v27 }
0x19ae   :  { %v14443_v24 = vsub.f32 %v14341_v8, %v6449_v23 }
0x19af   :  { %v6422_v45 = vpop.xlane.xlu1 %6421  ;;  %v6425_v62 = vpop.xlane.xlu0 %6424 }
0x19b0   :  { %v6450_v26 = vmul.f32 0.015625, %v6422_v45  ;;  %v6451_v4 = vmul.f32 0.015625, %v6425_v62  ;;  %v6481_v5 = vmul.f32 %v14443_v24, %v14443_v24 }
0x19b2   :  { %v14449_v12 = vsub.f32 %v14351_v40, %v6450_v26  ;;  %v14452_v18 = vsub.f32 %v14344_v22, %v6451_v4  ;;  %v6513_v13 = vsel %vm391_vm1, %v6481_v5, 0.0  ;;  %v6875_v4 = vadd.f32 %v14386_v57, %v14374_v6 }
0x19b3   :  { %v6428_v37 = vpop.xlane.xlu1 %6427  ;;  %6514 = vadd.xlane.f32.xlu0 %v6513_v13 }
0x19b4   :  { %v6452_v55 = vmul.f32 0.015625, %v6428_v37  ;;  %v6482_v11 = vmul.f32 %v14449_v12, %v14449_v12  ;;  %v6483_v44 = vmul.f32 %v14452_v18, %v14452_v18  ;;  %v6896_v5 = vpack.c.bf16 %v6875_v4, %v6875_v4  ;;  %v15418_v37 = vld [vmem:[#allocation50_spill] sm:$0xff] }
0x19b6   :  { %v14461_v14 = vsub.f32 %v14354_v7, %v6452_v55  ;;  %v6516_v63 = vsel %vm391_vm1, %v6482_v11, 0.0  ;;  %v6519_v2 = vsel %vm391_vm1, %v6483_v44, 0.0  ;;  %v6898_v13 = vrot.slane %v6896_v5, 4  ;;  %v14501_v11 = vld [vmem:[#allocation4 + $0x8] sm:$0xff]  }
0x19b7   :  { %6517 = vadd.xlane.f32.xlu1 %v6516_v63  ;;  %6520 = vadd.xlane.f32.xlu0 %v6519_v2 }
0x19b8   :  { %v6484_v17 = vmul.f32 %v14461_v14, %v14461_v14  ;;  %v14496_v16 = vsel %vm3282_vm3, %v6896_v5, %v6898_v13 }
0x19b9   :  { %v6905_v55 = vmul.bf16 %v14496_v16, %v15418_v37  ;;  %v6904_v44 = vmul.bf16 %v14501_v11, %v14496_v16 }
0x19ba   :  { %v6522_v52 = vsel %vm391_vm1, %v6484_v17, 0.0 }
0x19bb   :  { %6523 = vadd.xlane.f32.xlu1 %v6522_v52  ;;  %v6431_v20 = vpop.xlane.xlu0 %6430  ;;  %10020 = vmatprep.subr.msk.bf16.mxu0 %vm391_vm1, %v6904_v44  ;;  %v6935_v6 = vsel %vm391_vm1, %v6904_v44, 0 }
0x19bc   :  { %v6453_v29 = vmul.f32 0.015625, %v6431_v20  ;;  %9889 = vmatpush3.bf16.xpose.msra.mxu0 %v6935_v6 }
0x19be   :  { %v14470_v25 = vsub.f32 %v14365_v38, %v6453_v29 }
0x19bf   :  { %v6434_v15 = vpop.xlane.xlu1 %6433  ;;  %v6437_v49 = vpop.xlane.xlu0 %6436 }
0x19c0   :  { %v6454_v56 = vmul.f32 0.015625, %v6434_v15  ;;  %v6455_v59 = vmul.f32 0.015625, %v6437_v49  ;;  %v6485_v41 = vmul.f32 %v14470_v25, %v14470_v25 }
0x19c2   :  { %v14475_v61 = vsub.f32 %v14377_v10, %v6454_v56  ;;  %v14478_v31 = vsub.f32 %v14368_v19, %v6455_v59  ;;  %v6525_v51 = vsel %vm391_vm1, %v6485_v41, 0.0 }
0x19c3   :  { %v6440_v39 = vpop.xlane.xlu1 %6439  ;;  %6526 = vadd.xlane.f32.xlu0 %v6525_v51 }
0x19c4   :  { %v6456_v46 = vmul.f32 0.015625, %v6440_v39  ;;  %v6486_v33 = vmul.f32 %v14475_v61, %v14475_v61  ;;  %v6487_v27 = vmul.f32 %v14478_v31, %v14478_v31 }
0x19c6   :  { %v14486_v23 = vsub.f32 %v14380_v32, %v6456_v46  ;;  %v6528_v48 = vsel %vm391_vm1, %v6486_v33, 0.0  ;;  %v6531_v45 = vsel %vm391_vm1, %v6487_v27, 0.0  ;;  %v14507_v46 = vld [vmem:[#allocation15 + $0x1] ss:$0 sm:$0xff] }
0x19c7   :  { %6529 = vadd.xlane.f32.xlu1 %v6528_v48  ;;  %6532 = vadd.xlane.f32.xlu0 %v6531_v45 }
0x19c8   :  { %v6488_v62 = vmul.f32 %v14486_v23, %v14486_v23 }
0x19ca   :  { %v6534_v26 = vsel %vm391_vm1, %v6488_v62, 0.0 }
0x19cb   :  { %6535 = vadd.xlane.f32.xlu1 %v6534_v26 }
0x19dc   :  { %6909 = vrot.lane.b32.xlu1 %v6905_v55, %s11127_s0  ;;  %v14511_v55 = vld [vmem:[#allocation16 + $0x1] ss:$0 sm:$0xff] }
0x1a18   :  { %v6491_v57 = vpop.xlane.xlu0 %6490 }
0x1a19   :  { %v6537_v63 = vmul.f32 0.015625, %v6491_v57 }
0x1a1b   :  { %v6553_v2 = vadd.f32 1e-05, %v6537_v63 }
0x1a1c   :  { %v6494_v3 = vpop.xlane.xlu1 %6493  ;;  %v6497_v17 = vpop.xlane.xlu0 %6496 }
0x1a1d   :  { %10601 = vrsqrt.f32 %v6553_v2  ;;  %v6538_v52 = vmul.f32 0.015625, %v6494_v3  ;;  %v6539_v20 = vmul.f32 0.015625, %v6497_v17 }
0x1a1f   :  { %v6554_v29 = vadd.f32 1e-05, %v6538_v52  ;;  %v6555_v15 = vadd.f32 1e-05, %v6539_v20 }
0x1a20   :  { %v6500_v49 = vpop.xlane.xlu1 %6499 }
0x1a21   :  { %10603 = vrsqrt.f32 %v6554_v29  ;;  %v6540_v56 = vmul.f32 0.015625, %v6500_v49 }
0x1a22   :  { %10605 = vrsqrt.f32 %v6555_v15 }
0x1a23   :  { %v6556_v59 = vadd.f32 1e-05, %v6540_v56 }
0x1a25   :  { %10607 = vrsqrt.f32 %v6556_v59 }
0x1a28   :  { %v6503_v41 = vpop.xlane.xlu0 %6502 }
0x1a29   :  { %v6541_v51 = vmul.f32 0.015625, %v6503_v41 }
0x1a2a   :  { %v10602_v39 = vpop.eup %10601 }
0x1a2b   :  { %v6557_v33 = vadd.f32 1e-05, %v6541_v51  ;;  %v6585_v27 = vmul.f32 %v10602_v39, %v14394_v30 }
0x1a2c   :  { %v6506_v48 = vpop.xlane.xlu1 %6505  ;;  %v6509_v45 = vpop.xlane.xlu0 %6508 }
0x1a2d   :  { %10609 = vrsqrt.f32 %v6557_v33  ;;  %v6542_v62 = vmul.f32 0.015625, %v6506_v48  ;;  %v6543_v26 = vmul.f32 0.015625, %v6509_v45  ;;  %v6607_v5 = vmul.f32 %v14507_v46, %v6585_v27 }
0x1a2e   :  { %v10604_v4 = vpop.eup %10603 }
0x1a2f   :  { %v10606_v13 = vpop.eup %10605  ;;  %v6558_v44 = vadd.f32 1e-05, %v6542_v62  ;;  %v6559_v6 = vadd.f32 1e-05, %v6543_v26  ;;  %v6586_v57 = vmul.f32 %v10604_v4, %v14399_v0  ;;  %v6629_v52 = vadd.f32 %v14511_v55, %v6607_v5 }
0x1a30   :  { %v6587_v63 = vmul.f32 %v10606_v13, %v14402_v21  ;;  %v6512_v2 = vpop.xlane.xlu1 %6511 }
0x1a31   :  { %10611 = vrsqrt.f32 %v6558_v44  ;;  %v6544_v30 = vmul.f32 0.015625, %v6512_v2  ;;  %v6608_v3 = vmul.f32 %v14507_v46, %v6586_v57 }
0x1a32   :  { %v10608_v17 = vpop.eup %10607  ;;  %10613 = vrsqrt.f32 %v6559_v6  ;;  %v6609_v20 = vmul.f32 %v14507_v46, %v6587_v63 }
0x1a33   :  { %v6588_v29 = vmul.f32 %v10608_v17, %v14410_v54  ;;  %v6560_v15 = vadd.f32 1e-05, %v6544_v30  ;;  %v6630_v49 = vadd.f32 %v14511_v55, %v6608_v3 }
0x1a34   :  { %v6631_v56 = vadd.f32 %v14511_v55, %v6609_v20 }
0x1a35   :  { %v6610_v0 = vmul.f32 %v14507_v46, %v6588_v29  ;;  %10615 = vrsqrt.f32 %v6560_v15  ;;  %v6654_v21 = vpack.c.bf16 %v6630_v49, %v6629_v52 }
0x1a37   :  { %v6632_v59 = vadd.f32 %v14511_v55, %v6610_v0  ;;  %9864 = vmatprep.mubr.msk.bf16.mxu1 %vm391_vm1, %v6654_v21 }
0x1a39   :  { %v6655_v41 = vpack.c.bf16 %v6632_v59, %v6631_v56 }
0x1a3a   :  { %v10610_v51 = vpop.eup %10609 }
0x1a3b   :  { %9865 = vmatmul.mubr.msk.bf16.vlgmr.msra.gmra.mxu1 %vm391_vm1, %v6655_v41  ;;  %v6589_v39 = vmul.f32 %v10610_v51, %v14418_v53 }
0x1a3c   :  { %v6515_v54 = vpop.xlane.xlu0 %6514 }
0x1a3d   :  { %v6545_v33 = vmul.f32 0.015625, %v6515_v54  ;;  %v6611_v48 = vmul.f32 %v14507_v46, %v6589_v39 }
0x1a3e   :  { %v10612_v27 = vpop.eup %10611 }
0x1a3f   :  { %v10614_v45 = vpop.eup %10613  ;;  %v6561_v62 = vadd.f32 1e-05, %v6545_v33  ;;  %v6590_v26 = vmul.f32 %v10612_v27, %v14423_v47  ;;  %v6633_v53 = vadd.f32 %v14511_v55, %v6611_v48 }
0x1a40   :  { %v6591_v4 = vmul.f32 %v10614_v45, %v14426_v9  ;;  %v6518_v5 = vpop.xlane.xlu1 %6517  ;;  %v6521_v13 = vpop.xlane.xlu0 %6520 }
0x1a41   :  { %10617 = vrsqrt.f32 %v6561_v62  ;;  %v6546_v44 = vmul.f32 0.015625, %v6518_v5  ;;  %v6547_v6 = vmul.f32 0.015625, %v6521_v13  ;;  %v6612_v57 = vmul.f32 %v14507_v46, %v6590_v26 }
0x1a42   :  { %v10616_v63 = vpop.eup %10615  ;;  %v6613_v2 = vmul.f32 %v14507_v46, %v6591_v4 }
0x1a43   :  { %v6592_v30 = vmul.f32 %v10616_v63, %v14434_v42  ;;  %v6562_v3 = vadd.f32 1e-05, %v6546_v44  ;;  %v6563_v17 = vadd.f32 1e-05, %v6547_v6  ;;  %v6634_v47 = vadd.f32 %v14511_v55, %v6612_v57 }
0x1a44   :  { %v6524_v52 = vpop.xlane.xlu1 %6523  ;;  %v6635_v49 = vadd.f32 %v14511_v55, %v6613_v2 }
0x1a45   :  { %10619 = vrsqrt.f32 %v6562_v3  ;;  %v6548_v9 = vmul.f32 0.015625, %v6524_v52  ;;  %v6656_v20 = vpack.c.bf16 %v6634_v47, %v6633_v53  ;;  %v6614_v29 = vmul.f32 %v14507_v46, %v6592_v30 }
0x1a46   :  { %10621 = vrsqrt.f32 %v6563_v17 }
0x1a47   :  { %v6564_v15 = vadd.f32 1e-05, %v6548_v9  ;;  %9868 = vmatprep.mubr.msk.bf16.mxu1 %vm391_vm1, %v6656_v20  ;;  %v6636_v0 = vadd.f32 %v14511_v55, %v6614_v29 }
0x1a49   :  { %10623 = vrsqrt.f32 %v6564_v15  ;;  %v6657_v42 = vpack.c.bf16 %v6636_v0, %v6635_v49 }
0x1a4b   :  { %9869 = vmatmul.mubr.msk.bf16.gmra.mxu1 %vm391_vm1, %v6657_v42 }
0x1a4c   :  { %v6527_v21 = vpop.xlane.xlu0 %6526 }
0x1a4d   :  { %v6549_v56 = vmul.f32 0.015625, %v6527_v21 }
0x1a4e   :  { %v10618_v59 = vpop.eup %10617 }
0x1a4f   :  { %v6565_v41 = vadd.f32 1e-05, %v6549_v56  ;;  %v6593_v51 = vmul.f32 %v10618_v59, %v14443_v24 }
0x1a50   :  { %v6530_v39 = vpop.xlane.xlu1 %6529  ;;  %v6533_v54 = vpop.xlane.xlu0 %6532 }
0x1a51   :  { %10625 = vrsqrt.f32 %v6565_v41  ;;  %v6550_v33 = vmul.f32 0.015625, %v6530_v39  ;;  %v6551_v27 = vmul.f32 0.015625, %v6533_v54  ;;  %v6615_v45 = vmul.f32 %v14507_v46, %v6593_v51 }
0x1a52   :  { %v10620_v48 = vpop.eup %10619 }
0x1a53   :  { %v10622_v62 = vpop.eup %10621  ;;  %v6566_v26 = vadd.f32 1e-05, %v6550_v33  ;;  %v6567_v4 = vadd.f32 1e-05, %v6551_v27  ;;  %v6594_v5 = vmul.f32 %v10620_v48, %v14449_v12  ;;  %v6637_v63 = vadd.f32 %v14511_v55, %v6615_v45  ;;  %v10762_v27 = vld [vmem:[#allocation4] sm:$0xff]  }
0x1a54   :  { %v6595_v13 = vmul.f32 %v10622_v62, %v14452_v18  ;;  %v6536_v44 = vpop.xlane.xlu1 %6535  ;;  %v6903_v48 = vmul.bf16 %v10762_v27, %v14496_v16 }
0x1a55   :  { %10627 = vrsqrt.f32 %v6566_v26  ;;  %v6552_v6 = vmul.f32 0.015625, %v6536_v44  ;;  %v6616_v24 = vmul.f32 %v14507_v46, %v6594_v5 }
0x1a56   :  { %v10624_v57 = vpop.eup %10623  ;;  %10629 = vrsqrt.f32 %v6567_v4  ;;  %v6617_v3 = vmul.f32 %v14507_v46, %v6595_v13  ;;  %10021 = vmatprep.subr.msk.bf16.mxu0 %vm391_vm1, %v6903_v48  ;;  %v8886_v4 = vld [vmem:[#allocation18 + $0x1] ss:$0 sm:$0xff] }
0x1a57   :  { %v6596_v53 = vmul.f32 %v10624_v57, %v14461_v14  ;;  %v6568_v2 = vadd.f32 1e-05, %v6552_v6  ;;  %v6638_v30 = vadd.f32 %v14511_v55, %v6616_v24 }
0x1a58   :  { %v6639_v17 = vadd.f32 %v14511_v55, %v6617_v3 }
0x1a59   :  { %10631 = vrsqrt.f32 %v6568_v2  ;;  %v6658_v12 = vpack.c.bf16 %v6638_v30, %v6637_v63  ;;  %v6618_v18 = vmul.f32 %v14507_v46, %v6596_v53 }
0x1a5b   :  { %9872 = vmatprep.mubr.msk.bf16.mxu1 %vm391_vm1, %v6658_v12  ;;  %v6640_v47 = vadd.f32 %v14511_v55, %v6618_v18 }
0x1a5d   :  { %v6659_v52 = vpack.c.bf16 %v6640_v47, %v6639_v17 }
0x1a5e   :  { %v10626_v9 = vpop.eup %10625 }
0x1a5f   :  { %9873 = vmatmul.mubr.msk.bf16.gmra.mxu1 %vm391_vm1, %v6659_v52  ;;  %v6597_v14 = vmul.f32 %v10626_v9, %v14470_v25 }
0x1a61   :  { %v6619_v49 = vmul.f32 %v14507_v46, %v6597_v14 }
0x1a62   :  { %v10628_v20 = vpop.eup %10627 }
0x1a63   :  { %v10630_v29 = vpop.eup %10629  ;;  %v6598_v15 = vmul.f32 %v10628_v20, %v14475_v61  ;;  %v6641_v59 = vadd.f32 %v14511_v55, %v6619_v49  ;;  %v7183_v61 = vpack.c.bf16 %v14389_v58, %v14389_v58  ;;  %v6932_v58 = vsel %vm391_vm1, %v6903_v48, 0 }
0x1a64   :  { %v6599_v0 = vmul.f32 %v10630_v29, %v14478_v31  ;;  %9891 = vmatpush3.bf16.xpose.msra.mxu0 %v6932_v58 }
0x1a65   :  { %v6620_v42 = vmul.f32 %v14507_v46, %v6598_v15 }
0x1a66   :  { %v10632_v21 = vpop.eup %10631  ;;  %v6621_v51 = vmul.f32 %v14507_v46, %v6599_v0 }
0x1a67   :  { %v6600_v56 = vmul.f32 %v10632_v21, %v14486_v23  ;;  %v6642_v41 = vadd.f32 %v14511_v55, %v6620_v42  ;;  %v7185_v23 = vrot.slane %v7183_v61, 4 }
0x1a68   :  { %v6643_v31 = vadd.f32 %v14511_v55, %v6621_v51 }
0x1a69   :  { %v6660_v25 = vpack.c.bf16 %v6642_v41, %v6641_v59  ;;  %v6622_v39 = vmul.f32 %v14507_v46, %v6600_v56  ;;  %v14571_v45 = vsel %vm3282_vm3, %v7183_v61, %v7185_v23 }
0x1a6a   :  { %v7191_v46 = vmul.bf16 %v14501_v11, %v14571_v45  ;;  %v7190_v53 = vmul.bf16 %v10762_v27, %v14571_v45 }
0x1a6b   :  { %9876 = vmatprep.mubr.msk.bf16.mxu1 %vm391_vm1, %v6660_v25  ;;  %v6644_v54 = vadd.f32 %v14511_v55, %v6622_v39 }
0x1a6c   :  { %10022 = vmatprep.subr.msk.bf16.mxu0 %vm391_vm1, %v7191_v46  ;;  %v7222_v11 = vsel %vm391_vm1, %v7191_v46, 0  ;;  %v7219_v12 = vsel %vm391_vm1, %v7190_v53, 0 }
0x1a6d   :  { %v6661_v33 = vpack.c.bf16 %v6644_v54, %v6643_v31 }
0x1a6f   :  { %9877 = vmatmul.mubr.msk.bf16.gmra.mxu1 %vm391_vm1, %v6661_v33 }
0x1afb   :  { %v9866_v55 = vpop.f32.mrf.mxu1 }
0x1afc   :  { %v6761_v24 = vadd.f32 %v9866_v55, %v8886_v4 }
0x1afd   :  { %v6752_v62 = vpop.f32.mrf.mxu1 }
0x1afe   :  { %v6753_v44 = vadd.f32 %v8886_v4, %v6752_v62 }
0x1aff   :  { %v9867_v26 = vpop.f32.mrf.mxu1 }
0x1b00   :  { %v6764_v5 = vadd.f32 %v9867_v26, %v8886_v4 }
0x1b01   :  { %v6755_v13 = vpop.f32.mrf.mxu1 }
0x1b02   :  { %v6756_v6 = vadd.f32 %v8886_v4, %v6755_v13  ;;  %v6893_v63 = vpack.c.bf16 %v6764_v5, %v6761_v24 }
0x1b04   :  { %v6892_v57 = vpack.c.bf16 %v6756_v6, %v6753_v44 }
0x1b06   :  { %9892 = vmatprep.mubr.msk.bf16.mxu0 %vm391_vm1, %v6892_v57 }
0x1b07   :  { %9893 = vmatmul.mubr.msk.bf16.vlgmr.msra.gmra.mxu0 %vm391_vm1, %v6893_v63 }
0x1b08   :  { %9913 = vmatpush3.bf16.xpose.msra.mxu0 %v7222_v11 }
0x1b09   :  { %10023 = vmatprep.subr.msk.bf16.mxu0 %vm391_vm1, %v7190_v53 }
0x1b0b   :  { %v9870_v2 = vpop.f32.mrf.mxu1 }
0x1b0c   :  { %v6777_v9 = vadd.f32 %v9870_v2, %v8886_v4  ;;  %v15419_v2 = vld [vmem:[#allocation52_spill] sm:$0xff] }
0x1b0d   :  { %v6768_v30 = vpop.f32.mrf.mxu1 }
0x1b0e   :  { %v6769_v47 = vadd.f32 %v8886_v4, %v6768_v30  ;;  %v6906_v30 = vmul.bf16 %v14496_v16, %v15419_v2 }
0x1b0f   :  { %v9871_v3 = vpop.f32.mrf.mxu1 }
0x1b10   :  { %9915 = vmatpush3.bf16.xpose.msra.mxu0 %v7219_v12  ;;  %v6780_v18 = vadd.f32 %v9871_v3, %v8886_v4 }
0x1b11   :  { %v6771_v17 = vpop.f32.mrf.mxu1 }
0x1b12   :  { %v6772_v52 = vadd.f32 %v8886_v4, %v6771_v17  ;;  %v6895_v20 = vpack.c.bf16 %v6780_v18, %v6777_v9 }
0x1b14   :  { %v6894_v14 = vpack.c.bf16 %v6772_v52, %v6769_v47 }
0x1b16   :  { %9896 = vmatprep.mubr.msk.bf16.mxu0 %vm391_vm1, %v6894_v14 }
0x1b17   :  { %9897 = vmatmul.mubr.msk.bf16.gmra.mxu0 %vm391_vm1, %v6895_v20 }
0x1b1f   :  { %v9874_v29 = vpop.f32.mrf.mxu1 }
0x1b20   :  { %v6793_v59 = vadd.f32 %v9874_v29, %v8886_v4 }
0x1b21   :  { %v6784_v15 = vpop.f32.mrf.mxu1 }
0x1b22   :  { %v6785_v21 = vadd.f32 %v8886_v4, %v6784_v15 }
0x1b23   :  { %v9875_v49 = vpop.f32.mrf.mxu1 }
0x1b24   :  { %v6796_v0 = vadd.f32 %v9875_v49, %v8886_v4 }
0x1b25   :  { %v6787_v42 = vpop.f32.mrf.mxu1 }
0x1b26   :  { %v6788_v56 = vadd.f32 %v8886_v4, %v6787_v42  ;;  %v7180_v51 = vpack.c.bf16 %v6796_v0, %v6793_v59  ;;  %v7192_v59 = vmul.bf16 %v14571_v45, %v15418_v37 }
0x1b28   :  { %v7179_v41 = vpack.c.bf16 %v6788_v56, %v6785_v21 }
0x1b2a   :  { %9916 = vmatprep.mubr.msk.bf16.mxu0 %vm391_vm1, %v7179_v41 }
0x1b2b   :  { %9917 = vmatmul.mubr.msk.bf16.vlgmr.msra.gmra.mxu0 %vm391_vm1, %v7180_v51  ;;  %v7193_v51 = vmul.bf16 %v14571_v45, %v15419_v2 }
0x1b2f   :  { %v9878_v25 = vpop.f32.mrf.mxu1 }
0x1b30   :  { %v6809_v27 = vadd.f32 %v9878_v25, %v8886_v4  ;;  %v6910_v25 = vpop.permute.xlu1 %6909 }
0x1b31   :  { %v6800_v39 = vpop.f32.mrf.mxu1 }
0x1b32   :  { %v6801_v33 = vadd.f32 %v8886_v4, %v6800_v39 }
0x1b33   :  { %v9879_v61 = vpop.f32.mrf.mxu1 }
0x1b34   :  { %v6812_v31 = vadd.f32 %v9879_v61, %v8886_v4 }
0x1b35   :  { %v6803_v54 = vpop.f32.mrf.mxu1 }
0x1b36   :  { %v6804_v23 = vadd.f32 %v8886_v4, %v6803_v54  ;;  %v7182_v58 = vpack.c.bf16 %v6812_v31, %v6809_v27 }
0x1b38   :  { %v7181_v48 = vpack.c.bf16 %v6804_v23, %v6801_v33 }
0x1b3a   :  { %9920 = vmatprep.mubr.msk.bf16.mxu0 %vm391_vm1, %v7181_v48 }
0x1b3b   :  { %9921 = vmatmul.mubr.msk.bf16.gmra.mxu0 %vm391_vm1, %v7182_v58 }
0x1bc7   :  { %v14590_v46 = vpop.f32.mrf.mxu0 }
0x1bc8   :  { %v7008_v55 = vsel %vm3221_vm2, %v14590_v46, -inf }
0x1bc9   :  { %7009 = vmax.xlane.f32.xlu0 %v7008_v55  ;;  %v6971_v62 = vpop.f32.mrf.mxu0 }
0x1bca   :  { %v7002_v5 = vsel %vm3221_vm2, %v6971_v62, -inf }
0x1bcb   :  { %v9895_v26 = vpop.f32.mrf.mxu0 }
0x1bcc   :  { %v7011_v13 = vsel %vm3221_vm2, %v9895_v26, -inf }
0x1bcd   :  { %7003 = vmax.xlane.f32.xlu0 %v7002_v5  ;;  %7012 = vmax.xlane.f32.xlu1 %v7011_v13  ;;  %v6974_v4 = vpop.f32.mrf.mxu0 }
0x1bce   :  { %v7005_v44 = vsel %vm3221_vm2, %v6974_v4, -inf }
0x1bd1   :  { %7006 = vmax.xlane.f32.xlu1 %v7005_v44 }
0x1bd7   :  { %v14597_v6 = vpop.f32.mrf.mxu0 }
0x1bd8   :  { %v7020_v15 = vsel %vm3221_vm2, %v14597_v6, -inf }
0x1bd9   :  { %v14599_v24 = vpop.f32.mrf.mxu0 }
0x1bda   :  { %v7014_v0 = vsel %vm3221_vm2, %v14599_v24, -inf }
0x1bdb   :  { %v14601_v57 = vpop.f32.mrf.mxu0 }
0x1bdc   :  { %v7023_v63 = vsel %vm3221_vm2, %v14601_v57, -inf }
0x1bdd   :  { %7024 = vmax.xlane.f32.xlu1 %v7023_v63  ;;  %v14605_v11 = vpop.f32.mrf.mxu0  ;;  %v6914_v63 = vsel %vm391_vm1, %v6910_v25, %v15418_v37 }
0x1bde   :  { %v7017_v53 = vsel %vm3221_vm2, %v14605_v11, -inf }
0x1be1   :  { %7018 = vmax.xlane.f32.xlu1 %v7017_v53 }
0x1be3   :  { %6911 = vrot.lane.b32.xlu0 %v6906_v30, %s11127_s0 }
0x1beb   :  { %v14612_v3 = vpop.f32.mrf.mxu0 }
0x1bec   :  { %v7295_v42 = vsel %vm3221_vm2, %v14612_v3, -inf }
0x1bed   :  { %v14614_v12 = vpop.f32.mrf.mxu0 }
0x1bee   :  { %v7289_v18 = vsel %vm3221_vm2, %v14614_v12, -inf }
0x1bef   :  { %7290 = vmax.xlane.f32.xlu1 %v7289_v18  ;;  %v14618_v17 = vpop.f32.mrf.mxu0 }
0x1bf0   :  { %v7298_v47 = vsel %vm3221_vm2, %v14618_v17, -inf }
0x1bf1   :  { %v14622_v52 = vpop.f32.mrf.mxu0 }
0x1bf2   :  { %v7292_v21 = vsel %vm3221_vm2, %v14622_v52, -inf }
0x1bf3   :  { %7299 = vmax.xlane.f32.xlu1 %v7298_v47 }
0x1bfb   :  { %v14624_v9 = vpop.f32.mrf.mxu0 }
0x1bfc   :  { %v7307_v56 = vsel %vm3221_vm2, %v14624_v9, -inf }
0x1bfd   :  { %v14626_v16 = vpop.f32.mrf.mxu0 }
0x1bfe   :  { %v7301_v41 = vsel %vm3221_vm2, %v14626_v16, -inf }
0x1bff   :  { %v14628_v14 = vpop.f32.mrf.mxu0 }
0x1c00   :  { %v7310_v20 = vsel %vm3221_vm2, %v14628_v14, -inf }
0x1c01   :  { %7311 = vmax.xlane.f32.xlu1 %v7310_v20  ;;  %v14632_v29 = vpop.f32.mrf.mxu0 }
0x1c02   :  { %7021 = vmax.xlane.f32.xlu0 %v7020_v15  ;;  %v7304_v49 = vsel %vm3221_vm2, %v14632_v29, -inf }
0x1c05   :  { %7305 = vmax.xlane.f32.xlu1 %v7304_v49 }
0x1c06   :  { %7015 = vmax.xlane.f32.xlu0 %v7014_v0 }
0x1c0a   :  { %7296 = vmax.xlane.f32.xlu0 %v7295_v42 }
0x1c0e   :  { %7293 = vmax.xlane.f32.xlu0 %v7292_v21 }
0x1c12   :  { %7308 = vmax.xlane.f32.xlu0 %v7307_v56 }
0x1c16   :  { %7302 = vmax.xlane.f32.xlu0 %v7301_v41  ;;  %7196 = vrot.lane.b32.xlu1 %v7192_v59, %s11127_s0 }
0x1c2c   :  { %7198 = vrot.lane.b32.xlu0 %v7193_v51, %s11127_s0 }
0x1c52   :  { %v7010_v39 = vpop.xlane.xlu0 %7009 }
0x1c53   :  { %v7028_v23 = vsub.f32 %v14590_v46, %v7010_v39 }
0x1c55   :  { %v7038_v44 = vmul.f32 1.442695, %v7028_v23 }
0x1c56   :  { %v7013_v61 = vpop.xlane.xlu1 %7012  ;;  %v7004_v31 = vpop.xlane.xlu0 %7003 }
0x1c57   :  { %v7029_v54 = vsub.f32 %v9895_v26, %v7013_v61  ;;  %v7026_v33 = vsub.f32 %v6971_v62, %v7004_v31 }
0x1c59   :  { %v7040_v27 = vmul.f32 1.442695, %v7029_v54  ;;  %v7034_v48 = vmul.f32 1.442695, %v7026_v33 }
0x1c5a   :  { %v7007_v58 = vpop.xlane.xlu1 %7006  ;;  %v6912_v55 = vpop.permute.xlu0 %6911 }
0x1c5b   :  { %v7027_v5 = vsub.f32 %v6974_v4, %v7007_v58  ;;  %v6917_v13 = vsel %vm391_vm1, %v6912_v55, %v15419_v2  ;;  %10633 = vpow2.f32 %v7040_v27 }
0x1c5c   :  { %9900 = vmatprep.subr.bf16.mxu1 %v6917_v13  ;;  %10635 = vpow2.f32 %v7034_v48 }
0x1c5d   :  { %v7036_v45 = vmul.f32 1.442695, %v7027_v5  ;;  %9901 = vmatpush3.bf16.msra.mxu1 %v6917_v13 }
0x1c5e   :  { %9902 = vmatprep.subr.bf16.mxu1 %v6914_v63 }
0x1c5f   :  { %10637 = vpow2.f32 %v7036_v45 }
0x1c60   :  { %10639 = vpow2.f32 %v7038_v44 }
0x1c61   :  { %9903 = vmatpush3.bf16.msra.mxu1 %v6914_v63 }
0x1c66   :  { %v7025_v18 = vpop.xlane.xlu1 %7024 }
0x1c67   :  { %v7033_v42 = vsub.f32 %v14601_v57, %v7025_v18 }
0x1c68   :  { %v10634_v46 = vpop.eup %10633 }
0x1c69   :  { %v10636_v62 = vpop.eup %10635  ;;  %v7048_v25 = vmul.f32 1.442695, %v7033_v42 }
0x1c6a   :  { %v7019_v47 = vpop.xlane.xlu1 %7018 }
0x1c6b   :  { %v7031_v15 = vsub.f32 %v14605_v11, %v7019_v47 }
0x1c6c   :  { %v10638_v26 = vpop.eup %10637 }
0x1c6d   :  { %v10640_v4 = vpop.eup %10639  ;;  %v7050_v53 = vpack.c.bf16 %v10638_v26, %v10636_v62  ;;  %v7044_v56 = vmul.f32 1.442695, %v7031_v15 }
0x1c6e   :  { %v7051_v30 = vpack.c.bf16 %v10634_v46, %v10640_v4 }
0x1c6f   :  { %9904 = vmatprep.mubr.msk.bf16.mxu1 %vm3221_vm2, %v7050_v53  ;;  %10641 = vpow2.f32 %v7044_v56 }
0x1c70   :  { %9905 = vmatmul.mubr.msk.bf16.vlgmr.msra.gmra.mxu1 %vm3221_vm2, %v7051_v30 }
0x1c78   :  { %v7291_v20 = vpop.xlane.xlu1 %7290 }
0x1c79   :  { %v7313_v61 = vsub.f32 %v14614_v12, %v7291_v20 }
0x1c7b   :  { %v7321_v57 = vmul.f32 1.442695, %v7313_v61  ;;  %v10178_v61 = vld [vmem:[%s15345_s2 + $0x30] sm:$0xff]  }
0x1c7c   :  { %v7300_v21 = vpop.xlane.xlu1 %7299  ;;  %v10642_v13 = vpop.eup %10641 }
0x1c8a   :  { %v7312_v39 = vpop.xlane.xlu1 %7311 }
0x1c8b   :  { %v7022_v49 = vpop.xlane.xlu0 %7021 }
0x1c8c   :  { %v7032_v0 = vsub.f32 %v14597_v6, %v7022_v49  ;;  %v7316_v6 = vsub.f32 %v14618_v17, %v7300_v21 }
0x1c8e   :  { %v7046_v59 = vmul.f32 1.442695, %v7032_v0  ;;  %v7306_v33 = vpop.xlane.xlu1 %7305  ;;  %v7327_v48 = vmul.f32 1.442695, %v7316_v6  ;;  %v10180_v6 = vld [vmem:[%s15345_s2 + $0x20] sm:$0xff]  }
0x1c8f   :  { %v7016_v41 = vpop.xlane.xlu0 %7015  ;;  %v7318_v58 = vsub.f32 %v14632_v29, %v7306_v33 }
0x1c90   :  { %v7030_v51 = vsub.f32 %v14599_v24, %v7016_v41  ;;  %10643 = vpow2.f32 %v7046_v59  ;;  %v15420_v41 = vmov 0  }
0x1c91   :  { %v7331_v17 = vmul.f32 1.442695, %v7318_v58 }
0x1c92   :  { %v7042_v31 = vmul.f32 1.442695, %v7030_v51  ;;  %v7197_v53 = vpop.permute.xlu1 %7196  ;;  %v10177_v51 = vld [vmem:[%s15345_s2 + $0x38] sm:$0xff]  }
0x1c93   :  { %v7297_v54 = vpop.xlane.xlu0 %7296  ;;  %9936 = vmatprep.subr.bf16.mxu0 %v10177_v51 }
0x1c94   :  { %10645 = vpow2.f32 %v7042_v31  ;;  %v7315_v11 = vsub.f32 %v14612_v3, %v7297_v54  ;;  %v7320_v3 = vsub.f32 %v14628_v14, %v7312_v39  ;;  %9937 = vmatpush3.bf16.msra.mxu0 %v10177_v51 }
0x1c95   :  { %10647 = vpow2.f32 %v7048_v25  ;;  %9938 = vmatprep.subr.bf16.mxu0 %v10178_v61 }
0x1c96   :  { %v7325_v23 = vmul.f32 1.442695, %v7315_v11  ;;  %10649 = vpow2.f32 %v7321_v57  ;;  %v7335_v62 = vmul.f32 1.442695, %v7320_v3  ;;  %v10179_v11 = vld [vmem:[%s15345_s2 + $0x28] sm:$0xff]  }
0x1c97   :  { %v7294_v27 = vpop.xlane.xlu0 %7293 }
0x1c98   :  { %v7314_v24 = vsub.f32 %v14622_v52, %v7294_v27  ;;  %10651 = vpow2.f32 %v7325_v23  ;;  %9939 = vmatpush3.bf16.msra.mxu0 %v10178_v61 }
0x1c99   :  { %9940 = vmatprep.subr.bf16.mxu0 %v10179_v11 }
0x1c9a   :  { %v7323_v12 = vmul.f32 1.442695, %v7314_v24 }
0x1c9b   :  { %v7309_v55 = vpop.xlane.xlu0 %7308 }
0x1c9c   :  { %10653 = vpow2.f32 %v7323_v12  ;;  %v7319_v5 = vsub.f32 %v14624_v9, %v7309_v55  ;;  %9941 = vmatpush3.bf16.msra.mxu0 %v10179_v11 }
0x1c9d   :  { %10655 = vpow2.f32 %v7327_v48  ;;  %v10644_v63 = vpop.eup %10643  ;;  %9942 = vmatprep.subr.bf16.mxu0 %v10180_v6 }
0x1c9e   :  { %v7333_v44 = vmul.f32 1.442695, %v7319_v5  ;;  %10657 = vpow2.f32 %v7331_v17 }
0x1c9f   :  { %v7303_v45 = vpop.xlane.xlu0 %7302 }
0x1ca0   :  { %v7317_v52 = vsub.f32 %v14626_v16, %v7303_v45  ;;  %10659 = vpow2.f32 %v7333_v44  ;;  %v7201_v16 = vsel %vm391_vm1, %v7197_v53, %v15418_v37  ;;  %9943 = vmatpush3.bf16.msra.mxu0 %v10180_v6 }
0x1ca1   :  { %v10646_v46 = vpop.eup %10645 }
0x1ca2   :  { %v10648_v26 = vpop.eup %10647  ;;  %v7329_v29 = vmul.f32 1.442695, %v7317_v52  ;;  %v7052_v4 = vpack.c.bf16 %v10642_v13, %v10646_v46 }
0x1ca3   :  { %v7199_v30 = vpop.permute.xlu0 %7198  ;;  %v7053_v9 = vpack.c.bf16 %v10648_v26, %v10644_v63  ;;  %v10650_v18 = vpop.eup %10649 }
0x1ca4   :  { %10661 = vpow2.f32 %v7329_v29  ;;  %9908 = vmatprep.mubr.msk.bf16.mxu1 %vm3221_vm2, %v7052_v4  ;;  %v7204_v14 = vsel %vm391_vm1, %v7199_v30, %v15419_v2 }
0x1ca5   :  { %10663 = vpow2.f32 %v7335_v62  ;;  %9909 = vmatmul.mubr.msk.bf16.gmra.mxu1 %vm3221_vm2, %v7053_v9  ;;  %9924 = vmatprep.subr.bf16.mxu1 %v7204_v14  ;;  %v10652_v47 = vpop.eup %10651 }
0x1ca6   :  { %9925 = vmatpush3.bf16.msra.mxu1 %v7204_v14 }
0x1ca7   :  { %9926 = vmatprep.subr.bf16.mxu1 %v7201_v16 }
0x1ca9   :  { %v10654_v20 = vpop.eup %10653 }
0x1caa   :  { %v10656_v15 = vpop.eup %10655  ;;  %9927 = vmatpush3.bf16.msra.mxu1 %v7201_v16  ;;  %v7337_v49 = vpack.c.bf16 %v10654_v20, %v10650_v18 }
0x1cab   :  { %v7338_v0 = vpack.c.bf16 %v10656_v15, %v10652_v47  ;;  %v10658_v2 = vpop.eup %10657 }
0x1cac   :  { %9928 = vmatprep.mubr.msk.bf16.mxu1 %vm3221_vm2, %v7337_v49 }
0x1cad   :  { %9929 = vmatmul.mubr.msk.bf16.vlgmr.msra.gmra.mxu1 %vm3221_vm2, %v7338_v0  ;;  %v10660_v42 = vpop.eup %10659 }
0x1cb1   :  { %v10662_v21 = vpop.eup %10661 }
0x1cb2   :  { %v10664_v56 = vpop.eup %10663  ;;  %v7339_v59 = vpack.c.bf16 %v10658_v2, %v10662_v21 }
0x1cb3   :  { %v7340_v37 = vpack.c.bf16 %v10664_v56, %v10660_v42 }
0x1cb4   :  { %9932 = vmatprep.mubr.msk.bf16.mxu1 %vm3221_vm2, %v7339_v59 }
0x1cb5   :  { %9933 = vmatmul.mubr.msk.bf16.gmra.mxu1 %vm3221_vm2, %v7340_v37 }
0x1cb6   :  { %8023 = vmatprep.mubr.bf16.mxu1 %v15420_v41 }
0x1d30   :  { %v14685_v25 = vpop.f32.mrf.mxu1 }
0x1d31   :  { %10665 = vrcp.f32 %v14685_v25 }
0x1d32   :  { %v14688_v39 = vpop.f32.mrf.mxu1 }
0x1d33   :  { %10667 = vrcp.f32 %v14688_v39 }
0x1d34   :  { %v14692_v31 = vpop.f32.mrf.mxu1 }
0x1d36   :  { %v14694_v54 = vpop.f32.mrf.mxu1 }
0x1d37   :  { %10669 = vrcp.f32 %v14694_v54 }
0x1d38   :  { %10671 = vrcp.f32 %v14692_v31 }
0x1d3e   :  { %v10666_v57 = vpop.eup %10665 }
0x1d3f   :  { %7151 = vrot.lane.b32.xlu0 %v10666_v57, %s11127_s0 }
0x1d40   :  { %v10668_v33 = vpop.eup %10667 }
0x1d41   :  { %7147 = vrot.lane.b32.xlu1 %v10668_v33, %s11127_s0 }
0x1d44   :  { %v10670_v23 = vpop.eup %10669 }
0x1d45   :  { %7149 = vrot.lane.b32.xlu1 %v10670_v23, %s11127_s0  ;;  %v10672_v27 = vpop.eup %10671 }
0x1d49   :  { %7153 = vrot.lane.b32.xlu1 %v10672_v27, %s11127_s0 }
0x1d65   :  { %v14704_v24 = vpop.f32.mrf.mxu1 }
0x1d67   :  { %v7116_v48 = vpop.f32.mrf.mxu1 }
0x1d68   :  { %10673 = vrcp.f32 %v7116_v48 }
0x1d69   :  { %v14706_v58 = vpop.f32.mrf.mxu1  ;;  %10675 = vrcp.f32 %v14704_v24 }
0x1d6b   :  { %v7119_v12 = vpop.f32.mrf.mxu1 }
0x1d6c   :  { %10677 = vrcp.f32 %v7119_v12 }
0x1d6d   :  { %v14709_v55 = vpop.f32.mrf.mxu1  ;;  %10679 = vrcp.f32 %v14706_v58 }
0x1d6f   :  { %v14712_v5 = vpop.f32.mrf.mxu1 }
0x1d70   :  { %10681 = vrcp.f32 %v14712_v5 }
0x1d71   :  { %v14715_v3 = vpop.f32.mrf.mxu1  ;;  %10683 = vrcp.f32 %v14709_v55 }
0x1d73   :  { %v7390_v17 = vpop.f32.mrf.mxu1 }
0x1d74   :  { %10685 = vrcp.f32 %v7390_v17 }
0x1d75   :  { %v10674_v13 = vpop.eup %10673  ;;  %v14718_v44 = vpop.f32.mrf.mxu1  ;;  %10687 = vrcp.f32 %v14715_v3 }
0x1d76   :  { %7155 = vrot.lane.b32.xlu0 %v10674_v13, %s11127_s0  ;;  %v10676_v63 = vpop.eup %10675 }
0x1d77   :  { %v14722_v45 = vpop.f32.mrf.mxu1 }
0x1d78   :  { %10689 = vrcp.f32 %v14722_v45 }
0x1d79   :  { %v10678_v52 = vpop.eup %10677  ;;  %v14725_v46 = vpop.f32.mrf.mxu1  ;;  %10691 = vrcp.f32 %v14718_v44 }
0x1d7a   :  { %7159 = vrot.lane.b32.xlu0 %v10676_v63, %s11127_s0  ;;  %7157 = vrot.lane.b32.xlu1 %v10678_v52, %s11127_s0  ;;  %v10680_v26 = vpop.eup %10679 }
0x1d7b   :  { %v7406_v62 = vpop.f32.mrf.mxu1 }
0x1d7c   :  { %10693 = vrcp.f32 %v7406_v62 }
0x1d7d   :  { %v10682_v29 = vpop.eup %10681  ;;  %10695 = vrcp.f32 %v14725_v46 }
0x1d7e   :  { %7161 = vrot.lane.b32.xlu1 %v10680_v26, %s11127_s0  ;;  %7434 = vrot.lane.b32.xlu0 %v10682_v29, %s11127_s0  ;;  %v10684_v4 = vpop.eup %10683 }
0x1d81   :  { %v10686_v53 = vpop.eup %10685 }
0x1d82   :  { %7438 = vrot.lane.b32.xlu0 %v10684_v4, %s11127_s0  ;;  %7436 = vrot.lane.b32.xlu1 %v10686_v53, %s11127_s0  ;;  %v10688_v30 = vpop.eup %10687 }
0x1d85   :  { %v10690_v9 = vpop.eup %10689 }
0x1d86   :  { %7440 = vrot.lane.b32.xlu1 %v10688_v30, %s11127_s0  ;;  %7442 = vrot.lane.b32.xlu0 %v10690_v9, %s11127_s0  ;;  %v10692_v14 = vpop.eup %10691 }
0x1d89   :  { %v10694_v16 = vpop.eup %10693 }
0x1d8a   :  { %7446 = vrot.lane.b32.xlu0 %v10692_v14, %s11127_s0  ;;  %7444 = vrot.lane.b32.xlu1 %v10694_v16, %s11127_s0  ;;  %v10696_v18 = vpop.eup %10695  ;;  %v14760_v16 = vld [vmem:[#allocation21 + $0x1] ss:$0 sm:$0xff] }
0x1d8e   :  { %7448 = vrot.lane.b32.xlu1 %v10696_v18, %s11127_s0 }
0x1db1   :  { %v7152_v0 = vpop.permute.xlu0 %7151 }
0x1db2   :  { %v7173_v21 = vmul.f32 %v14685_v25, %v7152_v0 }
0x1db3   :  { %v7148_v47 = vpop.permute.xlu1 %7147 }
0x1db4   :  { %v7171_v15 = vmul.f32 %v7148_v47, %v14688_v39 }
0x1db7   :  { %v7150_v20 = vpop.permute.xlu1 %7149 }
0x1db8   :  { %v7172_v49 = vmul.f32 %v7150_v20, %v14694_v54 }
0x1dba   :  { %v7466_v2 = vpack.c.bf16 %v7172_v49, %v7171_v15 }
0x1dbb   :  { %v7154_v42 = vpop.permute.xlu1 %7153 }
0x1dbc   :  { %v7174_v56 = vmul.f32 %v14692_v31, %v7154_v42  ;;  %9944 = vmatprep.mubr.msk.bf16.mxu0 %vm391_vm1, %v7466_v2 }
0x1dbe   :  { %v7467_v59 = vpack.c.bf16 %v7174_v56, %v7173_v21 }
0x1dc0   :  { %9945 = vmatmul.mubr.msk.bf16.vlgmr.msra.gmra.mxu0 %vm391_vm1, %v7467_v59 }
0x1de8   :  { %v7156_v37 = vpop.permute.xlu0 %7155 }
0x1de9   :  { %v7175_v11 = vmul.f32 %v7156_v37, %v7116_v48 }
0x1dec   :  { %v7158_v51 = vpop.permute.xlu1 %7157  ;;  %v7160_v61 = vpop.permute.xlu0 %7159 }
0x1ded   :  { %v7176_v6 = vmul.f32 %v7158_v51, %v7119_v12  ;;  %v7177_v33 = vmul.f32 %v14704_v24, %v7160_v61 }
0x1def   :  { %v7468_v39 = vpack.c.bf16 %v7176_v6, %v7175_v11 }
0x1df0   :  { %v7162_v57 = vpop.permute.xlu1 %7161  ;;  %v7435_v54 = vpop.permute.xlu0 %7434 }
0x1df1   :  { %v7178_v23 = vmul.f32 %v14706_v58, %v7162_v57  ;;  %9948 = vmatprep.mubr.msk.bf16.mxu0 %vm391_vm1, %v7468_v39  ;;  %v7458_v13 = vmul.f32 %v7435_v54, %v14712_v5 }
0x1df3   :  { %v7469_v25 = vpack.c.bf16 %v7178_v23, %v7177_v33 }
0x1df4   :  { %v7437_v31 = vpop.permute.xlu1 %7436  ;;  %v7439_v27 = vpop.permute.xlu0 %7438 }
0x1df5   :  { %v7459_v63 = vmul.f32 %v7437_v31, %v7390_v17  ;;  %9949 = vmatmul.mubr.msk.bf16.gmra.mxu0 %vm391_vm1, %v7469_v25  ;;  %v7460_v26 = vmul.f32 %v14709_v55, %v7439_v27 }
0x1df7   :  { %v7470_v52 = vpack.c.bf16 %v7459_v63, %v7458_v13 }
0x1df8   :  { %v7441_v48 = vpop.permute.xlu1 %7440  ;;  %v7443_v12 = vpop.permute.xlu0 %7442 }
0x1df9   :  { %v7461_v29 = vmul.f32 %v14715_v3, %v7441_v48  ;;  %9952 = vmatprep.mubr.msk.bf16.mxu0 %vm391_vm1, %v7470_v52  ;;  %v7462_v4 = vmul.f32 %v7443_v12, %v14722_v45 }
0x1dfb   :  { %v7471_v24 = vpack.c.bf16 %v7461_v29, %v7460_v26 }
0x1dfc   :  { %v7445_v58 = vpop.permute.xlu1 %7444  ;;  %v7447_v5 = vpop.permute.xlu0 %7446 }
0x1dfd   :  { %v7463_v53 = vmul.f32 %v7445_v58, %v7406_v62  ;;  %9953 = vmatmul.mubr.msk.bf16.gmra.mxu0 %vm391_vm1, %v7471_v24  ;;  %v7464_v9 = vmul.f32 %v14718_v44, %v7447_v5 }
0x1dff   :  { %v7472_v17 = vpack.c.bf16 %v7463_v53, %v7462_v4 }
0x1e00   :  { %v7449_v30 = vpop.permute.xlu1 %7448 }
0x1e01   :  { %v7465_v14 = vmul.f32 %v14725_v46, %v7449_v30  ;;  %9956 = vmatprep.mubr.msk.bf16.mxu0 %vm391_vm1, %v7472_v17 }
0x1e03   :  { %v7473_v55 = vpack.c.bf16 %v7465_v14, %v7464_v9 }
0x1e05   :  { %9957 = vmatmul.mubr.msk.bf16.gmra.mxu0 %vm391_vm1, %v7473_v55 }
0x1e80   :  { %v9946_v3 = vpop.f32.mrf.mxu0 }
0x1e81   :  { %v7571_v45 = vadd.f32 %v9946_v3, %v14760_v16 }
0x1e82   :  { %v7562_v18 = vpop.f32.mrf.mxu0 }
0x1e83   :  { %v7563_v62 = vadd.f32 %v14760_v16, %v7562_v18  ;;  %v14768_v46 = vadd.f32 %v7571_v45, %v14296_v35 }
0x1e84   :  { %v9947_v47 = vpop.f32.mrf.mxu0 }
0x1e85   :  { %v14765_v20 = vadd.f32 %v7563_v62, %v14293_v60  ;;  %v7574_v15 = vadd.f32 %v9947_v47, %v14760_v16  ;;  %v7651_v35 = vsel %vm391_vm1, %v14768_v46, 0.0 }
0x1e86   :  { %v7565_v44 = vpop.f32.mrf.mxu0 }
0x1e87   :  { %v7566_v49 = vadd.f32 %v14760_v16, %v7565_v44  ;;  %v7645_v0 = vsel %vm391_vm1, %v14765_v20, 0.0  ;;  %v14778_v42 = vadd.f32 %v7574_v15, %v14306_v34 }
0x1e88   :  { %7646 = vadd.xlane.f32.xlu0 %v7645_v0 }
0x1e89   :  { %v14775_v2 = vadd.f32 %v7566_v49, %v14303_v50  ;;  %v7654_v21 = vsel %vm391_vm1, %v14778_v42, 0.0 }
0x1e8b   :  { %v7648_v60 = vsel %vm391_vm1, %v14775_v2, 0.0 }
0x1e8c   :  { %7649 = vadd.xlane.f32.xlu1 %v7648_v60  ;;  %7652 = vadd.xlane.f32.xlu0 %v7651_v35 }
0x1e90   :  { %7655 = vadd.xlane.f32.xlu0 %v7654_v21 }
0x1eb5   :  { %v9950_v56 = vpop.f32.mrf.mxu0 }
0x1eb6   :  { %v7587_v59 = vadd.f32 %v9950_v56, %v14760_v16 }
0x1eb7   :  { %v7578_v50 = vpop.f32.mrf.mxu0 }
0x1eb8   :  { %v7579_v37 = vadd.f32 %v14760_v16, %v7578_v50  ;;  %v14792_v61 = vadd.f32 %v7587_v59, %v14320_v36 }
0x1eb9   :  { %v9951_v34 = vpop.f32.mrf.mxu0 }
0x1eba   :  { %v14789_v51 = vadd.f32 %v7579_v37, %v14317_v28  ;;  %v7590_v6 = vadd.f32 %v9951_v34, %v14760_v16  ;;  %v7663_v28 = vsel %vm391_vm1, %v14792_v61, 0.0 }
0x1ebb   :  { %v7581_v11 = vpop.f32.mrf.mxu0 }
0x1ebc   :  { %v7582_v39 = vadd.f32 %v14760_v16, %v7581_v11  ;;  %v7657_v57 = vsel %vm391_vm1, %v14789_v51, 0.0  ;;  %v14804_v36 = vadd.f32 %v7590_v6, %v14330_v43 }
0x1ebd   :  { %7658 = vadd.xlane.f32.xlu0 %v7657_v57  ;;  %v9954_v54 = vpop.f32.mrf.mxu0 }
0x1ebe   :  { %v14799_v33 = vadd.f32 %v7582_v39, %v14327_v1  ;;  %v7603_v25 = vadd.f32 %v9954_v54, %v14760_v16  ;;  %v7666_v12 = vsel %vm391_vm1, %v14804_v36, 0.0  ;;  %v10183_v54 = vld [vmem:[%s15347_s9 + $0x74] ss:$8 sps:$4 sm:$0xff]  }
0x1ebf   :  { %v7594_v23 = vpop.f32.mrf.mxu0  ;;  %7999 = vmatprep.subr.bf16.mxu1 %v10183_v54 }
0x1ec0   :  { %v7595_v31 = vadd.f32 %v14760_v16, %v7594_v23  ;;  %v7660_v27 = vsel %vm391_vm1, %v14799_v33, 0.0  ;;  %v14815_v48 = vadd.f32 %v7603_v25, %v14344_v22  ;;  %v10181_v23 = vld [vmem:[%s15347_s9 + $0x70] ss:$8 sps:$4 sm:$0xff]   ;;  %v10184_v25 = vld [vmem:[%s15347_s9 + $0x60] ss:$8 sps:$4 sm:$0xff]  }
0x1ec1   :  { %7661 = vadd.xlane.f32.xlu1 %v7660_v27  ;;  %7664 = vadd.xlane.f32.xlu0 %v7663_v28  ;;  %v9955_v13 = vpop.f32.mrf.mxu0  ;;  %v10186_v28 = vld [vmem:[%s15347_s9 + $0x64] ss:$8 sps:$4 sm:$0xff]   ;;  %v10187_v27 = vld [vmem:[%s15347_s9 + $0x50] ss:$8 sps:$4 sm:$0xff]  }
0x1ec2   :  { %v14811_v1 = vadd.f32 %v7595_v31, %v14341_v8  ;;  %v7606_v63 = vadd.f32 %v9955_v13, %v14760_v16  ;;  %v7675_v5 = vsel %vm391_vm1, %v14815_v48, 0.0  ;;  %8000 = vmatpush1.bf16.msra.mxu1 %v10181_v23  ;;  %v10189_v31 = vld [vmem:[%s15347_s9 + $0x54] ss:$8 sps:$4 sm:$0xff]   ;;  %v10192_v13 = vld [vmem:[%s15347_s9 + $0x44] ss:$8 sps:$4 sm:$0xff]  }
0x1ec3   :  { %v7597_v52 = vpop.f32.mrf.mxu0  ;;  %8001 = vmatprep.subr.bf16.mxu1 %v10186_v28 }
0x1ec4   :  { %v7598_v43 = vadd.f32 %v14760_v16, %v7597_v52  ;;  %v7669_v26 = vsel %vm391_vm1, %v14811_v1, 0.0  ;;  %v14826_v24 = vadd.f32 %v7606_v63, %v14354_v7  ;;  %v10190_v63 = vld [vmem:[%s15347_s9 + $0x40] ss:$8 sps:$4 sm:$0xff]  }
0x1ec5   :  { %7667 = vadd.xlane.f32.xlu1 %v7666_v12  ;;  %7670 = vadd.xlane.f32.xlu0 %v7669_v26  ;;  %v9958_v29 = vpop.f32.mrf.mxu0 }
0x1ec6   :  { %v14823_v8 = vadd.f32 %v7598_v43, %v14351_v40  ;;  %v7619_v22 = vadd.f32 %v9958_v29, %v14760_v16  ;;  %v7678_v7 = vsel %vm391_vm1, %v14826_v24, 0.0  ;;  %8002 = vmatpush1.bf16.msra.mxu1 %v10184_v25 }
0x1ec7   :  { %v7610_v58 = vpop.f32.mrf.mxu0  ;;  %8003 = vmatprep.subr.bf16.mxu1 %v10189_v31 }
0x1ec8   :  { %v7611_v4 = vadd.f32 %v14760_v16, %v7610_v58  ;;  %v7672_v53 = vsel %vm391_vm1, %v14823_v8, 0.0  ;;  %v14840_v9 = vadd.f32 %v7619_v22, %v14368_v19 }
0x1ec9   :  { %7673 = vadd.xlane.f32.xlu1 %v7672_v53  ;;  %7676 = vadd.xlane.f32.xlu0 %v7675_v5  ;;  %v9959_v17 = vpop.f32.mrf.mxu0 }
0x1eca   :  { %v14835_v40 = vadd.f32 %v7611_v4, %v14365_v38  ;;  %v7622_v14 = vadd.f32 %v9959_v17, %v14760_v16  ;;  %v7687_v19 = vsel %vm391_vm1, %v14840_v9, 0.0  ;;  %8004 = vmatpush1.bf16.msra.mxu1 %v10187_v27 }
0x1ecb   :  { %v7613_v30 = vpop.f32.mrf.mxu0  ;;  %8005 = vmatprep.subr.bf16.mxu1 %v10192_v13 }
0x1ecc   :  { %v7614_v55 = vadd.f32 %v14760_v16, %v7613_v30  ;;  %v7681_v3 = vsel %vm391_vm1, %v14835_v40, 0.0  ;;  %v14850_v38 = vadd.f32 %v7622_v14, %v14380_v32 }
0x1ecd   :  { %7679 = vadd.xlane.f32.xlu1 %v7678_v7  ;;  %7682 = vadd.xlane.f32.xlu0 %v7681_v3 }
0x1ece   :  { %v14847_v18 = vadd.f32 %v7614_v55, %v14377_v10  ;;  %v7690_v16 = vsel %vm391_vm1, %v14850_v38, 0.0  ;;  %8006 = vmatpush1.bf16.msra.mxu1 %v10190_v63 }
0x1ed0   :  { %v7684_v45 = vsel %vm391_vm1, %v14847_v18, 0.0 }
0x1ed1   :  { %7685 = vadd.xlane.f32.xlu1 %v7684_v45  ;;  %7688 = vadd.xlane.f32.xlu0 %v7687_v19 }
0x1ed5   :  { %7691 = vadd.xlane.f32.xlu1 %v7690_v16 }
0x1f11   :  { %v7647_v62 = vpop.xlane.xlu0 %7646 }
0x1f12   :  { %v7693_v47 = vmul.f32 0.015625, %v7647_v62 }
0x1f14   :  { %v14859_v10 = vsub.f32 %v14765_v20, %v7693_v47 }
0x1f15   :  { %v7650_v44 = vpop.xlane.xlu1 %7649  ;;  %v7653_v32 = vpop.xlane.xlu0 %7652 }
0x1f16   :  { %v7694_v15 = vmul.f32 0.015625, %v7650_v44  ;;  %v7695_v49 = vmul.f32 0.015625, %v7653_v32  ;;  %v7725_v0 = vmul.f32 %v14859_v10, %v14859_v10 }
0x1f18   :  { %v14864_v60 = vsub.f32 %v14775_v2, %v7694_v15  ;;  %v14867_v35 = vsub.f32 %v14768_v46, %v7695_v49  ;;  %v7741_v21 = vsel %vm391_vm1, %v7725_v0, 0.0 }
0x1f19   :  { %7742 = vadd.xlane.f32.xlu0 %v7741_v21  ;;  %v7656_v56 = vpop.xlane.xlu0 %7655 }
0x1f1a   :  { %v7696_v59 = vmul.f32 0.015625, %v7656_v56  ;;  %v7726_v50 = vmul.f32 %v14864_v60, %v14864_v60  ;;  %v7727_v37 = vmul.f32 %v14867_v35, %v14867_v35 }
0x1f1c   :  { %v14875_v34 = vsub.f32 %v14778_v42, %v7696_v59  ;;  %v7744_v11 = vsel %vm391_vm1, %v7726_v50, 0.0  ;;  %v7747_v6 = vsel %vm391_vm1, %v7727_v37, 0.0 }
0x1f1d   :  { %7745 = vadd.xlane.f32.xlu1 %v7744_v11  ;;  %7748 = vadd.xlane.f32.xlu0 %v7747_v6 }
0x1f1e   :  { %v7728_v39 = vmul.f32 %v14875_v34, %v14875_v34 }
0x1f20   :  { %v7750_v57 = vsel %vm391_vm1, %v7728_v39, 0.0 }
0x1f21   :  { %7751 = vadd.xlane.f32.xlu1 %v7750_v57 }
0x1f46   :  { %v7659_v52 = vpop.xlane.xlu0 %7658 }
0x1f47   :  { %v7697_v43 = vmul.f32 0.015625, %v7659_v52 }
0x1f49   :  { %v14891_v12 = vsub.f32 %v14789_v51, %v7697_v43 }
0x1f4a   :  { %v7662_v26 = vpop.xlane.xlu1 %7661  ;;  %v7665_v29 = vpop.xlane.xlu0 %7664 }
0x1f4b   :  { %v7698_v58 = vmul.f32 0.015625, %v7662_v26  ;;  %v7699_v22 = vmul.f32 0.015625, %v7665_v29  ;;  %v7729_v4 = vmul.f32 %v14891_v12, %v14891_v12 }
0x1f4d   :  { %v14896_v53 = vsub.f32 %v14799_v33, %v7698_v58  ;;  %v14899_v5 = vsub.f32 %v14792_v61, %v7699_v22  ;;  %v7753_v17 = vsel %vm391_vm1, %v7729_v4, 0.0 }
0x1f4e   :  { %v7668_v30 = vpop.xlane.xlu1 %7667  ;;  %7754 = vadd.xlane.f32.xlu0 %v7753_v17  ;;  %v7671_v7 = vpop.xlane.xlu0 %7670 }
0x1f4f   :  { %v7700_v14 = vmul.f32 0.015625, %v7668_v30  ;;  %v7701_v55 = vmul.f32 0.015625, %v7671_v7  ;;  %v7730_v3 = vmul.f32 %v14896_v53, %v14896_v53  ;;  %v7731_v45 = vmul.f32 %v14899_v5, %v14899_v5 }
0x1f51   :  { %v14907_v19 = vsub.f32 %v14804_v36, %v7700_v14  ;;  %v14910_v16 = vsub.f32 %v14811_v1, %v7701_v55  ;;  %v7756_v62 = vsel %vm391_vm1, %v7730_v3, 0.0  ;;  %v7759_v47 = vsel %vm391_vm1, %v7731_v45, 0.0 }
0x1f52   :  { %v7674_v44 = vpop.xlane.xlu1 %7673  ;;  %7757 = vadd.xlane.f32.xlu1 %v7756_v62  ;;  %7760 = vadd.xlane.f32.xlu0 %v7759_v47  ;;  %v7677_v32 = vpop.xlane.xlu0 %7676 }
0x1f53   :  { %v7702_v15 = vmul.f32 0.015625, %v7674_v44  ;;  %v7703_v49 = vmul.f32 0.015625, %v7677_v32  ;;  %v7732_v0 = vmul.f32 %v14907_v19, %v14907_v19  ;;  %v7733_v21 = vmul.f32 %v14910_v16, %v14910_v16  ;;  %v10193_v32 = vld [vmem:[%s15348_s7 + $0xf8] sm:$0xff]  }
0x1f54   :  { %9528 = vmatprep.subr.bf16.mxu0 %v10193_v32 }
0x1f55   :  { %v14919_v56 = vsub.f32 %v14823_v8, %v7702_v15  ;;  %v14922_v59 = vsub.f32 %v14815_v48, %v7703_v49  ;;  %v7762_v50 = vsel %vm391_vm1, %v7732_v0, 0.0  ;;  %v7765_v37 = vsel %vm391_vm1, %v7733_v21, 0.0  ;;  %v10194_v15 = vld [vmem:[%s15348_s7 + $0xb8] sm:$0xff]   ;;  %v10195_v49 = vld [vmem:[%s15348_s7 + $0xf0] sm:$0xff]  }
0x1f56   :  { %v7680_v11 = vpop.xlane.xlu1 %7679  ;;  %7763 = vadd.xlane.f32.xlu1 %v7762_v50  ;;  %7766 = vadd.xlane.f32.xlu0 %v7765_v37  ;;  %v7683_v6 = vpop.xlane.xlu0 %7682  ;;  %v10196_v0 = vld [vmem:[%s15348_s7 + $0xb0] sm:$0xff]   ;;  %v10197_v50 = vld [vmem:[%s15348_s7 + $0xe8] sm:$0xff]  }
0x1f57   :  { %v7704_v39 = vmul.f32 0.015625, %v7680_v11  ;;  %v7705_v57 = vmul.f32 0.015625, %v7683_v6  ;;  %v7734_v54 = vmul.f32 %v14919_v56, %v14919_v56  ;;  %v7735_v23 = vmul.f32 %v14922_v59, %v14922_v59  ;;  %9529 = vmatpush3.bf16.msra.mxu0 %v10194_v15  ;;  %v10198_v6 = vld [vmem:[%s15348_s7 + $0xa8] sm:$0xff]  }
0x1f58   :  { %9530 = vmatprep.subr.bf16.mxu0 %v10195_v49 }
0x1f59   :  { %v14931_v28 = vsub.f32 %v14826_v24, %v7704_v39  ;;  %v14934_v25 = vsub.f32 %v14835_v40, %v7705_v57  ;;  %v7768_v31 = vsel %vm391_vm1, %v7734_v54, 0.0  ;;  %v7771_v27 = vsel %vm391_vm1, %v7735_v23, 0.0  ;;  %v10199_v54 = vld [vmem:[%s15348_s7 + $0xe0] sm:$0xff]  }
0x1f5a   :  { %v7686_v13 = vpop.xlane.xlu1 %7685  ;;  %7769 = vadd.xlane.f32.xlu1 %v7768_v31  ;;  %7772 = vadd.xlane.f32.xlu0 %v7771_v27  ;;  %v7689_v63 = vpop.xlane.xlu0 %7688 }
0x1f5b   :  { %v7706_v52 = vmul.f32 0.015625, %v7686_v13  ;;  %v7707_v43 = vmul.f32 0.015625, %v7689_v63  ;;  %v7736_v26 = vmul.f32 %v14931_v28, %v14931_v28  ;;  %v7737_v29 = vmul.f32 %v14934_v25, %v14934_v25  ;;  %9531 = vmatpush3.bf16.msra.mxu0 %v10196_v0  ;;  %v10200_v63 = vld [vmem:[%s15348_s7 + $0xa0] sm:$0xff]  }
0x1f5c   :  { %9532 = vmatprep.subr.bf16.mxu0 %v10197_v50 }
0x1f5d   :  { %v14943_v58 = vsub.f32 %v14847_v18, %v7706_v52  ;;  %v14946_v22 = vsub.f32 %v14840_v9, %v7707_v43  ;;  %v7774_v4 = vsel %vm391_vm1, %v7736_v26, 0.0  ;;  %v7777_v17 = vsel %vm391_vm1, %v7737_v29, 0.0  ;;  %v10201_v43 = vld [vmem:[%s15348_s7 + $0xd8] sm:$0xff]  }
0x1f5e   :  { %v7692_v30 = vpop.xlane.xlu1 %7691  ;;  %7775 = vadd.xlane.f32.xlu1 %v7774_v4  ;;  %7778 = vadd.xlane.f32.xlu0 %v7777_v17  ;;  %v10202_v4 = vld [vmem:[%s15348_s7 + $0x98] sm:$0xff]  }
0x1f5f   :  { %v7708_v7 = vmul.f32 0.015625, %v7692_v30  ;;  %v7738_v14 = vmul.f32 %v14943_v58, %v14943_v58  ;;  %v7739_v55 = vmul.f32 %v14946_v22, %v14946_v22  ;;  %9533 = vmatpush3.bf16.msra.mxu0 %v10198_v6 }
0x1f60   :  { %9534 = vmatprep.subr.bf16.mxu0 %v10199_v54 }
0x1f61   :  { %v14955_v3 = vsub.f32 %v14850_v38, %v7708_v7  ;;  %v7780_v45 = vsel %vm391_vm1, %v7738_v14, 0.0  ;;  %v7783_v62 = vsel %vm391_vm1, %v7739_v55, 0.0  ;;  %v14973_v7 = vld [vmem:[#allocation22 + $0x1] ss:$0 sm:$0xff] }
0x1f62   :  { %7781 = vadd.xlane.f32.xlu1 %v7780_v45  ;;  %7784 = vadd.xlane.f32.xlu0 %v7783_v62 }
0x1f63   :  { %v7740_v47 = vmul.f32 %v14955_v3, %v14955_v3  ;;  %9535 = vmatpush3.bf16.msra.mxu0 %v10200_v63 }
0x1f64   :  { %9536 = vmatprep.subr.bf16.mxu0 %v10201_v43 }
0x1f65   :  { %v7786_v44 = vsel %vm391_vm1, %v7740_v47, 0.0  ;;  %v14977_v47 = vld [vmem:[#allocation24 + $0x1] ss:$0 sm:$0xff] }
0x1f66   :  { %7787 = vadd.xlane.f32.xlu1 %v7786_v44 }
0x1f67   :  { %9537 = vmatpush3.bf16.msra.mxu0 %v10202_v4 }
0x1fa2   :  { %v7743_v21 = vpop.xlane.xlu0 %7742 }
0x1fa3   :  { %v7789_v37 = vmul.f32 0.015625, %v7743_v21 }
0x1fa5   :  { %v7805_v11 = vadd.f32 1e-05, %v7789_v37 }
0x1fa6   :  { %v7746_v39 = vpop.xlane.xlu1 %7745  ;;  %v7749_v57 = vpop.xlane.xlu0 %7748 }
0x1fa7   :  { %10697 = vrsqrt.f32 %v7805_v11  ;;  %v7790_v23 = vmul.f32 0.015625, %v7746_v39  ;;  %v7791_v31 = vmul.f32 0.015625, %v7749_v57 }
0x1fa9   :  { %v7806_v27 = vadd.f32 1e-05, %v7790_v23  ;;  %v7807_v13 = vadd.f32 1e-05, %v7791_v31 }
0x1faa   :  { %v7752_v52 = vpop.xlane.xlu1 %7751 }
0x1fab   :  { %10699 = vrsqrt.f32 %v7806_v27  ;;  %v7792_v26 = vmul.f32 0.015625, %v7752_v52 }
0x1fac   :  { %10701 = vrsqrt.f32 %v7807_v13 }
0x1fad   :  { %v7808_v29 = vadd.f32 1e-05, %v7792_v26 }
0x1faf   :  { %10703 = vrsqrt.f32 %v7808_v29 }
0x1fb4   :  { %v10698_v17 = vpop.eup %10697 }
0x1fb5   :  { %v7837_v30 = vmul.f32 %v10698_v17, %v14859_v10 }
0x1fb7   :  { %v7859_v55 = vmul.f32 %v14973_v7, %v7837_v30 }
0x1fb8   :  { %v10700_v14 = vpop.eup %10699 }
0x1fb9   :  { %v7838_v45 = vmul.f32 %v10700_v14, %v14864_v60  ;;  %v10702_v62 = vpop.eup %10701  ;;  %v7881_v15 = vadd.f32 %v14977_v47, %v7859_v55 }
0x1fba   :  { %v7839_v0 = vmul.f32 %v10702_v62, %v14867_v35 }
0x1fbb   :  { %v7860_v44 = vmul.f32 %v14973_v7, %v7838_v45 }
0x1fbc   :  { %v10704_v32 = vpop.eup %10703  ;;  %v7861_v60 = vmul.f32 %v14973_v7, %v7839_v0 }
0x1fbd   :  { %v7882_v49 = vadd.f32 %v14977_v47, %v7860_v44  ;;  %v7840_v10 = vmul.f32 %v10704_v32, %v14875_v34 }
0x1fbe   :  { %v7883_v11 = vadd.f32 %v14977_v47, %v7861_v60 }
0x1fbf   :  { %v7906_v21 = vpack.c.bf16 %v7882_v49, %v7881_v15  ;;  %v7862_v50 = vmul.f32 %v14973_v7, %v7840_v10 }
0x1fc1   :  { %8963 = vmatmul.mubr.msk.bf16.vlgmr.msra.gmra.mxu1 %vm391_vm1, %v7906_v21  ;;  %v7884_v37 = vadd.f32 %v14977_v47, %v7862_v50 }
0x1fc2   :  { %8033 = vmatprep.mubr.bf16.mxu1 %v15420_v41 }
0x1fc3   :  { %v7907_v6 = vpack.c.bf16 %v7884_v37, %v7883_v11 }
0x1fc9   :  { %8964 = vmatmul.mubr.msk.bf16.gmra.mxu1 %vm391_vm1, %v7907_v6 }
0x1fca   :  { %8043 = vmatprep.mubr.bf16.mxu1 %v15420_v41 }
0x1fd7   :  { %v7755_v35 = vpop.xlane.xlu0 %7754 }
0x1fd8   :  { %v7793_v34 = vmul.f32 0.015625, %v7755_v35 }
0x1fda   :  { %v7809_v39 = vadd.f32 1e-05, %v7793_v34 }
0x1fdb   :  { %v7758_v57 = vpop.xlane.xlu1 %7757  ;;  %v7761_v54 = vpop.xlane.xlu0 %7760 }
0x1fdc   :  { %10705 = vrsqrt.f32 %v7809_v39  ;;  %v7794_v23 = vmul.f32 0.015625, %v7758_v57  ;;  %v7795_v31 = vmul.f32 0.015625, %v7761_v54 }
0x1fde   :  { %v7810_v27 = vadd.f32 1e-05, %v7794_v23  ;;  %v7811_v13 = vadd.f32 1e-05, %v7795_v31 }
0x1fdf   :  { %v7764_v63 = vpop.xlane.xlu1 %7763  ;;  %v7767_v52 = vpop.xlane.xlu0 %7766 }
0x1fe0   :  { %10707 = vrsqrt.f32 %v7810_v27  ;;  %v7796_v43 = vmul.f32 0.015625, %v7764_v63  ;;  %v7797_v29 = vmul.f32 0.015625, %v7767_v52 }
0x1fe1   :  { %10709 = vrsqrt.f32 %v7811_v13 }
0x1fe2   :  { %v7812_v26 = vadd.f32 1e-05, %v7796_v43  ;;  %v7813_v30 = vadd.f32 1e-05, %v7797_v29 }
0x1fe3   :  { %v7770_v4 = vpop.xlane.xlu1 %7769  ;;  %v7773_v55 = vpop.xlane.xlu0 %7772 }
0x1fe4   :  { %10711 = vrsqrt.f32 %v7812_v26  ;;  %v7798_v17 = vmul.f32 0.015625, %v7770_v4  ;;  %v7799_v32 = vmul.f32 0.015625, %v7773_v55 }
0x1fe6   :  { %v7814_v14 = vadd.f32 1e-05, %v7798_v17  ;;  %v7815_v10 = vadd.f32 1e-05, %v7799_v32 }
0x1fe7   :  { %v7776_v45 = vpop.xlane.xlu1 %7775  ;;  %v7779_v60 = vpop.xlane.xlu0 %7778 }
0x1fe8   :  { %10713 = vrsqrt.f32 %v7814_v14  ;;  %v7800_v62 = vmul.f32 0.015625, %v7776_v45  ;;  %v7801_v39 = vmul.f32 0.015625, %v7779_v60 }
0x1fe9   :  { %v10706_v44 = vpop.eup %10705  ;;  %10715 = vrsqrt.f32 %v7813_v30 }
0x1fea   :  { %v7841_v15 = vmul.f32 %v10706_v44, %v14891_v12  ;;  %v7816_v49 = vadd.f32 1e-05, %v7800_v62  ;;  %v7817_v52 = vadd.f32 1e-05, %v7801_v39 }
0x1feb   :  { %v7782_v21 = vpop.xlane.xlu1 %7781  ;;  %v7785_v29 = vpop.xlane.xlu0 %7784 }
0x1fec   :  { %v7863_v37 = vmul.f32 %v14973_v7, %v7841_v15  ;;  %10717 = vrsqrt.f32 %v7816_v49  ;;  %v7802_v6 = vmul.f32 0.015625, %v7782_v21  ;;  %v7803_v30 = vmul.f32 0.015625, %v7785_v29  ;;  %v10203_v21 = vld [vmem:[%s15348_s7 + $0xd0] sm:$0xff]  }
0x1fed   :  { %v10708_v0 = vpop.eup %10707  ;;  %10719 = vrsqrt.f32 %v7815_v10  ;;  %9538 = vmatprep.subr.bf16.mxu0 %v10203_v21 }
0x1fee   :  { %v7842_v50 = vmul.f32 %v10708_v0, %v14896_v53  ;;  %v10710_v11 = vpop.eup %10709  ;;  %v7885_v54 = vadd.f32 %v14977_v47, %v7863_v37  ;;  %v7818_v53 = vadd.f32 1e-05, %v7802_v6  ;;  %v7819_v15 = vadd.f32 1e-05, %v7803_v30  ;;  %v10205_v6 = vld [vmem:[%s15348_s7 + $0xc8] sm:$0xff]   ;;  %v15421_v30 = vld [vmem:[#allocation47_spill] sm:$0xff] }
0x1fef   :  { %v7843_v12 = vmul.f32 %v10710_v11, %v14899_v5  ;;  %v7788_v63 = vpop.xlane.xlu1 %7787 }
0x1ff0   :  { %v7864_v35 = vmul.f32 %v14973_v7, %v7842_v50  ;;  %10721 = vrsqrt.f32 %v7818_v53  ;;  %v10204_v50 = vld [vmem:[%s15348_s7 + $0x90] sm:$0xff]  }
0x1ff1   :  { %v10712_v34 = vpop.eup %10711  ;;  %v7865_v43 = vmul.f32 %v14973_v7, %v7843_v12  ;;  %10723 = vrsqrt.f32 %v7817_v52  ;;  %9539 = vmatpush3.bf16.msra.mxu0 %v10204_v50 }
0x1ff2   :  { %v7844_v57 = vmul.f32 %v10712_v34, %v14907_v19  ;;  %v7886_v23 = vadd.f32 %v14977_v47, %v7864_v35  ;;  %v7804_v19 = vmul.f32 0.015625, %v7788_v63  ;;  %9540 = vmatprep.subr.bf16.mxu0 %v10205_v6 }
0x1ff3   :  { %v7887_v14 = vadd.f32 %v14977_v47, %v7865_v43 }
0x1ff4   :  { %v7908_v31 = vpack.c.bf16 %v7886_v23, %v7885_v54  ;;  %v7866_v27 = vmul.f32 %v14973_v7, %v7844_v57  ;;  %v7820_v55 = vadd.f32 1e-05, %v7804_v19  ;;  %v10207_v54 = vld [vmem:[%s15348_s7 + $0xc0] sm:$0xff]  }
0x1ff5   :  { %v10714_v13 = vpop.eup %10713  ;;  %v10208_v23 = vld [vmem:[%s15348_s7 + $0x80] sm:$0xff]  }
0x1ff6   :  { %8965 = vmatmul.mubr.msk.bf16.gmra.mxu1 %vm391_vm1, %v7908_v31  ;;  %v10716_v26 = vpop.eup %10715  ;;  %v7846_v5 = vmul.f32 %v10714_v13, %v14919_v56  ;;  %v7888_v4 = vadd.f32 %v14977_v47, %v7866_v27  ;;  %10725 = vrsqrt.f32 %v7820_v55  ;;  %v15422_v55 = vld [vmem:[#allocation49_spill] sm:$0xff] }
0x1ff7   :  { %8053 = vmatprep.mubr.bf16.mxu1 %v15420_v41  ;;  %v7845_v17 = vmul.f32 %v10716_v26, %v14910_v16  ;;  %10727 = vrsqrt.f32 %v7819_v15 }
0x1ff8   :  { %v7909_v45 = vpack.c.bf16 %v7888_v4, %v7887_v14  ;;  %v7868_v62 = vmul.f32 %v14973_v7, %v7846_v5 }
0x1ff9   :  { %v10718_v44 = vpop.eup %10717  ;;  %v7867_v56 = vmul.f32 %v14973_v7, %v7845_v17  ;;  %v8954_v17 = vld [vmem:[%s15349_s10 + $0x2] sm:$0x3] }
0x1ffa   :  { %v10720_v32 = vpop.eup %10719  ;;  %v7848_v16 = vmul.f32 %v10718_v44, %v14931_v28  ;;  %v7890_v49 = vadd.f32 %v14977_v47, %v7868_v62  ;;  %v15047_v14 = vrot.slane %v8954_v17, %v15421_v30 }
0x1ffb   :  { %v7847_v0 = vmul.f32 %v10720_v32, %v14922_v59  ;;  %v7889_v10 = vadd.f32 %v14977_v47, %v7867_v56  ;;  %v10206_v59 = vld [vmem:[%s15348_s7 + $0x88] sm:$0xff]  }
0x1ffc   :  { %v7870_v37 = vmul.f32 %v14973_v7, %v7848_v16  ;;  %9541 = vmatpush3.bf16.msra.mxu0 %v10206_v59 }
0x1ffd   :  { %v7910_v60 = vpack.c.bf16 %v7890_v49, %v7889_v10  ;;  %v10722_v11 = vpop.eup %10721  ;;  %v7869_v28 = vmul.f32 %v14973_v7, %v7847_v0  ;;  %9542 = vmatprep.subr.bf16.mxu0 %v10207_v54 }
0x1ffe   :  { %8966 = vmatmul.mubr.msk.bf16.gmra.mxu1 %vm391_vm1, %v7909_v45  ;;  %v10724_v35 = vpop.eup %10723  ;;  %v7850_v34 = vmul.f32 %v10722_v11, %v14943_v58  ;;  %v7892_v39 = vadd.f32 %v14977_v47, %v7870_v37  ;;  %v15050_v45 = vrot.slane %v8954_v17, %v15422_v55 }
0x1fff   :  { %8063 = vmatprep.mubr.bf16.mxu1 %v15420_v41  ;;  %v7849_v12 = vmul.f32 %v10724_v35, %v14934_v25  ;;  %v7891_v57 = vadd.f32 %v14977_v47, %v7869_v28 }
0x2000   :  { %v7872_v31 = vmul.f32 %v14973_v7, %v7850_v34  ;;  %9543 = vmatpush3.bf16.msra.mxu0 %v10208_v23 }
0x2001   :  { %v7911_v53 = vpack.c.bf16 %v7892_v39, %v7891_v57  ;;  %v7871_v58 = vmul.f32 %v14973_v7, %v7849_v12 }
0x2002   :  { %v7894_v63 = vadd.f32 %v14977_v47, %v7872_v31 }
0x2003   :  { %v10726_v27 = vpop.eup %10725  ;;  %v7893_v43 = vadd.f32 %v14977_v47, %v7871_v58 }
0x2004   :  { %v10728_v13 = vpop.eup %10727  ;;  %v7852_v25 = vmul.f32 %v10726_v27, %v14955_v3 }
0x2005   :  { %v7851_v52 = vmul.f32 %v10728_v13, %v14946_v22  ;;  %v7912_v26 = vpack.c.bf16 %v7894_v63, %v7893_v43 }
0x2006   :  { %8967 = vmatmul.mubr.msk.bf16.gmra.mxu1 %vm391_vm1, %v7910_v60  ;;  %v7874_v29 = vmul.f32 %v14973_v7, %v7852_v25 }
0x2007   :  { %8073 = vmatprep.mubr.bf16.mxu1 %v15420_v41  ;;  %v7873_v5 = vmul.f32 %v14973_v7, %v7851_v52 }
0x2008   :  { %v7896_v19 = vadd.f32 %v14977_v47, %v7874_v29 }
0x2009   :  { %v7895_v4 = vadd.f32 %v14977_v47, %v7873_v5 }
0x200b   :  { %v7913_v3 = vpack.c.bf16 %v7896_v19, %v7895_v4 }
0x200e   :  { %8968 = vmatmul.mubr.msk.bf16.gmra.mxu1 %vm391_vm1, %v7911_v53 }
0x200f   :  { %8083 = vmatprep.mubr.bf16.mxu1 %v15420_v41 }
0x2016   :  { %8969 = vmatmul.mubr.msk.bf16.gmra.mxu1 %vm391_vm1, %v7912_v26 }
0x2017   :  { %8093 = vmatprep.mubr.bf16.mxu1 %v15420_v41 }
0x201e   :  { %8970 = vmatmul.mubr.msk.bf16.gmra.mxu1 %vm391_vm1, %v7913_v3 }
0x2081   :  { %v8025_v22 = vpop.f32.mrf.mxu1 }
0x2082   :  { %v8026_v32 = vadd.f32 %v8025_v22, %v15050_v45 }
0x2083   :  { %v8027_v62 = vpop.f32.mrf.mxu1 }
0x2084   :  { %v8028_v7 = vadd.f32 %v8027_v62, %v15047_v14  ;;  %v8104_v10 = vmax.f32 %v8026_v32, 0.0 }
0x2085   :  { %v8029_v44 = vpop.f32.mrf.mxu1 }
0x2086   :  { %v8030_v41 = vadd.f32 %v8029_v44, %v15050_v45  ;;  %v8105_v49 = vmax.f32 %v8028_v7, 0.0 }
0x2087   :  { %v8031_v47 = vpop.f32.mrf.mxu1 }
0x2088   :  { %v8032_v15 = vadd.f32 %v8031_v47, %v15047_v14  ;;  %v8106_v56 = vmax.f32 %v8030_v41, 0.0 }
0x2089   :  { %v8035_v16 = vpop.f32.mrf.mxu1 }
0x208a   :  { %v8107_v0 = vmax.f32 %v8032_v15, 0.0  ;;  %v8169_v60 = vpack.c.bf16 %v8106_v56, %v8104_v10  ;;  %v8036_v6 = vadd.f32 %v8035_v16, %v15050_v45 }
0x208b   :  { %v8037_v21 = vpop.f32.mrf.mxu1 }
0x208c   :  { %v8170_v50 = vpack.c.bf16 %v8107_v0, %v8105_v49  ;;  %v8038_v11 = vadd.f32 %v8037_v21, %v15047_v14  ;;  %v8108_v57 = vmax.f32 %v8036_v6, 0.0 }
0x208d   :  { %v8039_v37 = vpop.f32.mrf.mxu1 }
0x208e   :  { %v8040_v28 = vadd.f32 %v8039_v37, %v15050_v45  ;;  %8313 = vmatprep.mubr.bf16.mxu0 %v8170_v50  ;;  %v8109_v39 = vmax.f32 %v8038_v11, 0.0 }
0x208f   :  { %v8041_v35 = vpop.f32.mrf.mxu1  ;;  %8314 = vmatmul.mubr.bf16.vlgmr.msra.gmra.mxu0 %v8169_v60 }
0x2090   :  { %v8042_v59 = vadd.f32 %v8041_v35, %v15047_v14  ;;  %v8110_v34 = vmax.f32 %v8040_v28, 0.0 }
0x2092   :  { %v8111_v12 = vmax.f32 %v8042_v59, 0.0  ;;  %v8171_v23 = vpack.c.bf16 %v8110_v34, %v8108_v57 }
0x2094   :  { %v8172_v54 = vpack.c.bf16 %v8111_v12, %v8109_v39 }
0x2096   :  { %8321 = vmatprep.mubr.bf16.mxu0 %v8172_v54 }
0x2097   :  { %8322 = vmatmul.mubr.bf16.gmra.mxu0 %v8171_v23 }
0x20b6   :  { %v8045_v53 = vpop.f32.mrf.mxu1 }
0x20b7   :  { %v8046_v25 = vadd.f32 %v8045_v53, %v15050_v45 }
0x20b8   :  { %v8047_v31 = vpop.f32.mrf.mxu1 }
0x20b9   :  { %v8048_v58 = vadd.f32 %v8047_v31, %v15047_v14  ;;  %v8112_v19 = vmax.f32 %v8046_v25, 0.0 }
0x20ba   :  { %v8049_v27 = vpop.f32.mrf.mxu1 }
0x20bb   :  { %v8050_v13 = vadd.f32 %v8049_v27, %v15050_v45  ;;  %v8113_v29 = vmax.f32 %v8048_v58, 0.0 }
0x20bc   :  { %v8051_v63 = vpop.f32.mrf.mxu1 }
0x20bd   :  { %v8052_v52 = vadd.f32 %v8051_v63, %v15047_v14  ;;  %v8114_v43 = vmax.f32 %v8050_v13, 0.0  ;;  %v10209_v13 = vld [vmem:[%s11303_s4 + $0x18] sm:$0xff]  }
0x20be   :  { %v8055_v26 = vpop.f32.mrf.mxu1  ;;  %9960 = vmatprep.subr.bf16.mxu1 %v10209_v13 }
0x20bf   :  { %v8115_v5 = vmax.f32 %v8052_v52, 0.0  ;;  %v8173_v17 = vpack.c.bf16 %v8114_v43, %v8112_v19  ;;  %v8056_v62 = vadd.f32 %v8055_v26, %v15050_v45  ;;  %9961 = vmatpush3.bf16.msra.mxu1 %v10209_v13  ;;  %v10210_v19 = vld [vmem:[%s11303_s4 + $0x10] sm:$0xff]  }
0x20c0   :  { %v8057_v4 = vpop.f32.mrf.mxu1  ;;  %9962 = vmatprep.subr.bf16.mxu1 %v10210_v19 }
0x20c1   :  { %v8174_v3 = vpack.c.bf16 %v8115_v5, %v8113_v29  ;;  %v8058_v30 = vadd.f32 %v8057_v4, %v15047_v14  ;;  %v8116_v56 = vmax.f32 %v8056_v62, 0.0 }
0x20c2   :  { %v8059_v22 = vpop.f32.mrf.mxu1 }
0x20c3   :  { %v8060_v55 = vadd.f32 %v8059_v22, %v15050_v45  ;;  %8329 = vmatprep.mubr.bf16.mxu0 %v8174_v3  ;;  %v8117_v47 = vmax.f32 %v8058_v30, 0.0  ;;  %9963 = vmatpush3.bf16.msra.mxu1 %v10210_v19 }
0x20c4   :  { %v8061_v44 = vpop.f32.mrf.mxu1  ;;  %8330 = vmatmul.mubr.bf16.gmra.mxu0 %v8173_v17 }
0x20c5   :  { %v8062_v7 = vadd.f32 %v8061_v44, %v15047_v14  ;;  %v8118_v41 = vmax.f32 %v8060_v55, 0.0  ;;  %v10211_v44 = vld [vmem:[%s11303_s4 + $0x8] sm:$0xff]  }
0x20c6   :  { %v8065_v32 = vpop.f32.mrf.mxu1  ;;  %9964 = vmatprep.subr.bf16.mxu1 %v10211_v44 }
0x20c7   :  { %v8119_v15 = vmax.f32 %v8062_v7, 0.0  ;;  %v8175_v0 = vpack.c.bf16 %v8118_v41, %v8116_v56  ;;  %v8066_v60 = vadd.f32 %v8065_v32, %v15050_v45  ;;  %9965 = vmatpush3.bf16.msra.mxu1 %v10211_v44 }
0x20c8   :  { %v8067_v16 = vpop.f32.mrf.mxu1 }
0x20c9   :  { %v8176_v49 = vpack.c.bf16 %v8119_v15, %v8117_v47  ;;  %v8068_v21 = vadd.f32 %v8067_v16, %v15047_v14  ;;  %v8120_v34 = vmax.f32 %v8066_v60, 0.0 }
0x20ca   :  { %v8069_v10 = vpop.f32.mrf.mxu1 }
0x20cb   :  { %v8070_v50 = vadd.f32 %v8069_v10, %v15050_v45  ;;  %8337 = vmatprep.mubr.bf16.mxu0 %v8176_v49  ;;  %v8121_v35 = vmax.f32 %v8068_v21, 0.0  ;;  %v10212_v49 = vld [vmem:[%s11303_s4] sm:$0xff]  }
0x20cc   :  { %v8071_v37 = vpop.f32.mrf.mxu1  ;;  %8338 = vmatmul.mubr.bf16.gmra.mxu0 %v8175_v0  ;;  %9966 = vmatprep.subr.bf16.mxu1 %v10212_v49 }
0x20cd   :  { %v8072_v11 = vadd.f32 %v8071_v37, %v15047_v14  ;;  %v8122_v28 = vmax.f32 %v8070_v50, 0.0  ;;  %9967 = vmatpush3.bf16.msra.mxu1 %v10212_v49 }
0x20ce   :  { %v8075_v6 = vpop.f32.mrf.mxu1 }
0x20cf   :  { %v8123_v59 = vmax.f32 %v8072_v11, 0.0  ;;  %v8177_v57 = vpack.c.bf16 %v8122_v28, %v8120_v34  ;;  %v8076_v31 = vadd.f32 %v8075_v6, %v15050_v45 }
0x20d0   :  { %v8077_v39 = vpop.f32.mrf.mxu1 }
0x20d1   :  { %v8178_v12 = vpack.c.bf16 %v8123_v59, %v8121_v35  ;;  %v8078_v23 = vadd.f32 %v8077_v39, %v15047_v14  ;;  %v8124_v26 = vmax.f32 %v8076_v31, 0.0 }
0x20d2   :  { %v8079_v54 = vpop.f32.mrf.mxu1 }
0x20d3   :  { %v8080_v53 = vadd.f32 %v8079_v54, %v15050_v45  ;;  %8345 = vmatprep.mubr.bf16.mxu0 %v8178_v12  ;;  %v8125_v52 = vmax.f32 %v8078_v23, 0.0 }
0x20d4   :  { %v8081_v27 = vpop.f32.mrf.mxu1  ;;  %8346 = vmatmul.mubr.bf16.gmra.mxu0 %v8177_v57 }
0x20d5   :  { %v8082_v58 = vadd.f32 %v8081_v27, %v15047_v14  ;;  %v8126_v25 = vmax.f32 %v8080_v53, 0.0  ;;  %v15090_v27 = vld [vmem:[%s11298_s30 + $0x1] ss:$0 sm:$0xff] }
0x20d6   :  { %v8085_v63 = vpop.f32.mrf.mxu1 }
0x20d7   :  { %v8127_v43 = vmax.f32 %v8082_v58, 0.0  ;;  %v8179_v4 = vpack.c.bf16 %v8126_v25, %v8124_v26  ;;  %v8086_v30 = vadd.f32 %v8085_v63, %v15050_v45 }
0x20d8   :  { %v8087_v29 = vpop.f32.mrf.mxu1 }
0x20d9   :  { %v8180_v5 = vpack.c.bf16 %v8127_v43, %v8125_v52  ;;  %v8088_v17 = vadd.f32 %v8087_v29, %v15047_v14  ;;  %v8128_v15 = vmax.f32 %v8086_v30, 0.0 }
0x20da   :  { %v8089_v3 = vpop.f32.mrf.mxu1 }
0x20db   :  { %v8090_v22 = vadd.f32 %v8089_v3, %v15050_v45  ;;  %8353 = vmatprep.mubr.bf16.mxu0 %v8180_v5  ;;  %v8129_v32 = vmax.f32 %v8088_v17, 0.0 }
0x20dc   :  { %v8091_v55 = vpop.f32.mrf.mxu1  ;;  %8354 = vmatmul.mubr.bf16.gmra.mxu0 %v8179_v4 }
0x20dd   :  { %v8092_v62 = vadd.f32 %v8091_v55, %v15047_v14  ;;  %v8130_v7 = vmax.f32 %v8090_v22, 0.0 }
0x20de   :  { %v8095_v41 = vpop.f32.mrf.mxu1 }
0x20df   :  { %v8131_v47 = vmax.f32 %v8092_v62, 0.0  ;;  %v8181_v0 = vpack.c.bf16 %v8130_v7, %v8128_v15  ;;  %v8096_v60 = vadd.f32 %v8095_v41, %v15050_v45 }
0x20e0   :  { %v8097_v56 = vpop.f32.mrf.mxu1 }
0x20e1   :  { %v8182_v16 = vpack.c.bf16 %v8131_v47, %v8129_v32  ;;  %v8098_v21 = vadd.f32 %v8097_v56, %v15047_v14  ;;  %v8132_v59 = vmax.f32 %v8096_v60, 0.0 }
0x20e2   :  { %v8099_v10 = vpop.f32.mrf.mxu1 }
0x20e3   :  { %v8100_v50 = vadd.f32 %v8099_v10, %v15050_v45  ;;  %8361 = vmatprep.mubr.bf16.mxu0 %v8182_v16  ;;  %v8133_v6 = vmax.f32 %v8098_v21, 0.0 }
0x20e4   :  { %v8101_v37 = vpop.f32.mrf.mxu1  ;;  %8362 = vmatmul.mubr.bf16.gmra.mxu0 %v8181_v0 }
0x20e5   :  { %v8102_v11 = vadd.f32 %v8101_v37, %v15047_v14  ;;  %v8134_v28 = vmax.f32 %v8100_v50, 0.0 }
0x20e7   :  { %v8135_v35 = vmax.f32 %v8102_v11, 0.0  ;;  %v8183_v39 = vpack.c.bf16 %v8134_v28, %v8132_v59 }
0x20e9   :  { %v8184_v34 = vpack.c.bf16 %v8135_v35, %v8133_v6 }
0x20eb   :  { %8369 = vmatprep.mubr.bf16.mxu0 %v8184_v34 }
0x20ec   :  { %8370 = vmatmul.mubr.bf16.gmra.mxu0 %v8183_v39 }
0x214f   :  { %v9544_v12 = vpop.f32.mrf.mxu0 }
0x2151   :  { %v9545_v57 = vpop.f32.mrf.mxu0 }
0x2152   :  { %v9546_v54 = vadd.f32 %v9545_v57, %v9544_v12 }
0x2153   :  { %v9547_v23 = vpop.f32.mrf.mxu0 }
0x2154   :  { %v8378_v45 = vadd.f32 %v9546_v54, %v14765_v20 }
0x2155   :  { %v9548_v53 = vpop.f32.mrf.mxu0 }
0x2156   :  { %v9549_v31 = vadd.f32 %v9548_v53, %v9547_v23  ;;  %v8402_v25 = vadd.f32 %v15090_v27, %v8378_v45 }
0x2157   :  { %v9550_v14 = vpop.f32.mrf.mxu0 }
0x2158   :  { %v8379_v58 = vadd.f32 %v9549_v31, %v14775_v2 }
0x2159   :  { %v9551_v13 = vpop.f32.mrf.mxu0 }
0x215a   :  { %v8403_v63 = vadd.f32 %v15090_v27, %v8379_v58  ;;  %v9552_v52 = vadd.f32 %v9551_v13, %v9550_v14 }
0x215b   :  { %v9553_v43 = vpop.f32.mrf.mxu0 }
0x215c   :  { %v8426_v26 = vpack.c.bf16 %v8403_v63, %v8402_v25  ;;  %v8380_v5 = vadd.f32 %v9552_v52, %v14768_v46 }
0x215d   :  { %v9554_v29 = vpop.f32.mrf.mxu0 }
0x215e   :  { %v9555_v19 = vadd.f32 %v9554_v29, %v9553_v43  ;;  %9968 = vmatprep.mubr.msk.bf16.mxu1 %vm391_vm1, %v8426_v26  ;;  %v8404_v4 = vadd.f32 %v15090_v27, %v8380_v5 }
0x2160   :  { %v8381_v20 = vadd.f32 %v9555_v19, %v14778_v42 }
0x2162   :  { %v8405_v2 = vadd.f32 %v15090_v27, %v8381_v20 }
0x2164   :  { %v8427_v3 = vpack.c.bf16 %v8405_v2, %v8404_v4 }
0x2166   :  { %9969 = vmatmul.mubr.msk.bf16.vlgmr.msra.gmra.mxu1 %vm391_vm1, %v8427_v3 }
0x2184   :  { %v9556_v17 = vpop.f32.mrf.mxu0 }
0x2186   :  { %v9557_v22 = vpop.f32.mrf.mxu0 }
0x2187   :  { %v9558_v30 = vadd.f32 %v9557_v22, %v9556_v17 }
0x2188   :  { %v9559_v55 = vpop.f32.mrf.mxu0 }
0x2189   :  { %v8382_v44 = vadd.f32 %v9558_v30, %v14789_v51 }
0x218a   :  { %v9560_v62 = vpop.f32.mrf.mxu0 }
0x218b   :  { %v9561_v46 = vadd.f32 %v9560_v62, %v9559_v55  ;;  %v8406_v42 = vadd.f32 %v15090_v27, %v8382_v44  ;;  %v15132_v44 = vld [vmem:[%s11308_s5] ss:$0 sm:$0xff] }
0x218c   :  { %v9562_v7 = vpop.f32.mrf.mxu0 }
0x218d   :  { %v8383_v41 = vadd.f32 %v9561_v46, %v14799_v33 }
0x218e   :  { %v9563_v32 = vpop.f32.mrf.mxu0 }
0x218f   :  { %v8407_v47 = vadd.f32 %v15090_v27, %v8383_v41  ;;  %v9564_v15 = vadd.f32 %v9563_v32, %v9562_v7  ;;  %v10763_v41 = vld [vmem:[%s15296_s17 + $0x10] sm:$0xff] }
0x2190   :  { %v9565_v56 = vpop.f32.mrf.mxu0 }
0x2191   :  { %v8428_v16 = vpack.c.bf16 %v8407_v47, %v8406_v42  ;;  %v8384_v0 = vadd.f32 %v9564_v15, %v14792_v61 }
0x2192   :  { %v9566_v49 = vpop.f32.mrf.mxu0 }
0x2193   :  { %v9567_v10 = vadd.f32 %v9566_v49, %v9565_v56  ;;  %9972 = vmatprep.mubr.msk.bf16.mxu1 %vm391_vm1, %v8428_v16  ;;  %v8408_v33 = vadd.f32 %v15090_v27, %v8384_v0  ;;  %v10765_v16 = vld [vmem:[%s15296_s17 + $0x18] sm:$0xff] }
0x2194   :  { %v9568_v21 = vpop.f32.mrf.mxu0 }
0x2195   :  { %v8385_v51 = vadd.f32 %v9567_v10, %v14804_v36  ;;  %v10766_v10 = vld [vmem:[%s15296_s17 + $0x8] sm:$0xff] }
0x2196   :  { %v9569_v50 = vpop.f32.mrf.mxu0 }
0x2197   :  { %v8409_v60 = vadd.f32 %v15090_v27, %v8385_v51  ;;  %v9570_v37 = vadd.f32 %v9569_v50, %v9568_v21 }
0x2198   :  { %v9571_v11 = vpop.f32.mrf.mxu0 }
0x2199   :  { %v8429_v28 = vpack.c.bf16 %v8409_v60, %v8408_v33  ;;  %v8386_v35 = vadd.f32 %v9570_v37, %v14811_v1  ;;  %v10767_v60 = vld [vmem:[%s15296_s17 + $0x30] sm:$0xff] }
0x219a   :  { %v9572_v6 = vpop.f32.mrf.mxu0 }
0x219b   :  { %v9573_v59 = vadd.f32 %v9572_v6, %v9571_v11  ;;  %9973 = vmatmul.mubr.msk.bf16.gmra.mxu1 %vm391_vm1, %v8429_v28  ;;  %v8410_v36 = vadd.f32 %v15090_v27, %v8386_v35  ;;  %v10768_v6 = vld [vmem:[%s15296_s17 + $0x20] sm:$0xff] }
0x219c   :  { %v9574_v61 = vpop.f32.mrf.mxu0 }
0x219d   :  { %v8387_v34 = vadd.f32 %v9573_v59, %v14823_v8 }
0x219e   :  { %v9575_v39 = vpop.f32.mrf.mxu0 }
0x219f   :  { %v8411_v12 = vadd.f32 %v15090_v27, %v8387_v34  ;;  %v9576_v57 = vadd.f32 %v9575_v39, %v9574_v61  ;;  %v10769_v34 = vld [vmem:[%s15296_s17 + $0x38] sm:$0xff] }
0x21a0   :  { %v9577_v54 = vpop.f32.mrf.mxu0 }
0x21a1   :  { %v8430_v23 = vpack.c.bf16 %v8411_v12, %v8410_v36  ;;  %v8388_v45 = vadd.f32 %v9576_v57, %v14815_v48  ;;  %v10770_v12 = vld [vmem:[%s15296_s17 + $0x28] sm:$0xff] }
0x21a2   :  { %v9578_v53 = vpop.f32.mrf.mxu0 }
0x21a3   :  { %v9579_v31 = vadd.f32 %v9578_v53, %v9577_v54  ;;  %9976 = vmatprep.mubr.msk.bf16.mxu1 %vm391_vm1, %v8430_v23  ;;  %v8412_v8 = vadd.f32 %v15090_v27, %v8388_v45  ;;  %v10771_v45 = vld [vmem:[%s15296_s17 + $0x50] sm:$0xff] }
0x21a4   :  { %v9580_v1 = vpop.f32.mrf.mxu0 }
0x21a5   :  { %v8389_v14 = vadd.f32 %v9579_v31, %v14826_v24 }
0x21a6   :  { %v9581_v58 = vpop.f32.mrf.mxu0 }
0x21a7   :  { %v8413_v13 = vadd.f32 %v15090_v27, %v8389_v14  ;;  %v9582_v25 = vadd.f32 %v9581_v58, %v9580_v1  ;;  %v10772_v58 = vld [vmem:[%s15296_s17 + $0x40] sm:$0xff] }
0x21a8   :  { %v9583_v63 = vpop.f32.mrf.mxu0 }
0x21a9   :  { %v8431_v52 = vpack.c.bf16 %v8413_v13, %v8412_v8  ;;  %v8390_v26 = vadd.f32 %v9582_v25, %v14835_v40 }
0x21aa   :  { %v9584_v43 = vpop.f32.mrf.mxu0 }
0x21ab   :  { %v9585_v29 = vadd.f32 %v9584_v43, %v9583_v63  ;;  %9977 = vmatmul.mubr.msk.bf16.gmra.mxu1 %vm391_vm1, %v8431_v52  ;;  %v8414_v24 = vadd.f32 %v15090_v27, %v8390_v26  ;;  %v10773_v63 = vld [vmem:[%s15296_s17 + $0x58] sm:$0xff]  ;;  %v10774_v26 = vld [vmem:[%s15296_s17 + $0x48] sm:$0xff] }
0x21ac   :  { %v9586_v48 = vpop.f32.mrf.mxu0 }
0x21ad   :  { %v8391_v5 = vadd.f32 %v9585_v29, %v14847_v18 }
0x21ae   :  { %v9587_v19 = vpop.f32.mrf.mxu0 }
0x21af   :  { %v8415_v20 = vadd.f32 %v15090_v27, %v8391_v5  ;;  %v9588_v4 = vadd.f32 %v9587_v19, %v9586_v48 }
0x21b0   :  { %v9589_v2 = vpop.f32.mrf.mxu0 }
0x21b1   :  { %v8432_v3 = vpack.c.bf16 %v8415_v20, %v8414_v24  ;;  %v8392_v22 = vadd.f32 %v9588_v4, %v14840_v9  ;;  %v10775_v24 = vld [vmem:[%s15296_s17 + $0x70] sm:$0xff] }
0x21b2   :  { %v9590_v17 = vpop.f32.mrf.mxu0 }
0x21b3   :  { %v9591_v40 = vadd.f32 %v9590_v17, %v9589_v2  ;;  %9980 = vmatprep.mubr.msk.bf16.mxu1 %vm391_vm1, %v8432_v3  ;;  %v8416_v30 = vadd.f32 %v15090_v27, %v8392_v22  ;;  %v10776_v3 = vld [vmem:[%s15296_s17 + $0x60] sm:$0xff] }
0x21b5   :  { %v8393_v18 = vadd.f32 %v9591_v40, %v14850_v38 }
0x21b7   :  { %v8417_v55 = vadd.f32 %v15090_v27, %v8393_v18  ;;  %v10764_v27 = vld [vmem:[%s15296_s17] sm:$0xff]  ;;  %v10777_v18 = vld [vmem:[%s15296_s17 + $0x78] sm:$0xff] }
0x21b9   :  { %v8433_v62 = vpack.c.bf16 %v8417_v55, %v8416_v30 }
0x21bb   :  { %9981 = vmatmul.mubr.msk.bf16.gmra.mxu1 %vm391_vm1, %v8433_v62  ;;  %v10778_v62 = vld [vmem:[%s15296_s17 + $0x68] sm:$0xff] }
0x2226   :  { %v9970_v46 = vpop.f32.mrf.mxu1 }
0x2227   :  { %v8532_v9 = vadd.f32 %v9970_v46, %v15132_v44 }
0x2228   :  { %v8523_v7 = vpop.f32.mrf.mxu1 }
0x2229   :  { %v8588_v38 = vadd.f32 %v10763_v41, %v8532_v9  ;;  %v8524_v32 = vadd.f32 %v15132_v44, %v8523_v7 }
0x222a   :  { %v9971_v42 = vpop.f32.mrf.mxu1 }
0x222b   :  { %8604 = vst.msk [vmem:[%s11313_s21 + $0x10] sm:$0xff] %vm391_vm1, %v8588_v38  ;;  %v8586_v47 = vadd.f32 %v10764_v27, %v8524_v32  ;;  %v8535_v15 = vadd.f32 %v9971_v42, %v15132_v44 }
0x222c   :  { %v8526_v56 = vpop.f32.mrf.mxu1 }
0x222d   :  { %8602 = vst.msk [vmem:[%s11313_s21] sm:$0xff] %vm391_vm1, %v8586_v47  ;;  %v8589_v49 = vadd.f32 %v10765_v16, %v8535_v15  ;;  %v8527_v0 = vadd.f32 %v15132_v44, %v8526_v56 }
0x222f   :  { %8605 = vst.msk [vmem:[%s11313_s21 + $0x18] sm:$0xff] %vm391_vm1, %v8589_v49  ;;  %v8587_v21 = vadd.f32 %v10766_v10, %v8527_v0 }
0x2231   :  { %8603 = vst.msk [vmem:[%s11313_s21 + $0x8] sm:$0xff] %vm391_vm1, %v8587_v21 }
0x225b   :  { %v9974_v51 = vpop.f32.mrf.mxu1 }
0x225c   :  { %v8548_v50 = vadd.f32 %v9974_v51, %v15132_v44 }
0x225d   :  { %v8539_v33 = vpop.f32.mrf.mxu1 }
0x225e   :  { %v8592_v37 = vadd.f32 %v10767_v60, %v8548_v50  ;;  %v8540_v11 = vadd.f32 %v15132_v44, %v8539_v33 }
0x225f   :  { %v9975_v28 = vpop.f32.mrf.mxu1 }
0x2260   :  { %8608 = vst.msk [vmem:[%s11313_s21 + $0x30] sm:$0xff] %vm391_vm1, %v8592_v37  ;;  %v8590_v35 = vadd.f32 %v10768_v6, %v8540_v11  ;;  %v8551_v59 = vadd.f32 %v9975_v28, %v15132_v44 }
0x2261   :  { %v8542_v61 = vpop.f32.mrf.mxu1 }
0x2262   :  { %8606 = vst.msk [vmem:[%s11313_s21 + $0x20] sm:$0xff] %vm391_vm1, %v8590_v35  ;;  %v8593_v39 = vadd.f32 %v10769_v34, %v8551_v59  ;;  %v8543_v36 = vadd.f32 %v15132_v44, %v8542_v61 }
0x2264   :  { %8609 = vst.msk [vmem:[%s11313_s21 + $0x38] sm:$0xff] %vm391_vm1, %v8593_v39  ;;  %v8591_v57 = vadd.f32 %v10770_v12, %v8543_v36 }
0x2266   :  { %8607 = vst.msk [vmem:[%s11313_s21 + $0x28] sm:$0xff] %vm391_vm1, %v8591_v57 }
0x226b   :  { %v9978_v54 = vpop.f32.mrf.mxu1 }
0x226c   :  { %v8564_v23 = vadd.f32 %v9978_v54, %v15132_v44 }
0x226d   :  { %v8555_v53 = vpop.f32.mrf.mxu1 }
0x226e   :  { %v8596_v31 = vadd.f32 %v10771_v45, %v8564_v23  ;;  %v8556_v1 = vadd.f32 %v15132_v44, %v8555_v53 }
0x226f   :  { %v9979_v14 = vpop.f32.mrf.mxu1 }
0x2270   :  { %8612 = vst.msk [vmem:[%s11313_s21 + $0x50] sm:$0xff] %vm391_vm1, %v8596_v31  ;;  %v8594_v8 = vadd.f32 %v10772_v58, %v8556_v1  ;;  %v8567_v13 = vadd.f32 %v9979_v14, %v15132_v44 }
0x2271   :  { %v8558_v25 = vpop.f32.mrf.mxu1 }
0x2272   :  { %8610 = vst.msk [vmem:[%s11313_s21 + $0x40] sm:$0xff] %vm391_vm1, %v8594_v8  ;;  %v8597_v52 = vadd.f32 %v10773_v63, %v8567_v13  ;;  %v8559_v43 = vadd.f32 %v15132_v44, %v8558_v25 }
0x2274   :  { %8613 = vst.msk [vmem:[%s11313_s21 + $0x58] sm:$0xff] %vm391_vm1, %v8597_v52  ;;  %v8595_v29 = vadd.f32 %v10774_v26, %v8559_v43 }
0x2276   :  { %8611 = vst.msk [vmem:[%s11313_s21 + $0x48] sm:$0xff] %vm391_vm1, %v8595_v29 }
0x227b   :  { %v9982_v48 = vpop.f32.mrf.mxu1 }
0x227c   :  { %v8580_v5 = vadd.f32 %v9982_v48, %v15132_v44 }
0x227d   :  { %v8571_v19 = vpop.f32.mrf.mxu1 }
0x227e   :  { %v8600_v20 = vadd.f32 %v10775_v24, %v8580_v5  ;;  %v8572_v4 = vadd.f32 %v15132_v44, %v8571_v19 }
0x227f   :  { %v9983_v2 = vpop.f32.mrf.mxu1 }
0x2280   :  { %8616 = vst.msk [vmem:[%s11313_s21 + $0x70] sm:$0xff] %vm391_vm1, %v8600_v20  ;;  %v8598_v17 = vadd.f32 %v10776_v3, %v8572_v4  ;;  %v8583_v22 = vadd.f32 %v9983_v2, %v15132_v44 }
0x2281   :  { %v8574_v40 = vpop.f32.mrf.mxu1 }
0x2282   :  { %8614 = vst.msk [vmem:[%s11313_s21 + $0x60] sm:$0xff] %vm391_vm1, %v8598_v17  ;;  %v8601_v30 = vadd.f32 %v10777_v18, %v8583_v22  ;;  %v8575_v55 = vadd.f32 %v15132_v44, %v8574_v40 }
0x2284   :  { %8617 = vst.msk [vmem:[%s11313_s21 + $0x78] sm:$0xff] %vm391_vm1, %v8601_v30  ;;  %v8599_v46 = vadd.f32 %v10778_v62, %v8575_v55 }
0x2286   :  { %8615 = vst.msk [vmem:[%s11313_s21 + $0x68] sm:$0xff] %vm391_vm1, %v8599_v46 }
0x2287   :  { %8622 = vsyncpa [#allocation3], 1 }
0x2288   :  { %8623 = vsyncpa [#allocation5], 1 }
0x2289   :  { %8624 = vsyncpa [#allocation8], 1 }
0x228a   :  { %8625 = vsyncpa [#allocation11], 1 }
0x228b   :  { %8626 = vsyncpa [#allocation14], 1 }
0x228c   :  { %8627 = vsyncpa [#allocation17], 1 }
0x228d   :  { %8628 = vsyncpa [#allocation20], 1 }
0x228e   :  { %8629 = vsyncpa [#allocation23], 1 }

</bundles_post_ra>
